<compile_context>
chip_gen: v6e
topology: v6e:2x2x1
jax: 0.10.0
libtpu: 0.0.40
codegen_flags: <defaults>
</compile_context>

<pallas_src>
import functools

import numpy as np
import jax
import jax.numpy as jnp
from jax.experimental import pallas as pl
from jax.experimental.pallas import tpu as pltpu

_BN_EPS = 1e-5


def _round_up(x, m):
    return (x + m - 1) // m * m


# ----------------------------------------------------------------------------
# Pallas kernels
# ----------------------------------------------------------------------------
def _conv1_sc_kernel(x_ref, w1_ref, b1_ref, wsc_ref, bsc_ref, h_ref, sc_ref):
    """Fused 1x1 conv1+BN1+ReLU and 1x1 shortcut-conv+BN (x is read once)."""
    x = x_ref[...]
    y1 = jnp.dot(x, w1_ref[...], preferred_element_type=jnp.float32) + b1_ref[...]
    h_ref[...] = jnp.maximum(y1, 0.0).astype(h_ref.dtype)
    ysc = jnp.dot(x, wsc_ref[...], preferred_element_type=jnp.float32) + bsc_ref[...]
    sc_ref[...] = ysc.astype(sc_ref.dtype)


def _conv1_kernel(x_ref, w1_ref, b1_ref, h_ref):
    """1x1 conv1+BN1+ReLU (identity-shortcut variant)."""
    y1 = jnp.dot(x_ref[...], w1_ref[...],
                 preferred_element_type=jnp.float32) + b1_ref[...]
    h_ref[...] = jnp.maximum(y1, 0.0).astype(h_ref.dtype)


def _im2col_patches(window, Mg, Wpa, off0):
    """Concatenate the 9 shifted tap windows -> (Mg, 9*Ci) for one wide MXU dot.

    `window(start)` must return the (Mg, Ci) slice beginning at flat row
    `off0 + start` of the zero-padded flattened activation.  Row stride Wpa is a
    multiple of 8, so the kh shifts are sublane-aligned.
    """
    cols = [window(dh * Wpa + dw) for dh in (-1, 0, 1) for dw in (-1, 0, 1)]
    return jnp.concatenate(cols, axis=-1)


def _conv2_kernel(h1_ref, w_ref, b_ref, o_ref, xpf, *, H, W, Wpa, off0):
    """3x3 conv2 + BN2 + ReLU.

    h1_ref : (1, H*W, Ci) unpadded activation (zero padding is built in VMEM here).
    o_ref  : (1, R, Co)  output written directly in the padded-flat layout used as
             conv3's input (pad ring / alignment columns are zero).
    xpf    : (R, Ci) VMEM scratch, R = (H+2)*Wpa + 2*off0.
    """
    Mg = (H + 2) * Wpa
    # Build the zero-padded, flattened activation in VMEM (sublane-aligned copies).
    xpf[...] = jnp.zeros(xpf.shape, xpf.dtype)
    for h in range(H):
        dst = off0 + (h + 1) * Wpa
        xpf[dst:dst + W, :] = h1_ref[0, h * W:(h + 1) * W, :]

    patches = _im2col_patches(lambda s: xpf[off0 + s: off0 + s + Mg, :], Mg, Wpa, off0)
    y = jnp.maximum(
        jnp.dot(patches, w_ref[...], preferred_element_type=jnp.float32) + b_ref[...],
        0.0)

    # Write directly in the padded-flat layout conv3 consumes: zero everything,
    # then store only the H interior row blocks (pad ring stays zero).
    o_ref[0, :, :] = jnp.zeros(o_ref.shape[1:], o_ref.dtype)
    for h in range(H):
        base = (h + 1) * Wpa
        o_ref[0, off0 + base: off0 + base + W, :] = y[base: base + W, :].astype(o_ref.dtype)


def _conv3_se_res_kernel(xpf_ref, sc_ref, w_ref, b_ref, sew1_ref, seb1_ref,
                         sew2_ref, seb2_ref, o_ref, *, H, W, Wpa, off0):
    """3x3 conv3 + BN3, Squeeze-Excitation, shortcut add and final ReLU, fused.

    xpf_ref : (1, R, Ci) padded-flat activation produced by K2.
    sc_ref  : (1, H*W, Co) unpadded shortcut (bf16 or f32).
    o_ref   : (1, H*W, Co) interior-only output (no ring writeback).
    """
    Mg = (H + 2) * Wpa
    patches = _im2col_patches(lambda s: xpf_ref[0, off0 + s: off0 + s + Mg, :],
                              Mg, Wpa, off0)
    y = jnp.dot(patches, w_ref[...], preferred_element_type=jnp.float32) + b_ref[...]

    # Extract the H*W interior rows (drops pad ring / alignment columns); all
    # slice starts are multiples of 8 because Wpa is a multiple of 8.
    y_int = jnp.concatenate(
        [y[(h + 1) * Wpa:(h + 1) * Wpa + W, :] for h in range(H)], axis=0)  # (H*W, Co) f32

    # Squeeze-Excitation on the interior global average pool (no mask needed).
    pooled = jnp.sum(y_int, axis=0, keepdims=True) * (1.0 / (H * W))        # (1, Co)
    hid = jnp.maximum(
        jnp.dot(pooled, sew1_ref[...], preferred_element_type=jnp.float32)
        + seb1_ref[...], 0.0)
    s = jax.nn.sigmoid(
        jnp.dot(hid, sew2_ref[...], preferred_element_type=jnp.float32)
        + seb2_ref[...])

    # scale, shortcut add (f32), final ReLU.  Dropout is identity in eval mode.
    out = jnp.maximum(y_int * s + sc_ref[0, :, :].astype(jnp.float32), 0.0)
    o_ref[0, :, :] = out.astype(o_ref.dtype)


# ----------------------------------------------------------------------------
# pallas_call wrappers
# ----------------------------------------------------------------------------
def _fused_conv1(x2d, w1, b1, wsc=None, bsc=None):
    """Tiled Pallas matmul for the 1x1 conv(s); conv1 + shortcut share one x read."""
    M, K = x2d.shape
    mid = w1.shape[1]
    Mp = _round_up(M, 8)
    # >= 2 grid steps (keeps both v7x TensorCores busy) and <= 1024 rows per tile
    # (keeps double-buffered blocks comfortably inside the 32 MiB scoped VMEM).
    TM = min(1024, _round_up(max(Mp // 2, 8), 8))
    Mp = _round_up(Mp, TM)
    xp = x2d if Mp == M else jnp.pad(x2d, ((0, Mp - M), (0, 0)))
    grid = (Mp // TM,)
    cp = pltpu.CompilerParams(dimension_semantics=("parallel",))

    if wsc is None:
        h1 = pl.pallas_call(
            _conv1_kernel,
            out_shape=jax.ShapeDtypeStruct((Mp, mid), jnp.bfloat16),
            grid=grid,
            in_specs=[pl.BlockSpec((TM, K), lambda i: (i, 0)),
                      pl.BlockSpec((K, mid), lambda i: (0, 0)),
                      pl.BlockSpec((1, mid), lambda i: (0, 0))],
            out_specs=pl.BlockSpec((TM, mid), lambda i: (i, 0)),
            compiler_params=cp,
        )(xp, w1, b1.reshape(1, mid))
        return h1[:M], None

    cout = wsc.shape[1]
    h1, sc = pl.pallas_call(
        _conv1_sc_kernel,
        out_shape=(jax.ShapeDtypeStruct((Mp, mid), jnp.bfloat16),
                   jax.ShapeDtypeStruct((Mp, cout), jnp.bfloat16)),
        grid=grid,
        in_specs=[pl.BlockSpec((TM, K), lambda i: (i, 0)),
                  pl.BlockSpec((K, mid), lambda i: (0, 0)),
                  pl.BlockSpec((1, mid), lambda i: (0, 0)),
                  pl.BlockSpec((K, cout), lambda i: (0, 0)),
                  pl.BlockSpec((1, cout), lambda i: (0, 0))],
        out_specs=(pl.BlockSpec((TM, mid), lambda i: (i, 0)),
                   pl.BlockSpec((TM, cout), lambda i: (i, 0))),
        compiler_params=cp,
    )(xp, w1, b1.reshape(1, mid), wsc, bsc.reshape(1, cout))
    return h1[:M], sc[:M]


def _conv2_call(h1, w2, b2, H, W, Wpa, off0):
    N, _, Ci = h1.shape
    Co = w2.shape[-1]
    Mg = (H + 2) * Wpa
    R = Mg + 2 * off0
    kern = functools.partial(_conv2_kernel, H=H, W=W, Wpa=Wpa, off0=off0)
    return pl.pallas_call(
        kern,
        out_shape=jax.ShapeDtypeStruct((N, R, Co), jnp.bfloat16),
        grid=(N,),
        in_specs=[pl.BlockSpec((1, H * W, Ci), lambda n: (n, 0, 0)),
                  pl.BlockSpec((9 * Ci, Co), lambda n: (0, 0)),
                  pl.BlockSpec((1, Co), lambda n: (0, 0))],
        out_specs=pl.BlockSpec((1, R, Co), lambda n: (n, 0, 0)),
        scratch_shapes=[pltpu.VMEM((R, Ci), jnp.bfloat16)],
        compiler_params=pltpu.CompilerParams(dimension_semantics=("parallel",)),
    )(h1, w2, b2.reshape(1, Co))


def _conv3_se_residual_call(h2pf, sc, w3, b3, se_w1, se_b1, se_w2, se_b2,
                            H, W, Wpa, off0):
    N, R, Ci = h2pf.shape
    Co = w3.shape[-1]
    hid = se_w1.shape[-1]
    kern = functools.partial(_conv3_se_res_kernel, H=H, W=W, Wpa=Wpa, off0=off0)
    return pl.pallas_call(
        kern,
        out_shape=jax.ShapeDtypeStruct((N, H * W, Co), jnp.float32),
        grid=(N,),
        in_specs=[pl.BlockSpec((1, R, Ci), lambda n: (n, 0, 0)),
                  pl.BlockSpec((1, H * W, Co), lambda n: (n, 0, 0)),
                  pl.BlockSpec((9 * Ci, Co), lambda n: (0, 0)),
                  pl.BlockSpec((1, Co), lambda n: (0, 0)),
                  pl.BlockSpec((Co, hid), lambda n: (0, 0)),
                  pl.BlockSpec((1, hid), lambda n: (0, 0)),
                  pl.BlockSpec((hid, Co), lambda n: (0, 0)),
                  pl.BlockSpec((1, Co), lambda n: (0, 0))],
        out_specs=pl.BlockSpec((1, H * W, Co), lambda n: (n, 0, 0)),
        compiler_params=pltpu.CompilerParams(dimension_semantics=("parallel",)),
    )(h2pf, sc, w3, b3.reshape(1, Co),
      se_w1, se_b1.reshape(1, hid), se_w2, se_b2.reshape(1, Co))


# ----------------------------------------------------------------------------
# ResidualBlock forward (NCHW in / NCHW out, like the PyTorch module)
# ----------------------------------------------------------------------------
def residual_block_forward(x_nchw, fp):
    N, Cin, H, W = x_nchw.shape
    mid = fp["w1"].shape[1]
    cout = fp["b3"].shape[0]
    Wpa = _round_up(W + 2, 8)           # sublane-aligned padded row width
    off0 = _round_up(Wpa + 1, 8)        # head/tail rows so every tap slice is in-bounds

    x = jnp.transpose(x_nchw, (0, 2, 3, 1)).astype(jnp.float32)     # NHWC
    x2d = x.reshape(N * H * W, Cin).astype(jnp.bfloat16)

    if "wsc" in fp:                                  # 1x1 projection shortcut + BN
        h1, sc2d = _fused_conv1(x2d, fp["w1"], fp["b1"], fp["wsc"], fp["bsc"])
        sc = sc2d.reshape(N, H * W, cout)            # bf16
    else:                                            # identity shortcut
        h1, _ = _fused_conv1(x2d, fp["w1"], fp["b1"])
        sc = x.reshape(N, H * W, cout)               # f32

    h1 = h1.reshape(N, H * W, mid)
    h2pf = _conv2_call(h1, fp["w2"], fp["b2"], H, W, Wpa, off0)     # (N, R, mid) padded-flat
    out = _conv3_se_residual_call(h2pf, sc, fp["w3"], fp["b3"],
                                  fp["se_w1"], fp["se_b1"],
                                  fp["se_w2"], fp["se_b2"],
                                  H, W, Wpa, off0)                   # (N, H*W, cout) f32
    out = out.reshape(N, H, W, cout)
    return jnp.transpose(out, (0, 3, 1, 2))
    # TODO(synk): when chaining several ResidualBlocks, keep activations in NHWC and
    # transpose once at model entry/exit instead of per block.


# ----------------------------------------------------------------------------
# Parameters (PyTorch layout) + BN folding
# ----------------------------------------------------------------------------
def init_residual_block_params(key, cin, cout, reduction=16):
    """Synthetic PyTorch-layout params (conv OIHW, BN gamma/beta/running stats)."""
    mid = cout // 4
    hid = cout // reduction
    ks = jax.random.split(key, 12)

    def conv_w(k, co, ci, kh, kw):
        return jax.random.normal(k, (co, ci, kh, kw), jnp.float32) / np.sqrt(ci * kh * kw)

    def bn_stats(k, c):
        kg, kb, km, kv = jax.random.split(k, 4)
        return (1.0 + 0.1 * jax.random.normal(kg, (c,), jnp.float32),        # gamma
                0.1 * jax.random.normal(kb, (c,), jnp.float32),              # beta
                0.1 * jax.random.normal(km, (c,), jnp.float32),              # running_mean
                0.5 + jax.nn.softplus(jax.random.normal(kv, (c,), jnp.float32)))  # running_var

    p = {
        "conv1_w": conv_w(ks[0], mid, cin, 1, 1), "bn1": bn_stats(ks[1], mid),
        "conv2_w": conv_w(ks[2], mid, mid, 3, 3), "bn2": bn_stats(ks[3], mid),
        "conv3_w": conv_w(ks[4], cout, mid, 3, 3), "bn3": bn_stats(ks[5], cout),
        "se_fc1_w": conv_w(ks[6], hid, cout, 1, 1),
        "se_fc1_b": 0.1 * jax.random.normal(ks[7], (hid,), jnp.float32),
        "se_fc2_w": conv_w(ks[8], cout, hid, 1, 1),
        "se_fc2_b": 0.1 * jax.random.normal(ks[9], (cout,), jnp.float32),
    }
    if cin != cout:
        p["sc_conv_w"] = conv_w(ks[10], cout, cin, 1, 1)
        p["bn_sc"] = bn_stats(ks[11], cout)
    return p


def fold_params(p):
    """Fold eval-mode BatchNorm into the conv weights and pre-cast to the layouts /
    dtypes the kernels consume: 1x1 -> (Cin, Cout) bf16, 3x3 -> (9*Cin, Cout) bf16
    (im2col order), biases + SE weights f32."""
    def fold(stats):
        g, b, m, v = stats
        scale = g / jnp.sqrt(v + _BN_EPS)
        return scale, b - m * scale

    s1, b1 = fold(p["bn1"])
    s2, b2 = fold(p["bn2"])
    s3, b3 = fold(p["bn3"])

    def w1x1(w_oihw, scale):
        return (jnp.transpose(w_oihw[:, :, 0, 0], (1, 0)) * scale[None, :]).astype(jnp.bfloat16)

    def w3x3(w_oihw, scale):
        co, ci = w_oihw.shape[0], w_oihw.shape[1]
        w = jnp.transpose(w_oihw, (2, 3, 1, 0)).reshape(9 * ci, co) * scale[None, :]
        return w.astype(jnp.bfloat16)

    fp = {
        "w1": w1x1(p["conv1_w"], s1), "b1": b1,
        "w2": w3x3(p["conv2_w"], s2), "b2": b2,
        "w3": w3x3(p["conv3_w"], s3), "b3": b3,
        "se_w1": jnp.transpose(p["se_fc1_w"][:, :, 0, 0], (1, 0)),
        "se_b1": p["se_fc1_b"],
        "se_w2": jnp.transpose(p["se_fc2_w"][:, :, 0, 0], (1, 0)),
        "se_b2": p["se_fc2_b"],
    }
    if "sc_conv_w" in p:
        ssc, bsc = fold(p["bn_sc"])
        fp["wsc"] = w1x1(p["sc_conv_w"], ssc)
        fp["bsc"] = bsc
    return fp


# ----------------------------------------------------------------------------
# Pure-JAX float32 reference (mirrors the PyTorch module in eval mode)
# ----------------------------------------------------------------------------
def residual_block_reference(x_nchw, p):
    x = jnp.transpose(x_nchw, (0, 2, 3, 1)).astype(jnp.float32)

    def conv(v, w_oihw, padding):
        w_hwio = jnp.transpose(w_oihw, (2, 3, 1, 0))
        return jax.lax.conv_general_dilated(
            v, w_hwio, window_strides=(1, 1), padding=padding,
            dimension_numbers=("NHWC", "HWIO", "NHWC"))

    def bn(v, stats):
        g, b, m, var = stats
        return (v - m) / jnp.sqrt(var + _BN_EPS) * g + b

    out = jax.nn.relu(bn(conv(x, p["conv1_w"], "VALID"), p["bn1"]))
    out = jax.nn.relu(bn(conv(out, p["conv2_w"], [(1, 1), (1, 1)]), p["bn2"]))
    out = bn(conv(out, p["conv3_w"], [(1, 1), (1, 1)]), p["bn3"])

    pooled = jnp.mean(out, axis=(1, 2))                                   # (N, C)
    w1 = p["se_fc1_w"][:, :, 0, 0]
    w2 = p["se_fc2_w"][:, :, 0, 0]
    h = jax.nn.relu(pooled @ w1.T + p["se_fc1_b"])
    s = jax.nn.sigmoid(h @ w2.T + p["se_fc2_b"])
    out = out * s[:, None, None, :]

    if "sc_conv_w" in p:
        sc = bn(conv(x, p["sc_conv_w"], "VALID"), p["bn_sc"])
    else:
        sc = x
    out = jax.nn.relu(out + sc)          # Dropout is identity in eval mode
    return jnp.transpose(out, (0, 3, 1, 2))


# ----------------------------------------------------------------------------
if __name__ == "__main__":
    key = jax.random.PRNGKey(0)
    kx, kp1, kp2 = jax.random.split(key, 3)
    N, H, W = 2, 16, 16

    configs = [("projection-shortcut", 128, 64, kp1),
               ("identity-shortcut", 64, 64, kp2)]

    fwd = jax.jit(residual_block_forward)
    for name, cin, cout, kp in configs:
        x = jax.random.normal(jax.random.fold_in(kx, cin), (N, cin, H, W), jnp.float32)
        params = init_residual_block_params(kp, cin, cout)
        fp = fold_params(params)

        y = jax.block_until_ready(fwd(x, fp))
        assert y.shape == (N, cout, H, W), (name, y.shape)
        assert bool(jnp.all(jnp.isfinite(y))), name

        ref = residual_block_reference(x, params)
        err = float(jnp.max(jnp.abs(y - ref)))
        assert err < 2e-1, f"{name}: max|err|={err}"

    print("KERNEL_OK")
</pallas_src>

<mosaic_0001>
module attributes {stable_mosaic.version = 11 : i64} {
  func.func @_conv1_sc_kernel(%arg0: i32, %arg1: memref<256x128xbf16, #tpu.memory_space<vmem>>, %arg2: memref<128x16xbf16, #tpu.memory_space<vmem>>, %arg3: memref<1x16xf32, #tpu.memory_space<vmem>>, %arg4: memref<128x64xbf16, #tpu.memory_space<vmem>>, %arg5: memref<1x64xf32, #tpu.memory_space<vmem>>, %arg6: memref<256x16xbf16, #tpu.memory_space<vmem>>, %arg7: memref<256x64xbf16, #tpu.memory_space<vmem>>) attributes {dimension_semantics = [#tpu.dimension_semantics<parallel>], iteration_bounds = array<i64: 2>, scalar_prefetch = 0 : i64, scratch_operands = 0 : i64, tpu.core_type = #tpu.core_type<tc>, window_params = [{transform_indices = @transform_0, window_bounds = array<i64: 256, 128>}, {pipeline_mode = #tpu.pipeline_mode<synchronous>, transform_indices = @transform_1, window_bounds = array<i64: 128, 16>}, {pipeline_mode = #tpu.pipeline_mode<synchronous>, transform_indices = @transform_2, window_bounds = array<i64: 1, 16>}, {pipeline_mode = #tpu.pipeline_mode<synchronous>, transform_indices = @transform_3, window_bounds = array<i64: 128, 64>}, {pipeline_mode = #tpu.pipeline_mode<synchronous>, transform_indices = @transform_4, window_bounds = array<i64: 1, 64>}, {transform_indices = @transform_5, window_bounds = array<i64: 256, 16>}, {transform_indices = @transform_6, window_bounds = array<i64: 256, 64>}]} {
    %c0 = arith.constant 0 : index
    %c0_0 = arith.constant 0 : index
    %0 = vector.load %arg1[%c0, %c0_0] : memref<256x128xbf16, #tpu.memory_space<vmem>>, vector<256x128xbf16>
    %c0_1 = arith.constant 0 : index
    %c0_2 = arith.constant 0 : index
    %1 = vector.load %arg2[%c0_1, %c0_2] : memref<128x16xbf16, #tpu.memory_space<vmem>>, vector<128x16xbf16>
    %cst = arith.constant dense<0.000000e+00> : vector<256x16xf32>
    %2 = tpu.matmul %0, %1, %cst {dimension_numbers = #tpu.dot_dimension_numbers<[1], [0], [0], [1], [0, 0, 1, 1], [], []>} : vector<256x128xbf16>, vector<128x16xbf16>, vector<256x16xf32> -> vector<256x16xf32>
    %c0_3 = arith.constant 0 : index
    %c0_4 = arith.constant 0 : index
    %3 = vector.load %arg3[%c0_3, %c0_4] : memref<1x16xf32, #tpu.memory_space<vmem>>, vector<1x16xf32>
    %4 = vector.broadcast %3 : vector<1x16xf32> to vector<256x16xf32>
    %5 = arith.addf %2, %4 : vector<256x16xf32>
    %cst_5 = arith.constant 0.000000e+00 : f32
    %6 = vector.broadcast %cst_5 : f32 to vector<256x16xf32>
    %7 = arith.maximumf %5, %6 : vector<256x16xf32>
    %8 = arith.truncf %7 : vector<256x16xf32> to vector<256x16xbf16>
    %c0_6 = arith.constant 0 : index
    %c0_7 = arith.constant 0 : index
    %9 = vector.load %arg6[%c0_6, %c0_7] : memref<256x16xbf16, #tpu.memory_space<vmem>>, vector<256x16xbf16>
    tpu.vector_store %arg6[%c0_6, %c0_7], %8 {strides = array<i32>} : memref<256x16xbf16, #tpu.memory_space<vmem>>, vector<256x16xbf16>,
    %c0_8 = arith.constant 0 : index
    %c0_9 = arith.constant 0 : index
    %10 = vector.load %arg4[%c0_8, %c0_9] : memref<128x64xbf16, #tpu.memory_space<vmem>>, vector<128x64xbf16>
    %cst_10 = arith.constant dense<0.000000e+00> : vector<256x64xf32>
    %11 = tpu.matmul %0, %10, %cst_10 {dimension_numbers = #tpu.dot_dimension_numbers<[1], [0], [0], [1], [0, 0, 1, 1], [], []>} : vector<256x128xbf16>, vector<128x64xbf16>, vector<256x64xf32> -> vector<256x64xf32>
    %c0_11 = arith.constant 0 : index
    %c0_12 = arith.constant 0 : index
    %12 = vector.load %arg5[%c0_11, %c0_12] : memref<1x64xf32, #tpu.memory_space<vmem>>, vector<1x64xf32>
    %13 = vector.broadcast %12 : vector<1x64xf32> to vector<256x64xf32>
    %14 = arith.addf %11, %13 : vector<256x64xf32>
    %15 = arith.truncf %14 : vector<256x64xf32> to vector<256x64xbf16>
    %c0_13 = arith.constant 0 : index
    %c0_14 = arith.constant 0 : index
    %16 = vector.load %arg7[%c0_13, %c0_14] : memref<256x64xbf16, #tpu.memory_space<vmem>>, vector<256x64xbf16>
    tpu.vector_store %arg7[%c0_13, %c0_14], %15 {strides = array<i32>} : memref<256x64xbf16, #tpu.memory_space<vmem>>, vector<256x64xbf16>,
    return
  }
  func.func @transform_0(%arg0: i32) -> (i32, i32) {
    %c0_i32 = arith.constant 0 : i32
    %c0_i32_0 = arith.constant 0 : i32
    return %arg0, %c0_i32 : i32, i32
  }
  func.func @transform_1(%arg0: i32) -> (i32, i32) {
    %c0_i32 = arith.constant 0 : i32
    %c0_i32_0 = arith.constant 0 : i32
    %c0_i32_1 = arith.constant 0 : i32
    return %c0_i32, %c0_i32_0 : i32, i32
  }
  func.func @transform_2(%arg0: i32) -> (i32, i32) {
    %c0_i32 = arith.constant 0 : i32
    %c0_i32_0 = arith.constant 0 : i32
    %c0_i32_1 = arith.constant 0 : i32
    return %c0_i32, %c0_i32_0 : i32, i32
  }
  func.func @transform_3(%arg0: i32) -> (i32, i32) {
    %c0_i32 = arith.constant 0 : i32
    %c0_i32_0 = arith.constant 0 : i32
    %c0_i32_1 = arith.constant 0 : i32
    return %c0_i32, %c0_i32_0 : i32, i32
  }
  func.func @transform_4(%arg0: i32) -> (i32, i32) {
    %c0_i32 = arith.constant 0 : i32
    %c0_i32_0 = arith.constant 0 : i32
    %c0_i32_1 = arith.constant 0 : i32
    return %c0_i32, %c0_i32_0 : i32, i32
  }
  func.func @transform_5(%arg0: i32) -> (i32, i32) {
    %c0_i32 = arith.constant 0 : i32
    %c0_i32_0 = arith.constant 0 : i32
    return %arg0, %c0_i32 : i32, i32
  }
  func.func @transform_6(%arg0: i32) -> (i32, i32) {
    %c0_i32 = arith.constant 0 : i32
    %c0_i32_0 = arith.constant 0 : i32
    return %arg0, %c0_i32 : i32, i32
  }
}

module attributes {stable_mosaic.version = 11 : i64} {
  func.func @_conv3_se_res_kernel(%arg0: i32, %arg1: memref<1x496x16xbf16, #tpu.memory_space<vmem>>, %arg2: memref<1x256x64xbf16, #tpu.memory_space<vmem>>, %arg3: memref<144x64xbf16, #tpu.memory_space<vmem>>, %arg4: memref<1x64xf32, #tpu.memory_space<vmem>>, %arg5: memref<64x4xf32, #tpu.memory_space<vmem>>, %arg6: memref<1x4xf32, #tpu.memory_space<vmem>>, %arg7: memref<4x64xf32, #tpu.memory_space<vmem>>, %arg8: memref<1x64xf32, #tpu.memory_space<vmem>>, %arg9: memref<1x256x64xf32, #tpu.memory_space<vmem>>) attributes {dimension_semantics = [#tpu.dimension_semantics<parallel>], iteration_bounds = array<i64: 2>, scalar_prefetch = 0 : i64, scratch_operands = 0 : i64, tpu.core_type = #tpu.core_type<tc>, window_params = [{transform_indices = @transform_0, window_bounds = array<i64: 1, 496, 16>}, {transform_indices = @transform_1, window_bounds = array<i64: 1, 256, 64>}, {pipeline_mode = #tpu.pipeline_mode<synchronous>, transform_indices = @transform_2, window_bounds = array<i64: 144, 64>}, {pipeline_mode = #tpu.pipeline_mode<synchronous>, transform_indices = @transform_3, window_bounds = array<i64: 1, 64>}, {pipeline_mode = #tpu.pipeline_mode<synchronous>, transform_indices = @transform_4, window_bounds = array<i64: 64, 4>}, {pipeline_mode = #tpu.pipeline_mode<synchronous>, transform_indices = @transform_5, window_bounds = array<i64: 1, 4>}, {pipeline_mode = #tpu.pipeline_mode<synchronous>, transform_indices = @transform_6, window_bounds = array<i64: 4, 64>}, {pipeline_mode = #tpu.pipeline_mode<synchronous>, transform_indices = @transform_7, window_bounds = array<i64: 1, 64>}, {transform_indices = @transform_8, window_bounds = array<i64: 1, 256, 64>}]} {
    %c0 = arith.constant 0 : index
    %c7 = arith.constant 7 : index
    %c0_0 = arith.constant 0 : index
    %0 = vector.load %arg1[%c0, %c7, %c0_0] : memref<1x496x16xbf16, #tpu.memory_space<vmem>>, vector<1x432x16xbf16>
    %1 = vector.shape_cast %0 : vector<1x432x16xbf16> to vector<432x16xbf16>
    %c0_1 = arith.constant 0 : index
    %c8 = arith.constant 8 : index
    %c0_2 = arith.constant 0 : index
    %2 = vector.load %arg1[%c0_1, %c8, %c0_2] : memref<1x496x16xbf16, #tpu.memory_space<vmem>>, vector<1x432x16xbf16>
    %3 = vector.shape_cast %2 : vector<1x432x16xbf16> to vector<432x16xbf16>
    %c0_3 = arith.constant 0 : index
    %c9 = arith.constant 9 : index
    %c0_4 = arith.constant 0 : index
    %4 = vector.load %arg1[%c0_3, %c9, %c0_4] : memref<1x496x16xbf16, #tpu.memory_space<vmem>>, vector<1x432x16xbf16>
    %5 = vector.shape_cast %4 : vector<1x432x16xbf16> to vector<432x16xbf16>
    %c0_5 = arith.constant 0 : index
    %c31 = arith.constant 31 : index
    %c0_6 = arith.constant 0 : index
    %6 = vector.load %arg1[%c0_5, %c31, %c0_6] : memref<1x496x16xbf16, #tpu.memory_space<vmem>>, vector<1x432x16xbf16>
    %7 = vector.shape_cast %6 : vector<1x432x16xbf16> to vector<432x16xbf16>
    %c0_7 = arith.constant 0 : index
    %c32 = arith.constant 32 : index
    %c0_8 = arith.constant 0 : index
    %8 = vector.load %arg1[%c0_7, %c32, %c0_8] : memref<1x496x16xbf16, #tpu.memory_space<vmem>>, vector<1x432x16xbf16>
    %9 = vector.shape_cast %8 : vector<1x432x16xbf16> to vector<432x16xbf16>
    %c0_9 = arith.constant 0 : index
    %c33 = arith.constant 33 : index
    %c0_10 = arith.constant 0 : index
    %10 = vector.load %arg1[%c0_9, %c33, %c0_10] : memref<1x496x16xbf16, #tpu.memory_space<vmem>>, vector<1x432x16xbf16>
    %11 = vector.shape_cast %10 : vector<1x432x16xbf16> to vector<432x16xbf16>
    %c0_11 = arith.constant 0 : index
    %c55 = arith.constant 55 : index
    %c0_12 = arith.constant 0 : index
    %12 = vector.load %arg1[%c0_11, %c55, %c0_12] : memref<1x496x16xbf16, #tpu.memory_space<vmem>>, vector<1x432x16xbf16>
    %13 = vector.shape_cast %12 : vector<1x432x16xbf16> to vector<432x16xbf16>
    %c0_13 = arith.constant 0 : index
    %c56 = arith.constant 56 : index
    %c0_14 = arith.constant 0 : index
    %14 = vector.load %arg1[%c0_13, %c56, %c0_14] : memref<1x496x16xbf16, #tpu.memory_space<vmem>>, vector<1x432x16xbf16>
    %15 = vector.shape_cast %14 : vector<1x432x16xbf16> to vector<432x16xbf16>
    %c0_15 = arith.constant 0 : index
    %c57 = arith.constant 57 : index
    %c0_16 = arith.constant 0 : index
    %16 = vector.load %arg1[%c0_15, %c57, %c0_16] : memref<1x496x16xbf16, #tpu.memory_space<vmem>>, vector<1x432x16xbf16>
    %17 = vector.shape_cast %16 : vector<1x432x16xbf16> to vector<432x16xbf16>
    %18 = tpu.concatenate %1, %3, %5, %7, %9, %11, %13, %15, %17 in 1 : vector<432x16xbf16>, vector<432x16xbf16>, vector<432x16xbf16>, vector<432x16xbf16>, vector<432x16xbf16>, vector<432x16xbf16>, vector<432x16xbf16>, vector<432x16xbf16>, vector<432x16xbf16> -> vector<432x144xbf16>
    %c0_17 = arith.constant 0 : index
    %c0_18 = arith.constant 0 : index
    %19 = vector.load %arg3[%c0_17, %c0_18] : memref<144x64xbf16, #tpu.memory_space<vmem>>, vector<144x64xbf16>
    %cst = arith.constant dense<0.000000e+00> : vector<432x64xf32>
    %20 = tpu.matmul %18, %19, %cst {dimension_numbers = #tpu.dot_dimension_numbers<[1], [0], [0], [1], [0, 0, 1, 1], [], []>} : vector<432x144xbf16>, vector<144x64xbf16>, vector<432x64xf32> -> vector<432x64xf32>
    %c0_19 = arith.constant 0 : index
    %c0_20 = arith.constant 0 : index
    %21 = vector.load %arg4[%c0_19, %c0_20] : memref<1x64xf32, #tpu.memory_space<vmem>>, vector<1x64xf32>
    %22 = vector.broadcast %21 : vector<1x64xf32> to vector<432x64xf32>
    %23 = arith.addf %20, %22 : vector<432x64xf32>
    %24 = vector.extract_strided_slice %23 {offsets = [24, 0], sizes = [16, 64], strides = [1, 1]} : vector<432x64xf32> to vector<16x64xf32>
    %25 = vector.extract_strided_slice %23 {offsets = [48, 0], sizes = [16, 64], strides = [1, 1]} : vector<432x64xf32> to vector<16x64xf32>
    %26 = vector.extract_strided_slice %23 {offsets = [72, 0], sizes = [16, 64], strides = [1, 1]} : vector<432x64xf32> to vector<16x64xf32>
    %27 = vector.extract_strided_slice %23 {offsets = [96, 0], sizes = [16, 64], strides = [1, 1]} : vector<432x64xf32> to vector<16x64xf32>
    %28 = vector.extract_strided_slice %23 {offsets = [120, 0], sizes = [16, 64], strides = [1, 1]} : vector<432x64xf32> to vector<16x64xf32>
    %29 = vector.extract_strided_slice %23 {offsets = [144, 0], sizes = [16, 64], strides = [1, 1]} : vector<432x64xf32> to vector<16x64xf32>
    %30 = vector.extract_strided_slice %23 {offsets = [168, 0], sizes = [16, 64], strides = [1, 1]} : vector<432x64xf32> to vector<16x64xf32>
    %31 = vector.extract_strided_slice %23 {offsets = [192, 0], sizes = [16, 64], strides = [1, 1]} : vector<432x64xf32> to vector<16x64xf32>
    %32 = vector.extract_strided_slice %23 {offsets = [216, 0], sizes = [16, 64], strides = [1, 1]} : vector<432x64xf32> to vector<16x64xf32>
    %33 = vector.extract_strided_slice %23 {offsets = [240, 0], sizes = [16, 64], strides = [1, 1]} : vector<432x64xf32> to vector<16x64xf32>
    %34 = vector.extract_strided_slice %23 {offsets = [264, 0], sizes = [16, 64], strides = [1, 1]} : vector<432x64xf32> to vector<16x64xf32>
    %35 = vector.extract_strided_slice %23 {offsets = [288, 0], sizes = [16, 64], strides = [1, 1]} : vector<432x64xf32> to vector<16x64xf32>
    %36 = vector.extract_strided_slice %23 {offsets = [312, 0], sizes = [16, 64], strides = [1, 1]} : vector<432x64xf32> to vector<16x64xf32>
    %37 = vector.extract_strided_slice %23 {offsets = [336, 0], sizes = [16, 64], strides = [1, 1]} : vector<432x64xf32> to vector<16x64xf32>
    %38 = vector.extract_strided_slice %23 {offsets = [360, 0], sizes = [16, 64], strides = [1, 1]} : vector<432x64xf32> to vector<16x64xf32>
    %39 = vector.extract_strided_slice %23 {offsets = [384, 0], sizes = [16, 64], strides = [1, 1]} : vector<432x64xf32> to vector<16x64xf32>
    %40 = tpu.concatenate %24, %25, %26, %27, %28, %29, %30, %31, %32, %33, %34, %35, %36, %37, %38, %39 in 0 : vector<16x64xf32>, vector<16x64xf32>, vector<16x64xf32>, vector<16x64xf32>, vector<16x64xf32>, vector<16x64xf32>, vector<16x64xf32>, vector<16x64xf32>, vector<16x64xf32>, vector<16x64xf32>, vector<16x64xf32>, vector<16x64xf32>, vector<16x64xf32>, vector<16x64xf32>, vector<16x64xf32>, vector<16x64xf32> -> vector<256x64xf32>
    %cst_21 = arith.constant dense<0.000000e+00> : vector<64xf32>
    %41 = vector.multi_reduction <add>, %40, %cst_21 [0] : vector<256x64xf32> to vector<64xf32>
    %42 = vector.shape_cast %41 : vector<64xf32> to vector<1x64xf32>
    %cst_22 = arith.constant 3.906250e-03 : f32
    %43 = vector.broadcast %cst_22 : f32 to vector<1x64xf32>
    %44 = arith.mulf %42, %43 : vector<1x64xf32>
    %c0_23 = arith.constant 0 : index
    %c0_24 = arith.constant 0 : index
    %45 = vector.load %arg5[%c0_23, %c0_24] : memref<64x4xf32, #tpu.memory_space<vmem>>, vector<64x4xf32>
    %cst_25 = arith.constant dense<0.000000e+00> : vector<1x4xf32>
    %46 = tpu.matmul %44, %45, %cst_25 {dimension_numbers = #tpu.dot_dimension_numbers<[1], [0], [0], [1], [0, 0, 1, 1], [], []>} : vector<1x64xf32>, vector<64x4xf32>, vector<1x4xf32> -> vector<1x4xf32>
    %c0_26 = arith.constant 0 : index
    %c0_27 = arith.constant 0 : index
    %47 = vector.load %arg6[%c0_26, %c0_27] : memref<1x4xf32, #tpu.memory_space<vmem>>, vector<1x4xf32>
    %48 = arith.addf %46, %47 : vector<1x4xf32>
    %cst_28 = arith.constant 0.000000e+00 : f32
    %49 = vector.broadcast %cst_28 : f32 to vector<1x4xf32>
    %50 = arith.maximumf %48, %49 : vector<1x4xf32>
    %c0_29 = arith.constant 0 : index
    %c0_30 = arith.constant 0 : index
    %51 = vector.load %arg7[%c0_29, %c0_30] : memref<4x64xf32, #tpu.memory_space<vmem>>, vector<4x64xf32>
    %cst_31 = arith.constant dense<0.000000e+00> : vector<1x64xf32>
    %52 = tpu.matmul %50, %51, %cst_31 {dimension_numbers = #tpu.dot_dimension_numbers<[1], [0], [0], [1], [0, 0, 1, 1], [], []>} : vector<1x4xf32>, vector<4x64xf32>, vector<1x64xf32> -> vector<1x64xf32>
    %c0_32 = arith.constant 0 : index
    %c0_33 = arith.constant 0 : index
    %53 = vector.load %arg8[%c0_32, %c0_33] : memref<1x64xf32, #tpu.memory_space<vmem>>, vector<1x64xf32>
    %54 = arith.addf %52, %53 : vector<1x64xf32>
    %55 = arith.negf %54 : vector<1x64xf32>
    %56 = math.exp %55 : vector<1x64xf32>
    %cst_34 = arith.constant 1.000000e+00 : f32
    %57 = vector.broadcast %cst_34 : f32 to vector<1x64xf32>
    %58 = arith.addf %57, %56 : vector<1x64xf32>
    %59 = arith.divf %57, %58 : vector<1x64xf32>
    %60 = vector.broadcast %59 : vector<1x64xf32> to vector<256x64xf32>
    %61 = arith.mulf %40, %60 : vector<256x64xf32>
    %c0_35 = arith.constant 0 : index
    %c0_36 = arith.constant 0 : index
    %c0_37 = arith.constant 0 : index
    %62 = vector.load %arg2[%c0_35, %c0_36, %c0_37] : memref<1x256x64xbf16, #tpu.memory_space<vmem>>, vector<1x256x64xbf16>
    %63 = vector.shape_cast %62 : vector<1x256x64xbf16> to vector<256x64xbf16>
    %64 = arith.extf %63 : vector<256x64xbf16> to vector<256x64xf32>
    %65 = arith.addf %61, %64 : vector<256x64xf32>
    %cst_38 = arith.constant 0.000000e+00 : f32
    %66 = vector.broadcast %cst_38 : f32 to vector<256x64xf32>
    %67 = arith.maximumf %65, %66 : vector<256x64xf32>
    %c0_39 = arith.constant 0 : index
    %c0_40 = arith.constant 0 : index
    %c0_41 = arith.constant 0 : index
    %68 = vector.load %arg9[%c0_39, %c0_40, %c0_41] : memref<1x256x64xf32, #tpu.memory_space<vmem>>, vector<1x256x64xf32>
    %69 = vector.shape_cast %68 : vector<1x256x64xf32> to vector<256x64xf32>
    %70 = vector.shape_cast %67 : vector<256x64xf32> to vector<1x256x64xf32>
    tpu.vector_store %arg9[%c0_39, %c0_40, %c0_41], %70 {strides = array<i32>} : memref<1x256x64xf32, #tpu.memory_space<vmem>>, vector<1x256x64xf32>,
    return
  }
  func.func @transform_0(%arg0: i32) -> (i32, i32, i32) {
    %c0_i32 = arith.constant 0 : i32
    %c0_i32_0 = arith.constant 0 : i32
    %c0_i32_1 = arith.constant 0 : i32
    return %arg0, %c0_i32, %c0_i32_0 : i32, i32, i32
  }
  func.func @transform_1(%arg0: i32) -> (i32, i32, i32) {
    %c0_i32 = arith.constant 0 : i32
    %c0_i32_0 = arith.constant 0 : i32
    %c0_i32_1 = arith.constant 0 : i32
    return %arg0, %c0_i32, %c0_i32_0 : i32, i32, i32
  }
  func.func @transform_2(%arg0: i32) -> (i32, i32) {
    %c0_i32 = arith.constant 0 : i32
    %c0_i32_0 = arith.constant 0 : i32
    %c0_i32_1 = arith.constant 0 : i32
    return %c0_i32, %c0_i32_0 : i32, i32
  }
  func.func @transform_3(%arg0: i32) -> (i32, i32) {
    %c0_i32 = arith.constant 0 : i32
    %c0_i32_0 = arith.constant 0 : i32
    %c0_i32_1 = arith.constant 0 : i32
    return %c0_i32, %c0_i32_0 : i32, i32
  }
  func.func @transform_4(%arg0: i32) -> (i32, i32) {
    %c0_i32 = arith.constant 0 : i32
    %c0_i32_0 = arith.constant 0 : i32
    %c0_i32_1 = arith.constant 0 : i32
    return %c0_i32, %c0_i32_0 : i32, i32
  }
  func.func @transform_5(%arg0: i32) -> (i32, i32) {
    %c0_i32 = arith.constant 0 : i32
    %c0_i32_0 = arith.constant 0 : i32
    %c0_i32_1 = arith.constant 0 : i32
    return %c0_i32, %c0_i32_0 : i32, i32
  }
  func.func @transform_6(%arg0: i32) -> (i32, i32) {
    %c0_i32 = arith.constant 0 : i32
    %c0_i32_0 = arith.constant 0 : i32
    %c0_i32_1 = arith.constant 0 : i32
    return %c0_i32, %c0_i32_0 : i32, i32
  }
  func.func @transform_7(%arg0: i32) -> (i32, i32) {
    %c0_i32 = arith.constant 0 : i32
    %c0_i32_0 = arith.constant 0 : i32
    %c0_i32_1 = arith.constant 0 : i32
    return %c0_i32, %c0_i32_0 : i32, i32
  }
  func.func @transform_8(%arg0: i32) -> (i32, i32, i32) {
    %c0_i32 = arith.constant 0 : i32
    %c0_i32_0 = arith.constant 0 : i32
    %c0_i32_1 = arith.constant 0 : i32
    return %arg0, %c0_i32, %c0_i32_0 : i32, i32, i32
  }
}

module attributes {stable_mosaic.version = 11 : i64} {
  func.func @_conv2_kernel(%arg0: i32, %arg1: memref<1x256x16xbf16, #tpu.memory_space<vmem>>, %arg2: memref<144x16xbf16, #tpu.memory_space<vmem>>, %arg3: memref<1x16xf32, #tpu.memory_space<vmem>>, %arg4: memref<1x496x16xbf16, #tpu.memory_space<vmem>>, %arg5: memref<496x16xbf16, #tpu.memory_space<vmem>>) attributes {dimension_semantics = [#tpu.dimension_semantics<parallel>], iteration_bounds = array<i64: 2>, scalar_prefetch = 0 : i64, scratch_operands = 1 : i64, tpu.core_type = #tpu.core_type<tc>, window_params = [{transform_indices = @transform_0, window_bounds = array<i64: 1, 256, 16>}, {pipeline_mode = #tpu.pipeline_mode<synchronous>, transform_indices = @transform_1, window_bounds = array<i64: 144, 16>}, {pipeline_mode = #tpu.pipeline_mode<synchronous>, transform_indices = @transform_2, window_bounds = array<i64: 1, 16>}, {transform_indices = @transform_3, window_bounds = array<i64: 1, 496, 16>}]} {
    %cst = arith.constant 0.000000e+00 : bf16
    %0 = vector.broadcast %cst : bf16 to vector<496x16xbf16>
    %c0 = arith.constant 0 : index
    %c0_0 = arith.constant 0 : index
    %1 = vector.load %arg5[%c0, %c0_0] : memref<496x16xbf16, #tpu.memory_space<vmem>>, vector<496x16xbf16>
    tpu.vector_store %arg5[%c0, %c0_0], %0 {strides = array<i32>} : memref<496x16xbf16, #tpu.memory_space<vmem>>, vector<496x16xbf16>,
    %c0_1 = arith.constant 0 : index
    %c0_2 = arith.constant 0 : index
    %c0_3 = arith.constant 0 : index
    %2 = vector.load %arg1[%c0_1, %c0_2, %c0_3] : memref<1x256x16xbf16, #tpu.memory_space<vmem>>, vector<1x16x16xbf16>
    %3 = vector.shape_cast %2 : vector<1x16x16xbf16> to vector<16x16xbf16>
    %c56 = arith.constant 56 : index
    %c0_4 = arith.constant 0 : index
    %4 = vector.load %arg5[%c56, %c0_4] : memref<496x16xbf16, #tpu.memory_space<vmem>>, vector<16x16xbf16>
    tpu.vector_store %arg5[%c56, %c0_4], %3 {strides = array<i32>} : memref<496x16xbf16, #tpu.memory_space<vmem>>, vector<16x16xbf16>,
    %c0_5 = arith.constant 0 : index
    %c16 = arith.constant 16 : index
    %c0_6 = arith.constant 0 : index
    %5 = vector.load %arg1[%c0_5, %c16, %c0_6] : memref<1x256x16xbf16, #tpu.memory_space<vmem>>, vector<1x16x16xbf16>
    %6 = vector.shape_cast %5 : vector<1x16x16xbf16> to vector<16x16xbf16>
    %c80 = arith.constant 80 : index
    %c0_7 = arith.constant 0 : index
    %7 = vector.load %arg5[%c80, %c0_7] : memref<496x16xbf16, #tpu.memory_space<vmem>>, vector<16x16xbf16>
    tpu.vector_store %arg5[%c80, %c0_7], %6 {strides = array<i32>} : memref<496x16xbf16, #tpu.memory_space<vmem>>, vector<16x16xbf16>,
    %c0_8 = arith.constant 0 : index
    %c32 = arith.constant 32 : index
    %c0_9 = arith.constant 0 : index
    %8 = vector.load %arg1[%c0_8, %c32, %c0_9] : memref<1x256x16xbf16, #tpu.memory_space<vmem>>, vector<1x16x16xbf16>
    %9 = vector.shape_cast %8 : vector<1x16x16xbf16> to vector<16x16xbf16>
    %c104 = arith.constant 104 : index
    %c0_10 = arith.constant 0 : index
    %10 = vector.load %arg5[%c104, %c0_10] : memref<496x16xbf16, #tpu.memory_space<vmem>>, vector<16x16xbf16>
    tpu.vector_store %arg5[%c104, %c0_10], %9 {strides = array<i32>} : memref<496x16xbf16, #tpu.memory_space<vmem>>, vector<16x16xbf16>,
    %c0_11 = arith.constant 0 : index
    %c48 = arith.constant 48 : index
    %c0_12 = arith.constant 0 : index
    %11 = vector.load %arg1[%c0_11, %c48, %c0_12] : memref<1x256x16xbf16, #tpu.memory_space<vmem>>, vector<1x16x16xbf16>
    %12 = vector.shape_cast %11 : vector<1x16x16xbf16> to vector<16x16xbf16>
    %c128 = arith.constant 128 : index
    %c0_13 = arith.constant 0 : index
    %13 = vector.load %arg5[%c128, %c0_13] : memref<496x16xbf16, #tpu.memory_space<vmem>>, vector<16x16xbf16>
    tpu.vector_store %arg5[%c128, %c0_13], %12 {strides = array<i32>} : memref<496x16xbf16, #tpu.memory_space<vmem>>, vector<16x16xbf16>,
    %c0_14 = arith.constant 0 : index
    %c64 = arith.constant 64 : index
    %c0_15 = arith.constant 0 : index
    %14 = vector.load %arg1[%c0_14, %c64, %c0_15] : memref<1x256x16xbf16, #tpu.memory_space<vmem>>, vector<1x16x16xbf16>
    %15 = vector.shape_cast %14 : vector<1x16x16xbf16> to vector<16x16xbf16>
    %c152 = arith.constant 152 : index
    %c0_16 = arith.constant 0 : index
    %16 = vector.load %arg5[%c152, %c0_16] : memref<496x16xbf16, #tpu.memory_space<vmem>>, vector<16x16xbf16>
    tpu.vector_store %arg5[%c152, %c0_16], %15 {strides = array<i32>} : memref<496x16xbf16, #tpu.memory_space<vmem>>, vector<16x16xbf16>,
    %c0_17 = arith.constant 0 : index
    %c80_18 = arith.constant 80 : index
    %c0_19 = arith.constant 0 : index
    %17 = vector.load %arg1[%c0_17, %c80_18, %c0_19] : memref<1x256x16xbf16, #tpu.memory_space<vmem>>, vector<1x16x16xbf16>
    %18 = vector.shape_cast %17 : vector<1x16x16xbf16> to vector<16x16xbf16>
    %c176 = arith.constant 176 : index
    %c0_20 = arith.constant 0 : index
    %19 = vector.load %arg5[%c176, %c0_20] : memref<496x16xbf16, #tpu.memory_space<vmem>>, vector<16x16xbf16>
    tpu.vector_store %arg5[%c176, %c0_20], %18 {strides = array<i32>} : memref<496x16xbf16, #tpu.memory_space<vmem>>, vector<16x16xbf16>,
    %c0_21 = arith.constant 0 : index
    %c96 = arith.constant 96 : index
    %c0_22 = arith.constant 0 : index
    %20 = vector.load %arg1[%c0_21, %c96, %c0_22] : memref<1x256x16xbf16, #tpu.memory_space<vmem>>, vector<1x16x16xbf16>
    %21 = vector.shape_cast %20 : vector<1x16x16xbf16> to vector<16x16xbf16>
    %c200 = arith.constant 200 : index
    %c0_23 = arith.constant 0 : index
    %22 = vector.load %arg5[%c200, %c0_23] : memref<496x16xbf16, #tpu.memory_space<vmem>>, vector<16x16xbf16>
    tpu.vector_store %arg5[%c200, %c0_23], %21 {strides = array<i32>} : memref<496x16xbf16, #tpu.memory_space<vmem>>, vector<16x16xbf16>,
    %c0_24 = arith.constant 0 : index
    %c112 = arith.constant 112 : index
    %c0_25 = arith.constant 0 : index
    %23 = vector.load %arg1[%c0_24, %c112, %c0_25] : memref<1x256x16xbf16, #tpu.memory_space<vmem>>, vector<1x16x16xbf16>
    %24 = vector.shape_cast %23 : vector<1x16x16xbf16> to vector<16x16xbf16>
    %c224 = arith.constant 224 : index
    %c0_26 = arith.constant 0 : index
    %25 = vector.load %arg5[%c224, %c0_26] : memref<496x16xbf16, #tpu.memory_space<vmem>>, vector<16x16xbf16>
    tpu.vector_store %arg5[%c224, %c0_26], %24 {strides = array<i32>} : memref<496x16xbf16, #tpu.memory_space<vmem>>, vector<16x16xbf16>,
    %c0_27 = arith.constant 0 : index
    %c128_28 = arith.constant 128 : index
    %c0_29 = arith.constant 0 : index
    %26 = vector.load %arg1[%c0_27, %c128_28, %c0_29] : memref<1x256x16xbf16, #tpu.memory_space<vmem>>, vector<1x16x16xbf16>
    %27 = vector.shape_cast %26 : vector<1x16x16xbf16> to vector<16x16xbf16>
    %c248 = arith.constant 248 : index
    %c0_30 = arith.constant 0 : index
    %28 = vector.load %arg5[%c248, %c0_30] : memref<496x16xbf16, #tpu.memory_space<vmem>>, vector<16x16xbf16>
    tpu.vector_store %arg5[%c248, %c0_30], %27 {strides = array<i32>} : memref<496x16xbf16, #tpu.memory_space<vmem>>, vector<16x16xbf16>,
    %c0_31 = arith.constant 0 : index
    %c144 = arith.constant 144 : index
    %c0_32 = arith.constant 0 : index
    %29 = vector.load %arg1[%c0_31, %c144, %c0_32] : memref<1x256x16xbf16, #tpu.memory_space<vmem>>, vector<1x16x16xbf16>
    %30 = vector.shape_cast %29 : vector<1x16x16xbf16> to vector<16x16xbf16>
    %c272 = arith.constant 272 : index
    %c0_33 = arith.constant 0 : index
    %31 = vector.load %arg5[%c272, %c0_33] : memref<496x16xbf16, #tpu.memory_space<vmem>>, vector<16x16xbf16>
    tpu.vector_store %arg5[%c272, %c0_33], %30 {strides = array<i32>} : memref<496x16xbf16, #tpu.memory_space<vmem>>, vector<16x16xbf16>,
    %c0_34 = arith.constant 0 : index
    %c160 = arith.constant 160 : index
    %c0_35 = arith.constant 0 : index
    %32 = vector.load %arg1[%c0_34, %c160, %c0_35] : memref<1x256x16xbf16, #tpu.memory_space<vmem>>, vector<1x16x16xbf16>
    %33 = vector.shape_cast %32 : vector<1x16x16xbf16> to vector<16x16xbf16>
    %c296 = arith.constant 296 : index
    %c0_36 = arith.constant 0 : index
    %34 = vector.load %arg5[%c296, %c0_36] : memref<496x16xbf16, #tpu.memory_space<vmem>>, vector<16x16xbf16>
    tpu.vector_store %arg5[%c296, %c0_36], %33 {strides = array<i32>} : memref<496x16xbf16, #tpu.memory_space<vmem>>, vector<16x16xbf16>,
    %c0_37 = arith.constant 0 : index
    %c176_38 = arith.constant 176 : index
    %c0_39 = arith.constant 0 : index
    %35 = vector.load %arg1[%c0_37, %c176_38, %c0_39] : memref<1x256x16xbf16, #tpu.memory_space<vmem>>, vector<1x16x16xbf16>
    %36 = vector.shape_cast %35 : vector<1x16x16xbf16> to vector<16x16xbf16>
    %c320 = arith.constant 320 : index
    %c0_40 = arith.constant 0 : index
    %37 = vector.load %arg5[%c320, %c0_40] : memref<496x16xbf16, #tpu.memory_space<vmem>>, vector<16x16xbf16>
    tpu.vector_store %arg5[%c320, %c0_40], %36 {strides = array<i32>} : memref<496x16xbf16, #tpu.memory_space<vmem>>, vector<16x16xbf16>,
    %c0_41 = arith.constant 0 : index
    %c192 = arith.constant 192 : index
    %c0_42 = arith.constant 0 : index
    %38 = vector.load %arg1[%c0_41, %c192, %c0_42] : memref<1x256x16xbf16, #tpu.memory_space<vmem>>, vector<1x16x16xbf16>
    %39 = vector.shape_cast %38 : vector<1x16x16xbf16> to vector<16x16xbf16>
    %c344 = arith.constant 344 : index
    %c0_43 = arith.constant 0 : index
    %40 = vector.load %arg5[%c344, %c0_43] : memref<496x16xbf16, #tpu.memory_space<vmem>>, vector<16x16xbf16>
    tpu.vector_store %arg5[%c344, %c0_43], %39 {strides = array<i32>} : memref<496x16xbf16, #tpu.memory_space<vmem>>, vector<16x16xbf16>,
    %c0_44 = arith.constant 0 : index
    %c208 = arith.constant 208 : index
    %c0_45 = arith.constant 0 : index
    %41 = vector.load %arg1[%c0_44, %c208, %c0_45] : memref<1x256x16xbf16, #tpu.memory_space<vmem>>, vector<1x16x16xbf16>
    %42 = vector.shape_cast %41 : vector<1x16x16xbf16> to vector<16x16xbf16>
    %c368 = arith.constant 368 : index
    %c0_46 = arith.constant 0 : index
    %43 = vector.load %arg5[%c368, %c0_46] : memref<496x16xbf16, #tpu.memory_space<vmem>>, vector<16x16xbf16>
    tpu.vector_store %arg5[%c368, %c0_46], %42 {strides = array<i32>} : memref<496x16xbf16, #tpu.memory_space<vmem>>, vector<16x16xbf16>,
    %c0_47 = arith.constant 0 : index
    %c224_48 = arith.constant 224 : index
    %c0_49 = arith.constant 0 : index
    %44 = vector.load %arg1[%c0_47, %c224_48, %c0_49] : memref<1x256x16xbf16, #tpu.memory_space<vmem>>, vector<1x16x16xbf16>
    %45 = vector.shape_cast %44 : vector<1x16x16xbf16> to vector<16x16xbf16>
    %c392 = arith.constant 392 : index
    %c0_50 = arith.constant 0 : index
    %46 = vector.load %arg5[%c392, %c0_50] : memref<496x16xbf16, #tpu.memory_space<vmem>>, vector<16x16xbf16>
    tpu.vector_store %arg5[%c392, %c0_50], %45 {strides = array<i32>} : memref<496x16xbf16, #tpu.memory_space<vmem>>, vector<16x16xbf16>,
    %c0_51 = arith.constant 0 : index
    %c240 = arith.constant 240 : index
    %c0_52 = arith.constant 0 : index
    %47 = vector.load %arg1[%c0_51, %c240, %c0_52] : memref<1x256x16xbf16, #tpu.memory_space<vmem>>, vector<1x16x16xbf16>
    %48 = vector.shape_cast %47 : vector<1x16x16xbf16> to vector<16x16xbf16>
    %c416 = arith.constant 416 : index
    %c0_53 = arith.constant 0 : index
    %49 = vector.load %arg5[%c416, %c0_53] : memref<496x16xbf16, #tpu.memory_space<vmem>>, vector<16x16xbf16>
    tpu.vector_store %arg5[%c416, %c0_53], %48 {strides = array<i32>} : memref<496x16xbf16, #tpu.memory_space<vmem>>, vector<16x16xbf16>,
    %c7 = arith.constant 7 : index
    %c0_54 = arith.constant 0 : index
    %50 = vector.load %arg5[%c7, %c0_54] : memref<496x16xbf16, #tpu.memory_space<vmem>>, vector<432x16xbf16>
    %c8 = arith.constant 8 : index
    %c0_55 = arith.constant 0 : index
    %51 = vector.load %arg5[%c8, %c0_55] : memref<496x16xbf16, #tpu.memory_space<vmem>>, vector<432x16xbf16>
    %c9 = arith.constant 9 : index
    %c0_56 = arith.constant 0 : index
    %52 = vector.load %arg5[%c9, %c0_56] : memref<496x16xbf16, #tpu.memory_space<vmem>>, vector<432x16xbf16>
    %c31 = arith.constant 31 : index
    %c0_57 = arith.constant 0 : index
    %53 = vector.load %arg5[%c31, %c0_57] : memref<496x16xbf16, #tpu.memory_space<vmem>>, vector<432x16xbf16>
    %c32_58 = arith.constant 32 : index
    %c0_59 = arith.constant 0 : index
    %54 = vector.load %arg5[%c32_58, %c0_59] : memref<496x16xbf16, #tpu.memory_space<vmem>>, vector<432x16xbf16>
    %c33 = arith.constant 33 : index
    %c0_60 = arith.constant 0 : index
    %55 = vector.load %arg5[%c33, %c0_60] : memref<496x16xbf16, #tpu.memory_space<vmem>>, vector<432x16xbf16>
    %c55 = arith.constant 55 : index
    %c0_61 = arith.constant 0 : index
    %56 = vector.load %arg5[%c55, %c0_61] : memref<496x16xbf16, #tpu.memory_space<vmem>>, vector<432x16xbf16>
    %c56_62 = arith.constant 56 : index
    %c0_63 = arith.constant 0 : index
    %57 = vector.load %arg5[%c56_62, %c0_63] : memref<496x16xbf16, #tpu.memory_space<vmem>>, vector<432x16xbf16>
    %c57 = arith.constant 57 : index
    %c0_64 = arith.constant 0 : index
    %58 = vector.load %arg5[%c57, %c0_64] : memref<496x16xbf16, #tpu.memory_space<vmem>>, vector<432x16xbf16>
    %59 = tpu.concatenate %50, %51, %52, %53, %54, %55, %56, %57, %58 in 1 : vector<432x16xbf16>, vector<432x16xbf16>, vector<432x16xbf16>, vector<432x16xbf16>, vector<432x16xbf16>, vector<432x16xbf16>, vector<432x16xbf16>, vector<432x16xbf16>, vector<432x16xbf16> -> vector<432x144xbf16>
    %c0_65 = arith.constant 0 : index
    %c0_66 = arith.constant 0 : index
    %60 = vector.load %arg2[%c0_65, %c0_66] : memref<144x16xbf16, #tpu.memory_space<vmem>>, vector<144x16xbf16>
    %cst_67 = arith.constant dense<0.000000e+00> : vector<432x16xf32>
    %61 = tpu.matmul %59, %60, %cst_67 {dimension_numbers = #tpu.dot_dimension_numbers<[1], [0], [0], [1], [0, 0, 1, 1], [], []>} : vector<432x144xbf16>, vector<144x16xbf16>, vector<432x16xf32> -> vector<432x16xf32>
    %c0_68 = arith.constant 0 : index
    %c0_69 = arith.constant 0 : index
    %62 = vector.load %arg3[%c0_68, %c0_69] : memref<1x16xf32, #tpu.memory_space<vmem>>, vector<1x16xf32>
    %63 = vector.broadcast %62 : vector<1x16xf32> to vector<432x16xf32>
    %64 = arith.addf %61, %63 : vector<432x16xf32>
    %cst_70 = arith.constant 0.000000e+00 : f32
    %65 = vector.broadcast %cst_70 : f32 to vector<432x16xf32>
    %66 = arith.maximumf %64, %65 : vector<432x16xf32>
    %cst_71 = arith.constant 0.000000e+00 : bf16
    %67 = vector.broadcast %cst_71 : bf16 to vector<496x16xbf16>
    %c0_72 = arith.constant 0 : index
    %c0_73 = arith.constant 0 : index
    %c0_74 = arith.constant 0 : index
    %68 = vector.load %arg4[%c0_72, %c0_73, %c0_74] : memref<1x496x16xbf16, #tpu.memory_space<vmem>>, vector<1x496x16xbf16>
    %69 = vector.shape_cast %68 : vector<1x496x16xbf16> to vector<496x16xbf16>
    %70 = vector.shape_cast %67 : vector<496x16xbf16> to vector<1x496x16xbf16>
    tpu.vector_store %arg4[%c0_72, %c0_73, %c0_74], %70 {strides = array<i32>} : memref<1x496x16xbf16, #tpu.memory_space<vmem>>, vector<1x496x16xbf16>,
    %71 = vector.extract_strided_slice %66 {offsets = [24, 0], sizes = [16, 16], strides = [1, 1]} : vector<432x16xf32> to vector<16x16xf32>
    %72 = arith.truncf %71 : vector<16x16xf32> to vector<16x16xbf16>
    %c0_75 = arith.constant 0 : index
    %c56_76 = arith.constant 56 : index
    %c0_77 = arith.constant 0 : index
    %73 = vector.load %arg4[%c0_75, %c56_76, %c0_77] : memref<1x496x16xbf16, #tpu.memory_space<vmem>>, vector<1x16x16xbf16>
    %74 = vector.shape_cast %73 : vector<1x16x16xbf16> to vector<16x16xbf16>
    %75 = vector.shape_cast %72 : vector<16x16xbf16> to vector<1x16x16xbf16>
    tpu.vector_store %arg4[%c0_75, %c56_76, %c0_77], %75 {strides = array<i32>} : memref<1x496x16xbf16, #tpu.memory_space<vmem>>, vector<1x16x16xbf16>,
    %76 = vector.extract_strided_slice %66 {offsets = [48, 0], sizes = [16, 16], strides = [1, 1]} : vector<432x16xf32> to vector<16x16xf32>
    %77 = arith.truncf %76 : vector<16x16xf32> to vector<16x16xbf16>
    %c0_78 = arith.constant 0 : index
    %c80_79 = arith.constant 80 : index
    %c0_80 = arith.constant 0 : index
    %78 = vector.load %arg4[%c0_78, %c80_79, %c0_80] : memref<1x496x16xbf16, #tpu.memory_space<vmem>>, vector<1x16x16xbf16>
    %79 = vector.shape_cast %78 : vector<1x16x16xbf16> to vector<16x16xbf16>
    %80 = vector.shape_cast %77 : vector<16x16xbf16> to vector<1x16x16xbf16>
    tpu.vector_store %arg4[%c0_78, %c80_79, %c0_80], %80 {strides = array<i32>} : memref<1x496x16xbf16, #tpu.memory_space<vmem>>, vector<1x16x16xbf16>,
    %81 = vector.extract_strided_slice %66 {offsets = [72, 0], sizes = [16, 16], strides = [1, 1]} : vector<432x16xf32> to vector<16x16xf32>
    %82 = arith.truncf %81 : vector<16x16xf32> to vector<16x16xbf16>
    %c0_81 = arith.constant 0 : index
    %c104_82 = arith.constant 104 : index
    %c0_83 = arith.constant 0 : index
    %83 = vector.load %arg4[%c0_81, %c104_82, %c0_83] : memref<1x496x16xbf16, #tpu.memory_space<vmem>>, vector<1x16x16xbf16>
    %84 = vector.shape_cast %83 : vector<1x16x16xbf16> to vector<16x16xbf16>
    %85 = vector.shape_cast %82 : vector<16x16xbf16> to vector<1x16x16xbf16>
    tpu.vector_store %arg4[%c0_81, %c104_82, %c0_83], %85 {strides = array<i32>} : memref<1x496x16xbf16, #tpu.memory_space<vmem>>, vector<1x16x16xbf16>,
    %86 = vector.extract_strided_slice %66 {offsets = [96, 0], sizes = [16, 16], strides = [1, 1]} : vector<432x16xf32> to vector<16x16xf32>
    %87 = arith.truncf %86 : vector<16x16xf32> to vector<16x16xbf16>
    %c0_84 = arith.constant 0 : index
    %c128_85 = arith.constant 128 : index
    %c0_86 = arith.constant 0 : index
    %88 = vector.load %arg4[%c0_84, %c128_85, %c0_86] : memref<1x496x16xbf16, #tpu.memory_space<vmem>>, vector<1x16x16xbf16>
    %89 = vector.shape_cast %88 : vector<1x16x16xbf16> to vector<16x16xbf16>
    %90 = vector.shape_cast %87 : vector<16x16xbf16> to vector<1x16x16xbf16>
    tpu.vector_store %arg4[%c0_84, %c128_85, %c0_86], %90 {strides = array<i32>} : memref<1x496x16xbf16, #tpu.memory_space<vmem>>, vector<1x16x16xbf16>,
    %91 = vector.extract_strided_slice %66 {offsets = [120, 0], sizes = [16, 16], strides = [1, 1]} : vector<432x16xf32> to vector<16x16xf32>
    %92 = arith.truncf %91 : vector<16x16xf32> to vector<16x16xbf16>
    %c0_87 = arith.constant 0 : index
    %c152_88 = arith.constant 152 : index
    %c0_89 = arith.constant 0 : index
    %93 = vector.load %arg4[%c0_87, %c152_88, %c0_89] : memref<1x496x16xbf16, #tpu.memory_space<vmem>>, vector<1x16x16xbf16>
    %94 = vector.shape_cast %93 : vector<1x16x16xbf16> to vector<16x16xbf16>
    %95 = vector.shape_cast %92 : vector<16x16xbf16> to vector<1x16x16xbf16>
    tpu.vector_store %arg4[%c0_87, %c152_88, %c0_89], %95 {strides = array<i32>} : memref<1x496x16xbf16, #tpu.memory_space<vmem>>, vector<1x16x16xbf16>,
    %96 = vector.extract_strided_slice %66 {offsets = [144, 0], sizes = [16, 16], strides = [1, 1]} : vector<432x16xf32> to vector<16x16xf32>
    %97 = arith.truncf %96 : vector<16x16xf32> to vector<16x16xbf16>
    %c0_90 = arith.constant 0 : index
    %c176_91 = arith.constant 176 : index
    %c0_92 = arith.constant 0 : index
    %98 = vector.load %arg4[%c0_90, %c176_91, %c0_92] : memref<1x496x16xbf16, #tpu.memory_space<vmem>>, vector<1x16x16xbf16>
    %99 = vector.shape_cast %98 : vector<1x16x16xbf16> to vector<16x16xbf16>
    %100 = vector.shape_cast %97 : vector<16x16xbf16> to vector<1x16x16xbf16>
    tpu.vector_store %arg4[%c0_90, %c176_91, %c0_92], %100 {strides = array<i32>} : memref<1x496x16xbf16, #tpu.memory_space<vmem>>, vector<1x16x16xbf16>,
    %101 = vector.extract_strided_slice %66 {offsets = [168, 0], sizes = [16, 16], strides = [1, 1]} : vector<432x16xf32> to vector<16x16xf32>
    %102 = arith.truncf %101 : vector<16x16xf32> to vector<16x16xbf16>
    %c0_93 = arith.constant 0 : index
    %c200_94 = arith.constant 200 : index
    %c0_95 = arith.constant 0 : index
    %103 = vector.load %arg4[%c0_93, %c200_94, %c0_95] : memref<1x496x16xbf16, #tpu.memory_space<vmem>>, vector<1x16x16xbf16>
    %104 = vector.shape_cast %103 : vector<1x16x16xbf16> to vector<16x16xbf16>
    %105 = vector.shape_cast %102 : vector<16x16xbf16> to vector<1x16x16xbf16>
    tpu.vector_store %arg4[%c0_93, %c200_94, %c0_95], %105 {strides = array<i32>} : memref<1x496x16xbf16, #tpu.memory_space<vmem>>, vector<1x16x16xbf16>,
    %106 = vector.extract_strided_slice %66 {offsets = [192, 0], sizes = [16, 16], strides = [1, 1]} : vector<432x16xf32> to vector<16x16xf32>
    %107 = arith.truncf %106 : vector<16x16xf32> to vector<16x16xbf16>
    %c0_96 = arith.constant 0 : index
    %c224_97 = arith.constant 224 : index
    %c0_98 = arith.constant 0 : index
    %108 = vector.load %arg4[%c0_96, %c224_97, %c0_98] : memref<1x496x16xbf16, #tpu.memory_space<vmem>>, vector<1x16x16xbf16>
    %109 = vector.shape_cast %108 : vector<1x16x16xbf16> to vector<16x16xbf16>
    %110 = vector.shape_cast %107 : vector<16x16xbf16> to vector<1x16x16xbf16>
    tpu.vector_store %arg4[%c0_96, %c224_97, %c0_98], %110 {strides = array<i32>} : memref<1x496x16xbf16, #tpu.memory_space<vmem>>, vector<1x16x16xbf16>,
    %111 = vector.extract_strided_slice %66 {offsets = [216, 0], sizes = [16, 16], strides = [1, 1]} : vector<432x16xf32> to vector<16x16xf32>
    %112 = arith.truncf %111 : vector<16x16xf32> to vector<16x16xbf16>
    %c0_99 = arith.constant 0 : index
    %c248_100 = arith.constant 248 : index
    %c0_101 = arith.constant 0 : index
    %113 = vector.load %arg4[%c0_99, %c248_100, %c0_101] : memref<1x496x16xbf16, #tpu.memory_space<vmem>>, vector<1x16x16xbf16>
    %114 = vector.shape_cast %113 : vector<1x16x16xbf16> to vector<16x16xbf16>
    %115 = vector.shape_cast %112 : vector<16x16xbf16> to vector<1x16x16xbf16>
    tpu.vector_store %arg4[%c0_99, %c248_100, %c0_101], %115 {strides = array<i32>} : memref<1x496x16xbf16, #tpu.memory_space<vmem>>, vector<1x16x16xbf16>,
    %116 = vector.extract_strided_slice %66 {offsets = [240, 0], sizes = [16, 16], strides = [1, 1]} : vector<432x16xf32> to vector<16x16xf32>
    %117 = arith.truncf %116 : vector<16x16xf32> to vector<16x16xbf16>
    %c0_102 = arith.constant 0 : index
    %c272_103 = arith.constant 272 : index
    %c0_104 = arith.constant 0 : index
    %118 = vector.load %arg4[%c0_102, %c272_103, %c0_104] : memref<1x496x16xbf16, #tpu.memory_space<vmem>>, vector<1x16x16xbf16>
    %119 = vector.shape_cast %118 : vector<1x16x16xbf16> to vector<16x16xbf16>
    %120 = vector.shape_cast %117 : vector<16x16xbf16> to vector<1x16x16xbf16>
    tpu.vector_store %arg4[%c0_102, %c272_103, %c0_104], %120 {strides = array<i32>} : memref<1x496x16xbf16, #tpu.memory_space<vmem>>, vector<1x16x16xbf16>,
    %121 = vector.extract_strided_slice %66 {offsets = [264, 0], sizes = [16, 16], strides = [1, 1]} : vector<432x16xf32> to vector<16x16xf32>
    %122 = arith.truncf %121 : vector<16x16xf32> to vector<16x16xbf16>
    %c0_105 = arith.constant 0 : index
    %c296_106 = arith.constant 296 : index
    %c0_107 = arith.constant 0 : index
    %123 = vector.load %arg4[%c0_105, %c296_106, %c0_107] : memref<1x496x16xbf16, #tpu.memory_space<vmem>>, vector<1x16x16xbf16>
    %124 = vector.shape_cast %123 : vector<1x16x16xbf16> to vector<16x16xbf16>
    %125 = vector.shape_cast %122 : vector<16x16xbf16> to vector<1x16x16xbf16>
    tpu.vector_store %arg4[%c0_105, %c296_106, %c0_107], %125 {strides = array<i32>} : memref<1x496x16xbf16, #tpu.memory_space<vmem>>, vector<1x16x16xbf16>,
    %126 = vector.extract_strided_slice %66 {offsets = [288, 0], sizes = [16, 16], strides = [1, 1]} : vector<432x16xf32> to vector<16x16xf32>
    %127 = arith.truncf %126 : vector<16x16xf32> to vector<16x16xbf16>
    %c0_108 = arith.constant 0 : index
    %c320_109 = arith.constant 320 : index
    %c0_110 = arith.constant 0 : index
    %128 = vector.load %arg4[%c0_108, %c320_109, %c0_110] : memref<1x496x16xbf16, #tpu.memory_space<vmem>>, vector<1x16x16xbf16>
    %129 = vector.shape_cast %128 : vector<1x16x16xbf16> to vector<16x16xbf16>
    %130 = vector.shape_cast %127 : vector<16x16xbf16> to vector<1x16x16xbf16>
    tpu.vector_store %arg4[%c0_108, %c320_109, %c0_110], %130 {strides = array<i32>} : memref<1x496x16xbf16, #tpu.memory_space<vmem>>, vector<1x16x16xbf16>,
    %131 = vector.extract_strided_slice %66 {offsets = [312, 0], sizes = [16, 16], strides = [1, 1]} : vector<432x16xf32> to vector<16x16xf32>
    %132 = arith.truncf %131 : vector<16x16xf32> to vector<16x16xbf16>
    %c0_111 = arith.constant 0 : index
    %c344_112 = arith.constant 344 : index
    %c0_113 = arith.constant 0 : index
    %133 = vector.load %arg4[%c0_111, %c344_112, %c0_113] : memref<1x496x16xbf16, #tpu.memory_space<vmem>>, vector<1x16x16xbf16>
    %134 = vector.shape_cast %133 : vector<1x16x16xbf16> to vector<16x16xbf16>
    %135 = vector.shape_cast %132 : vector<16x16xbf16> to vector<1x16x16xbf16>
    tpu.vector_store %arg4[%c0_111, %c344_112, %c0_113], %135 {strides = array<i32>} : memref<1x496x16xbf16, #tpu.memory_space<vmem>>, vector<1x16x16xbf16>,
    %136 = vector.extract_strided_slice %66 {offsets = [336, 0], sizes = [16, 16], strides = [1, 1]} : vector<432x16xf32> to vector<16x16xf32>
    %137 = arith.truncf %136 : vector<16x16xf32> to vector<16x16xbf16>
    %c0_114 = arith.constant 0 : index
    %c368_115 = arith.constant 368 : index
    %c0_116 = arith.constant 0 : index
    %138 = vector.load %arg4[%c0_114, %c368_115, %c0_116] : memref<1x496x16xbf16, #tpu.memory_space<vmem>>, vector<1x16x16xbf16>
    %139 = vector.shape_cast %138 : vector<1x16x16xbf16> to vector<16x16xbf16>
    %140 = vector.shape_cast %137 : vector<16x16xbf16> to vector<1x16x16xbf16>
    tpu.vector_store %arg4[%c0_114, %c368_115, %c0_116], %140 {strides = array<i32>} : memref<1x496x16xbf16, #tpu.memory_space<vmem>>, vector<1x16x16xbf16>,
    %141 = vector.extract_strided_slice %66 {offsets = [360, 0], sizes = [16, 16], strides = [1, 1]} : vector<432x16xf32> to vector<16x16xf32>
    %142 = arith.truncf %141 : vector<16x16xf32> to vector<16x16xbf16>
    %c0_117 = arith.constant 0 : index
    %c392_118 = arith.constant 392 : index
    %c0_119 = arith.constant 0 : index
    %143 = vector.load %arg4[%c0_117, %c392_118, %c0_119] : memref<1x496x16xbf16, #tpu.memory_space<vmem>>, vector<1x16x16xbf16>
    %144 = vector.shape_cast %143 : vector<1x16x16xbf16> to vector<16x16xbf16>
    %145 = vector.shape_cast %142 : vector<16x16xbf16> to vector<1x16x16xbf16>
    tpu.vector_store %arg4[%c0_117, %c392_118, %c0_119], %145 {strides = array<i32>} : memref<1x496x16xbf16, #tpu.memory_space<vmem>>, vector<1x16x16xbf16>,
    %146 = vector.extract_strided_slice %66 {offsets = [384, 0], sizes = [16, 16], strides = [1, 1]} : vector<432x16xf32> to vector<16x16xf32>
    %147 = arith.truncf %146 : vector<16x16xf32> to vector<16x16xbf16>
    %c0_120 = arith.constant 0 : index
    %c416_121 = arith.constant 416 : index
    %c0_122 = arith.constant 0 : index
    %148 = vector.load %arg4[%c0_120, %c416_121, %c0_122] : memref<1x496x16xbf16, #tpu.memory_space<vmem>>, vector<1x16x16xbf16>
    %149 = vector.shape_cast %148 : vector<1x16x16xbf16> to vector<16x16xbf16>
    %150 = vector.shape_cast %147 : vector<16x16xbf16> to vector<1x16x16xbf16>
    tpu.vector_store %arg4[%c0_120, %c416_121, %c0_122], %150 {strides = array<i32>} : memref<1x496x16xbf16, #tpu.memory_space<vmem>>, vector<1x16x16xbf16>,
    return
  }
  func.func @transform_0(%arg0: i32) -> (i32, i32, i32) {
    %c0_i32 = arith.constant 0 : i32
    %c0_i32_0 = arith.constant 0 : i32
    %c0_i32_1 = arith.constant 0 : i32
    return %arg0, %c0_i32, %c0_i32_0 : i32, i32, i32
  }
  func.func @transform_1(%arg0: i32) -> (i32, i32) {
    %c0_i32 = arith.constant 0 : i32
    %c0_i32_0 = arith.constant 0 : i32
    %c0_i32_1 = arith.constant 0 : i32
    return %c0_i32, %c0_i32_0 : i32, i32
  }
  func.func @transform_2(%arg0: i32) -> (i32, i32) {
    %c0_i32 = arith.constant 0 : i32
    %c0_i32_0 = arith.constant 0 : i32
    %c0_i32_1 = arith.constant 0 : i32
    return %c0_i32, %c0_i32_0 : i32, i32
  }
  func.func @transform_3(%arg0: i32) -> (i32, i32, i32) {
    %c0_i32 = arith.constant 0 : i32
    %c0_i32_0 = arith.constant 0 : i32
    %c0_i32_1 = arith.constant 0 : i32
    return %arg0, %c0_i32, %c0_i32_0 : i32, i32, i32
  }
}

</mosaic_0001>

<bundles_post_ra>
// kernel: residual_block_forward.3
= control target key start
LH: loop header
LB: loop body
LE: loop exit
PB: predicated region body
PF: predicated region fallthrough
CT: control target
= control target key end

     0   :  { %s1708_s21 = smov 0   ;;  %s2005_s0 = inlined_call_operand.vmem [shape: bf16[512,128], index: 0, kind: input, shape index: {}]   ;;  %s2006_s1 = inlined_call_operand.vmem [shape: bf16[128,16], index: 1, kind: input, shape index: {}]   ;;  %s2007_s2 = inlined_call_operand.vmem [shape: f32[1,16], index: 2, kind: input, shape index: {}]   ;;  %s2008_s3 = inlined_call_operand.vmem [shape: bf16[128,64], index: 3, kind: input, shape index: {}]   ;;  %s2009_s4 = inlined_call_operand.vmem [shape: f32[1,64], index: 4, kind: input, shape index: {}]   ;;  %s2010_s5 = inlined_call_operand.vmem [shape: bf16[512,16], index: 5, kind: output, shape index: {0}]   ;;  %s2011_s6 = inlined_call_operand.vmem [shape: bf16[512,64], index: 6, kind: output, shape index: {1}]  }
   0x1 LB: > { %s1306_s22 = sadd.s32 4294967295, %s1671_s21   ;;  %p1310_p0 = scmp.ge.s32.totalorder %s1671_s21, 1  ;;  %s1671_s21 = sphi %s1708_s21, %s17_s21  }
   0x2   : > { %p216_p1 = scmp.lt.s32.totalorder %s1671_s21, 3 }
   0x4   : > { %p217_p2 = pnand %p1310_p0, %p216_p1 }
   0x5   : > { %s1311_s25 = sshll.u32 (!%p217_p2), %s1306_s22, 5 }
   0x6   : > { %220 = sbr.rel (%p217_p2) target bundleno = 306 (0x132), region = 40  ;;  %p252_p3 = scmp.lt.s32.totalorder (!%p217_p2), %s1311_s25, 63 }
   0xb   : > { %v1633_v0 = vld [vmem:[%s2006_s1 + $0x38] sm:$0xff]   ;;  %v1635_v2 = vld [vmem:[%s2006_s1 + $0x30] sm:$0xff]   ;;  %v1637_v4 = vld [vmem:[%s2006_s1 + $0x28] sm:$0xff]   ;;  %s2013_s25 = smov (!%p252_p3, %s1311_s25), 63  ;;  %vm1183_vm0 = vcmask 519168   ;;  %vm790_vm1 = vcmask 125952  }
   0xc   : > { %v1634_v1 = vld [vmem:[%s2008_s3 + $0x38] sm:$0xff]   ;;  %1529 = vmatprep.subr.bf16.mxu0 %v1633_v0  ;;  %v1636_v3 = vld [vmem:[%s2008_s3 + $0x30] sm:$0xff]   ;;  %v1638_v5 = vld [vmem:[%s2008_s3 + $0x28] sm:$0xff]   ;;  %s1740_s16 = sshll.u32 %s2013_s25, 2 }
   0xd   : > { %1577 = vmatprep.subr.bf16.mxu1 %v1634_v1  ;;  %1530 = vmatpush3.bf16.msra.mxu0 %v1633_v0  ;;  %v1639_v6 = vld [vmem:[%s2006_s1 + $0x20] sm:$0xff]   ;;  %v1641_v8 = vld [vmem:[%s2006_s1 + $0x18] sm:$0xff]   ;;  %s1752_s24 = scalar_lea.vmem %s2005_s0, %s1740_s16  ;;  %v1643_v10 = vld [vmem:[%s2006_s1 + $0x10] sm:$0xff]   ;;  %s1804_s20 = scalar_lea.vmem %s2011_s6, %s1740_s16 }
   0xe   : > { %1578 = vmatpush3.bf16.msra.mxu1 %v1634_v1  ;;  %1531 = vmatprep.subr.bf16.mxu0 %v1635_v2  ;;  %v1640_v7 = vld [vmem:[%s2008_s3 + $0x20] sm:$0xff]   ;;  %v1642_v9 = vld [vmem:[%s2008_s3 + $0x18] sm:$0xff]   ;;  %v1644_v12 = vld [vmem:[%s2008_s3 + $0x10] sm:$0xff]  }
   0xf   : > { %1579 = vmatprep.subr.bf16.mxu1 %v1636_v3  ;;  %v1649_v11 = vld [vmem:[%s1752_s24] sm:$0xff]   ;;  %v1645_v13 = vld [vmem:[%s2006_s1 + $0x8] sm:$0xff]   ;;  %v1651_v18 = vld [vmem:[%s1752_s24 + $0x10] sm:$0xff]  }
  0x10   : > { %1545 = vmatprep.mubr.bf16.mxu0 %v1649_v11  ;;  %1593 = vmatprep.mubr.bf16.mxu1 %v1649_v11  ;;  %v1646_v14 = vld [vmem:[%s2008_s3 + $0x8] sm:$0xff]   ;;  %v1647_v15 = vld [vmem:[%s2006_s1] sm:$0xff]   ;;  %v1652_v19 = vld [vmem:[%s1752_s24 + $0x18] sm:$0xff]  }
  0x11   : > { %1532 = vmatpush3.bf16.msra.mxu0 %v1635_v2  ;;  %v1648_v16 = vld [vmem:[%s2008_s3] sm:$0xff]   ;;  %v1650_v17 = vld [vmem:[%s1752_s24 + $0x8] sm:$0xff]   ;;  %v1655_v22 = vld [vmem:[%s1752_s24 + $0x30] sm:$0xff]  }
  0x12   : > { %1580 = vmatpush3.bf16.msra.mxu1 %v1636_v3  ;;  %1533 = vmatprep.subr.bf16.mxu0 %v1637_v4  ;;  %v1653_v20 = vld [vmem:[%s1752_s24 + $0x20] sm:$0xff]   ;;  %v1654_v21 = vld [vmem:[%s1752_s24 + $0x28] sm:$0xff]   ;;  %v1656_v23 = vld [vmem:[%s1752_s24 + $0x38] sm:$0xff]  }
  0x13   : > { %1581 = vmatprep.subr.bf16.mxu1 %v1638_v5  ;;  %v1657_v24 = vld [vmem:[%s1752_s24 + $0x40] sm:$0xff]   ;;  %v1658_v25 = vld [vmem:[%s1752_s24 + $0x48] sm:$0xff]   ;;  %v1659_v26 = vld [vmem:[%s1752_s24 + $0x50] sm:$0xff]  }
  0x14   : > { %v1660_v27 = vld [vmem:[%s1752_s24 + $0x58] sm:$0xff]   ;;  %v1661_v28 = vld [vmem:[%s1752_s24 + $0x60] sm:$0xff]   ;;  %v1662_v29 = vld [vmem:[%s1752_s24 + $0x68] sm:$0xff]  }
  0x15   : > { %1534 = vmatpush3.bf16.msra.mxu0 %v1637_v4  ;;  %v1663_v30 = vld [vmem:[%s1752_s24 + $0x70] sm:$0xff]   ;;  %v1664_v31 = vld [vmem:[%s1752_s24 + $0x78] sm:$0xff]   ;;  %v1791_v32 = vld [vmem:[%s2007_s2] ss:$0 sm:$0xff]  ;;  %s1811_s24 = scalar_lea.vmem %s2010_s5, %s1740_s16 }
  0x16   : > { %1582 = vmatpush3.bf16.msra.mxu1 %v1638_v5  ;;  %1535 = vmatprep.subr.bf16.mxu0 %v1639_v6  ;;  %v1796_v33 = vld [vmem:[%s2009_s4] ss:$0 sm:$0xff] }
  0x17   : > { %1583 = vmatprep.subr.bf16.mxu1 %v1640_v7 }
  0x19   : > { %1536 = vmatpush3.bf16.msra.mxu0 %v1639_v6 }
  0x1a   : > { %1584 = vmatpush3.bf16.msra.mxu1 %v1640_v7  ;;  %1537 = vmatprep.subr.bf16.mxu0 %v1641_v8 }
  0x1b   : > { %1585 = vmatprep.subr.bf16.mxu1 %v1642_v9 }
  0x1d   : > { %1538 = vmatpush3.bf16.msra.mxu0 %v1641_v8 }
  0x1e   : > { %1586 = vmatpush3.bf16.msra.mxu1 %v1642_v9  ;;  %1539 = vmatprep.subr.bf16.mxu0 %v1643_v10 }
  0x1f   : > { %1587 = vmatprep.subr.bf16.mxu1 %v1644_v12 }
  0x21   : > { %1540 = vmatpush3.bf16.msra.mxu0 %v1643_v10 }
  0x22   : > { %1588 = vmatpush3.bf16.msra.mxu1 %v1644_v12  ;;  %1541 = vmatprep.subr.bf16.mxu0 %v1645_v13 }
  0x23   : > { %1589 = vmatprep.subr.bf16.mxu1 %v1646_v14 }
  0x25   : > { %1542 = vmatpush3.bf16.msra.mxu0 %v1645_v13 }
  0x26   : > { %1590 = vmatpush3.bf16.msra.mxu1 %v1646_v14  ;;  %1543 = vmatprep.subr.bf16.mxu0 %v1647_v15 }
  0x27   : > { %1591 = vmatprep.subr.bf16.mxu1 %v1648_v16 }
  0x29   : > { %1544 = vmatpush3.bf16.msra.mxu0 %v1647_v15 }
  0x2a   : > { %1592 = vmatpush3.bf16.msra.mxu1 %v1648_v16 }
  0x2c   : > { %1546 = vmatmul.mubr.bf16.vlgmr.msra.gmra.mxu0 %v1650_v17 }
  0x2d   : > { %1594 = vmatmul.mubr.bf16.vlgmr.msra.gmra.mxu1 %v1650_v17  ;;  %1549 = vmatprep.mubr.bf16.mxu0 %v1651_v18 }
  0x2e   : > { %1597 = vmatprep.mubr.bf16.mxu1 %v1651_v18 }
  0x34   : > { %1550 = vmatmul.mubr.bf16.gmra.mxu0 %v1652_v19 }
  0x35   : > { %1598 = vmatmul.mubr.bf16.gmra.mxu1 %v1652_v19  ;;  %1553 = vmatprep.mubr.bf16.mxu0 %v1653_v20 }
  0x36   : > { %1601 = vmatprep.mubr.bf16.mxu1 %v1653_v20 }
  0x3c   : > { %1554 = vmatmul.mubr.bf16.gmra.mxu0 %v1654_v21 }
  0x3d   : > { %1602 = vmatmul.mubr.bf16.gmra.mxu1 %v1654_v21  ;;  %1557 = vmatprep.mubr.bf16.mxu0 %v1655_v22 }
  0x3e   : > { %1605 = vmatprep.mubr.bf16.mxu1 %v1655_v22 }
  0x44   : > { %1558 = vmatmul.mubr.bf16.gmra.mxu0 %v1656_v23 }
  0x45   : > { %1606 = vmatmul.mubr.bf16.gmra.mxu1 %v1656_v23  ;;  %1561 = vmatprep.mubr.bf16.mxu0 %v1657_v24 }
  0x46   : > { %1609 = vmatprep.mubr.bf16.mxu1 %v1657_v24 }
  0x4c   : > { %1562 = vmatmul.mubr.bf16.gmra.mxu0 %v1658_v25 }
  0x4d   : > { %1610 = vmatmul.mubr.bf16.gmra.mxu1 %v1658_v25  ;;  %1565 = vmatprep.mubr.bf16.mxu0 %v1659_v26 }
  0x4e   : > { %1613 = vmatprep.mubr.bf16.mxu1 %v1659_v26 }
  0x54   : > { %1566 = vmatmul.mubr.bf16.gmra.mxu0 %v1660_v27 }
  0x55   : > { %1614 = vmatmul.mubr.bf16.gmra.mxu1 %v1660_v27  ;;  %1569 = vmatprep.mubr.bf16.mxu0 %v1661_v28 }
  0x56   : > { %1617 = vmatprep.mubr.bf16.mxu1 %v1661_v28 }
  0x5c   : > { %1570 = vmatmul.mubr.bf16.gmra.mxu0 %v1662_v29 }
  0x5d   : > { %1618 = vmatmul.mubr.bf16.gmra.mxu1 %v1662_v29  ;;  %1573 = vmatprep.mubr.bf16.mxu0 %v1663_v30 }
  0x5e   : > { %1621 = vmatprep.mubr.bf16.mxu1 %v1663_v30 }
  0x64   : > { %1574 = vmatmul.mubr.bf16.gmra.mxu0 %v1664_v31 }
  0x65   : > { %1622 = vmatmul.mubr.bf16.gmra.mxu1 %v1664_v31 }
  0xec   : > { %v1547_v34 = vpop.f32.mrf.mxu0 }
  0xed   : > { %v512_v35 = vadd.f32 %v1547_v34, %v1791_v32  ;;  %v1595_v36 = vpop.f32.mrf.mxu1 }
  0xee   : > { %v937_v37 = vadd.f32 %v1595_v36, %v1796_v33  ;;  %v503_v38 = vpop.f32.mrf.mxu0 }
  0xef   : > { %v632_v39 = vmax.f32 %v512_v35, 0.0  ;;  %v504_v40 = vadd.f32 %v1791_v32, %v503_v38  ;;  %v928_v41 = vpop.f32.mrf.mxu1 }
  0xf0   : > { %v1451_v42 = vpack.c.bf16 %v937_v37, %v937_v37  ;;  %v929_v43 = vadd.f32 %v1796_v33, %v928_v41  ;;  %v1548_v44 = vpop.f32.mrf.mxu0 }
  0xf1   : > { %v1419_v45 = vpack.c.bf16 %v632_v39, %v632_v39  ;;  %v630_v46 = vmax.f32 %v504_v40, 0.0  ;;  %v515_v47 = vadd.f32 %v1548_v44, %v1791_v32  ;;  %v1596_v48 = vpop.f32.mrf.mxu1 }
  0xf2   : > { %1186 = vst.msk [vmem:[%s1804_s20 + $0x8] sm:$0xf] %vm1183_vm0, %v1451_v42  ;;  %v1449_v49 = vpack.c.bf16 %v929_v43, %v929_v43  ;;  %v940_v50 = vadd.f32 %v1596_v48, %v1796_v33  ;;  %v506_v51 = vpop.f32.mrf.mxu0 }
  0xf3   : > { %793 = vst.msk [vmem:[%s1811_s24 + $0x8] sm:$0xf] %vm790_vm1, %v1419_v45  ;;  %v1417_v52 = vpack.c.bf16 %v630_v46, %v630_v46  ;;  %v633_v53 = vmax.f32 %v515_v47, 0.0  ;;  %v507_v54 = vadd.f32 %v1791_v32, %v506_v51  ;;  %v931_v55 = vpop.f32.mrf.mxu1 }
  0xf4   : > { %1184 = vst.msk [vmem:[%s1804_s20] sm:$0xf] %vm1183_vm0, %v1449_v49  ;;  %v1452_v56 = vpack.c.bf16 %v940_v50, %v940_v50  ;;  %v932_v57 = vadd.f32 %v1796_v33, %v931_v55  ;;  %v1551_v58 = vpop.f32.mrf.mxu0 }
  0xf5   : > { %791 = vst.msk [vmem:[%s1811_s24] sm:$0xf] %vm790_vm1, %v1417_v52  ;;  %v1420_v59 = vpack.c.bf16 %v633_v53, %v633_v53  ;;  %v631_v60 = vmax.f32 %v507_v54, 0.0  ;;  %v528_v61 = vadd.f32 %v1551_v58, %v1791_v32  ;;  %v1599_v62 = vpop.f32.mrf.mxu1 }
  0xf6   : > { %1187 = vst.msk [vmem:[%s1804_s20 + $0xc] sm:$0xf] %vm1183_vm0, %v1452_v56  ;;  %v1450_v63 = vpack.c.bf16 %v932_v57, %v932_v57  ;;  %v953_v0 = vadd.f32 %v1599_v62, %v1796_v33  ;;  %v519_v1 = vpop.f32.mrf.mxu0 }
  0xf7   : > { %794 = vst.msk [vmem:[%s1811_s24 + $0xc] sm:$0xf] %vm790_vm1, %v1420_v59  ;;  %v1418_v2 = vpack.c.bf16 %v631_v60, %v631_v60  ;;  %v636_v3 = vmax.f32 %v528_v61, 0.0  ;;  %v520_v4 = vadd.f32 %v1791_v32, %v519_v1  ;;  %v944_v5 = vpop.f32.mrf.mxu1 }
  0xf8   : > { %1185 = vst.msk [vmem:[%s1804_s20 + $0x4] sm:$0xf] %vm1183_vm0, %v1450_v63  ;;  %v1455_v6 = vpack.c.bf16 %v953_v0, %v953_v0  ;;  %v945_v7 = vadd.f32 %v1796_v33, %v944_v5  ;;  %v1552_v8 = vpop.f32.mrf.mxu0 }
  0xf9   : > { %792 = vst.msk [vmem:[%s1811_s24 + $0x4] sm:$0xf] %vm790_vm1, %v1418_v2  ;;  %v1423_v9 = vpack.c.bf16 %v636_v3, %v636_v3  ;;  %v634_v10 = vmax.f32 %v520_v4, 0.0  ;;  %v531_v11 = vadd.f32 %v1552_v8, %v1791_v32  ;;  %v1600_v12 = vpop.f32.mrf.mxu1 }
  0xfa   : > { %1190 = vst.msk [vmem:[%s1804_s20 + $0x18] sm:$0xf] %vm1183_vm0, %v1455_v6  ;;  %v1453_v13 = vpack.c.bf16 %v945_v7, %v945_v7  ;;  %v956_v14 = vadd.f32 %v1600_v12, %v1796_v33  ;;  %v522_v15 = vpop.f32.mrf.mxu0 }
  0xfb   : > { %797 = vst.msk [vmem:[%s1811_s24 + $0x18] sm:$0xf] %vm790_vm1, %v1423_v9  ;;  %v1421_v16 = vpack.c.bf16 %v634_v10, %v634_v10  ;;  %v637_v17 = vmax.f32 %v531_v11, 0.0  ;;  %v523_v18 = vadd.f32 %v1791_v32, %v522_v15  ;;  %v947_v19 = vpop.f32.mrf.mxu1 }
  0xfc   : > { %1188 = vst.msk [vmem:[%s1804_s20 + $0x10] sm:$0xf] %vm1183_vm0, %v1453_v13  ;;  %v1456_v20 = vpack.c.bf16 %v956_v14, %v956_v14  ;;  %v948_v21 = vadd.f32 %v1796_v33, %v947_v19  ;;  %v1555_v22 = vpop.f32.mrf.mxu0 }
  0xfd   : > { %795 = vst.msk [vmem:[%s1811_s24 + $0x10] sm:$0xf] %vm790_vm1, %v1421_v16  ;;  %v1424_v23 = vpack.c.bf16 %v637_v17, %v637_v17  ;;  %v635_v24 = vmax.f32 %v523_v18, 0.0  ;;  %v544_v25 = vadd.f32 %v1555_v22, %v1791_v32  ;;  %v1603_v26 = vpop.f32.mrf.mxu1 }
  0xfe   : > { %1191 = vst.msk [vmem:[%s1804_s20 + $0x1c] sm:$0xf] %vm1183_vm0, %v1456_v20  ;;  %v1454_v27 = vpack.c.bf16 %v948_v21, %v948_v21  ;;  %v969_v28 = vadd.f32 %v1603_v26, %v1796_v33  ;;  %v535_v29 = vpop.f32.mrf.mxu0 }
  0xff   : > { %798 = vst.msk [vmem:[%s1811_s24 + $0x1c] sm:$0xf] %vm790_vm1, %v1424_v23  ;;  %v1422_v30 = vpack.c.bf16 %v635_v24, %v635_v24  ;;  %v640_v31 = vmax.f32 %v544_v25, 0.0  ;;  %v536_v34 = vadd.f32 %v1791_v32, %v535_v29  ;;  %v960_v35 = vpop.f32.mrf.mxu1 }
 0x100   : > { %1189 = vst.msk [vmem:[%s1804_s20 + $0x14] sm:$0xf] %vm1183_vm0, %v1454_v27  ;;  %v1459_v36 = vpack.c.bf16 %v969_v28, %v969_v28  ;;  %v961_v37 = vadd.f32 %v1796_v33, %v960_v35  ;;  %v1556_v38 = vpop.f32.mrf.mxu0 }
 0x101   : > { %796 = vst.msk [vmem:[%s1811_s24 + $0x14] sm:$0xf] %vm790_vm1, %v1422_v30  ;;  %v1427_v39 = vpack.c.bf16 %v640_v31, %v640_v31  ;;  %v638_v40 = vmax.f32 %v536_v34, 0.0  ;;  %v547_v41 = vadd.f32 %v1556_v38, %v1791_v32  ;;  %v1604_v42 = vpop.f32.mrf.mxu1 }
 0x102   : > { %1194 = vst.msk [vmem:[%s1804_s20 + $0x28] sm:$0xf] %vm1183_vm0, %v1459_v36  ;;  %v1457_v43 = vpack.c.bf16 %v961_v37, %v961_v37  ;;  %v972_v44 = vadd.f32 %v1604_v42, %v1796_v33  ;;  %v538_v45 = vpop.f32.mrf.mxu0 }
 0x103   : > { %801 = vst.msk [vmem:[%s1811_s24 + $0x28] sm:$0xf] %vm790_vm1, %v1427_v39  ;;  %v1425_v46 = vpack.c.bf16 %v638_v40, %v638_v40  ;;  %v641_v47 = vmax.f32 %v547_v41, 0.0  ;;  %v539_v48 = vadd.f32 %v1791_v32, %v538_v45  ;;  %v963_v49 = vpop.f32.mrf.mxu1 }
 0x104   : > { %1192 = vst.msk [vmem:[%s1804_s20 + $0x20] sm:$0xf] %vm1183_vm0, %v1457_v43  ;;  %v1460_v50 = vpack.c.bf16 %v972_v44, %v972_v44  ;;  %v964_v51 = vadd.f32 %v1796_v33, %v963_v49  ;;  %v1559_v52 = vpop.f32.mrf.mxu0 }
 0x105   : > { %799 = vst.msk [vmem:[%s1811_s24 + $0x20] sm:$0xf] %vm790_vm1, %v1425_v46  ;;  %v1428_v53 = vpack.c.bf16 %v641_v47, %v641_v47  ;;  %v639_v54 = vmax.f32 %v539_v48, 0.0  ;;  %v560_v55 = vadd.f32 %v1559_v52, %v1791_v32  ;;  %v1607_v56 = vpop.f32.mrf.mxu1 }
 0x106   : > { %1195 = vst.msk [vmem:[%s1804_s20 + $0x2c] sm:$0xf] %vm1183_vm0, %v1460_v50  ;;  %v1458_v57 = vpack.c.bf16 %v964_v51, %v964_v51  ;;  %v985_v58 = vadd.f32 %v1607_v56, %v1796_v33  ;;  %v551_v59 = vpop.f32.mrf.mxu0 }
 0x107   : > { %802 = vst.msk [vmem:[%s1811_s24 + $0x2c] sm:$0xf] %vm790_vm1, %v1428_v53  ;;  %v1426_v60 = vpack.c.bf16 %v639_v54, %v639_v54  ;;  %v644_v61 = vmax.f32 %v560_v55, 0.0  ;;  %v552_v62 = vadd.f32 %v1791_v32, %v551_v59  ;;  %v976_v63 = vpop.f32.mrf.mxu1 }
 0x108   : > { %1193 = vst.msk [vmem:[%s1804_s20 + $0x24] sm:$0xf] %vm1183_vm0, %v1458_v57  ;;  %v1463_v0 = vpack.c.bf16 %v985_v58, %v985_v58  ;;  %v977_v1 = vadd.f32 %v1796_v33, %v976_v63  ;;  %v1560_v2 = vpop.f32.mrf.mxu0 }
 0x109   : > { %800 = vst.msk [vmem:[%s1811_s24 + $0x24] sm:$0xf] %vm790_vm1, %v1426_v60  ;;  %v1431_v3 = vpack.c.bf16 %v644_v61, %v644_v61  ;;  %v642_v4 = vmax.f32 %v552_v62, 0.0  ;;  %v563_v5 = vadd.f32 %v1560_v2, %v1791_v32  ;;  %v1608_v6 = vpop.f32.mrf.mxu1 }
 0x10a   : > { %1198 = vst.msk [vmem:[%s1804_s20 + $0x38] sm:$0xf] %vm1183_vm0, %v1463_v0  ;;  %v1461_v7 = vpack.c.bf16 %v977_v1, %v977_v1  ;;  %v988_v8 = vadd.f32 %v1608_v6, %v1796_v33  ;;  %v554_v9 = vpop.f32.mrf.mxu0 }
 0x10b   : > { %805 = vst.msk [vmem:[%s1811_s24 + $0x38] sm:$0xf] %vm790_vm1, %v1431_v3  ;;  %v1429_v10 = vpack.c.bf16 %v642_v4, %v642_v4  ;;  %v645_v11 = vmax.f32 %v563_v5, 0.0  ;;  %v555_v12 = vadd.f32 %v1791_v32, %v554_v9  ;;  %v979_v13 = vpop.f32.mrf.mxu1 }
 0x10c   : > { %1196 = vst.msk [vmem:[%s1804_s20 + $0x30] sm:$0xf] %vm1183_vm0, %v1461_v7  ;;  %v1464_v14 = vpack.c.bf16 %v988_v8, %v988_v8  ;;  %v980_v15 = vadd.f32 %v1796_v33, %v979_v13  ;;  %v1563_v16 = vpop.f32.mrf.mxu0 }
 0x10d   : > { %803 = vst.msk [vmem:[%s1811_s24 + $0x30] sm:$0xf] %vm790_vm1, %v1429_v10  ;;  %v1432_v17 = vpack.c.bf16 %v645_v11, %v645_v11  ;;  %v643_v18 = vmax.f32 %v555_v12, 0.0  ;;  %v576_v19 = vadd.f32 %v1563_v16, %v1791_v32  ;;  %v1611_v20 = vpop.f32.mrf.mxu1 }
 0x10e   : > { %1199 = vst.msk [vmem:[%s1804_s20 + $0x3c] sm:$0xf] %vm1183_vm0, %v1464_v14  ;;  %v1462_v21 = vpack.c.bf16 %v980_v15, %v980_v15  ;;  %v1001_v22 = vadd.f32 %v1611_v20, %v1796_v33  ;;  %v567_v23 = vpop.f32.mrf.mxu0 }
 0x10f   : > { %806 = vst.msk [vmem:[%s1811_s24 + $0x3c] sm:$0xf] %vm790_vm1, %v1432_v17  ;;  %v1430_v24 = vpack.c.bf16 %v643_v18, %v643_v18  ;;  %v648_v25 = vmax.f32 %v576_v19, 0.0  ;;  %v568_v26 = vadd.f32 %v1791_v32, %v567_v23  ;;  %v992_v27 = vpop.f32.mrf.mxu1 }
 0x110   : > { %1197 = vst.msk [vmem:[%s1804_s20 + $0x34] sm:$0xf] %vm1183_vm0, %v1462_v21  ;;  %v1467_v28 = vpack.c.bf16 %v1001_v22, %v1001_v22  ;;  %v993_v29 = vadd.f32 %v1796_v33, %v992_v27  ;;  %v1564_v30 = vpop.f32.mrf.mxu0 }
 0x111   : > { %804 = vst.msk [vmem:[%s1811_s24 + $0x34] sm:$0xf] %vm790_vm1, %v1430_v24  ;;  %v1435_v31 = vpack.c.bf16 %v648_v25, %v648_v25  ;;  %v646_v34 = vmax.f32 %v568_v26, 0.0  ;;  %v579_v35 = vadd.f32 %v1564_v30, %v1791_v32  ;;  %v1612_v36 = vpop.f32.mrf.mxu1 }
 0x112   : > { %1202 = vst.msk [vmem:[%s1804_s20 + $0x48] sm:$0xf] %vm1183_vm0, %v1467_v28  ;;  %v1465_v37 = vpack.c.bf16 %v993_v29, %v993_v29  ;;  %v1004_v38 = vadd.f32 %v1612_v36, %v1796_v33  ;;  %v570_v39 = vpop.f32.mrf.mxu0 }
 0x113   : > { %809 = vst.msk [vmem:[%s1811_s24 + $0x48] sm:$0xf] %vm790_vm1, %v1435_v31  ;;  %v1433_v40 = vpack.c.bf16 %v646_v34, %v646_v34  ;;  %v649_v41 = vmax.f32 %v579_v35, 0.0  ;;  %v571_v42 = vadd.f32 %v1791_v32, %v570_v39  ;;  %v995_v43 = vpop.f32.mrf.mxu1 }
 0x114   : > { %1200 = vst.msk [vmem:[%s1804_s20 + $0x40] sm:$0xf] %vm1183_vm0, %v1465_v37  ;;  %v1468_v44 = vpack.c.bf16 %v1004_v38, %v1004_v38  ;;  %v996_v45 = vadd.f32 %v1796_v33, %v995_v43  ;;  %v1567_v46 = vpop.f32.mrf.mxu0 }
 0x115   : > { %807 = vst.msk [vmem:[%s1811_s24 + $0x40] sm:$0xf] %vm790_vm1, %v1433_v40  ;;  %v1436_v47 = vpack.c.bf16 %v649_v41, %v649_v41  ;;  %v647_v48 = vmax.f32 %v571_v42, 0.0  ;;  %v592_v49 = vadd.f32 %v1567_v46, %v1791_v32  ;;  %v1615_v50 = vpop.f32.mrf.mxu1 }
 0x116   : > { %1203 = vst.msk [vmem:[%s1804_s20 + $0x4c] sm:$0xf] %vm1183_vm0, %v1468_v44  ;;  %v1466_v51 = vpack.c.bf16 %v996_v45, %v996_v45  ;;  %v1017_v52 = vadd.f32 %v1615_v50, %v1796_v33  ;;  %v583_v53 = vpop.f32.mrf.mxu0 }
 0x117   : > { %810 = vst.msk [vmem:[%s1811_s24 + $0x4c] sm:$0xf] %vm790_vm1, %v1436_v47  ;;  %v1434_v54 = vpack.c.bf16 %v647_v48, %v647_v48  ;;  %v652_v55 = vmax.f32 %v592_v49, 0.0  ;;  %v584_v56 = vadd.f32 %v1791_v32, %v583_v53  ;;  %v1008_v57 = vpop.f32.mrf.mxu1 }
 0x118   : > { %1201 = vst.msk [vmem:[%s1804_s20 + $0x44] sm:$0xf] %vm1183_vm0, %v1466_v51  ;;  %v1471_v58 = vpack.c.bf16 %v1017_v52, %v1017_v52  ;;  %v1009_v59 = vadd.f32 %v1796_v33, %v1008_v57  ;;  %v1568_v60 = vpop.f32.mrf.mxu0 }
 0x119   : > { %808 = vst.msk [vmem:[%s1811_s24 + $0x44] sm:$0xf] %vm790_vm1, %v1434_v54  ;;  %v1439_v61 = vpack.c.bf16 %v652_v55, %v652_v55  ;;  %v650_v62 = vmax.f32 %v584_v56, 0.0  ;;  %v595_v63 = vadd.f32 %v1568_v60, %v1791_v32  ;;  %v1616_v0 = vpop.f32.mrf.mxu1 }
 0x11a   : > { %1206 = vst.msk [vmem:[%s1804_s20 + $0x58] sm:$0xf] %vm1183_vm0, %v1471_v58  ;;  %v1469_v1 = vpack.c.bf16 %v1009_v59, %v1009_v59  ;;  %v1020_v2 = vadd.f32 %v1616_v0, %v1796_v33  ;;  %v586_v3 = vpop.f32.mrf.mxu0 }
 0x11b   : > { %813 = vst.msk [vmem:[%s1811_s24 + $0x58] sm:$0xf] %vm790_vm1, %v1439_v61  ;;  %v1437_v4 = vpack.c.bf16 %v650_v62, %v650_v62  ;;  %v653_v5 = vmax.f32 %v595_v63, 0.0  ;;  %v587_v6 = vadd.f32 %v1791_v32, %v586_v3  ;;  %v1011_v7 = vpop.f32.mrf.mxu1 }
 0x11c   : > { %1204 = vst.msk [vmem:[%s1804_s20 + $0x50] sm:$0xf] %vm1183_vm0, %v1469_v1  ;;  %v1472_v8 = vpack.c.bf16 %v1020_v2, %v1020_v2  ;;  %v1012_v9 = vadd.f32 %v1796_v33, %v1011_v7  ;;  %v1571_v10 = vpop.f32.mrf.mxu0 }
 0x11d   : > { %811 = vst.msk [vmem:[%s1811_s24 + $0x50] sm:$0xf] %vm790_vm1, %v1437_v4  ;;  %v1440_v11 = vpack.c.bf16 %v653_v5, %v653_v5  ;;  %v651_v12 = vmax.f32 %v587_v6, 0.0  ;;  %v608_v13 = vadd.f32 %v1571_v10, %v1791_v32  ;;  %v1619_v14 = vpop.f32.mrf.mxu1 }
 0x11e   : > { %1207 = vst.msk [vmem:[%s1804_s20 + $0x5c] sm:$0xf] %vm1183_vm0, %v1472_v8  ;;  %v1470_v15 = vpack.c.bf16 %v1012_v9, %v1012_v9  ;;  %v1033_v16 = vadd.f32 %v1619_v14, %v1796_v33  ;;  %v599_v17 = vpop.f32.mrf.mxu0 }
 0x11f   : > { %814 = vst.msk [vmem:[%s1811_s24 + $0x5c] sm:$0xf] %vm790_vm1, %v1440_v11  ;;  %v1438_v18 = vpack.c.bf16 %v651_v12, %v651_v12  ;;  %v656_v19 = vmax.f32 %v608_v13, 0.0  ;;  %v600_v20 = vadd.f32 %v1791_v32, %v599_v17  ;;  %v1024_v21 = vpop.f32.mrf.mxu1 }
 0x120   : > { %1205 = vst.msk [vmem:[%s1804_s20 + $0x54] sm:$0xf] %vm1183_vm0, %v1470_v15  ;;  %v1475_v22 = vpack.c.bf16 %v1033_v16, %v1033_v16  ;;  %v1025_v23 = vadd.f32 %v1796_v33, %v1024_v21  ;;  %v1572_v24 = vpop.f32.mrf.mxu0 }
 0x121   : > { %812 = vst.msk [vmem:[%s1811_s24 + $0x54] sm:$0xf] %vm790_vm1, %v1438_v18  ;;  %v1443_v25 = vpack.c.bf16 %v656_v19, %v656_v19  ;;  %v654_v26 = vmax.f32 %v600_v20, 0.0  ;;  %v611_v27 = vadd.f32 %v1572_v24, %v1791_v32  ;;  %v1620_v28 = vpop.f32.mrf.mxu1 }
 0x122   : > { %1210 = vst.msk [vmem:[%s1804_s20 + $0x68] sm:$0xf] %vm1183_vm0, %v1475_v22  ;;  %v1473_v29 = vpack.c.bf16 %v1025_v23, %v1025_v23  ;;  %v1036_v30 = vadd.f32 %v1620_v28, %v1796_v33  ;;  %v602_v31 = vpop.f32.mrf.mxu0 }
 0x123   : > { %817 = vst.msk [vmem:[%s1811_s24 + $0x68] sm:$0xf] %vm790_vm1, %v1443_v25  ;;  %v1441_v34 = vpack.c.bf16 %v654_v26, %v654_v26  ;;  %v657_v35 = vmax.f32 %v611_v27, 0.0  ;;  %v603_v36 = vadd.f32 %v1791_v32, %v602_v31  ;;  %v1027_v37 = vpop.f32.mrf.mxu1 }
 0x124   : > { %1208 = vst.msk [vmem:[%s1804_s20 + $0x60] sm:$0xf] %vm1183_vm0, %v1473_v29  ;;  %v1476_v38 = vpack.c.bf16 %v1036_v30, %v1036_v30  ;;  %v1028_v39 = vadd.f32 %v1796_v33, %v1027_v37  ;;  %v1575_v40 = vpop.f32.mrf.mxu0 }
 0x125   : > { %815 = vst.msk [vmem:[%s1811_s24 + $0x60] sm:$0xf] %vm790_vm1, %v1441_v34  ;;  %v1444_v41 = vpack.c.bf16 %v657_v35, %v657_v35  ;;  %v655_v42 = vmax.f32 %v603_v36, 0.0  ;;  %v624_v43 = vadd.f32 %v1575_v40, %v1791_v32  ;;  %v1623_v44 = vpop.f32.mrf.mxu1 }
 0x126   : > { %1211 = vst.msk [vmem:[%s1804_s20 + $0x6c] sm:$0xf] %vm1183_vm0, %v1476_v38  ;;  %v1474_v45 = vpack.c.bf16 %v1028_v39, %v1028_v39  ;;  %v1049_v46 = vadd.f32 %v1623_v44, %v1796_v33  ;;  %v615_v47 = vpop.f32.mrf.mxu0 }
 0x127   : > { %818 = vst.msk [vmem:[%s1811_s24 + $0x6c] sm:$0xf] %vm790_vm1, %v1444_v41  ;;  %v1442_v48 = vpack.c.bf16 %v655_v42, %v655_v42  ;;  %v660_v49 = vmax.f32 %v624_v43, 0.0  ;;  %v616_v50 = vadd.f32 %v1791_v32, %v615_v47  ;;  %v1040_v51 = vpop.f32.mrf.mxu1 }
 0x128   : > { %1209 = vst.msk [vmem:[%s1804_s20 + $0x64] sm:$0xf] %vm1183_vm0, %v1474_v45  ;;  %v1479_v52 = vpack.c.bf16 %v1049_v46, %v1049_v46  ;;  %v1041_v53 = vadd.f32 %v1796_v33, %v1040_v51  ;;  %v1576_v54 = vpop.f32.mrf.mxu0 }
 0x129   : > { %816 = vst.msk [vmem:[%s1811_s24 + $0x64] sm:$0xf] %vm790_vm1, %v1442_v48  ;;  %v1447_v55 = vpack.c.bf16 %v660_v49, %v660_v49  ;;  %v658_v56 = vmax.f32 %v616_v50, 0.0  ;;  %v627_v57 = vadd.f32 %v1576_v54, %v1791_v32  ;;  %v1624_v58 = vpop.f32.mrf.mxu1 }
 0x12a   : > { %1214 = vst.msk [vmem:[%s1804_s20 + $0x78] sm:$0xf] %vm1183_vm0, %v1479_v52  ;;  %v1477_v59 = vpack.c.bf16 %v1041_v53, %v1041_v53  ;;  %v1052_v60 = vadd.f32 %v1624_v58, %v1796_v33  ;;  %v618_v61 = vpop.f32.mrf.mxu0 }
 0x12b   : > { %821 = vst.msk [vmem:[%s1811_s24 + $0x78] sm:$0xf] %vm790_vm1, %v1447_v55  ;;  %v1445_v62 = vpack.c.bf16 %v658_v56, %v658_v56  ;;  %v661_v63 = vmax.f32 %v627_v57, 0.0  ;;  %v619_v0 = vadd.f32 %v1791_v32, %v618_v61  ;;  %v1043_v1 = vpop.f32.mrf.mxu1 }
 0x12c   : > { %1212 = vst.msk [vmem:[%s1804_s20 + $0x70] sm:$0xf] %vm1183_vm0, %v1477_v59  ;;  %v1480_v2 = vpack.c.bf16 %v1052_v60, %v1052_v60  ;;  %v1044_v3 = vadd.f32 %v1796_v33, %v1043_v1 }
 0x12d   : > { %819 = vst.msk [vmem:[%s1811_s24 + $0x70] sm:$0xf] %vm790_vm1, %v1445_v62  ;;  %v1448_v4 = vpack.c.bf16 %v661_v63, %v661_v63  ;;  %v659_v5 = vmax.f32 %v619_v0, 0.0 }
 0x12e   : > { %1215 = vst.msk [vmem:[%s1804_s20 + $0x7c] sm:$0xf] %vm1183_vm0, %v1480_v2  ;;  %v1478_v6 = vpack.c.bf16 %v1044_v3, %v1044_v3 }
 0x12f   : > { %822 = vst.msk [vmem:[%s1811_s24 + $0x7c] sm:$0xf] %vm790_vm1, %v1448_v4  ;;  %v1446_v7 = vpack.c.bf16 %v659_v5, %v659_v5 }
 0x130   : > { %1213 = vst.msk [vmem:[%s1804_s20 + $0x74] sm:$0xf] %vm1183_vm0, %v1478_v6 }
 0x131   : > { %820 = vst.msk [vmem:[%s1811_s24 + $0x74] sm:$0xf] %vm790_vm1, %v1446_v7 }
 0x132 PF: > { %s17_s21 = sadd.s32 1, %s1671_s21  }
 0x133   : > { %p14_p4 = scmp.ge.s32.totalorder %s17_s21, 4  }
 0x135   :  { %16 = sbr.rel (!%p14_p4) target bundleno = 1 (0x1), region = 82 }

// kernel: residual_block_forward.5
= control target key start
LH: loop header
LB: loop body
LE: loop exit
PB: predicated region body
PF: predicated region fallthrough
CT: control target
= control target key end

     0   :  { %13 = vsyncpa [#allocation3], 0  ;;  %s6476_s0 = inlined_call_operand.vmem [shape: bf16[2,496,16], index: 0, kind: input, shape index: {}]   ;;  %s6477_s1 = inlined_call_operand.vmem [shape: bf16[2,256,64], index: 1, kind: input, shape index: {}]   ;;  %s6478_s2 = inlined_call_operand.vmem [shape: bf16[144,64], index: 2, kind: input, shape index: {}]   ;;  %s6479_s3 = inlined_call_operand.vmem [shape: f32[1,64], index: 3, kind: input, shape index: {}]   ;;  %s6480_s4 = inlined_call_operand.vmem [shape: f32[64,4], index: 4, kind: input, shape index: {}]   ;;  %s6481_s5 = inlined_call_operand.vmem [shape: f32[1,4], index: 5, kind: input, shape index: {}]   ;;  %s6482_s6 = inlined_call_operand.vmem [shape: f32[4,64], index: 6, kind: input, shape index: {}]   ;;  %s6483_s7 = inlined_call_operand.vmem [shape: f32[1,64], index: 7, kind: input, shape index: {}]   ;;  %s6484_s8 = inlined_call_operand.hbm [shape: f32[2,256,64], index: 8, kind: output, shape index: {}]  }
   0x1   :  { %15 = vsyncpa [#allocation3 + $0x1], 0  ;;  %s3938_s27 = smov 0   ;;  %s3940_s28 = smov 0  }
   0x2   :  { %s3942_s29 = smov 0   ;;  %s3944_s30 = smov 0  }
   0x3 LB: > { %s3959_s9 = sadd.s32 4294967295, %s3878_s30   ;;  %s3428_s10 = sadd.s32 4294967294, %s3878_s30   ;;  %s3878_s30 = sphi %s3944_s30, %s6586_s30   ;;  %s3874_s29 = sphi %s3942_s29, %s6585_s29   ;;  %s3870_s28 = sphi %s3940_s28, %s6584_s28   ;;  %s3866_s27 = sphi %s3938_s27, %s6583_s27  }
   0x4   : > { %s3963_s11 = sadd.s32 1, %s3878_s30   ;;  %s206_s12 = sadd.s32 1, %s3874_s29 }
   0x5   : > { %s203_s13 = ssub.s32 %s3878_s30, %s3963_s11  ;;  %p216_p0 = scmp.ne.s32.totalorder %s3874_s29, %s3870_s28 }
   0x6   : > { %p204_p1 = scmp.eq.s32.totalorder %s203_s13, 0  ;;  %p217_p2 = scmp.eq.s32.totalorder %s3959_s9, 1 }
   0x7   : > { %p222_p3 = scmp.ne.s32.totalorder %s3870_s28, %s3866_s27  ;;  %p223_p4 = scmp.eq.s32.totalorder %s3428_s10, 1 }
   0x8   : > { %s3974_s14 = scalar_select %p204_p1, %s3874_s29, %s206_s12  }
   0x9   : > { %p3976_p5 = por %p217_p2, %p216_p0  ;;  %p3980_p6 = por %p223_p4, %p222_p3 }
   0xa   : > { %p3431_p7 = scmp.ge.s32.totalorder %s3878_s30, 1  ;;  %p275_p8 = scmp.lt.s32.totalorder %s3878_s30, 3 }
   0xc   : > { %p276_p9 = pnand %p3431_p7, %p275_p8 }
   0xe   : > { %279 = sbr.rel (%p276_p9) target bundleno = 1209 (0x4b9), region = 52 }
  0x13   : > { %p314_p10 = scmp.lt.s32.totalorder %s3959_s9, 1  ;;  %v3880_v0 = vmov 0   ;;  %v3760_v1 = vld [vmem:[%s6478_s2 + $0x38] sm:$0xff]   ;;  %v3763_v2 = vld [vmem:[%s6478_s2 + $0x30] sm:$0xff]   ;;  %v3764_v3 = vld [vmem:[%s6478_s2 + $0x28] sm:$0xff]   ;;  %s3881_s12 = smov 48  }
  0x14   : > { %2678 = vmatprep.subr.bf16.mxu0 %v3880_v0  ;;  %3666 = vmatprep.subr.bf16.mxu1 %v3880_v0  ;;  %vm858_vm0 = vcmask 1042432   ;;  %v3766_v29 = vld [vmem:[%s6478_s2 + $0x20] sm:$0xff]   ;;  %s3882_s19 = smov 32   ;;  %v3771_v45 = vld [vmem:[%s6478_s2 + $0x18] sm:$0xff]   ;;  %vm556_vm1 = vsmask.f32 3328 }
  0x15   : > { %s3990_s17 = scalar_select %p314_p10, %s3959_s9, 1  ;;  %2679 = vmatpush1.bf16.msra.mxu0 %v3760_v1  ;;  %3675 = vmatpush1.bf16.msra.mxu1 %v3760_v1  ;;  %v3773_v55 = vld [vmem:[%s6478_s2 + $0x10] sm:$0xff]   ;;  %vm2041_vm2 = vsmask.f32 4352  ;;  %vm1614_vm3 = vcmask 130048   ;;  %vm1674_vm4 = vcmask 261120  }
  0x16   : > { %2680 = vmatprep.subr.bf16.mxu0 %v3880_v0  ;;  %3667 = vmatprep.subr.bf16.mxu1 %v3880_v0  ;;  %s3884_s23 = smov 16   ;;  %s3885_s10 = smov 64   ;;  %vm1731_vm5 = vcmask 392192   ;;  %vm1788_vm6 = vcmask 523264   ;;  %vm1845_vm7 = vcmask 654336   ;;  %vm1902_vm8 = vcmask 785408  }
  0x17   : > { %s3684_s20 = smul.u32 248, %s3990_s17  ;;  %s3886_s24 = smov 96   ;;  %vm1959_vm9 = vcmask 916480   ;;  %vm3889_vm10 = vmmov 0   ;;  %vm3064_vm11 = vcmask 1043456   ;;  %vm3060_vm12 = vcmask 31744  }
  0x18   : > { %s3887_s18 = smov 112   ;;  %s3551_s22 = sshll.u32 %s3959_s9, 12 }
  0x19   : > { %s4004_s25 = scalar_lea.vmem %s6476_s0, %s3684_s20  ;;  %2681 = vmatpush1.bf16.msra.mxu0 %v3763_v2  ;;  %3676 = vmatpush1.bf16.msra.mxu1 %v3763_v2  ;;  %s3883_s20 = smov 80   ;;  %v3774_v2 = vld [vmem:[%s6478_s2 + $0x8] sm:$0xff]  }
  0x1a   : > { %v330_v4 = vld [vmem:[%s4004_s25 + $0x14] sm:$0xf]  ;;  %v331_v5 = vld [vmem:[%s4004_s25 + $0x18] sm:$0xf]  ;;  %v4012_v6 = vld [vmem:[%s4004_s25 + $0x1c] sm:$0xf]  ;;  %2682 = vmatprep.subr.bf16.mxu0 %v3880_v0  ;;  %3668 = vmatprep.subr.bf16.mxu1 %v3880_v0  ;;  %s6402_s13 = scalar_lea.hbm %s6484_s8, %s3551_s22 }
  0x1b   : > { %v4015_v7 = vcombine.low %v331_v5, %v4012_v6  ;;  %v4017_v8 = vcombine.low %v330_v4, %v331_v5  ;;  %v329_v9 = vld [vmem:[%s4004_s25 + $0x10] sm:$0xf]  ;;  %v381_v10 = vld [vmem:[%s4004_s25 + $0xc] sm:$0x8]  ;;  %v4030_v15 = vld [vmem:[%s4004_s25 + $0x4] sm:$0xf] }
  0x1c   : > { %v4022_v11 = vld [vmem:[%s4004_s25 + $0xc] sm:$0xf]  ;;  %v3492_v12 = vcombine.low %v381_v10, %v329_v9  ;;  %v4024_v13 = vcombine.low %v329_v9, %v330_v4  ;;  %v4033_v16 = vld [vmem:[%s4004_s25 + $0x8] sm:$0xf]  ;;  %v4049_v24 = vld [vmem:[%s4004_s25 + $0x20] sm:$0xf] }
  0x1d   : > { %v4027_v14 = vcombine.low %v4022_v11, %v329_v9  ;;  %983 = vrot.lane.b32.xlu1 %v4017_v8, %s3881_s12  ;;  %v3464_v17 = vcombine.low %v4030_v15, %v4033_v16  ;;  %v1048_v18 = vshrl.u32 %v4015_v7, 16  ;;  %v1051_v19 = vshll.u32 %v4015_v7, 16  ;;  %v4052_v28 = vld [vmem:[%s4004_s25 + $0x24] sm:$0xf]  ;;  %2683 = vmatpush1.bf16.msra.mxu0 %v3764_v3  ;;  %v4059_v34 = vld [vmem:[%s4004_s25 + $0x28] sm:$0xf] }
  0x1e   : > { %981 = vrot.lane.b32.xlu0 %v3492_v12, %s3881_s12  ;;  %v1340_v20 = vrot.slane %v4024_v13, 5  ;;  %v1040_v22 = vshrl.u32 %v4024_v13, 16  ;;  %v1043_v23 = vshll.u32 %v4024_v13, 16  ;;  %3677 = vmatpush1.bf16.msra.mxu1 %v3764_v3  ;;  %v1341_v30 = vrot.slane %v4015_v7, 5  ;;  %v386_v58 = vld [vmem:[%s4004_s25 + $0x18] sm:$0x8] }
  0x1f   : > { %v860_v21 = vrot.slane %v4027_v14, 5  ;;  %v859_v25 = vrot.slane %v3464_v17, 5  ;;  %v558_v26 = vshrl.u32 %v3464_v17, 16  ;;  %v561_v27 = vshll.u32 %v3464_v17, 16  ;;  %2684 = vmatprep.subr.bf16.mxu0 %v3880_v0  ;;  %3669 = vmatprep.subr.bf16.mxu1 %v3880_v0 }
  0x20   : > { %v1042_v31 = vrot.slane %v1040_v22, 4  ;;  %v1045_v32 = vrot.slane %v1043_v23, 5  ;;  %v1050_v33 = vrot.slane %v1048_v18, 4  ;;  %v1053_v37 = vrot.slane %v1051_v19, 5  ;;  %v3775_v19 = vld [vmem:[%s6478_s2] sm:$0xff]  }
  0x21   : > { %914 = vrot.lane.b32.xlu1 %v859_v25, %s3882_s19  ;;  %v560_v35 = vrot.slane %v558_v26, 4  ;;  %v563_v36 = vrot.slane %v561_v27, 5  ;;  %v566_v38 = vshrl.u32 %v4027_v14, 16  ;;  %v861_v39 = vsel %vm858_vm0, %v859_v25, %v860_v21  ;;  %2685 = vmatpush1.bf16.msra.mxu0 %v3766_v29  ;;  %v337_v22 = vld [vmem:[%s4004_s25 + $0x30] sm:$0xf] }
  0x22   : > { %1395 = vrot.lane.b32.xlu0 %v1340_v20, %s3883_s20  ;;  %v569_v40 = vshll.u32 %v4027_v14, 16  ;;  %v4072_v43 = vcombine.low %v4012_v6, %v4049_v24  ;;  %v4076_v44 = vcombine.low %v4052_v28, %v4059_v34  ;;  %3678 = vmatpush1.bf16.msra.mxu1 %v3766_v29  ;;  %v1342_v47 = vsel %vm858_vm0, %v1340_v20, %v1341_v30  ;;  %v336_v20 = vld [vmem:[%s4004_s25 + $0x2c] sm:$0xf] }
  0x23   : > { %v564_v41 = vor.u32 %v563_v36, %v560_v35  ;;  %v568_v42 = vrot.slane %v566_v38, 4  ;;  %2686 = vmatprep.subr.bf16.mxu0 %v3880_v0  ;;  %3670 = vmatprep.subr.bf16.mxu1 %v3880_v0  ;;  %v1046_v48 = vor.u32 %v1045_v32, %v1042_v31  ;;  %v4087_v49 = vor.u32 %v1053_v37, %v1050_v33  ;;  %v338_v35 = vld [vmem:[%s4004_s25 + $0x34] sm:$0xf]  ;;  %v339_v37 = vld [vmem:[%s4004_s25 + $0x38] sm:$0xf] }
  0x24   : > { %v571_v46 = vrot.slane %v569_v40, 5  ;;  %v584_v50 = vshrl.u32 %v4072_v43, 16  ;;  %v587_v51 = vshll.u32 %v4072_v43, 16  ;;  %v593_v52 = vshrl.u32 %v4076_v44, 16 }
  0x25   : > { %916 = vrot.lane.b32.xlu1 %v861_v39, %s3882_s19  ;;  %v596_v53 = vshll.u32 %v4076_v44, 16  ;;  %2687 = vmatpush1.bf16.msra.mxu0 %v3771_v45  ;;  %v1055_v56 = vsel %vm556_vm1, %v1046_v48, %v4087_v49  ;;  %v575_v57 = vshrl.u32 %v4017_v8, 16  ;;  %v578_v1 = vshll.u32 %v4017_v8, 16 }
  0x26   : > { %799 = vrot.lane.b32.xlu0 %v564_v41, %s3884_s23  ;;  %v572_v54 = vor.u32 %v571_v46, %v568_v42  ;;  %3679 = vmatpush1.bf16.msra.mxu1 %v3771_v45  ;;  %v586_v59 = vrot.slane %v584_v50, 4  ;;  %v589_v60 = vrot.slane %v587_v51, 5  ;;  %v595_v61 = vrot.slane %v593_v52, 4 }
  0x27   : > { %2688 = vmatprep.subr.bf16.mxu0 %v3880_v0  ;;  %3671 = vmatprep.subr.bf16.mxu1 %v3880_v0  ;;  %v598_v62 = vrot.slane %v596_v53, 5  ;;  %v4112_v3 = vcombine.low %v4049_v24, %v4052_v28  ;;  %v3498_v4 = vcombine.low %v386_v58, %v4012_v6  ;;  %v577_v5 = vrot.slane %v575_v57, 4  ;;  %v3778_v28 = vld [vmem:[%s6478_s2 + $0x40] sm:$0xff]  }
  0x28   : > { %v573_v63 = vsel %vm556_vm1, %v564_v41, %v572_v54  ;;  %v590_v9 = vor.u32 %v589_v60, %v586_v59  ;;  %v580_v18 = vrot.slane %v578_v1, 5  ;;  %v862_v23 = vrot.slane %v4017_v8, 5 }
  0x29   : > { %1397 = vrot.lane.b32.xlu1 %v1342_v47, %s3883_s20  ;;  %2689 = vmatpush1.bf16.msra.mxu0 %v3773_v55  ;;  %v599_v10 = vor.u32 %v598_v62, %v595_v61  ;;  %v1057_v12 = vshrl.u32 %v4112_v3, 16  ;;  %v1060_v17 = vshll.u32 %v4112_v3, 16  ;;  %v4135_v27 = vcombine.low %v336_v20, %v337_v22  ;;  %v340_v61 = vld [vmem:[%s4004_s25 + $0x3c] sm:$0xf]  ;;  %v341_v62 = vld [vmem:[%s4004_s25 + $0x40] sm:$0xf] }
  0x2a   : > { %1281 = vrot.lane.b32.xlu0 %v1046_v48, %s3885_s10  ;;  %3680 = vmatpush1.bf16.msra.mxu1 %v3773_v55  ;;  %v581_v26 = vor.u32 %v580_v18, %v577_v5  ;;  %v863_v8 = vsel %vm858_vm0, %v860_v21, %v862_v23  ;;  %v1343_v14 = vrot.slane %v4112_v3, 5  ;;  %v4160_v38 = vcombine.low %v4059_v34, %v336_v20 }
  0x2b   : > { %2690 = vmatprep.subr.bf16.mxu0 %v3880_v0  ;;  %3672 = vmatprep.subr.bf16.mxu1 %v3880_v0  ;;  %v4132_v6 = vsel %vm556_vm1, %v590_v9, %v599_v10  ;;  %v1059_v24 = vrot.slane %v1057_v12, 4  ;;  %v1062_v25 = vrot.slane %v1060_v17, 5  ;;  %v602_v32 = vshrl.u32 %v4135_v27, 16 }
  0x2c   : > { %v582_v31 = vsel %vm556_vm1, %v572_v54, %v581_v26  ;;  %v605_v33 = vshll.u32 %v4135_v27, 16  ;;  %v4164_v39 = vcombine.low %v338_v35, %v339_v37  ;;  %v1344_v40 = vsel %vm858_vm0, %v1341_v30, %v1343_v14 }
  0x2d   : > { %1283 = vrot.lane.b32.xlu1 %v1055_v56, %s3885_s10  ;;  %2691 = vmatpush1.bf16.msra.mxu0 %v3774_v2  ;;  %v1063_v29 = vor.u32 %v1062_v25, %v1059_v24  ;;  %v604_v21 = vrot.slane %v602_v32, 4  ;;  %v1066_v42 = vshrl.u32 %v4160_v38, 16  ;;  %v1069_v45 = vshll.u32 %v4160_v38, 16  ;;  %v4227_v24 = vld [vmem:[%s4004_s25 + $0x48] sm:$0xf] }
  0x2e   : > { %801 = vrot.lane.b32.xlu0 %v573_v63, %s3884_s23  ;;  %3681 = vmatpush1.bf16.msra.mxu1 %v3774_v2  ;;  %v607_v36 = vrot.slane %v605_v33, 5  ;;  %v591_v34 = vsel %vm556_vm1, %v581_v26, %v590_v9  ;;  %v611_v46 = vshrl.u32 %v4164_v39, 16  ;;  %v614_v47 = vshll.u32 %v4164_v39, 16 }
  0x2f   : > { %2692 = vmatprep.subr.bf16.mxu0 %v3880_v0  ;;  %3673 = vmatprep.subr.bf16.mxu1 %v3880_v0  ;;  %v4181_v30 = vrot.slane %v4072_v43, 5  ;;  %v1071_v50 = vrot.slane %v1069_v45, 5  ;;  %v1345_v51 = vrot.slane %v4160_v38, 5  ;;  %v4187_v54 = vcombine.low %v337_v22, %v338_v35 }
  0x30   : > { %v608_v41 = vor.u32 %v607_v36, %v604_v21  ;;  %v613_v52 = vrot.slane %v611_v46, 4  ;;  %v616_v53 = vrot.slane %v614_v47, 5  ;;  %v866_v1 = vrot.slane %v4076_v44, 5 }
  0x31   : > { %1464 = vrot.lane.b32.xlu1 %v4112_v3, %s3886_s24  ;;  %2693 = vmatpush1.bf16.msra.mxu0 %v3775_v19  ;;  %v865_v55 = vsel %vm858_vm0, %v862_v23, %v4181_v30  ;;  %v1346_v56 = vsel %vm858_vm0, %v1343_v14, %v1345_v51  ;;  %v1075_v58 = vshrl.u32 %v4187_v54, 16  ;;  %v1078_v59 = vshll.u32 %v4187_v54, 16 }
  0x32   : > { %1462 = vrot.lane.b32.xlu0 %v3498_v4, %s3886_s24  ;;  %3682 = vmatpush1.bf16.msra.mxu1 %v3775_v19  ;;  %v4178_v48 = vsel %vm556_vm1, %v599_v10, %v608_v41  ;;  %v617_v57 = vor.u32 %v616_v53, %v613_v52  ;;  %v4206_v5 = vcombine.low %v340_v61, %v341_v62  ;;  %v868_v17 = vrot.slane %v4135_v27, 5  ;;  %v342_v19 = vld [vmem:[%s4004_s25 + $0x44] sm:$0xf] }
  0x33   : > { %2708 = vmatprep.subr.bf16.mxu0 %v3880_v0  ;;  %3674 = vmatprep.subr.bf16.mxu1 %v3880_v0  ;;  %v1064_v0 = vsel %vm556_vm1, %v4087_v49, %v1063_v29  ;;  %v1068_v49 = vrot.slane %v1066_v42, 4  ;;  %v1077_v2 = vrot.slane %v1075_v58, 4  ;;  %v1080_v4 = vrot.slane %v1078_v59, 5 }
  0x34   : > { %v4203_v63 = vsel %vm556_vm1, %v608_v41, %v617_v57  ;;  %v620_v12 = vshrl.u32 %v4206_v5, 16  ;;  %v1347_v20 = vrot.slane %v4187_v54, 5  ;;  %v4238_v32 = vcombine.low %v342_v19, %v4227_v24 }
  0x35   : > { %1549 = vrot.lane.b32.xlu1 %v4132_v6, %s3887_s18  ;;  %2709 = vmatpush2.bf16.msra.mxu0 %v3778_v28  ;;  %v4214_v10 = vor.u32 %v1080_v4, %v1077_v2  ;;  %v870_v21 = vrot.slane %v4164_v39, 5  ;;  %v2058_v47 = vshrl.u32 %v4181_v30, 16  ;;  %v872_v52 = vrot.slane %v4206_v5, 5 }
  0x36   : > { %1547 = vrot.lane.b32.xlu0 %v590_v9, %s3887_s18  ;;  %3683 = vmatpush2.bf16.msra.mxu1 %v3778_v28  ;;  %v867_v9 = vsel %vm858_vm0, %v4181_v30, %v866_v1  ;;  %v622_v22 = vrot.slane %v620_v12, 4  ;;  %v1348_v33 = vsel %vm858_vm0, %v1345_v51, %v1347_v20  ;;  %v629_v41 = vshrl.u32 %v4238_v32, 16 }
  0x37   : > { %v2066_v26 = vshrl.u32 %v867_v9, 16  ;;  %v2069_v28 = vshll.u32 %v867_v9, 16  ;;  %v632_v42 = vshll.u32 %v4238_v32, 16  ;;  %v871_v51 = vsel %vm858_vm0, %v868_v17, %v870_v21 }
  0x38   : > { %v2100_v53 = vshrl.u32 %v871_v51, 16  ;;  %v2103_v59 = vshll.u32 %v871_v51, 16 }
  0x39   : > { %918 = vrot.lane.b32.xlu1 %v863_v8, %s3882_s19  ;;  %v4232_v8 = vcombine.low %v339_v37, %v340_v61  ;;  %v2068_v36 = vrot.slane %v2066_v26, 3  ;;  %v2071_v37 = vrot.slane %v2069_v28, 4  ;;  %v634_v58 = vrot.slane %v632_v42, 5  ;;  %v354_v42 = vld [vmem:[%s4004_s25 + $0x74] sm:$0xf] }
  0x3a   : > { %803 = vrot.lane.b32.xlu0 %v582_v31, %s3884_s23  ;;  %v2102_v2 = vrot.slane %v2100_v53, 3 }
  0x3b   : > { %6514 = vst [vmem:[#allocation5_spill] sm:$0xff] %v4232_v8  ;;  %v1084_v35 = vshrl.u32 %v4232_v8, 16  ;;  %v1087_v14 = vshll.u32 %v4232_v8, 16 }
  0x3d   : > { %1285 = vrot.lane.b32.xlu1 %v1064_v0, %s3885_s10  ;;  %v1089_v46 = vrot.slane %v1087_v14, 5 }
  0x3e   : > { %985 = vrot.lane.b32.xlu0 %v4072_v43, %s3881_s12  ;;  %v1072_v43 = vor.u32 %v1071_v50, %v1068_v49  ;;  %v1349_v49 = vrot.slane %v4232_v8, 5  ;;  %v4254_v50 = vcombine.low %v341_v62, %v342_v19  ;;  %v2072_v62 = vor.u32 %v2071_v37, %v2068_v36 }
  0x40   : > { %v1073_v60 = vsel %vm556_vm1, %v1063_v29, %v1072_v43  ;;  %v1082_v18 = vsel %vm556_vm1, %v1072_v43, %v4214_v10  ;;  %6515 = vst [vmem:[#allocation6_spill] sm:$0xff] %v4254_v50  ;;  %v2061_v43 = vshll.u32 %v4181_v30, 16  ;;  %v4270_v30 = vsel %vm858_vm0, %v870_v21, %v872_v52 }
  0x41   : > { %1466 = vrot.lane.b32.xlu1 %v4160_v38, %s3886_s24  ;;  %v2117_v4 = vshrl.u32 %v4270_v30, 16 }
  0x42   : > { %1399 = vrot.lane.b32.xlu0 %v1344_v40, %s3883_s20  ;;  %v2063_v61 = vrot.slane %v2061_v43, 4 }
  0x43   : > { %v2119_v26 = vrot.slane %v2117_v4, 3 }
  0x45   : > { %805 = vrot.lane.b32.xlu1 %v591_v34, %s3884_s23  ;;  %v1086_v34 = vrot.slane %v1084_v35, 4 }
  0x46   : > { %1551 = vrot.lane.b32.xlu0 %v4178_v48, %s3887_s18 }
  0x49   : > { %987 = vrot.lane.b32.xlu1 %v4076_v44, %s3881_s12  ;;  %v623_v44 = vshll.u32 %v4206_v5, 16 }
  0x4a   : > { %920 = vrot.lane.b32.xlu0 %v865_v55, %s3882_s19  ;;  %v2060_v55 = vrot.slane %v2058_v47, 3 }
  0x4b   : > { %v625_v23 = vrot.slane %v623_v44, 5 }
  0x4c   : > { %v2064_v12 = vor.u32 %v2063_v61, %v2060_v55  ;;  %v357_v61 = vld [vmem:[%s4004_s25 + $0x80] sm:$0xf] }
  0x4d   : > { %1401 = vrot.lane.b32.xlu1 %v1346_v56, %s3883_s20  ;;  %v626_v0 = vor.u32 %v625_v23, %v622_v22  ;;  %v344_v22 = vld [vmem:[%s4004_s25 + $0x4c] sm:$0xf]  ;;  %v4286_v23 = vld [vmem:[%s4004_s25 + $0x50] sm:$0xf] }
  0x4e   : > { %1287 = vrot.lane.b32.xlu0 %v1073_v60, %s3885_s10  ;;  %v1090_v60 = vor.u32 %v1089_v46, %v1086_v34  ;;  %v1351_v34 = vrot.slane %v4254_v50, 5 }
  0x4f   : > { %v4250_v45 = vsel %vm556_vm1, %v617_v57, %v626_v0  ;;  %v631_v57 = vrot.slane %v629_v41, 4  ;;  %v353_v41 = vld [vmem:[%s4004_s25 + $0x70] sm:$0xf] }
  0x50   : > { %v1352_v43 = vsel %vm858_vm0, %v1349_v49, %v1351_v34 }
  0x51   : > { %1553 = vrot.lane.b32.xlu1 %v4203_v63, %s3887_s18  ;;  %v635_v44 = vor.u32 %v634_v58, %v631_v57 }
  0x52   : > { %1468 = vrot.lane.b32.xlu0 %v4187_v54, %s3886_s24 }
  0x55   : > { %922 = vrot.lane.b32.xlu1 %v867_v9, %s3882_s19  ;;  %v2120_v9 = vshll.u32 %v4270_v30, 16 }
  0x56   : > { %807 = vrot.lane.b32.xlu0 %v4132_v6, %s3884_s23  ;;  %v869_v6 = vsel %vm858_vm0, %v866_v1, %v868_v17  ;;  %v1350_v1 = vsel %vm858_vm0, %v1347_v20, %v1349_v49  ;;  %v2105_v17 = vrot.slane %v2103_v59, 4  ;;  %v1091_v20 = vsel %vm556_vm1, %v4214_v10, %v1090_v60  ;;  %v4344_v59 = vld [vmem:[%s4004_s25 + $0x58] sm:$0xf] }
  0x57   : > { %v2083_v29 = vshrl.u32 %v869_v6, 16  ;;  %v2086_v31 = vshll.u32 %v869_v6, 16  ;;  %v2122_v28 = vrot.slane %v2120_v9, 4 }
  0x59   : > { %1289 = vrot.lane.b32.xlu1 %v1082_v18, %s3885_s10  ;;  %v2088_v40 = vrot.slane %v2086_v31, 4  ;;  %v1096_v18 = vshll.u32 %v4254_v50, 16  ;;  %v4299_v35 = vor.u32 %v2122_v28, %v2119_v26 }
  0x5a   : > { %989 = vrot.lane.b32.xlu0 %v4135_v27, %s3881_s12  ;;  %v2085_v27 = vrot.slane %v2083_v29, 3  ;;  %v2106_v29 = vor.u32 %v2105_v17, %v2102_v2 }
  0x5b   : > { %v1098_v31 = vrot.slane %v1096_v18, 5 }
  0x5c   : > { %v2089_v56 = vor.u32 %v2088_v40, %v2085_v27  ;;  %v4311_v37 = vsel %vm2041_vm2, %v2106_v29, %v4299_v35  ;;  %v4317_v40 = vld [vmem:[%s4004_s25 + $0x6c] sm:$0xf] }
  0x5d   : > { %1470 = vrot.lane.b32.xlu1 %v4232_v8, %s3886_s24  ;;  %v4330_v53 = vcombine.low %v4317_v40, %v353_v41 }
  0x5e   : > { %1403 = vrot.lane.b32.xlu0 %v1348_v33, %s3883_s20  ;;  %v4279_v19 = vsel %vm2041_vm2, %v2072_v62, %v2089_v56  ;;  %v4295_v33 = vcombine.low %v344_v22, %v4286_v23  ;;  %v4304_v14 = vsel %vm2041_vm2, %v2089_v56, %v2106_v29 }
  0x5f   : > { %6516 = vst [vmem:[#allocation7_spill] sm:$0xff] %v4330_v53 }
  0x60   : > { %v638_v21 = vshrl.u32 %v4295_v33, 16  ;;  %v641_v36 = vshll.u32 %v4295_v33, 16 }
  0x61   : > { %809 = vrot.lane.b32.xlu1 %v4178_v48, %s3884_s23  ;;  %v1093_v48 = vshrl.u32 %v4254_v50, 16 }
  0x62   : > { %1555 = vrot.lane.b32.xlu0 %v4250_v45, %s3887_s18  ;;  %v640_v46 = vrot.slane %v638_v21, 4  ;;  %v643_v47 = vrot.slane %v641_v36, 5  ;;  %v4379_v21 = vcombine.low %v353_v41, %v354_v42 }
  0x63   : > { %v1095_v10 = vrot.slane %v1093_v48, 4 }
  0x64   : > { %v644_v56 = vor.u32 %v643_v47, %v640_v46  ;;  %6518 = vst [vmem:[#allocation9_spill] sm:$0xff] %v4379_v21 }
  0x65   : > { %991 = vrot.lane.b32.xlu1 %v4164_v39, %s3881_s12  ;;  %v2073_v39 = vsel %vm2041_vm2, %v2064_v12, %v2072_v62  ;;  %v674_v62 = vshrl.u32 %v4330_v53, 16 }
  0x66   : > { %924 = vrot.lane.b32.xlu0 %v869_v6, %s3882_s19  ;;  %3514 = vmatprep.mubr.msk.bf16.mxu0 %vm1614_vm3, %v2073_v39  ;;  %v4292_v6 = vsel %vm556_vm1, %v626_v0, %v635_v44  ;;  %v1099_v0 = vor.u32 %v1098_v31, %v1095_v10  ;;  %v4359_v4 = vsel %vm556_vm1, %v635_v44, %v644_v56 }
  0x68   : > { %v1100_v27 = vsel %vm556_vm1, %v1090_v60, %v1099_v0  ;;  %v356_v60 = vld [vmem:[%s4004_s25 + $0x7c] sm:$0xf] }
  0x69   : > { %1405 = vrot.lane.b32.xlu1 %v1350_v1, %s3883_s20  ;;  %v677_v1 = vshll.u32 %v4330_v53, 16  ;;  %v4361_v17 = vcombine.low %v356_v60, %v357_v61 }
  0x6a   : > { %1291 = vrot.lane.b32.xlu0 %v1091_v20, %s3885_s10  ;;  %v676_v20 = vrot.slane %v674_v62, 4 }
  0x6b   : > { %v679_v39 = vrot.slane %v677_v1, 5  ;;  %v692_v10 = vshrl.u32 %v4361_v17, 16  ;;  %v695_v31 = vshll.u32 %v4361_v17, 16  ;;  %v359_v1 = vld [vmem:[%s4004_s25 + $0x88] sm:$0xf] }
  0x6d   : > { %1557 = vrot.lane.b32.xlu1 %v4292_v6, %s3887_s18  ;;  %v4383_v36 = vor.u32 %v679_v39, %v676_v20  ;;  %v6486_v39 = vrot.slane %v4330_v53, 5 }
  0x6e   : > { %1472 = vrot.lane.b32.xlu0 %v4254_v50, %s3886_s24 }
  0x71   : > { %926 = vrot.lane.b32.xlu1 %v871_v51, %s3882_s19  ;;  %v4323_v51 = vld [vmem:[%s4004_s25 + $0x78] sm:$0xf] }
  0x72   : > { %811 = vrot.lane.b32.xlu0 %v4203_v63, %s3884_s23  ;;  %v4327_v63 = vcombine.low %v4227_v24, %v344_v22  ;;  %v4335_v55 = vcombine.low %v354_v42, %v4323_v51  ;;  %v346_v24 = vld [vmem:[%s4004_s25 + $0x54] sm:$0xf] }
  0x73   : > { %v4356_v2 = vcombine.low %v346_v24, %v4344_v59 }
  0x74   : > { %6517 = vst [vmem:[#allocation8_spill] sm:$0xff] %v4335_v55  ;;  %v1102_v57 = vshrl.u32 %v4327_v63, 16  ;;  %v1105_v58 = vshll.u32 %v4327_v63, 16  ;;  %v683_v49 = vshrl.u32 %v4335_v55, 16  ;;  %v686_v48 = vshll.u32 %v4335_v55, 16 }
  0x75   : > { %1293 = vrot.lane.b32.xlu1 %v1100_v27, %s3885_s10  ;;  %v6487_v18 = vrot.slane %v4327_v63, 5  ;;  %v647_v28 = vshrl.u32 %v4356_v2, 16  ;;  %v650_v44 = vshll.u32 %v4356_v2, 16 }
  0x76   : > { %993 = vrot.lane.b32.xlu0 %v4206_v5, %s3881_s12  ;;  %v1104_v9 = vrot.slane %v1102_v57, 4  ;;  %v1107_v12 = vrot.slane %v1105_v58, 5  ;;  %v685_v22 = vrot.slane %v683_v49, 4  ;;  %v688_v26 = vrot.slane %v686_v48, 5  ;;  %v4484_v5 = vld [vmem:[%s4004_s25 + $0x94] sm:$0xf] }
  0x77   : > { %v649_v46 = vrot.slane %v647_v28, 4  ;;  %v652_v47 = vrot.slane %v650_v44, 5  ;;  %v694_v57 = vrot.slane %v692_v10, 4  ;;  %v697_v58 = vrot.slane %v695_v31, 5 }
  0x78   : > { %v4370_v29 = vor.u32 %v1107_v12, %v1104_v9  ;;  %v689_v27 = vor.u32 %v688_v26, %v685_v22  ;;  %v886_v49 = vrot.slane %v4335_v55, 5  ;;  %v6485_v48 = vrot.slane %v4361_v17, 5 }
  0x79   : > { %1474 = vrot.lane.b32.xlu1 %v4327_v63, %s3886_s24  ;;  %v4396_v42 = vor.u32 %v652_v47, %v649_v46  ;;  %v4399_v62 = vor.u32 %v697_v58, %v694_v57 }
  0x7a   : > { %1407 = vrot.lane.b32.xlu0 %v1352_v43, %s3883_s20  ;;  %v1109_v43 = vsel %vm556_vm1, %v1099_v0, %v4370_v29  ;;  %v4391_v41 = vsel %vm556_vm1, %v4383_v36, %v689_v27  ;;  %v360_v0 = vld [vmem:[%s4004_s25 + $0x8c] sm:$0xf]  ;;  %v4445_v10 = vsel %vm858_vm0, %v6486_v39, %v886_v49  ;;  %v325_v39 = vld [vmem:[%s4004_s25] sm:$0x8] }
  0x7b   : > { %6519 = vst [vmem:[#allocation10_spill] sm:$0xff] %v4391_v41  ;;  %v4418_v12 = vcombine.low %v359_v1, %v360_v0  ;;  %v4422_v20 = vsel %vm556_vm1, %v689_v27, %v4399_v62  ;;  %6524 = vst [vmem:[#allocation15_spill] sm:$0xff] %v4445_v10 }
  0x7c   : > { %6522 = vst [vmem:[#allocation13_spill] sm:$0xff] %v4422_v20 }
  0x7d   : > { %813 = vrot.lane.b32.xlu1 %v4250_v45, %s3884_s23  ;;  %v1354_v45 = vsel %vm858_vm0, %v1351_v34, %v6487_v18  ;;  %v358_v34 = vld [vmem:[%s4004_s25 + $0x84] sm:$0xf]  ;;  %v1177_v22 = vshll.u32 %v4418_v12, 16  ;;  %v4458_v18 = vld [vmem:[%s4004_s25 + $0x90] sm:$0xf] }
  0x7e   : > { %1559 = vrot.lane.b32.xlu0 %v4359_v4, %s3887_s18  ;;  %v4407_v9 = vcombine.low %v357_v61, %v358_v34  ;;  %v4430_v61 = vsel %vm858_vm0, %v886_v49, %v6485_v48  ;;  %v4481_v55 = vcombine.low %v360_v0, %v4458_v18 }
  0x7f   : > { %6523 = vst [vmem:[#allocation14_spill] sm:$0xff] %v4430_v61 }
  0x80   : > { %6520 = vst [vmem:[#allocation11_spill] sm:$0xff] %v4407_v9 }
  0x81   : > { %995 = vrot.lane.b32.xlu1 %v4238_v32, %s3881_s12 }
  0x82   : > { %928 = vrot.lane.b32.xlu0 %v4270_v30, %s3882_s19  ;;  %v4394_v30 = vcombine.low %v4286_v23, %v346_v24  ;;  %v4413_v23 = vsel %vm556_vm1, %v644_v56, %v4396_v42  ;;  %v4416_v24 = vcombine.low %v4323_v51, %v356_v60  ;;  %v1165_v56 = vshrl.u32 %v4407_v9, 16 }
  0x83   : > { %v1168_v51 = vshll.u32 %v4407_v9, 16  ;;  %v1174_v60 = vshrl.u32 %v4418_v12, 16 }
  0x84   : > { %6521 = vst [vmem:[#allocation12_spill] sm:$0xff] %v4416_v24  ;;  %v1156_v26 = vshrl.u32 %v4416_v24, 16  ;;  %v1159_v28 = vshll.u32 %v4416_v24, 16  ;;  %v1167_v27 = vrot.slane %v1165_v56, 4  ;;  %v1111_v25 = vshrl.u32 %v4394_v30, 16 }
  0x85   : > { %1409 = vrot.lane.b32.xlu1 %v1354_v45, %s3883_s20  ;;  %v6493_v45 = vrot.slane %v4238_v32, 5  ;;  %v1170_v46 = vrot.slane %v1168_v51, 5  ;;  %v1176_v47 = vrot.slane %v1174_v60, 4  ;;  %v1114_v56 = vshll.u32 %v4394_v30, 16 }
  0x86   : > { %1295 = vrot.lane.b32.xlu0 %v1109_v43, %s3885_s10  ;;  %v1179_v43 = vrot.slane %v1177_v22, 5  ;;  %v1158_v57 = vrot.slane %v1156_v26, 4  ;;  %v1161_v58 = vrot.slane %v1159_v28, 5  ;;  %v4473_v60 = vcombine.low %v358_v34, %v359_v1 }
  0x87   : > { %v4469_v51 = vsel %vm858_vm0, %v872_v52, %v6493_v45  ;;  %v1171_v22 = vor.u32 %v1170_v46, %v1167_v27  ;;  %v4487_v52 = vld [vmem:[%s4004_s25 + $0x98] sm:$0xf]  ;;  %v1367_v1 = vrot.slane %v4407_v9, 5  ;;  %v892_v34 = vrot.slane %v4481_v55, 5 }
  0x88   : > { %v4475_v26 = vor.u32 %v1179_v43, %v1176_v47  ;;  %v4477_v28 = vor.u32 %v1161_v58, %v1158_v57  ;;  %v701_v47 = vshrl.u32 %v4473_v60, 16  ;;  %v704_v43 = vshll.u32 %v4473_v60, 16 }
  0x89   : > { %827 = vrot.lane.b32.xlu1 %v4391_v41, %s3884_s23  ;;  %v710_v57 = vshrl.u32 %v4481_v55, 16 }
  0x8a   : > { %1476 = vrot.lane.b32.xlu0 %v4394_v30, %s3886_s24  ;;  %6525 = vst [vmem:[#allocation16_spill] sm:$0xff] %v4477_v28  ;;  %v1172_v0 = vsel %vm556_vm1, %v4477_v28, %v1171_v22  ;;  %v6504_v28 = vrot.slane %v4473_v60, 5  ;;  %v703_v41 = vrot.slane %v701_v47, 4  ;;  %v706_v21 = vrot.slane %v704_v43, 5 }
  0x8b   : > { %v712_v8 = vrot.slane %v710_v57, 4  ;;  %v6528_v47 = vcombine.low %v4033_v16, %v4022_v11 }
  0x8d   : > { %1561 = vrot.lane.b32.xlu1 %v4413_v23, %s3887_s18 }
  0x8e   : > { %829 = vrot.lane.b32.xlu0 %v4422_v20, %s3884_s23  ;;  %v1113_v20 = vrot.slane %v1111_v25, 4  ;;  %v4512_v25 = vld [vmem:[%s4004_s25 + $0x5c] sm:$0xf] }
  0x8f   : > { %v4440_v44 = vpop.permute.xlu1 %983 }
  0x90   : > { %v4447_v31 = vpop.permute.xlu0 %981 }
  0x91   : > { %944 = vrot.lane.b32.xlu1 %v4430_v61, %s3882_s19 }
  0x92   : > { %942 = vrot.lane.b32.xlu0 %v4445_v10, %s3882_s19  ;;  %v3436_v10 = vcombine.low %v325_v39, %v4030_v15  ;;  %v1181_v15 = vsel %vm556_vm1, %v1171_v22, %v4475_v26  ;;  %v4502_v39 = vcombine.low %v4484_v5, %v4487_v52  ;;  %v713_v22 = vshll.u32 %v4481_v55, 16 }
  0x93   : > { %v915_v48 = vpop.permute.xlu1 %914 }
  0x94   : > { %v4454_v49 = vpop.permute.xlu0 %1395  ;;  %v6529_v57 = vrot.slane %v4502_v39, 5 }
  0x95   : > { %1009 = vrot.lane.b32.xlu1 %v4361_v17, %s3881_s12 }
  0x96   : > { %815 = vrot.lane.b32.xlu0 %v4292_v6, %s3884_s23  ;;  %v1116_v6 = vrot.slane %v1114_v56, 5 }
  0x97   : > { %v917_v61 = vpop.permute.xlu1 %916 }
  0x98   : > { %v800_v45 = vpop.permute.xlu0 %799  ;;  %v4508_v56 = vor.u32 %v1116_v6, %v1113_v20  ;;  %v6526_v20 = vrot.slane %v4416_v24, 5 }
  0x99   : > { %930 = vrot.lane.b32.xlu1 %v4469_v51, %s3882_s19  ;;  %v1617_v27 = vsel %vm1614_vm3, %v3436_v10, %v800_v45  ;;  %v4517_v10 = vld [vmem:[%s4004_s25 + $0x60] sm:$0xf] }
  0x9a   : > { %1011 = vrot.lane.b32.xlu0 %v4473_v60, %s3881_s12  ;;  %v1676_v9 = vsel %vm1674_vm4, %v1617_v27, %v915_v48  ;;  %v1368_v6 = vsel %vm858_vm0, %v6526_v20, %v1367_v1  ;;  %v1118_v48 = vsel %vm556_vm1, %v4370_v29, %v4508_v56  ;;  %v4534_v27 = vcombine.low %v4512_v25, %v4517_v10 }
  0x9b   : > { %v1398_v46 = vpop.permute.xlu1 %1397  ;;  %v4539_v20 = vsel %vm858_vm0, %v6504_v28, %v892_v34 }
  0x9c   : > { %v1282_v58 = vpop.permute.xlu0 %1281  ;;  %v2287_v29 = vshrl.u32 %v4539_v20, 16  ;;  %v656_v24 = vshrl.u32 %v4534_v27, 16 }
  0x9d   : > { %1311 = vrot.lane.b32.xlu1 %v1181_v15, %s3885_s10  ;;  %v6527_v15 = vrot.slane %v4418_v12, 5 }
  0x9e   : > { %1309 = vrot.lane.b32.xlu0 %v1172_v0, %s3885_s10  ;;  %v715_v0 = vrot.slane %v713_v22, 5  ;;  %v4552_v22 = vsel %vm858_vm0, %v892_v34, %v6529_v57  ;;  %v719_v34 = vshrl.u32 %v4502_v39, 16 }
  0x9f   : > { %v1284_v50 = vpop.permute.xlu1 %1283  ;;  %v1370_v53 = vsel %vm858_vm0, %v1367_v1, %v6527_v15  ;;  %v1733_v1 = vsel %vm1731_vm5, %v1676_v9, %v4447_v31  ;;  %6530 = vst [vmem:[#allocation17_spill] sm:$0xff] %v4552_v22  ;;  %v2290_v9 = vshll.u32 %v4539_v20, 16  ;;  %v2304_v11 = vshrl.u32 %v4552_v22, 16 }
  0xa0   : > { %v802_v45 = vpop.permute.xlu0 %801  ;;  %v2307_v16 = vshll.u32 %v4552_v22, 16  ;;  %v716_v28 = vor.u32 %v715_v0, %v712_v8 }
  0xa1   : > { %v1620_v43 = vsel %vm1614_vm3, %v6528_v47, %v802_v45  ;;  %1423 = vrot.lane.b32.xlu1 %v1368_v6, %s3883_s20  ;;  %v4562_v6 = vor.u32 %v706_v21, %v703_v41  ;;  %v722_v47 = vshll.u32 %v4502_v39, 16  ;;  %v4573_v21 = vcombine.low %v4458_v18, %v4484_v5 }
  0xa2   : > { %v1678_v15 = vsel %vm1674_vm4, %v1620_v43, %v917_v61  ;;  %997 = vrot.lane.b32.xlu0 %v4295_v33, %s3881_s12  ;;  %v1790_v61 = vsel %vm1788_vm6, %v1733_v1, %v1282_v58  ;;  %v1355_v41 = vrot.slane %v4394_v30, 5  ;;  %v2289_v58 = vrot.slane %v2287_v29, 3 }
  0xa3   : > { %v1735_v31 = vsel %vm1731_vm5, %v1678_v15, %v4440_v44  ;;  %v1465_v45 = vpop.permute.xlu1 %1464  ;;  %v659_v44 = vshll.u32 %v4534_v27, 16  ;;  %v2306_v1 = vrot.slane %v2304_v11, 3  ;;  %v2309_v8 = vrot.slane %v2307_v16, 4 }
  0xa4   : > { %v1792_v43 = vsel %vm1788_vm6, %v1735_v31, %v1284_v50  ;;  %v1463_v57 = vpop.permute.xlu0 %1462  ;;  %v2292_v50 = vrot.slane %v2290_v9, 4  ;;  %v721_v15 = vrot.slane %v719_v34, 4  ;;  %v724_v31 = vrot.slane %v722_v47, 5 }
  0xa5   : > { %v1849_v22 = vsel %vm1845_vm7, %v1792_v43, %v1398_v46  ;;  %1297 = vrot.lane.b32.xlu1 %v1118_v48, %s3885_s10  ;;  %v1847_v46 = vsel %vm1845_vm7, %v1790_v61, %v4454_v49  ;;  %v658_v29 = vrot.slane %v656_v24, 4  ;;  %v661_v49 = vrot.slane %v659_v44, 5 }
  0xa6   : > { %1425 = vrot.lane.b32.xlu0 %v1370_v53, %s3883_s20  ;;  %v1906_v0 = vsel %vm1902_vm8, %v1849_v22, %v1465_v45  ;;  %v1904_v18 = vsel %vm1902_vm8, %v1847_v46, %v1463_v57  ;;  %v4585_v53 = vsel %vm556_vm1, %v4562_v6, %v716_v28  ;;  %v4592_v34 = vor.u32 %v2292_v50, %v2289_v58 }
  0xa7   : > { %v1550_v48 = vpop.permute.xlu1 %1549  ;;  %v4594_v47 = vor.u32 %v2309_v8, %v2306_v1  ;;  %v4614_v8 = vcombine.low %v4344_v59, %v4512_v25 }
  0xa8   : > { %v1963_v5 = vsel %vm1959_vm9, %v1906_v0, %v1550_v48  ;;  %v1548_v43 = vpop.permute.xlu0 %1547  ;;  %v6531_v0 = vrot.slane %v4327_v63, 5  ;;  %v4601_v48 = vor.u32 %v724_v31, %v721_v15  ;;  %v4618_v31 = vor.u32 %v661_v49, %v658_v29 }
  0xa9   : > { %v2049_v9 = vshrl.u32 %v1963_v5, 16  ;;  %v2052_v11 = vshll.u32 %v1963_v5, 16  ;;  %v1961_v22 = vsel %vm1959_vm9, %v1904_v18, %v1548_v43  ;;  %1492 = vrot.lane.b32.xlu1 %v4573_v21, %s3886_s24  ;;  %v2311_v58 = vsel %vm2041_vm2, %v4592_v34, %v4594_v47 }
  0xaa   : > { %v2042_v16 = vshrl.u32 %v1961_v22, 16  ;;  %v2045_v45 = vshll.u32 %v1961_v22, 16  ;;  %1490 = vrot.lane.b32.xlu0 %v4418_v12, %s3886_s24  ;;  %v1356_v46 = vsel %vm858_vm0, %v6531_v0, %v1355_v41  ;;  %3528 = vmatprep.mubr.msk.bf16.mxu1 %vm1614_vm3, %v2311_v58  ;;  %v4642_v22 = vsel %vm556_vm1, %v4399_v62, %v4562_v6 }
  0xab   : > { %v2051_v61 = vrot.slane %v2049_v9, 3  ;;  %v2054_v57 = vrot.slane %v2052_v11, 4  ;;  %v919_v24 = vpop.permute.xlu1 %918  ;;  %v1183_v49 = vshrl.u32 %v4573_v21, 16  ;;  %v1120_v62 = vshrl.u32 %v4614_v8, 16 }
  0xac   : > { %v2044_v44 = vrot.slane %v2042_v16, 3  ;;  %v2047_v18 = vrot.slane %v2045_v45, 4  ;;  %v804_v5 = vpop.permute.xlu0 %803  ;;  %v1186_v16 = vshll.u32 %v4573_v21, 16  ;;  %v4647_v45 = vld [vmem:[%s4004_s25 + $0x9c] sm:$0xf]  ;;  %v1123_v6 = vshll.u32 %v4614_v8, 16 }
  0xad   : > { %v4606_v50 = vor.u32 %v2054_v57, %v2051_v61  ;;  %v1622_v1 = vsel %vm1614_vm3, %v4024_v13, %v804_v5  ;;  %1575 = vrot.lane.b32.xlu1 %v4585_v53, %s3887_s18  ;;  %v4622_v13 = vsel %vm556_vm1, %v716_v28, %v4601_v48  ;;  %v4635_v28 = vsel %vm556_vm1, %v4396_v42, %v4618_v31  ;;  %v4650_v61 = vld [vmem:[%s4004_s25 + $0xa0] sm:$0xf] }
  0xae   : > { %v2048_v15 = vor.u32 %v2047_v18, %v2044_v44  ;;  %1411 = vrot.lane.b32.xlu0 %v1356_v46, %s3883_s20  ;;  %v1680_v9 = vsel %vm1674_vm4, %v1622_v1, %v919_v24  ;;  %v4663_v0 = vcombine.low %v4647_v45, %v4650_v61  ;;  %v6532_v44 = vrot.slane %v4473_v60, 5 }
  0xaf   : > { %v1286_v43 = vpop.permute.xlu1 %1285  ;;  %v6533_v18 = vrot.slane %v4361_v17, 5  ;;  %v1185_v58 = vrot.slane %v1183_v49, 4  ;;  %v1188_v1 = vrot.slane %v1186_v16, 5  ;;  %v6534_v17 = vrot.slane %v4238_v32, 5 }
  0xb0   : > { %v986_v11 = vpop.permute.xlu0 %985  ;;  %v2056_v59 = vsel %vm2041_vm2, %v2048_v15, %v4606_v50  ;;  %v1125_v49 = vrot.slane %v1123_v6, 5 }
  0xb1   : > { %v1737_v25 = vsel %vm1731_vm5, %v1680_v9, %v986_v11  ;;  %2711 = vmatmul.mubr.bf16.vlgmr.msra.gmra.mxu0 %v2056_v59  ;;  %1478 = vrot.lane.b32.xlu1 %v4614_v8, %s3886_s24  ;;  %v4670_v5 = vsel %vm858_vm0, %v6533_v18, %v6532_v44  ;;  %v6508_v9 = vrot.slane %v4663_v0, 5 }
  0xb2   : > { %1577 = vrot.lane.b32.xlu0 %v4622_v13, %s3887_s18  ;;  %3515 = vmatprep.mubr.msk.bf16.mxu0 %vm1614_vm3, %v4279_v19  ;;  %v1794_v42 = vsel %vm1788_vm6, %v1737_v25, %v1286_v43  ;;  %v6509_v19 = vrot.slane %v4295_v33, 5 }
  0xb3   : > { %v1467_v29 = vpop.permute.xlu1 %1466 }
  0xb4   : > { %v1400_v57 = vpop.permute.xlu0 %1399  ;;  %v4682_v60 = vsel %vm858_vm0, %v6534_v17, %v6509_v19 }
  0xb5   : > { %v1851_v24 = vsel %vm1845_vm7, %v1794_v42, %v1400_v57  ;;  %1563 = vrot.lane.b32.xlu1 %v4635_v28, %s3887_s18  ;;  %v4686_v42 = vor.u32 %v1188_v1, %v1185_v58  ;;  %v350_v57 = vld [vmem:[%s4004_s25 + $0x64] sm:$0xf] }
  0xb6   : > { %831 = vrot.lane.b32.xlu0 %v4642_v22, %s3884_s23  ;;  %v1908_v15 = vsel %vm1902_vm8, %v1851_v24, %v1467_v29  ;;  %v1122_v29 = vrot.slane %v1120_v62, 4  ;;  %v4690_v24 = vld [vmem:[%s4004_s25 + $0x68] sm:$0xf] }
  0xb7   : > { %v806_v46 = vpop.permute.xlu1 %805  ;;  %v4711_v1 = vcombine.low %v350_v57, %v4690_v24  ;;  %v1190_v17 = vsel %vm556_vm1, %v4475_v26, %v4686_v42 }
  0xb8   : > { %v1552_v43 = vpop.permute.xlu0 %1551 }
  0xb9   : > { %v1965_v11 = vsel %vm1959_vm9, %v1908_v15, %v1552_v43  ;;  %817 = vrot.lane.b32.xlu1 %v4359_v4, %s3884_s23  ;;  %v1624_v4 = vsel %vm1614_vm3, %v4015_v7, %v806_v46  ;;  %v6535_v15 = vrot.slane %v4502_v39, 5  ;;  %v4708_v46 = vor.u32 %v1125_v49, %v1122_v29 }
  0xba   : > { %v2074_v59 = vshrl.u32 %v1965_v11, 16  ;;  %v2077_v25 = vshll.u32 %v1965_v11, 16  ;;  %946 = vrot.lane.b32.xlu0 %v4670_v5, %s3882_s19 }
  0xbb   : > { %v988_v16 = vpop.permute.xlu1 %987  ;;  %v4699_v43 = vsel %vm858_vm0, %v6535_v15, %v6508_v9  ;;  %v668_v15 = vshll.u32 %v4711_v1, 16 }
  0xbc   : > { %v2076_v32 = vrot.slane %v2074_v59, 3  ;;  %v2079_v44 = vrot.slane %v2077_v25, 4  ;;  %v921_v18 = vpop.permute.xlu0 %920  ;;  %v2321_v6 = vshrl.u32 %v4699_v43, 16  ;;  %v2324_v58 = vshll.u32 %v4699_v43, 16 }
  0xbd   : > { %v1682_v62 = vsel %vm1674_vm4, %v1624_v4, %v921_v18  ;;  %932 = vrot.lane.b32.xlu1 %v4682_v60, %s3882_s19  ;;  %v1371_v59 = vrot.slane %v4573_v21, 5  ;;  %v728_v25 = vshrl.u32 %v4663_v0, 16  ;;  %v731_v4 = vshll.u32 %v4663_v0, 16 }
  0xbe   : > { %v2080_v7 = vor.u32 %v2079_v44, %v2076_v32  ;;  %1013 = vrot.lane.b32.xlu0 %v4481_v55, %s3881_s12  ;;  %v1739_v32 = vsel %vm1731_vm5, %v1682_v62, %v988_v16  ;;  %v2323_v49 = vrot.slane %v2321_v6, 3  ;;  %v2326_v26 = vrot.slane %v2324_v58, 4 }
  0xbf   : > { %v1402_v11 = vpop.permute.xlu1 %1401  ;;  %v1127_v18 = vsel %vm556_vm1, %v4508_v56, %v4708_v46  ;;  %v1357_v16 = vrot.slane %v4614_v8, 5  ;;  %v6536_v6 = vrot.slane %v4418_v12, 5 }
  0xc0   : > { %v1288_v44 = vpop.permute.xlu0 %1287  ;;  %v2081_v55 = vsel %vm2041_vm2, %v4606_v50, %v2080_v7  ;;  %v665_v50 = vshrl.u32 %v4711_v1, 16  ;;  %v4746_v9 = vor.u32 %v2326_v26, %v2323_v49 }
  0xc1   : > { %v1796_v29 = vsel %vm1788_vm6, %v1739_v32, %v1288_v44  ;;  %2717 = vmatmul.mubr.bf16.gmra.mxu0 %v2081_v55  ;;  %999 = vrot.lane.b32.xlu1 %v4356_v2, %s3881_s12  ;;  %v1372_v58 = vsel %vm858_vm0, %v6536_v6, %v1371_v59  ;;  %v733_v32 = vrot.slane %v731_v4, 5  ;;  %v670_v4 = vrot.slane %v668_v15, 5 }
  0xc2   : > { %1313 = vrot.lane.b32.xlu0 %v1190_v17, %s3885_s10  ;;  %3516 = vmatprep.mubr.msk.bf16.mxu0 %vm1614_vm3, %v4304_v14  ;;  %v730_v17 = vrot.slane %v728_v25, 4  ;;  %v1853_v56 = vsel %vm1845_vm7, %v1796_v29, %v1402_v11  ;;  %v4744_v14 = vcombine.low %v4487_v52, %v4647_v45  ;;  %v1358_v11 = vsel %vm858_vm0, %v1355_v41, %v1357_v16 }
  0xc3   : > { %v1554_v62 = vpop.permute.xlu1 %1553  ;;  %v667_v25 = vrot.slane %v665_v50, 4  ;;  %v4760_v52 = vsel %vm2041_vm2, %v4594_v47, %v4746_v9  ;;  %v4766_v41 = vcombine.low %v4517_v10, %v350_v57  ;;  %v2134_v57 = vshrl.u32 %v4469_v51, 16 }
  0xc4   : > { %v1469_v44 = vpop.permute.xlu0 %1468 }
  0xc5   : > { %v1910_v55 = vsel %vm1902_vm8, %v1853_v56, %v1469_v44  ;;  %1299 = vrot.lane.b32.xlu1 %v1127_v18, %s3885_s10  ;;  %v4755_v56 = vor.u32 %v733_v32, %v730_v17  ;;  %v2137_v32 = vshll.u32 %v4469_v51, 16  ;;  %v878_v51 = vrot.slane %v4356_v2, 5 }
  0xc6   : > { %v1967_v19 = vsel %vm1959_vm9, %v1910_v55, %v1554_v62  ;;  %1427 = vrot.lane.b32.xlu0 %v1372_v58, %s3883_s20  ;;  %v1192_v55 = vshrl.u32 %v4744_v14, 16 }
  0xc7   : > { %v2091_v29 = vshrl.u32 %v1967_v19, 16  ;;  %v2094_v18 = vshll.u32 %v1967_v19, 16  ;;  %v923_v6 = vpop.permute.xlu1 %922  ;;  %v4770_v19 = vor.u32 %v670_v4, %v667_v25  ;;  %v4775_v47 = vsel %vm556_vm1, %v4601_v48, %v4755_v56 }
  0xc8   : > { %v808_v45 = vpop.permute.xlu0 %807  ;;  %v1132_v4 = vshll.u32 %v4766_v41, 16 }
  0xc9   : > { %v2093_v49 = vrot.slane %v2091_v29, 3  ;;  %v2096_v26 = vrot.slane %v2094_v18, 4  ;;  %v1626_v62 = vsel %vm1614_vm3, %v4112_v3, %v808_v45  ;;  %1413 = vrot.lane.b32.xlu1 %v1358_v11, %s3883_s20  ;;  %v4790_v48 = vsel %vm556_vm1, %v4618_v31, %v4770_v19 }
  0xca   : > { %1494 = vrot.lane.b32.xlu0 %v4744_v14, %s3886_s24  ;;  %v1684_v3 = vsel %vm1674_vm4, %v1626_v62, %v923_v6  ;;  %v2136_v29 = vrot.slane %v2134_v57, 3  ;;  %v2139_v18 = vrot.slane %v2137_v32, 4  ;;  %v1194_v45 = vrot.slane %v1192_v55, 4 }
  0xcb   : > { %v1290_v50 = vpop.permute.xlu1 %1289  ;;  %v4777_v15 = vor.u32 %v2096_v26, %v2093_v49 }
  0xcc   : > { %v990_v58 = vpop.permute.xlu0 %989  ;;  %v4824_v55 = vor.u32 %v2139_v18, %v2136_v29 }
  0xcd   : > { %v1741_v17 = vsel %vm1731_vm5, %v1684_v3, %v990_v58  ;;  %1480 = vrot.lane.b32.xlu1 %v4766_v41, %s3886_s24  ;;  %v2098_v10 = vsel %vm2041_vm2, %v2080_v7, %v4777_v15  ;;  %v1195_v7 = vshll.u32 %v4744_v14, 16  ;;  %v4810_v3 = vld [vmem:[%s4004_s25 + $0xa8] sm:$0xf] }
  0xce   : > { %1579 = vrot.lane.b32.xlu0 %v4775_v47, %s3887_s18  ;;  %2724 = vmatmul.mubr.bf16.gmra.mxu0 %v2098_v10  ;;  %v1798_v11 = vsel %vm1788_vm6, %v1741_v17, %v1290_v50  ;;  %v366_v50 = vld [vmem:[%s4004_s25 + $0xa4] sm:$0xf]  ;;  %v2141_v18 = vsel %vm2041_vm2, %v4299_v35, %v4824_v55 }
  0xcf   : > { %v1471_v44 = vpop.permute.xlu1 %1470  ;;  %3517 = vmatprep.mubr.msk.bf16.mxu0 %vm1614_vm3, %v4311_v37  ;;  %v1129_v37 = vshrl.u32 %v4766_v41, 16  ;;  %v1197_v49 = vrot.slane %v1195_v7, 5 }
  0xd0   : > { %v1404_v25 = vpop.permute.xlu0 %1403 }
  0xd1   : > { %v1855_v31 = vsel %vm1845_vm7, %v1798_v11, %v1404_v25  ;;  %1565 = vrot.lane.b32.xlu1 %v4790_v48, %s3887_s18  ;;  %v1131_v32 = vrot.slane %v1129_v37, 4  ;;  %v4826_v11 = vor.u32 %v1197_v49, %v1194_v45  ;;  %v2151_v49 = vshrl.u32 %v4682_v60, 16 }
  0xd2   : > { %833 = vrot.lane.b32.xlu0 %v4585_v53, %s3884_s23  ;;  %v1912_v26 = vsel %vm1902_vm8, %v1855_v31, %v1471_v44  ;;  %v6537_v53 = vrot.slane %v4295_v33, 5  ;;  %v1134_v44 = vrot.slane %v1132_v4, 5  ;;  %v1373_v4 = vrot.slane %v4744_v14, 5 }
  0xd3   : > { %v810_v6 = vpop.permute.xlu1 %809 }
  0xd4   : > { %v1556_v62 = vpop.permute.xlu0 %1555  ;;  %v4820_v17 = vsel %vm858_vm0, %v6537_v53, %v878_v51  ;;  %v1628_v33 = vsel %vm1614_vm3, %v4160_v38, %v810_v6  ;;  %v4838_v37 = vor.u32 %v1134_v44, %v1131_v32  ;;  %v1199_v38 = vsel %vm556_vm1, %v4686_v42, %v4826_v11 }
  0xd5   : > { %v1969_v58 = vsel %vm1959_vm9, %v1912_v26, %v1556_v62  ;;  %819 = vrot.lane.b32.xlu1 %v4413_v23, %s3884_s23  ;;  %v4829_v23 = vcombine.low %v366_v50, %v4810_v3 }
  0xd6   : > { %v2108_v10 = vshrl.u32 %v1969_v58, 16  ;;  %v2111_v57 = vshll.u32 %v1969_v58, 16  ;;  %948 = vrot.lane.b32.xlu0 %v4539_v20, %s3882_s19  ;;  %v1136_v35 = vsel %vm556_vm1, %v4708_v46, %v4838_v37 }
  0xd7   : > { %v992_v7 = vpop.permute.xlu1 %991  ;;  %v737_v6 = vshrl.u32 %v4829_v23, 16  ;;  %v740_v45 = vshll.u32 %v4829_v23, 16 }
  0xd8   : > { %v2110_v25 = vrot.slane %v2108_v10, 3  ;;  %v2113_v31 = vrot.slane %v2111_v57, 4  ;;  %v925_v26 = vpop.permute.xlu0 %924 }
  0xd9   : > { %v1686_v62 = vsel %vm1674_vm4, %v1628_v33, %v925_v26  ;;  %934 = vrot.lane.b32.xlu1 %v4820_v17, %s3882_s19  ;;  %v739_v32 = vrot.slane %v737_v6, 4  ;;  %v742_v44 = vrot.slane %v740_v45, 5 }
  0xda   : > { %v2114_v20 = vor.u32 %v2113_v31, %v2110_v25  ;;  %1015 = vrot.lane.b32.xlu0 %v4502_v39, %s3881_s12  ;;  %v2154_v39 = vshll.u32 %v4682_v60, 16  ;;  %v1743_v58 = vsel %vm1731_vm5, %v1686_v62, %v992_v7  ;;  %v1359_v60 = vrot.slane %v4766_v41, 5 }
  0xdb   : > { %v1406_v29 = vpop.permute.xlu1 %1405  ;;  %v2153_v7 = vrot.slane %v2151_v49, 3  ;;  %v4879_v62 = vcombine.low %v4650_v61, %v366_v50  ;;  %v4881_v6 = vor.u32 %v742_v44, %v739_v32  ;;  %v2171_v32 = vshll.u32 %v4820_v17, 16 }
  0xdc   : > { %v1292_v53 = vpop.permute.xlu0 %1291  ;;  %v2115_v10 = vsel %vm2041_vm2, %v4777_v15, %v2114_v20  ;;  %v1374_v15 = vsel %vm858_vm0, %v1371_v59, %v1373_v4  ;;  %v2156_v33 = vrot.slane %v2154_v39, 4  ;;  %v1360_v59 = vsel %vm858_vm0, %v1357_v16, %v1359_v60 }
  0xdd   : > { %v1800_v42 = vsel %vm1788_vm6, %v1743_v58, %v1292_v53  ;;  %2731 = vmatmul.mubr.bf16.gmra.mxu0 %v2115_v10  ;;  %1001 = vrot.lane.b32.xlu1 %v4534_v27, %s3881_s12  ;;  %v4890_v16 = vcombine.low %v4690_v24, %v4317_v40  ;;  %v4897_v50 = vsel %vm556_vm1, %v4755_v56, %v4881_v6  ;;  %v1204_v56 = vshll.u32 %v4879_v62, 16 }
  0xde   : > { %1315 = vrot.lane.b32.xlu0 %v1199_v38, %s3885_s10  ;;  %3518 = vmatprep.mubr.msk.bf16.mxu0 %vm1614_vm3, %v2141_v18  ;;  %v1857_v25 = vsel %vm1845_vm7, %v1800_v42, %v1406_v29  ;;  %v4883_v45 = vor.u32 %v2156_v33, %v2153_v7 }
  0xdf   : > { %v1558_v57 = vpop.permute.xlu1 %1557 }
  0xe0   : > { %v1473_v31 = vpop.permute.xlu0 %1472 }
  0xe1   : > { %v1914_v46 = vsel %vm1902_vm8, %v1857_v25, %v1473_v31  ;;  %1301 = vrot.lane.b32.xlu1 %v1136_v35, %s3885_s10  ;;  %v1206_v25 = vrot.slane %v1204_v56, 5  ;;  %v1141_v31 = vshll.u32 %v4890_v16, 16 }
  0xe2   : > { %v1971_v26 = vsel %vm1959_vm9, %v1914_v46, %v1558_v57  ;;  %1429 = vrot.lane.b32.xlu0 %v1374_v15, %s3883_s20  ;;  %v1201_v57 = vshrl.u32 %v4879_v62, 16  ;;  %v4914_v15 = vsel %vm556_vm1, %v4770_v19, %v4383_v36  ;;  %v880_v36 = vrot.slane %v4534_v27, 5 }
  0xe3   : > { %v2125_v38 = vshrl.u32 %v1971_v26, 16  ;;  %v2128_v29 = vshll.u32 %v1971_v26, 16  ;;  %v927_v18 = vpop.permute.xlu1 %926  ;;  %v2173_v26 = vrot.slane %v2171_v32, 4 }
  0xe4   : > { %v812_v49 = vpop.permute.xlu0 %811  ;;  %v1203_v19 = vrot.slane %v1201_v57, 4 }
  0xe5   : > { %v2127_v39 = vrot.slane %v2125_v38, 3  ;;  %v2130_v58 = vrot.slane %v2128_v29, 4  ;;  %v1630_v53 = vsel %vm1614_vm3, %v4187_v54, %v812_v49  ;;  %1415 = vrot.lane.b32.xlu1 %v1360_v59, %s3883_s20  ;;  %v2158_v54 = vsel %vm2041_vm2, %v4824_v55, %v4883_v45  ;;  %v4931_v49 = vld [vmem:[%s4004_s25 + $0xb0] sm:$0xf] }
  0xe6   : > { %1496 = vrot.lane.b32.xlu0 %v4879_v62, %s3886_s24  ;;  %v1688_v42 = vsel %vm1674_vm4, %v1630_v53, %v927_v18  ;;  %v2168_v55 = vshrl.u32 %v4820_v17, 16  ;;  %v1138_v17 = vshrl.u32 %v4890_v16, 16  ;;  %v368_v18 = vld [vmem:[%s4004_s25 + $0xac] sm:$0xf] }
  0xe7   : > { %v1294_v61 = vpop.permute.xlu1 %1293  ;;  %v2131_v10 = vor.u32 %v2130_v58, %v2127_v39  ;;  %v4941_v58 = vor.u32 %v1206_v25, %v1203_v19  ;;  %v4946_v57 = vcombine.low %v368_v18, %v4931_v49 }
  0xe8   : > { %v994_v35 = vpop.permute.xlu0 %993  ;;  %v2170_v46 = vrot.slane %v2168_v55, 3 }
  0xe9   : > { %v1745_v40 = vsel %vm1731_vm5, %v1688_v42, %v994_v35  ;;  %1482 = vrot.lane.b32.xlu1 %v4890_v16, %s3886_s24  ;;  %v2132_v24 = vsel %vm2041_vm2, %v2114_v20, %v2131_v10  ;;  %v6538_v42 = vld [vmem:[#allocation17_spill] sm:$0xff]  ;;  %v1140_v35 = vrot.slane %v1138_v17, 4  ;;  %v1208_v2 = vsel %vm556_vm1, %v4826_v11, %v4941_v58 }
  0xea   : > { %1581 = vrot.lane.b32.xlu0 %v4897_v50, %s3887_s18  ;;  %2739 = vmatmul.mubr.bf16.gmra.mxu0 %v2132_v24  ;;  %v1802_v20 = vsel %vm1788_vm6, %v1745_v40, %v1294_v61  ;;  %v2174_v40 = vor.u32 %v2173_v26, %v2170_v46  ;;  %v746_v25 = vshrl.u32 %v4946_v57, 16  ;;  %v749_v17 = vshll.u32 %v4946_v57, 16 }
  0xeb   : > { %v1475_v44 = vpop.permute.xlu1 %1474  ;;  %3519 = vmatprep.mubr.msk.bf16.mxu0 %vm1614_vm3, %v2158_v54  ;;  %v1143_v54 = vrot.slane %v1141_v31, 5 }
  0xec   : > { %v1408_v7 = vpop.permute.xlu0 %1407  ;;  %v2175_v11 = vsel %vm2041_vm2, %v4883_v45, %v2174_v40 }
  0xed   : > { %v1859_v33 = vsel %vm1845_vm7, %v1802_v20, %v1408_v7  ;;  %1567 = vrot.lane.b32.xlu1 %v4914_v15, %s3887_s18  ;;  %v4956_v20 = vor.u32 %v1143_v54, %v1140_v35  ;;  %v1375_v7 = vrot.slane %v4879_v62, 5 }
  0xee   : > { %835 = vrot.lane.b32.xlu0 %v4622_v13, %s3884_s23  ;;  %v1916_v38 = vsel %vm1902_vm8, %v1859_v33, %v1475_v44  ;;  %v881_v13 = vsel %vm858_vm0, %v878_v51, %v880_v36  ;;  %v6539_v51 = vld [vmem:[#allocation5_spill] sm:$0xff] }
  0xef   : > { %v814_v59 = vpop.permute.xlu1 %813  ;;  %v2185_v26 = vshrl.u32 %v881_v13, 16 }
  0xf0   : > { %v1560_v29 = vpop.permute.xlu0 %1559  ;;  %v1632_v32 = vsel %vm1614_vm3, %v6539_v51, %v814_v59  ;;  %v2188_v59 = vshll.u32 %v881_v13, 16 }
  0xf1   : > { %v1973_v39 = vsel %vm1959_vm9, %v1916_v38, %v1560_v29  ;;  %821 = vrot.lane.b32.xlu1 %v4635_v28, %s3884_s23  ;;  %v1145_v29 = vsel %vm556_vm1, %v4838_v37, %v4956_v20  ;;  %v2187_v35 = vrot.slane %v2185_v26, 3 }
  0xf2   : > { %v2142_v53 = vshrl.u32 %v1973_v39, 16  ;;  %v2145_v61 = vshll.u32 %v1973_v39, 16  ;;  %950 = vrot.lane.b32.xlu0 %v6538_v42, %s3882_s19  ;;  %v1361_v39 = vrot.slane %v4890_v16, 5  ;;  %v2190_v37 = vrot.slane %v2188_v59, 4 }
  0xf3   : > { %v996_v24 = vpop.permute.xlu1 %995 }
  0xf4   : > { %v2144_v28 = vrot.slane %v2142_v53, 3  ;;  %v2147_v56 = vrot.slane %v2145_v61, 4  ;;  %v929_v55 = vpop.permute.xlu0 %928  ;;  %v748_v53 = vrot.slane %v746_v25, 4  ;;  %v751_v61 = vrot.slane %v749_v17, 5 }
  0xf5   : > { %936 = vrot.lane.b32.xlu1 %v881_v13, %s3882_s19  ;;  %v1690_v33 = vsel %vm1674_vm4, %v1632_v32, %v929_v55  ;;  %v1376_v13 = vsel %vm858_vm0, %v1373_v4, %v1375_v7 }
  0xf6   : > { %v2148_v44 = vor.u32 %v2147_v56, %v2144_v28  ;;  %1017 = vrot.lane.b32.xlu0 %v4663_v0, %s3881_s12  ;;  %v1747_v38 = vsel %vm1731_vm5, %v1690_v33, %v996_v24  ;;  %v1362_v24 = vsel %vm858_vm0, %v1359_v60, %v1361_v39  ;;  %v4991_v28 = vcombine.low %v4810_v3, %v368_v18 }
  0xf7   : > { %v1410_v19 = vpop.permute.xlu1 %1409  ;;  %v4994_v55 = vor.u32 %v751_v61, %v748_v53  ;;  %v5002_v60 = vor.u32 %v2190_v37, %v2187_v35  ;;  %v370_v37 = vld [vmem:[%s4004_s25 + $0xb4] sm:$0xf] }
  0xf8   : > { %v1296_v31 = vpop.permute.xlu0 %1295  ;;  %v2149_v46 = vsel %vm2041_vm2, %v2131_v10, %v2148_v44 }
  0xf9   : > { %2746 = vmatmul.mubr.bf16.gmra.mxu0 %v2149_v46  ;;  %1003 = vrot.lane.b32.xlu1 %v4711_v1, %s3881_s12  ;;  %v1804_v45 = vsel %vm1788_vm6, %v1747_v38, %v1296_v31  ;;  %v5009_v25 = vsel %vm556_vm1, %v4881_v6, %v4994_v55  ;;  %v6540_v31 = vld [vmem:[#allocation9_spill] sm:$0xff]  ;;  %v2192_v46 = vsel %vm2041_vm2, %v2174_v40, %v5002_v60  ;;  %v1210_v6 = vshrl.u32 %v4991_v28, 16 }
  0xfa   : > { %1317 = vrot.lane.b32.xlu0 %v1208_v2, %s3885_s10  ;;  %3520 = vmatprep.mubr.msk.bf16.mxu0 %vm1614_vm3, %v2175_v11  ;;  %v1861_v54 = vsel %vm1845_vm7, %v1804_v45, %v1410_v19  ;;  %v1213_v38 = vshll.u32 %v4991_v28, 16  ;;  %v6541_v45 = vld [vmem:[#allocation10_spill] sm:$0xff]  ;;  %v882_v40 = vrot.slane %v4711_v1, 5 }
  0xfb   : > { %v4975_v10 = vpop.permute.xlu1 %827  ;;  %v1212_v61 = vrot.slane %v1210_v6, 4 }
  0xfc   : > { %v1477_v42 = vpop.permute.xlu0 %1476 }
  0xfd   : > { %1303 = vrot.lane.b32.xlu1 %v1145_v29, %s3885_s10  ;;  %v1918_v4 = vsel %vm1902_vm8, %v1861_v54, %v1477_v42  ;;  %v1215_v42 = vrot.slane %v1213_v38, 5  ;;  %v5035_v54 = vld [vmem:[%s4004_s25 + $0xb8] sm:$0xf]  ;;  %v1363_v38 = vrot.slane %v6540_v31, 5 }
  0xfe   : > { %1431 = vrot.lane.b32.xlu0 %v1376_v13, %s3883_s20  ;;  %v1150_v13 = vshll.u32 %v6540_v31, 16 }
  0xff   : > { %v1562_v56 = vpop.permute.xlu1 %1561 }
 0x100   : > { %v1975_v2 = vsel %vm1959_vm9, %v1918_v4, %v1562_v56  ;;  %v4997_v51 = vpop.permute.xlu0 %829  ;;  %v1152_v4 = vrot.slane %v1150_v13, 5 }
 0x101   : > { %v2159_v32 = vshrl.u32 %v1975_v2, 16  ;;  %v2162_v33 = vshll.u32 %v1975_v2, 16  ;;  %1417 = vrot.lane.b32.xlu1 %v1362_v24, %s3883_s20  ;;  %v5048_v2 = vor.u32 %v1215_v42, %v1212_v61  ;;  %v1646_v42 = vsel %vm1614_vm3, %v6540_v31, %v4975_v10 }
 0x102   : > { %1498 = vrot.lane.b32.xlu0 %v4991_v28, %s3886_s24 }
 0x103   : > { %v2161_v3 = vrot.slane %v2159_v32, 3  ;;  %v2164_v18 = vrot.slane %v2162_v33, 4  ;;  %v5004_v19 = vpop.permute.xlu1 %944  ;;  %v5051_v32 = vcombine.low %v370_v37, %v5035_v54 }
 0x104   : > { %v943_v17 = vpop.permute.xlu0 %942 }
 0x105   : > { %v5011_v11 = vor.u32 %v2164_v18, %v2161_v3  ;;  %1484 = vrot.lane.b32.xlu1 %v6540_v31, %s3886_s24  ;;  %v755_v3 = vshrl.u32 %v5051_v32, 16  ;;  %v758_v18 = vshll.u32 %v5051_v32, 16 }
 0x106   : > { %1583 = vrot.lane.b32.xlu0 %v5009_v25, %s3887_s18 }
 0x107   : > { %v1010_v26 = vpop.permute.xlu1 %1009  ;;  %v2166_v59 = vsel %vm2041_vm2, %v2148_v44, %v5011_v11  ;;  %v1147_v44 = vshrl.u32 %v6540_v31, 16  ;;  %v760_v13 = vrot.slane %v758_v18, 5 }
 0x108   : > { %v5023_v29 = vpop.permute.xlu0 %815  ;;  %2753 = vmatmul.mubr.bf16.gmra.mxu0 %v2166_v59  ;;  %v6542_v59 = vld [vmem:[#allocation7_spill] sm:$0xff] }
 0x109   : > { %1569 = vrot.lane.b32.xlu1 %v6541_v45, %s3887_s18  ;;  %3521 = vmatprep.mubr.msk.bf16.mxu0 %vm1614_vm3, %v2192_v46  ;;  %v1149_v24 = vrot.slane %v1147_v44, 4  ;;  %v757_v44 = vrot.slane %v755_v3, 4 }
 0x10a   : > { %837 = vrot.lane.b32.xlu0 %v4775_v47, %s3884_s23  ;;  %v5046_v47 = vsel %vm858_vm0, %v880_v36, %v882_v40  ;;  %v1377_v36 = vrot.slane %v4991_v28, 5 }
 0x10b   : > { %v931_v53 = vpop.permute.xlu1 %930 }
 0x10c   : > { %v1012_v35 = vpop.permute.xlu0 %1011 }
 0x10d   : > { %823 = vrot.lane.b32.xlu1 %v4790_v48, %s3884_s23  ;;  %v1217_v48 = vsel %vm556_vm1, %v4941_v58, %v5048_v2  ;;  %v1378_v58 = vsel %vm858_vm0, %v1375_v7, %v1377_v36  ;;  %v1704_v7 = vsel %vm1674_vm4, %v1646_v42, %v943_v17 }
 0x10e   : > { %952 = vrot.lane.b32.xlu0 %v4699_v43, %s3882_s19  ;;  %v5057_v43 = vor.u32 %v1152_v4, %v1149_v24  ;;  %v5088_v24 = vcombine.low %v4931_v49, %v370_v37  ;;  %v1761_v3 = vsel %vm1731_vm5, %v1704_v7, %v1010_v26  ;;  %v6543_v49 = vld [vmem:[#allocation12_spill] sm:$0xff] }
 0x10f   : > { %v1312_v56 = vpop.permute.xlu1 %1311 }
 0x110   : > { %v1310_v33 = vpop.permute.xlu0 %1309  ;;  %v1154_v6 = vsel %vm556_vm1, %v4956_v20, %v5057_v43  ;;  %v1364_v20 = vsel %vm858_vm0, %v1361_v39, %v1363_v38  ;;  %v1648_v39 = vsel %vm1614_vm3, %v6543_v49, %v4997_v51  ;;  %v1379_v1 = vrot.slane %v5088_v24, 5 }
 0x111   : > { %938 = vrot.lane.b32.xlu1 %v5046_v47, %s3882_s19  ;;  %v1818_v10 = vsel %vm1788_vm6, %v1761_v3, %v1310_v33  ;;  %v1706_v33 = vsel %vm1674_vm4, %v1648_v39, %v5004_v19 }
 0x112   : > { %1019 = vrot.lane.b32.xlu0 %v4829_v23, %s3881_s12  ;;  %v1763_v42 = vsel %vm1731_vm5, %v1706_v33, %v1012_v35 }
 0x113   : > { %v1424_v27 = vpop.permute.xlu1 %1423  ;;  %v1820_v7 = vsel %vm1788_vm6, %v1763_v42, %v1312_v56 }
 0x114   : > { %v998_v46 = vpop.permute.xlu0 %997 }
 0x115   : > { %1005 = vrot.lane.b32.xlu1 %v6542_v59, %s3881_s12 }
 0x116   : > { %1319 = vrot.lane.b32.xlu0 %v1217_v48, %s3885_s10  ;;  %v5091_v48 = vor.u32 %v760_v13, %v757_v44  ;;  %v6544_v13 = vld [vmem:[#allocation6_spill] sm:$0xff] }
 0x117   : > { %v1298_v45 = vpop.permute.xlu1 %1297  ;;  %v1634_v51 = vsel %vm1614_vm3, %v6544_v13, %v5023_v29 }
 0x118   : > { %v1426_v61 = vpop.permute.xlu0 %1425  ;;  %v5106_v26 = vsel %vm556_vm1, %v4994_v55, %v5091_v48  ;;  %v898_v55 = vrot.slane %v4829_v23, 5  ;;  %v1692_v19 = vsel %vm1674_vm4, %v1634_v51, %v931_v53 }
 0x119   : > { %1305 = vrot.lane.b32.xlu1 %v1154_v6, %s3885_s10  ;;  %v1875_v6 = vsel %vm1845_vm7, %v1818_v10, %v1424_v27  ;;  %v2202_v27 = vshrl.u32 %v5046_v47, 16  ;;  %v1749_v29 = vsel %vm1731_vm5, %v1692_v19, %v998_v46  ;;  %v1877_v35 = vsel %vm1845_vm7, %v1820_v7, %v1426_v61  ;;  %v6545_v46 = vld [vmem:[#allocation13_spill] sm:$0xff] }
 0x11a   : > { %1433 = vrot.lane.b32.xlu0 %v1378_v58, %s3883_s20  ;;  %v1806_v39 = vsel %vm1788_vm6, %v1749_v29, %v1298_v45 }
 0x11b   : > { %v1493_v4 = vpop.permute.xlu1 %1492  ;;  %v2204_v56 = vrot.slane %v2202_v27, 3  ;;  %v6546_v27 = vrot.slane %v4663_v0, 5 }
 0x11c   : > { %v1491_v18 = vpop.permute.xlu0 %1490  ;;  %v1934_v53 = vsel %vm1902_vm8, %v1877_v35, %v1493_v4  ;;  %v372_v35 = vld [vmem:[%s4004_s25 + $0xbc] sm:$0xf] }
 0x11d   : > { %1419 = vrot.lane.b32.xlu1 %v1364_v20, %s3883_s20  ;;  %v1932_v17 = vsel %vm1902_vm8, %v1875_v6, %v1491_v18  ;;  %v2205_v20 = vshll.u32 %v5046_v47, 16  ;;  %v1219_v47 = vshrl.u32 %v5088_v24, 16  ;;  %v1222_v6 = vshll.u32 %v5088_v24, 16 }
 0x11e   : > { %1500 = vrot.lane.b32.xlu0 %v5088_v24, %s3886_s24 }
 0x11f   : > { %v1576_v37 = vpop.permute.xlu1 %1575  ;;  %v1224_v19 = vrot.slane %v1222_v6, 5 }
 0x120   : > { %v1989_v58 = vsel %vm1959_vm9, %v1932_v17, %v1576_v37  ;;  %v1412_v44 = vpop.permute.xlu0 %1411  ;;  %v2207_v37 = vrot.slane %v2205_v20, 4  ;;  %v1221_v20 = vrot.slane %v1219_v47, 4  ;;  %v6547_v47 = vrot.slane %v6542_v59, 5 }
 0x121   : > { %1486 = vrot.lane.b32.xlu1 %v6543_v49, %s3886_s24  ;;  %v2278_v3 = vshrl.u32 %v1989_v58, 16  ;;  %v2281_v18 = vshll.u32 %v1989_v58, 16  ;;  %v1863_v33 = vsel %vm1845_vm7, %v1806_v39, %v1412_v44  ;;  %v5142_v44 = vsel %vm858_vm0, %v6546_v27, %v898_v55  ;;  %v5147_v39 = vld [vmem:[%s4004_s25 + $0xc0] sm:$0xf] }
 0x122   : > { %1585 = vrot.lane.b32.xlu0 %v5106_v26, %s3887_s18  ;;  %v5162_v6 = vsel %vm858_vm0, %v882_v40, %v6547_v47  ;;  %v5218_v47 = vld [vmem:[%s4004_s25 + $0xc8] sm:$0xf] }
 0x123   : > { %v1479_v10 = vpop.permute.xlu1 %1478  ;;  %v2280_v61 = vrot.slane %v2278_v3, 3  ;;  %v2283_v13 = vrot.slane %v2281_v18, 4 }
 0x124   : > { %v1578_v17 = vpop.permute.xlu0 %1577  ;;  %v1920_v45 = vsel %vm1902_vm8, %v1863_v33, %v1479_v10 }
 0x125   : > { %v1991_v58 = vsel %vm1959_vm9, %v1934_v53, %v1578_v17  ;;  %1571 = vrot.lane.b32.xlu1 %v6545_v46, %s3887_s18  ;;  %v5151_v53 = vor.u32 %v2283_v13, %v2280_v61  ;;  %v5164_v17 = vor.u32 %v2207_v37, %v2204_v56  ;;  %v5169_v61 = vcombine.low %v372_v35, %v5147_v39 }
 0x126   : > { %v2295_v51 = vshrl.u32 %v1991_v58, 16  ;;  %v2298_v42 = vshll.u32 %v1991_v58, 16  ;;  %839 = vrot.lane.b32.xlu0 %v4897_v50, %s3884_s23 }
 0x127   : > { %v1564_v4 = vpop.permute.xlu1 %1563  ;;  %v2209_v40 = vsel %vm2041_vm2, %v5002_v60, %v5164_v17  ;;  %v6549_v60 = vld [vmem:[#allocation16_spill] sm:$0xff] }
 0x128   : > { %v2297_v7 = vrot.slane %v2295_v51, 3  ;;  %v2300_v3 = vrot.slane %v2298_v42, 4  ;;  %v1977_v18 = vsel %vm1959_vm9, %v1920_v45, %v1564_v4  ;;  %v832_v29 = vpop.permute.xlu0 %831  ;;  %v764_v45 = vshrl.u32 %v5169_v61, 16 }
 0x129   : > { %v2176_v50 = vshrl.u32 %v1977_v18, 16  ;;  %v2179_v10 = vshll.u32 %v1977_v18, 16  ;;  %825 = vrot.lane.b32.xlu1 %v4914_v15, %s3884_s23  ;;  %v5166_v15 = vor.u32 %v1224_v19, %v1221_v20  ;;  %v767_v4 = vshll.u32 %v5169_v61, 16 }
 0x12a   : > { %v5153_v0 = vor.u32 %v2300_v3, %v2297_v7  ;;  %954 = vrot.lane.b32.xlu0 %v5142_v44, %s3882_s19  ;;  %v1380_v20 = vsel %vm858_vm0, %v1377_v36, %v1379_v1  ;;  %v766_v19 = vrot.slane %v764_v45, 4  ;;  %v6550_v18 = vrot.slane %v6543_v49, 5 }
 0x12b   : > { %v2178_v33 = vrot.slane %v2176_v50, 3  ;;  %v2181_v58 = vrot.slane %v2179_v10, 4  ;;  %v818_v46 = vpop.permute.xlu1 %817  ;;  %v1226_v42 = vsel %vm556_vm1, %v5048_v2, %v5166_v15  ;;  %v769_v7 = vrot.slane %v767_v4, 5  ;;  %v374_v10 = vld [vmem:[%s4004_s25 + $0xc4] sm:$0xf] }
 0x12c   : > { %v947_v13 = vpop.permute.xlu0 %946  ;;  %v2302_v59 = vsel %vm2041_vm2, %v5151_v53, %v5153_v0  ;;  %v5214_v50 = vcombine.low %v5035_v54, %v372_v35  ;;  %v5226_v31 = vcombine.low %v374_v10, %v5218_v47  ;;  %v6551_v54 = vld [vmem:[#allocation11_spill] sm:$0xff]  ;;  %v2219_v4 = vshrl.u32 %v5162_v6, 16 }
 0x12d   : > { %v5174_v51 = vor.u32 %v2181_v58, %v2178_v33  ;;  %2812 = vmatmul.mubr.bf16.vlgmr.msra.gmra.mxu1 %v2302_v59  ;;  %940 = vrot.lane.b32.xlu1 %v5162_v6, %s3882_s19  ;;  %v5220_v33 = vor.u32 %v769_v7, %v766_v19  ;;  %v2338_v58 = vshrl.u32 %v5142_v44, 16  ;;  %v2222_v19 = vshll.u32 %v5162_v6, 16 }
 0x12e   : > { %1021 = vrot.lane.b32.xlu0 %v4946_v57, %s3881_s12  ;;  %3529 = vmatprep.mubr.msk.bf16.mxu1 %vm1614_vm3, %v4760_v52  ;;  %v6548_v52 = vld [vmem:[#allocation8_spill] sm:$0xff]  ;;  %v900_v7 = vrot.slane %v4946_v57, 5 }
 0x12f   : > { %v933_v56 = vpop.permute.xlu1 %932  ;;  %v2183_v37 = vsel %vm2041_vm2, %v5011_v11, %v5174_v51  ;;  %v1163_v11 = vsel %vm556_vm1, %v5057_v43, %v6549_v60  ;;  %v1366_v43 = vsel %vm858_vm0, %v1363_v38, %v6550_v18  ;;  %v1650_v38 = vsel %vm1614_vm3, %v6551_v54, %v832_v29 }
 0x130   : > { %v1014_v27 = vpop.permute.xlu0 %1013  ;;  %2761 = vmatmul.mubr.bf16.gmra.mxu0 %v2183_v37  ;;  %v5235_v35 = vsel %vm556_vm1, %v5091_v48, %v5220_v33  ;;  %v1228_v37 = vshrl.u32 %v5214_v50, 16  ;;  %v1708_v45 = vsel %vm1674_vm4, %v1650_v38, %v947_v13  ;;  %v773_v29 = vshrl.u32 %v5226_v31, 16 }
 0x131   : > { %1007 = vrot.lane.b32.xlu1 %v6548_v52, %s3881_s12  ;;  %3522 = vmatprep.mubr.msk.bf16.mxu0 %vm1614_vm3, %v2209_v40  ;;  %v2341_v40 = vshll.u32 %v5142_v44, 16  ;;  %v1231_v44 = vshll.u32 %v5214_v50, 16  ;;  %v776_v48 = vshll.u32 %v5226_v31, 16 }
 0x132   : > { %1321 = vrot.lane.b32.xlu0 %v1226_v42, %s3885_s10  ;;  %v2340_v42 = vrot.slane %v2338_v58, 3  ;;  %v1230_v58 = vrot.slane %v1228_v37, 4 }
 0x133   : > { %v1000_v2 = vpop.permute.xlu1 %999  ;;  %v2343_v60 = vrot.slane %v2341_v40, 4  ;;  %v1233_v40 = vrot.slane %v1231_v44, 5 }
 0x134   : > { %v1314_v3 = vpop.permute.xlu0 %1313 }
 0x135   : > { %1307 = vrot.lane.b32.xlu1 %v1163_v11, %s3885_s10  ;;  %v1765_v11 = vsel %vm1731_vm5, %v1708_v45, %v1014_v27 }
 0x136   : > { %1435 = vrot.lane.b32.xlu0 %v1380_v20, %s3883_s20  ;;  %v1636_v20 = vsel %vm1614_vm3, %v4327_v63, %v818_v46  ;;  %v1822_v13 = vsel %vm1788_vm6, %v1765_v11, %v1314_v3  ;;  %v1381_v46 = vrot.slane %v5214_v50, 5  ;;  %v2224_v11 = vrot.slane %v2222_v19, 4 }
 0x137   : > { %v1300_v36 = vpop.permute.xlu1 %1299  ;;  %v1694_v27 = vsel %vm1674_vm4, %v1636_v20, %v933_v56  ;;  %v775_v56 = vrot.slane %v773_v29, 4  ;;  %v5273_v29 = vor.u32 %v2343_v60, %v2340_v42 }
 0x138   : > { %v1428_v59 = vpop.permute.xlu0 %1427  ;;  %v1751_v38 = vsel %vm1731_vm5, %v1694_v27, %v1000_v2  ;;  %v1382_v23 = vsel %vm858_vm0, %v1379_v1, %v1381_v46 }
 0x139   : > { %1421 = vrot.lane.b32.xlu1 %v1366_v43, %s3883_s20  ;;  %v1879_v18 = vsel %vm1845_vm7, %v1822_v13, %v1428_v59  ;;  %v1808_v3 = vsel %vm1788_vm6, %v1751_v38, %v1300_v36  ;;  %v778_v59 = vrot.slane %v776_v48, 5  ;;  %v5271_v36 = vsel %vm858_vm0, %v898_v55, %v900_v7  ;;  %v5304_v38 = vld [vmem:[%s4004_s25 + $0xd0] sm:$0xf] }
 0x13a   : > { %1502 = vrot.lane.b32.xlu0 %v5214_v50, %s3886_s24 }
 0x13b   : > { %v1414_v49 = vpop.permute.xlu1 %1413  ;;  %v5288_v55 = vor.u32 %v778_v59, %v775_v56 }
 0x13c   : > { %v1495_v52 = vpop.permute.xlu0 %1494  ;;  %v1865_v37 = vsel %vm1845_vm7, %v1808_v3, %v1414_v49 }
 0x13d   : > { %1488 = vrot.lane.b32.xlu1 %v6551_v54, %s3886_s24  ;;  %v2221_v54 = vrot.slane %v2219_v4, 3  ;;  %v1936_v63 = vsel %vm1902_vm8, %v1879_v18, %v1495_v52 }
 0x13e   : > { %1587 = vrot.lane.b32.xlu0 %v5235_v35, %s3887_s18 }
 0x13f   : > { %v1481_v43 = vpop.permute.xlu1 %1480  ;;  %v5296_v60 = vor.u32 %v2224_v11, %v2221_v54 }
 0x140   : > { %v1580_v6 = vpop.permute.xlu0 %1579  ;;  %v1922_v2 = vsel %vm1902_vm8, %v1865_v37, %v1481_v43 }
 0x141   : > { %v1993_v45 = vsel %vm1959_vm9, %v1936_v63, %v1580_v6  ;;  %1573 = vrot.lane.b32.xlu1 %v4642_v22, %s3887_s18  ;;  %v1234_v22 = vor.u32 %v1233_v40, %v1230_v58  ;;  %v376_v40 = vld [vmem:[%s4004_s25 + $0xcc] sm:$0xf]  ;;  %v2345_v63 = vsel %vm2041_vm2, %v4746_v9, %v5273_v29 }
 0x142   : > { %v2312_v44 = vshrl.u32 %v1993_v45, 16  ;;  %v2315_v4 = vshll.u32 %v1993_v45, 16  ;;  %841 = vrot.lane.b32.xlu0 %v5009_v25, %s3884_s23  ;;  %v5279_v25 = vcombine.low %v5147_v39, %v374_v10  ;;  %v902_v45 = vrot.slane %v5051_v32, 5 }
 0x143   : > { %v1566_v52 = vpop.permute.xlu1 %1565  ;;  %v1235_v1 = vsel %vm556_vm1, %v5166_v15, %v1234_v22  ;;  %v5318_v15 = vsel %vm556_vm1, %v5220_v33, %v5288_v55  ;;  %v5323_v59 = vcombine.low %v376_v40, %v5304_v38 }
 0x144   : > { %v2314_v48 = vrot.slane %v2312_v44, 3  ;;  %v2317_v49 = vrot.slane %v2315_v4, 4  ;;  %v1979_v20 = vsel %vm1959_vm9, %v1922_v2, %v1566_v52  ;;  %v5276_v19 = vpop.permute.xlu0 %833  ;;  %v1237_v39 = vshrl.u32 %v5279_v25, 16 }
 0x145   : > { %v2193_v13 = vshrl.u32 %v1979_v20, 16  ;;  %v2196_v27 = vshll.u32 %v1979_v20, 16  ;;  %1023 = vrot.lane.b32.xlu1 %v5051_v32, %s3881_s12  ;;  %v1240_v10 = vshll.u32 %v5279_v25, 16  ;;  %v782_v44 = vshrl.u32 %v5323_v59, 16  ;;  %v5356_v20 = vld [vmem:[%s4004_s25 + $0xd8] sm:$0xf] }
 0x146   : > { %v5290_v42 = vor.u32 %v2317_v49, %v2314_v48  ;;  %956 = vrot.lane.b32.xlu0 %v5271_v36, %s3882_s19  ;;  %v1239_v9 = vrot.slane %v1237_v39, 4  ;;  %v785_v4 = vshll.u32 %v5323_v59, 16  ;;  %v378_v49 = vld [vmem:[%s4004_s25 + $0xd4] sm:$0xf] }
 0x147   : > { %v2195_v18 = vrot.slane %v2193_v13, 3  ;;  %v2198_v43 = vrot.slane %v2196_v27, 4  ;;  %v5298_v58 = vpop.permute.xlu1 %819  ;;  %v1242_v56 = vrot.slane %v1240_v10, 5  ;;  %v784_v48 = vrot.slane %v782_v44, 4 }
 0x148   : > { %v949_v6 = vpop.permute.xlu0 %948  ;;  %v2319_v54 = vsel %vm2041_vm2, %v5153_v0, %v5290_v42  ;;  %v2226_v0 = vsel %vm2041_vm2, %v5164_v17, %v5296_v60  ;;  %v5342_v17 = vsel %vm858_vm0, %v900_v7, %v902_v45  ;;  %v787_v7 = vrot.slane %v785_v4, 5 }
 0x149   : > { %v5312_v3 = vor.u32 %v2198_v43, %v2195_v18  ;;  %2819 = vmatmul.mubr.bf16.gmra.mxu1 %v2319_v54  ;;  %1437 = vrot.lane.b32.xlu1 %v1382_v23, %s3883_s20  ;;  %v1383_v27 = vrot.slane %v5279_v25, 5  ;;  %v2355_v23 = vshrl.u32 %v5271_v36, 16  ;;  %v2358_v10 = vshll.u32 %v5271_v36, 16 }
 0x14a   : > { %1323 = vrot.lane.b32.xlu0 %v1235_v1, %s3885_s10  ;;  %3530 = vmatprep.mubr.msk.bf16.mxu1 %vm1614_vm3, %v2345_v63  ;;  %v5370_v18 = vor.u32 %v787_v7, %v784_v48  ;;  %v1652_v43 = vsel %vm1614_vm3, %v4418_v12, %v5276_v19  ;;  %v6552_v63 = vld [vmem:[#allocation15_spill] sm:$0xff]  ;;  %v1638_v4 = vsel %vm1614_vm3, %v4394_v30, %v5298_v58 }
 0x14b   : > { %v935_v11 = vpop.permute.xlu1 %934  ;;  %v2200_v33 = vsel %vm2041_vm2, %v5174_v51, %v5312_v3  ;;  %v5344_v51 = vor.u32 %v1242_v56, %v1239_v9  ;;  %v2236_v54 = vshrl.u32 %v6552_v63, 16  ;;  %v2239_v9 = vshll.u32 %v6552_v63, 16 }
 0x14c   : > { %v1016_v37 = vpop.permute.xlu0 %1015  ;;  %2768 = vmatmul.mubr.bf16.gmra.mxu0 %v2200_v33  ;;  %v2357_v56 = vrot.slane %v2355_v23, 3  ;;  %v2360_v12 = vrot.slane %v2358_v10, 4  ;;  %v1696_v48 = vsel %vm1674_vm4, %v1638_v4, %v935_v11 }
 0x14d   : > { %1589 = vrot.lane.b32.xlu1 %v5318_v15, %s3887_s18  ;;  %3523 = vmatprep.mubr.msk.bf16.mxu0 %vm1614_vm3, %v2226_v0  ;;  %v1244_v57 = vsel %vm556_vm1, %v1234_v22, %v5344_v51  ;;  %v5366_v22 = vcombine.low %v378_v49, %v5356_v20  ;;  %v1710_v0 = vsel %vm1674_vm4, %v1652_v43, %v949_v6  ;;  %v2238_v63 = vrot.slane %v2236_v54, 3 }
 0x14e   : > { %1504 = vrot.lane.b32.xlu0 %v5279_v25, %s3886_s24  ;;  %v1767_v19 = vsel %vm1731_vm5, %v1710_v0, %v1016_v37  ;;  %v5398_v6 = vsel %vm556_vm1, %v5288_v55, %v5370_v18  ;;  %v904_v37 = vrot.slane %v5169_v61, 5  ;;  %v2241_v30 = vrot.slane %v2239_v9, 4 }
 0x14f   : > { %v1002_v2 = vpop.permute.xlu1 %1001  ;;  %v794_v44 = vshll.u32 %v5366_v22, 16 }
 0x150   : > { %v1316_v52 = vpop.permute.xlu0 %1315  ;;  %v1753_v58 = vsel %vm1731_vm5, %v1696_v48, %v1002_v2  ;;  %v5429_v48 = vor.u32 %v2241_v30, %v2238_v63  ;;  %v382_v30 = vld [vmem:[%s4004_s25 + $0xdc] sm:$0xf] }
 0x151   : > { %958 = vrot.lane.b32.xlu1 %v5342_v17, %s3882_s19 }
 0x152   : > { %843 = vrot.lane.b32.xlu0 %v5106_v26, %s3884_s23  ;;  %v5363_v26 = vcombine.low %v5218_v47, %v376_v40  ;;  %v1384_v47 = vsel %vm858_vm0, %v1381_v46, %v1383_v27  ;;  %v791_v46 = vshrl.u32 %v5366_v22, 16 }
 0x153   : > { %v1302_v13 = vpop.permute.xlu1 %1301 }
 0x154   : > { %v1430_v39 = vpop.permute.xlu0 %1429  ;;  %v1246_v36 = vshrl.u32 %v5363_v26, 16  ;;  %v1249_v40 = vshll.u32 %v5363_v26, 16  ;;  %v1810_v0 = vsel %vm1788_vm6, %v1753_v58, %v1302_v13  ;;  %v793_v11 = vrot.slane %v791_v46, 4  ;;  %v5452_v58 = vld [vmem:[%s4004_s25 + $0xe0] sm:$0xf] }
 0x155   : > { %1325 = vrot.lane.b32.xlu1 %v1244_v57, %s3885_s10  ;;  %v1824_v57 = vsel %vm1788_vm6, %v1767_v19, %v1316_v52  ;;  %v796_v19 = vrot.slane %v794_v44, 5  ;;  %v1385_v2 = vrot.slane %v5363_v26, 5 }
 0x156   : > { %1025 = vrot.lane.b32.xlu0 %v5169_v61, %s3881_s12  ;;  %v1881_v7 = vsel %vm1845_vm7, %v1824_v57, %v1430_v39  ;;  %v1248_v10 = vrot.slane %v1246_v36, 4  ;;  %v1251_v43 = vrot.slane %v1249_v40, 5  ;;  %v5427_v57 = vcombine.low %v5304_v38, %v378_v49 }
 0x157   : > { %v1416_v1 = vpop.permute.xlu1 %1415  ;;  %v1386_v38 = vsel %vm858_vm0, %v1383_v27, %v1385_v2 }
 0x158   : > { %v1497_v33 = vpop.permute.xlu0 %1496  ;;  %v1867_v39 = vsel %vm1845_vm7, %v1810_v0, %v1416_v1  ;;  %v1252_v13 = vor.u32 %v1251_v43, %v1248_v10  ;;  %v1255_v49 = vshrl.u32 %v5427_v57, 16 }
 0x159   : > { %1506 = vrot.lane.b32.xlu1 %v5363_v26, %s3886_s24  ;;  %v1938_v52 = vsel %vm1902_vm8, %v1881_v7, %v1497_v33  ;;  %v5421_v33 = vor.u32 %v2360_v12, %v2357_v56  ;;  %v1258_v12 = vshll.u32 %v5427_v57, 16 }
 0x15a   : > { %1439 = vrot.lane.b32.xlu0 %v1384_v47, %s3883_s20  ;;  %v1253_v63 = vsel %vm556_vm1, %v5344_v51, %v1252_v13 }
 0x15b   : > { %v1483_v23 = vpop.permute.xlu1 %1482 }
 0x15c   : > { %v1582_v47 = vpop.permute.xlu0 %1581  ;;  %v1924_v54 = vsel %vm1902_vm8, %v1867_v39, %v1483_v23 }
 0x15d   : > { %v1995_v55 = vsel %vm1959_vm9, %v1938_v52, %v1582_v47  ;;  %845 = vrot.lane.b32.xlu1 %v5235_v35, %s3884_s23  ;;  %v5419_v35 = vsel %vm858_vm0, %v902_v45, %v904_v37  ;;  %v5433_v45 = vor.u32 %v796_v19, %v793_v11  ;;  %v2362_v52 = vsel %vm2041_vm2, %v5273_v29, %v5421_v33 }
 0x15e   : > { %v2329_v36 = vshrl.u32 %v1995_v55, 16  ;;  %v2332_v40 = vshll.u32 %v1995_v55, 16  ;;  %1591 = vrot.lane.b32.xlu0 %v5398_v6, %s3887_s18  ;;  %v6511_v55 = vrot.slane %v5226_v31, 5  ;;  %v1257_v29 = vrot.slane %v1255_v49, 4 }
 0x15f   : > { %v1568_v9 = vpop.permute.xlu1 %1567  ;;  %v5466_v51 = vsel %vm556_vm1, %v5370_v18, %v5433_v45  ;;  %v1260_v11 = vrot.slane %v1258_v12, 5  ;;  %v5471_v19 = vcombine.low %v382_v30, %v5452_v58  ;;  %v2372_v49 = vshrl.u32 %v5342_v17, 16 }
 0x160   : > { %v2331_v1 = vrot.slane %v2329_v36, 3  ;;  %v2334_v46 = vrot.slane %v2332_v40, 4  ;;  %v1981_v44 = vsel %vm1959_vm9, %v1924_v54, %v1568_v9  ;;  %v5424_v4 = vpop.permute.xlu0 %835 }
 0x161   : > { %v2210_v32 = vshrl.u32 %v1981_v44, 16  ;;  %v2213_v7 = vshll.u32 %v1981_v44, 16  ;;  %1027 = vrot.lane.b32.xlu1 %v5226_v31, %s3881_s12  ;;  %v1521_v40 = vshrl.u32 %v5471_v19, 16  ;;  %v1524_v54 = vshll.u32 %v5471_v19, 16  ;;  %v5503_v44 = vld [vmem:[%s4004_s25 + $0xe4] sm:$0xf] }
 0x162   : > { %v5435_v56 = vor.u32 %v2334_v46, %v2331_v1  ;;  %960 = vrot.lane.b32.xlu0 %v5419_v35, %s3882_s19 }
 0x163   : > { %v2212_v23 = vrot.slane %v2210_v32, 3  ;;  %v2215_v10 = vrot.slane %v2213_v7, 4  ;;  %v5446_v43 = vpop.permute.xlu1 %821  ;;  %v1523_v46 = vrot.slane %v1521_v40, 4  ;;  %v5506_v32 = vld [vmem:[%s4004_s25 + $0xe8] sm:$0xf]  ;;  %v2374_v40 = vrot.slane %v2372_v49, 3 }
 0x164   : > { %v951_v47 = vpop.permute.xlu0 %950  ;;  %v2336_v27 = vsel %vm2041_vm2, %v5290_v42, %v5435_v56  ;;  %v2243_v42 = vsel %vm2041_vm2, %v5296_v60, %v5429_v48  ;;  %v5490_v60 = vsel %vm858_vm0, %v904_v37, %v6511_v55  ;;  %v1526_v37 = vrot.slane %v1524_v54, 5 }
 0x165   : > { %v5460_v0 = vor.u32 %v2215_v10, %v2212_v23  ;;  %2827 = vmatmul.mubr.bf16.gmra.mxu1 %v2336_v27  ;;  %1441 = vrot.lane.b32.xlu1 %v1386_v38, %s3883_s20  ;;  %v6510_v38 = vrot.slane %v5427_v57, 5  ;;  %v2375_v23 = vshll.u32 %v5342_v17, 16 }
 0x166   : > { %1327 = vrot.lane.b32.xlu0 %v1253_v63, %s3885_s10  ;;  %3531 = vmatprep.mubr.msk.bf16.mxu1 %vm1614_vm3, %v2362_v52  ;;  %v5521_v63 = vor.u32 %v1526_v37, %v1523_v46  ;;  %v1654_v52 = vsel %vm1614_vm3, %v4573_v21, %v5424_v4 }
 0x167   : > { %v937_v39 = vpop.permute.xlu1 %936  ;;  %v2217_v18 = vsel %vm2041_vm2, %v5312_v3, %v5460_v0  ;;  %v5492_v3 = vor.u32 %v1260_v11, %v1257_v29  ;;  %v6553_v11 = vld [vmem:[#allocation14_spill] sm:$0xff]  ;;  %v1712_v54 = vsel %vm1674_vm4, %v1654_v52, %v951_v47  ;;  %v2377_v4 = vrot.slane %v2375_v23, 4 }
 0x168   : > { %v1018_v36 = vpop.permute.xlu0 %1017  ;;  %2775 = vmatmul.mubr.bf16.gmra.mxu0 %v2217_v18  ;;  %v2256_v18 = vshll.u32 %v6553_v11, 16  ;;  %v1528_v47 = vsel %vm556_vm1, %v5433_v45, %v5521_v63 }
 0x169   : > { %1593 = vrot.lane.b32.xlu1 %v5466_v51, %s3887_s18  ;;  %3524 = vmatprep.mubr.msk.bf16.mxu0 %vm1614_vm3, %v2243_v42  ;;  %v1262_v61 = vsel %vm556_vm1, %v1252_v13, %v5492_v3  ;;  %v5517_v13 = vcombine.low %v5503_v44, %v5506_v32  ;;  %v2253_v42 = vshrl.u32 %v6553_v11, 16 }
 0x16a   : > { %1508 = vrot.lane.b32.xlu0 %v5427_v57, %s3886_s24 }
 0x16b   : > { %v1004_v9 = vpop.permute.xlu1 %1003  ;;  %v1533_v37 = vshll.u32 %v5517_v13, 16 }
 0x16c   : > { %v1318_v1 = vpop.permute.xlu0 %1317 }
 0x16d   : > { %962 = vrot.lane.b32.xlu1 %v5490_v60, %s3882_s19 }
 0x16e   : > { %847 = vrot.lane.b32.xlu0 %v5318_v15, %s3884_s23  ;;  %v5513_v15 = vcombine.low %v5356_v20, %v382_v30  ;;  %v1388_v20 = vsel %vm858_vm0, %v1385_v2, %v6510_v38  ;;  %v1530_v2 = vshrl.u32 %v5517_v13, 16  ;;  %v2255_v38 = vrot.slane %v2253_v42, 3 }
 0x16f   : > { %v1304_v7 = vpop.permute.xlu1 %1303 }
 0x170   : > { %v1432_v12 = vpop.permute.xlu0 %1431  ;;  %v1264_v30 = vshrl.u32 %v5513_v15, 16  ;;  %v1267_v29 = vshll.u32 %v5513_v15, 16 }
 0x171   : > { %v2712_v10 = vpop.f32.mrf.mxu0  ;;  %1329 = vrot.lane.b32.xlu1 %v1262_v61, %s3885_s10  ;;  %v1769_v61 = vsel %vm1731_vm5, %v1712_v54, %v1018_v36  ;;  %v908_v36 = vrot.slane %v5323_v59, 5 }
 0x172   : > { %1029 = vrot.lane.b32.xlu0 %v5323_v59, %s3881_s12  ;;  %v1640_v10 = vsel %vm1614_vm3, %v4614_v8, %v5446_v43  ;;  %v1826_v49 = vsel %vm1788_vm6, %v1769_v61, %v1318_v1  ;;  %v1266_v54 = vrot.slane %v1264_v30, 4  ;;  %v2258_v8 = vrot.slane %v2256_v18, 4 }
 0x173   : > { %v2713_v17 = vpop.f32.mrf.mxu0  ;;  %v1418_v27 = vpop.permute.xlu1 %1417  ;;  %v1698_v23 = vsel %vm1674_vm4, %v1640_v10, %v937_v39  ;;  %v1883_v52 = vsel %vm1845_vm7, %v1826_v49, %v1432_v12  ;;  %v1532_v39 = vrot.slane %v1530_v2, 4  ;;  %v1535_v12 = vrot.slane %v1533_v37, 5 }
 0x174   : > { %v1499_v21 = vpop.permute.xlu0 %1498  ;;  %v1755_v43 = vsel %vm1731_vm5, %v1698_v23, %v1004_v9  ;;  %v1389_v9 = vrot.slane %v5513_v15, 5  ;;  %v5569_v2 = vor.u32 %v2377_v4, %v2374_v40  ;;  %v5578_v23 = vor.u32 %v2258_v8, %v2255_v38 }
 0x175   : > { %v2714_v46 = vpop.f32.mrf.mxu0  ;;  %1510 = vrot.lane.b32.xlu1 %v5513_v15, %s3886_s24  ;;  %v1940_v1 = vsel %vm1902_vm8, %v1883_v52, %v1499_v21  ;;  %v1812_v61 = vsel %vm1788_vm6, %v1755_v43, %v1304_v7  ;;  %v6554_v7 = vrot.slane %v5226_v31, 5  ;;  %v5582_v40 = vor.u32 %v1535_v12, %v1532_v39  ;;  %v388_v39 = vld [vmem:[%s4004_s25 + $0xec] sm:$0xf]  ;;  %v5605_v12 = vld [vmem:[%s4004_s25 + $0xf0] sm:$0xf] }
 0x176   : > { %1443 = vrot.lane.b32.xlu0 %v1388_v20, %s3883_s20  ;;  %v1269_v46 = vrot.slane %v1267_v29, 5  ;;  %v1869_v10 = vsel %vm1845_vm7, %v1812_v61, %v1418_v27 }
 0x177   : > { %v2715_v17 = vpop.f32.mrf.mxu0  ;;  %v1485_v11 = vpop.permute.xlu1 %1484  ;;  %v5567_v21 = vsel %vm858_vm0, %v6554_v7, %v908_v36 }
 0x178   : > { %v1584_v20 = vpop.permute.xlu0 %1583  ;;  %v1926_v42 = vsel %vm1902_vm8, %v1869_v10, %v1485_v11 }
 0x179   : > { %v1997_v55 = vsel %vm1959_vm9, %v1940_v1, %v1584_v20  ;;  %849 = vrot.lane.b32.xlu1 %v5398_v6, %s3884_s23  ;;  %v1270_v6 = vor.u32 %v1269_v46, %v1266_v54  ;;  %v2379_v1 = vsel %vm2041_vm2, %v5421_v33, %v5569_v2  ;;  %v5615_v33 = vrot.slane %v5366_v22, 5 }
 0x17a   : > { %v2346_v30 = vshrl.u32 %v1997_v55, 16  ;;  %v2349_v29 = vshll.u32 %v1997_v55, 16  ;;  %1595 = vrot.lane.b32.xlu0 %v1528_v47, %s3887_s18  ;;  %v5576_v47 = vcombine.low %v5452_v58, %v5503_v44  ;;  %v6555_v58 = vrot.slane %v5427_v57, 5 }
 0x17b   : > { %v1570_v18 = vpop.permute.xlu1 %1569  ;;  %v1271_v43 = vsel %vm556_vm1, %v5492_v3, %v1270_v6  ;;  %v1537_v3 = vsel %vm556_vm1, %v5521_v63, %v5582_v40  ;;  %v5625_v63 = vcombine.low %v388_v39, %v5605_v12 }
 0x17c   : > { %v2348_v27 = vrot.slane %v2346_v30, 3  ;;  %v2351_v37 = vrot.slane %v2349_v29, 4  ;;  %v1983_v55 = vsel %vm1959_vm9, %v1926_v42, %v1570_v18  ;;  %v5572_v49 = vpop.permute.xlu0 %837  ;;  %v1390_v38 = vsel %vm858_vm0, %v6555_v58, %v1389_v9 }
 0x17d   : > { %v2227_v52 = vshrl.u32 %v1983_v55, 16  ;;  %v2230_v31 = vshll.u32 %v1983_v55, 16  ;;  %1031 = vrot.lane.b32.xlu1 %v5366_v22, %s3881_s12  ;;  %v1273_v17 = vshrl.u32 %v5576_v47, 16  ;;  %v1276_v11 = vshll.u32 %v5576_v47, 16 }
 0x17e   : > { %v5584_v4 = vor.u32 %v2351_v37, %v2348_v27  ;;  %964 = vrot.lane.b32.xlu0 %v5567_v21, %s3882_s19  ;;  %v2260_v42 = vsel %vm2041_vm2, %v5429_v48, %v5578_v23  ;;  %v5637_v48 = vsel %vm858_vm0, %v908_v36, %v5615_v33  ;;  %v1542_v58 = vshll.u32 %v5625_v63, 16 }
 0x17f   : > { %v2229_v54 = vrot.slane %v2227_v52, 3  ;;  %v2232_v46 = vrot.slane %v2230_v31, 4  ;;  %v824_v8 = vpop.permute.xlu1 %823  ;;  %v1275_v29 = vrot.slane %v1273_v17, 4  ;;  %v1539_v31 = vshrl.u32 %v5625_v63, 16 }
 0x180   : > { %v953_v20 = vpop.permute.xlu0 %952  ;;  %v2353_v61 = vsel %vm2041_vm2, %v5435_v56, %v5584_v4  ;;  %v1278_v56 = vrot.slane %v1276_v11, 5  ;;  %v1391_v17 = vrot.slane %v5576_v47, 5  ;;  %v1642_v15 = vsel %vm1614_vm3, %v4766_v41, %v824_v8 }
 0x181   : > { %v5607_v10 = vor.u32 %v2232_v46, %v2229_v54  ;;  %v2718_v30 = vpop.f32.mrf.mxu0  ;;  %2834 = vmatmul.mubr.bf16.gmra.mxu1 %v2353_v61  ;;  %1445 = vrot.lane.b32.xlu1 %v1390_v38, %s3883_s20  ;;  %v1541_v11 = vrot.slane %v1539_v31, 4  ;;  %v1544_v54 = vrot.slane %v1542_v58, 5 }
 0x182   : > { %1331 = vrot.lane.b32.xlu0 %v1271_v43, %s3885_s10  ;;  %3532 = vmatprep.mubr.msk.bf16.mxu1 %vm1614_vm3, %v2379_v1  ;;  %v3499_v43 = vcombine.low %v5506_v32, %v388_v39  ;;  %v2389_v1 = vshrl.u32 %v5419_v35, 16  ;;  %v1392_v32 = vsel %vm858_vm0, %v1389_v9, %v1391_v17 }
 0x183   : > { %v2719_v18 = vpop.f32.mrf.mxu0  ;;  %v939_v7 = vpop.permute.xlu1 %938  ;;  %v2234_v27 = vsel %vm2041_vm2, %v5460_v0, %v5607_v10  ;;  %v5639_v0 = vor.u32 %v1278_v56, %v1275_v29  ;;  %v5666_v39 = vor.u32 %v1544_v54, %v1541_v11 }
 0x184   : > { %v1020_v37 = vpop.permute.xlu0 %1019  ;;  %2783 = vmatmul.mubr.bf16.gmra.mxu0 %v2234_v27  ;;  %v1700_v27 = vsel %vm1674_vm4, %v1642_v15, %v939_v7 }
 0x185   : > { %v5627_v22 = vpop.f32.mrf.mxu0  ;;  %1597 = vrot.lane.b32.xlu1 %v1537_v3, %s3887_s18  ;;  %3525 = vmatprep.mubr.msk.bf16.mxu0 %vm1614_vm3, %v2260_v42  ;;  %v1280_v59 = vsel %vm556_vm1, %v1270_v6, %v5639_v0  ;;  %v1656_v6 = vsel %vm1614_vm3, %v4744_v14, %v5572_v49  ;;  %v2270_v42 = vshrl.u32 %v4670_v5, 16  ;;  %v2273_v14 = vshll.u32 %v4670_v5, 16 }
 0x186   : > { %1512 = vrot.lane.b32.xlu0 %v5576_v47, %s3886_s24  ;;  %v1714_v3 = vsel %vm1674_vm4, %v1656_v6, %v953_v20  ;;  %v2391_v49 = vrot.slane %v2389_v1, 3 }
 0x187   : > { %v2722_v55 = vpop.f32.mrf.mxu0  ;;  %v1006_v52 = vpop.permute.xlu1 %1005  ;;  %v2275_v7 = vrot.slane %v2273_v14, 4 }
 0x188   : > { %v1320_v38 = vpop.permute.xlu0 %1319  ;;  %v1757_v5 = vsel %vm1731_vm5, %v1700_v27, %v1006_v52 }
 0x189   : > { %966 = vrot.lane.b32.xlu1 %v5637_v48, %s3882_s19 }
 0x18a   : > { %851 = vrot.lane.b32.xlu0 %v5466_v51, %s3884_s23  ;;  %v2392_v51 = vshll.u32 %v5419_v35, 16  ;;  %v1771_v35 = vsel %vm1731_vm5, %v1714_v3, %v1020_v37  ;;  %v1546_v37 = vsel %vm556_vm1, %v5582_v40, %v5666_v39 }
 0x18b   : > { %v1306_v36 = vpop.permute.xlu1 %1305  ;;  %v1828_v9 = vsel %vm1788_vm6, %v1771_v35, %v1320_v38  ;;  %v2272_v38 = vrot.slane %v2270_v42, 3 }
 0x18c   : > { %v1434_v46 = vpop.permute.xlu0 %1433  ;;  %v2394_v20 = vrot.slane %v2392_v51, 4 }
 0x18d   : > { %1333 = vrot.lane.b32.xlu1 %v1280_v59, %s3885_s10  ;;  %v1885_v55 = vsel %vm1845_vm7, %v1828_v9, %v1434_v46  ;;  %v1814_v59 = vsel %vm1788_vm6, %v1757_v5, %v1306_v36 }
 0x18e   : > { %1033 = vrot.lane.b32.xlu0 %v5471_v19, %s3881_s12  ;;  %v5655_v61 = vpop.f32.mrf.mxu0  ;;  %v5691_v1 = vor.u32 %v2394_v20, %v2391_v49 }
 0x18f   : > { %v1420_v30 = vpop.permute.xlu1 %1419 }
 0x190   : > { %v1501_v29 = vpop.permute.xlu0 %1500  ;;  %v2727_v56 = vpop.f32.mrf.mxu0  ;;  %v1871_v54 = vsel %vm1845_vm7, %v1814_v59, %v1420_v30  ;;  %v2396_v14 = vsel %vm2041_vm2, %v5569_v2, %v5691_v1  ;;  %v2409_v59 = vshll.u32 %v5490_v60, 16 }
 0x191   : > { %1514 = vrot.lane.b32.xlu1 %v3499_v43, %s3886_s24  ;;  %v1942_v58 = vsel %vm1902_vm8, %v1885_v55, %v1501_v29 }
 0x192   : > { %1447 = vrot.lane.b32.xlu0 %v1392_v32, %s3883_s20  ;;  %v2728_v18 = vpop.f32.mrf.mxu0 }
 0x193   : > { %v1487_v31 = vpop.permute.xlu1 %1486 }
 0x194   : > { %v1586_v41 = vpop.permute.xlu0 %1585  ;;  %v2729_v8 = vpop.f32.mrf.mxu0  ;;  %v1928_v40 = vsel %vm1902_vm8, %v1871_v54, %v1487_v31 }
 0x195   : > { %v1999_v11 = vsel %vm1959_vm9, %v1942_v58, %v1586_v41  ;;  %853 = vrot.lane.b32.xlu1 %v5433_v45, %s3884_s23  ;;  %v5694_v45 = vor.u32 %v2275_v7, %v2272_v38 }
 0x196   : > { %v2363_v46 = vshrl.u32 %v1999_v11, 16  ;;  %v2366_v43 = vshll.u32 %v1999_v11, 16  ;;  %1599 = vrot.lane.b32.xlu0 %v1546_v37, %s3887_s18 }
 0x197   : > { %v1572_v52 = vpop.permute.xlu1 %1571  ;;  %v2277_v20 = vsel %vm2041_vm2, %v5578_v23, %v5694_v45  ;;  %v2406_v23 = vshrl.u32 %v5490_v60, 16 }
 0x198   : > { %v2365_v51 = vrot.slane %v2363_v46, 3  ;;  %v2368_v6 = vrot.slane %v2366_v43, 4  ;;  %v1985_v36 = vsel %vm1959_vm9, %v1928_v40, %v1572_v52  ;;  %v840_v32 = vpop.permute.xlu0 %839 }
 0x199   : > { %v2244_v3 = vshrl.u32 %v1985_v36, 16  ;;  %v2247_v29 = vshll.u32 %v1985_v36, 16  ;;  %v1658_v11 = vsel %vm1614_vm3, %v4879_v62, %v840_v32  ;;  %v2408_v60 = vrot.slane %v2406_v23, 3 }
 0x19a   : > { %v5696_v56 = vor.u32 %v2368_v6, %v2365_v51  ;;  %v2411_v6 = vrot.slane %v2409_v59, 4 }
 0x19b   : > { %v2246_v30 = vrot.slane %v2244_v3, 3  ;;  %v2249_v42 = vrot.slane %v2247_v29, 4  ;;  %v826_v35 = vpop.permute.xlu1 %825 }
 0x19c   : > { %v955_v49 = vpop.permute.xlu0 %954  ;;  %v2370_v15 = vsel %vm2041_vm2, %v5584_v4, %v5696_v56  ;;  %v1644_v40 = vsel %vm1614_vm3, %v4890_v16, %v826_v35  ;;  %v3494_v16 = vcombine.low %v5503_v44, %v5503_v44  ;;  %v3809_v35 = vld [vmem:[%s4004_s25 + $0xe8] ss:$0 sps:$4 sm:$0x11]  }
 0x19d   : > { %v5704_v9 = vor.u32 %v2249_v42, %v2246_v30  ;;  %v5706_v18 = vpop.f32.mrf.mxu0  ;;  %2841 = vmatmul.mubr.bf16.gmra.mxu1 %v2370_v15  ;;  %v1716_v7 = vsel %vm1674_vm4, %v1658_v11, %v955_v49 }
 0x19e   : > { %3533 = vmatprep.mubr.msk.bf16.mxu1 %vm1614_vm3, %v2396_v14  ;;  %v3807_v14 = vld [vmem:[%s4004_s25 + $0xdc] ss:$0 sps:$4 sm:$0x11]   ;;  %1035 = vrot.lane.b32.xlu1 %v3494_v16, %s3881_s12 }
 0x19f   : > { %v2734_v27 = vpop.f32.mrf.mxu0  ;;  %v941_v55 = vpop.permute.xlu1 %940  ;;  %v2251_v2 = vsel %vm2041_vm2, %v5607_v10, %v5704_v9 }
 0x1a0   : > { %v1022_v31 = vpop.permute.xlu0 %1021  ;;  %2790 = vmatmul.mubr.bf16.gmra.mxu0 %v2251_v2  ;;  %v1702_v62 = vsel %vm1674_vm4, %v1644_v40, %v941_v55  ;;  %v912_v2 = vrot.slane %v3807_v14, 5 }
 0x1a1   : > { %v5715_v4 = vpop.f32.mrf.mxu0  ;;  %3526 = vmatprep.mubr.msk.bf16.mxu0 %vm1614_vm3, %v2277_v20  ;;  %v1773_v43 = vsel %vm1731_vm5, %v1716_v7, %v1022_v31 }
 0x1a2   : > { %v913_v23 = vsel %vm858_vm0, %v5615_v33, %v912_v2 }
 0x1a3   : > { %v2737_v37 = vpop.f32.mrf.mxu0  ;;  %v1008_v5 = vpop.permute.xlu1 %1007  ;;  %968 = vrot.lane.b32.xlu0 %v913_v23, %s3882_s19 }
 0x1a4   : > { %v1322_v58 = vpop.permute.xlu0 %1321  ;;  %v1759_v3 = vsel %vm1731_vm5, %v1702_v62, %v1008_v5  ;;  %v5742_v5 = vor.u32 %v2411_v6, %v2408_v60 }
 0x1a5   : > { %v1830_v52 = vsel %vm1788_vm6, %v1773_v43, %v1322_v58  ;;  %v1393_v58 = vrot.slane %v3809_v35, 5 }
 0x1a6   : > { %v2413_v40 = vsel %vm2041_vm2, %v5691_v1, %v5742_v5 }
 0x1a7   : > { %v1308_v41 = vpop.permute.xlu1 %1307  ;;  %1335 = vrot.lane.b32.xlu0 %v5639_v0, %s3885_s10  ;;  %v2426_v0 = vshll.u32 %v5567_v21, 16 }
 0x1a8   : > { %v1436_v8 = vpop.permute.xlu0 %1435  ;;  %v1816_v49 = vsel %vm1788_vm6, %v1759_v3, %v1308_v41  ;;  %v2423_v3 = vshrl.u32 %v5567_v21, 16 }
 0x1a9   : > { %v1887_v36 = vsel %vm1845_vm7, %v1830_v52, %v1436_v8  ;;  %v2428_v14 = vrot.slane %v2426_v0, 4 }
 0x1aa   : > { %v2740_v38 = vpop.f32.mrf.mxu0 }
 0x1ab   : > { %v1422_v10 = vpop.permute.xlu1 %1421 }
 0x1ac   : > { %v1503_v54 = vpop.permute.xlu0 %1502  ;;  %v2741_v46 = vpop.f32.mrf.mxu0  ;;  %v1873_v20 = vsel %vm1845_vm7, %v1816_v49, %v1422_v10  ;;  %v1394_v10 = vsel %vm858_vm0, %v1391_v17, %v1393_v58 }
 0x1ad   : > { %v1944_v29 = vsel %vm1902_vm8, %v1887_v36, %v1503_v54  ;;  %1449 = vrot.lane.b32.xlu1 %v1394_v10, %s3883_s20  ;;  %v3500_v36 = vcombine.low %v5605_v12, %v5605_v12 }
 0x1ae   : > { %v5727_v51 = vpop.f32.mrf.mxu0 }
 0x1af   : > { %v1489_v32 = vpop.permute.xlu1 %1488  ;;  %1516 = vrot.lane.b32.xlu0 %v3500_v36, %s3886_s24 }
 0x1b0   : > { %v1588_v30 = vpop.permute.xlu0 %1587  ;;  %v2744_v42 = vpop.f32.mrf.mxu0  ;;  %v1930_v31 = vsel %vm1902_vm8, %v1873_v20, %v1489_v32 }
 0x1b1   : > { %v2001_v15 = vsel %vm1959_vm9, %v1944_v29, %v1588_v30  ;;  %1601 = vrot.lane.b32.xlu1 %v5666_v39, %s3887_s18  ;;  %v2425_v42 = vrot.slane %v2423_v3, 3 }
 0x1b2   : > { %v2380_v27 = vshrl.u32 %v2001_v15, 16  ;;  %v2383_v55 = vshll.u32 %v2001_v15, 16 }
 0x1b3   : > { %v1574_v37 = vpop.permute.xlu1 %1573  ;;  %v2429_v2 = vor.u32 %v2428_v14, %v2425_v42 }
 0x1b4   : > { %v2382_v8 = vrot.slane %v2380_v27, 3  ;;  %v2385_v44 = vrot.slane %v2383_v55, 4  ;;  %v1987_v38 = vsel %vm1959_vm9, %v1930_v31, %v1574_v37  ;;  %v842_v41 = vpop.permute.xlu0 %841 }
 0x1b5   : > { %v2261_v59 = vshrl.u32 %v1987_v38, 16  ;;  %v2264_v11 = vshll.u32 %v1987_v38, 16  ;;  %v1660_v52 = vsel %vm1614_vm3, %v4991_v28, %v842_v41  ;;  %v2294_v28 = vsel %vm2041_vm2, %v5694_v45, %v4592_v34 }
 0x1b6   : > { %v2386_v7 = vor.u32 %v2385_v44, %v2382_v8 }
 0x1b7   : > { %v2263_v54 = vrot.slane %v2261_v59, 3  ;;  %v2266_v46 = vrot.slane %v2264_v11, 4  ;;  %v1024_v43 = vpop.permute.xlu1 %1023  ;;  %v2430_v59 = vsel %vm2041_vm2, %v5742_v5, %v2429_v2 }
 0x1b8   : > { %v957_v60 = vpop.permute.xlu0 %956  ;;  %v2387_v6 = vsel %vm2041_vm2, %v5696_v56, %v2386_v7 }
 0x1b9   : > { %v2267_v47 = vor.u32 %v2266_v46, %v2263_v54  ;;  %v1718_v17 = vsel %vm1674_vm4, %v1660_v52, %v957_v60  ;;  %v5760_v62 = vpop.f32.mrf.mxu0  ;;  %2849 = vmatmul.mubr.bf16.gmra.mxu1 %v2387_v6  ;;  %v2440_v54 = vshrl.u32 %v5637_v48, 16 }
 0x1ba   : > { %3534 = vmatprep.mubr.msk.bf16.mxu1 %vm1614_vm3, %v2413_v40  ;;  %v1775_v12 = vsel %vm1731_vm5, %v1718_v17, %v1024_v43 }
 0x1bb   : > { %v2749_v1 = vpop.f32.mrf.mxu0  ;;  %v1438_v56 = vpop.permute.xlu1 %1437  ;;  %v2268_v32 = vsel %vm2041_vm2, %v5704_v9, %v2267_v47  ;;  %v2285_v27 = vsel %vm2041_vm2, %v2267_v47, %v5151_v53  ;;  %v2442_v6 = vrot.slane %v2440_v54, 3 }
 0x1bc   : > { %v1324_v29 = vpop.permute.xlu0 %1323  ;;  %2797 = vmatmul.mubr.bf16.gmra.mxu0 %v2268_v32 }
 0x1bd   : > { %v1832_v34 = vsel %vm1788_vm6, %v1775_v12, %v1324_v29  ;;  %v2750_v45 = vpop.f32.mrf.mxu0  ;;  %3527 = vmatprep.mubr.msk.bf16.mxu0 %vm1614_vm3, %v2294_v28 }
 0x1be   : > { %v1889_v9 = vsel %vm1845_vm7, %v1832_v34, %v1438_v56 }
 0x1bf   : > { %v2751_v39 = vpop.f32.mrf.mxu0  ;;  %v1590_v30 = vpop.permute.xlu1 %1589 }
 0x1c0   : > { %v1505_v16 = vpop.permute.xlu0 %1504 }
 0x1c1   : > { %v1946_v21 = vsel %vm1902_vm8, %v1889_v9, %v1505_v16 }
 0x1c2   : > { %v2003_v35 = vsel %vm1959_vm9, %v1946_v21, %v1590_v30 }
 0x1c3   : > { %v2397_v49 = vshrl.u32 %v2003_v35, 16  ;;  %v2400_v15 = vshll.u32 %v2003_v35, 16  ;;  %v959_v20 = vpop.permute.xlu1 %958 }
 0x1c4   : > { %v844_v55 = vpop.permute.xlu0 %843  ;;  %2805 = vmatmul.mubr.bf16.gmra.mxu0 %v2285_v27 }
 0x1c5   : > { %v2399_v31 = vrot.slane %v2397_v49, 3  ;;  %v2402_v37 = vrot.slane %v2400_v15, 4  ;;  %v1662_v58 = vsel %vm1614_vm3, %v5088_v24, %v844_v55  ;;  %v2443_v24 = vshll.u32 %v5637_v48, 16 }
 0x1c6   : > { %v1720_v38 = vsel %vm1674_vm4, %v1662_v58, %v959_v20  ;;  %v1606_v48 = vrot.slane %v5471_v19, 5 }
 0x1c7   : > { %v2403_v8 = vor.u32 %v2402_v37, %v2399_v31  ;;  %v1326_v44 = vpop.permute.xlu1 %1325  ;;  %v2445_v47 = vrot.slane %v2443_v24, 4 }
 0x1c8   : > { %v1026_v41 = vpop.permute.xlu0 %1025  ;;  %v5788_v23 = vpop.f32.mrf.mxu0  ;;  %v1607_v39 = vsel %vm858_vm0, %v5615_v33, %v1606_v48 }
 0x1c9   : > { %v1777_v53 = vsel %vm1731_vm5, %v1720_v38, %v1026_v41  ;;  %v2404_v11 = vsel %vm2041_vm2, %v2386_v7, %v2403_v8  ;;  %v2446_v3 = vor.u32 %v2445_v47, %v2442_v6  ;;  %v2457_v21 = vshrl.u32 %v1607_v39, 16 }
 0x1ca   : > { %2856 = vmatmul.mubr.bf16.gmra.mxu1 %v2404_v11  ;;  %v2756_v10 = vpop.f32.mrf.mxu0  ;;  %v1834_v43 = vsel %vm1788_vm6, %v1777_v53, %v1326_v44  ;;  %v2460_v35 = vshll.u32 %v1607_v39, 16  ;;  %v1608_v38 = vrot.slane %v5517_v13, 5  ;;  %v2982_v13 = vld [vmem:[%s6480_s4 + $0x38] sm:$0xff]  ;;  %v3888_v47 = vmov 0.0  }
 0x1cb   : > { %v1507_v46 = vpop.permute.xlu1 %1506  ;;  %3535 = vmatprep.mubr.msk.bf16.mxu1 %vm1614_vm3, %v2430_v59  ;;  %v2447_v14 = vsel %vm2041_vm2, %v2429_v2, %v2446_v3  ;;  %v2459_v20 = vrot.slane %v2457_v21, 3  ;;  %3642 = vmatprep.subr.mxu1 %v3888_v47 }
 0x1cc   : > { %v1440_v40 = vpop.permute.xlu0 %1439  ;;  %v5798_v52 = vpop.f32.mrf.mxu0  ;;  %v2462_v27 = vrot.slane %v2460_v35, 4  ;;  %3643 = vmatpush3.msra.mxu1 %v2982_v13 }
 0x1cd   : > { %v1891_v5 = vsel %vm1845_vm7, %v1834_v43, %v1440_v40  ;;  %v1609_v43 = vsel %vm858_vm0, %v1606_v48, %v1608_v38  ;;  %3644 = vmatprep.subr.mxu1 %v3888_v47 }
 0x1ce   : > { %v2759_v60 = vpop.f32.mrf.mxu0  ;;  %v1948_v17 = vsel %vm1902_vm8, %v1891_v5, %v1507_v46  ;;  %v2463_v44 = vor.u32 %v2462_v27, %v2459_v20  ;;  %v2477_v6 = vshll.u32 %v1609_v43, 16 }
 0x1cf   : > { %v846_v7 = vpop.permute.xlu1 %845 }
 0x1d0   : > { %v1592_v36 = vpop.permute.xlu0 %1591  ;;  %v1664_v29 = vsel %vm1614_vm3, %v5214_v50, %v846_v7  ;;  %v2464_v46 = vsel %vm2041_vm2, %v2446_v3, %v2463_v44  ;;  %v1610_v3 = vrot.slane %v5625_v63, 5 }
 0x1d1   : > { %v2005_v28 = vsel %vm1959_vm9, %v1948_v17, %v1592_v36 }
 0x1d2   : > { %v2414_v1 = vshrl.u32 %v2005_v28, 16  ;;  %v2417_v56 = vshll.u32 %v2005_v28, 16 }
 0x1d3   : > { %v1028_v32 = vpop.permute.xlu1 %1027 }
 0x1d4   : > { %v2416_v0 = vrot.slane %v2414_v1, 3  ;;  %v2419_v12 = vrot.slane %v2417_v56, 4  ;;  %v961_v34 = vpop.permute.xlu0 %960  ;;  %v2479_v1 = vrot.slane %v2477_v6, 4 }
 0x1d5   : > { %v1722_v45 = vsel %vm1674_vm4, %v1664_v29, %v961_v34 }
 0x1d6   : > { %v2420_v30 = vor.u32 %v2419_v12, %v2416_v0  ;;  %v1779_v19 = vsel %vm1731_vm5, %v1722_v45, %v1028_v32 }
 0x1d7   : > { %v1442_v42 = vpop.permute.xlu1 %1441 }
 0x1d8   : > { %v1328_v9 = vpop.permute.xlu0 %1327  ;;  %v2421_v16 = vsel %vm2041_vm2, %v2403_v8, %v2420_v30 }
 0x1d9   : > { %v1836_v49 = vsel %vm1788_vm6, %v1779_v19, %v1328_v9  ;;  %2863 = vmatmul.mubr.bf16.gmra.mxu1 %v2421_v16 }
 0x1da   : > { %3536 = vmatprep.mubr.msk.bf16.mxu1 %vm1614_vm3, %v2447_v14  ;;  %v1893_v15 = vsel %vm1845_vm7, %v1836_v49, %v1442_v42  ;;  %v1611_v49 = vsel %vm858_vm0, %v1608_v38, %v1610_v3 }
 0x1db   : > { %v1594_v50 = vpop.permute.xlu1 %1593 }
 0x1dc   : > { %v1509_v33 = vpop.permute.xlu0 %1508 }
 0x1dd   : > { %v1950_v55 = vsel %vm1902_vm8, %v1893_v15, %v1509_v33 }
 0x1de   : > { %v2007_v2 = vsel %vm1959_vm9, %v1950_v55, %v1594_v50 }
 0x1df   : > { %v2431_v31 = vshrl.u32 %v2007_v2, 16  ;;  %v2434_v37 = vshll.u32 %v2007_v2, 16  ;;  %v963_v58 = vpop.permute.xlu1 %962 }
 0x1e0   : > { %v848_v8 = vpop.permute.xlu0 %847 }
 0x1e1   : > { %v2433_v41 = vrot.slane %v2431_v31, 3  ;;  %v2436_v59 = vrot.slane %v2434_v37, 4  ;;  %v1666_v53 = vsel %vm1614_vm3, %v5279_v25, %v848_v8  ;;  %v2474_v25 = vshrl.u32 %v1609_v43, 16 }
 0x1e2   : > { %v1724_v54 = vsel %vm1674_vm4, %v1666_v53, %v963_v58  ;;  %v2491_v37 = vshrl.u32 %v1611_v49, 16  ;;  %v2494_v58 = vshll.u32 %v1611_v49, 16 }
 0x1e3   : > { %v2437_v11 = vor.u32 %v2436_v59, %v2433_v41  ;;  %v1330_v10 = vpop.permute.xlu1 %1329  ;;  %v2476_v48 = vrot.slane %v2474_v25, 3 }
 0x1e4   : > { %v1030_v24 = vpop.permute.xlu0 %1029 }
 0x1e5   : > { %v1781_v40 = vsel %vm1731_vm5, %v1724_v54, %v1030_v24  ;;  %v2438_v5 = vsel %vm2041_vm2, %v2420_v30, %v2437_v11  ;;  %v2480_v30 = vor.u32 %v2479_v1, %v2476_v48  ;;  %v2981_v48 = vld [vmem:[%s6480_s4 + $0x30] sm:$0xff] }
 0x1e6   : > { %2871 = vmatmul.mubr.bf16.gmra.mxu1 %v2438_v5  ;;  %v1838_v7 = vsel %vm1788_vm6, %v1781_v40, %v1330_v10  ;;  %v2496_v10 = vrot.slane %v2494_v58, 4 }
 0x1e7   : > { %v1511_v60 = vpop.permute.xlu1 %1510  ;;  %3537 = vmatprep.mubr.msk.bf16.mxu1 %vm1614_vm3, %v2464_v46  ;;  %v2481_v27 = vsel %vm2041_vm2, %v2463_v44, %v2480_v30  ;;  %v2493_v44 = vrot.slane %v2491_v37, 3  ;;  %3645 = vmatpush3.msra.mxu1 %v2981_v48 }
 0x1e8   : > { %v1444_v17 = vpop.permute.xlu0 %1443  ;;  %3646 = vmatprep.subr.mxu1 %v3888_v47 }
 0x1e9   : > { %v1895_v36 = vsel %vm1845_vm7, %v1838_v7, %v1444_v17  ;;  %v5854_v5 = vor.u32 %v2496_v10, %v2493_v44 }
 0x1ea   : > { %v1952_v56 = vsel %vm1902_vm8, %v1895_v36, %v1511_v60 }
 0x1eb   : > { %v850_v28 = vpop.permute.xlu1 %849 }
 0x1ec   : > { %v1596_v32 = vpop.permute.xlu0 %1595  ;;  %v1668_v19 = vsel %vm1614_vm3, %v5363_v26, %v850_v28  ;;  %v2498_v28 = vsel %vm2041_vm2, %v2480_v30, %v5854_v5 }
 0x1ed   : > { %v2009_v0 = vsel %vm1959_vm9, %v1952_v56, %v1596_v32  ;;  %v5836_v12 = vpop.f32.mrf.mxu1 }
 0x1ee   : > { %v2448_v29 = vshrl.u32 %v2009_v0, 16  ;;  %v2451_v34 = vshll.u32 %v2009_v0, 16 }
 0x1ef   : > { %v2815_v45 = vpop.f32.mrf.mxu1  ;;  %v1032_v39 = vpop.permute.xlu1 %1031 }
 0x1f0   : > { %v2450_v42 = vrot.slane %v2448_v29, 3  ;;  %v2453_v14 = vrot.slane %v2451_v34, 4  ;;  %v965_v9 = vpop.permute.xlu0 %964  ;;  %v2762_v16 = vpop.f32.mrf.mxu0 }
 0x1f1   : > { %v1726_v21 = vsel %vm1674_vm4, %v1668_v19, %v965_v9  ;;  %v2816_v35 = vpop.f32.mrf.mxu1 }
 0x1f2   : > { %v2454_v50 = vor.u32 %v2453_v14, %v2450_v42  ;;  %v2763_v15 = vpop.f32.mrf.mxu0  ;;  %v1783_v55 = vsel %vm1731_vm5, %v1726_v21, %v1032_v39 }
 0x1f3   : > { %v2817_v33 = vpop.f32.mrf.mxu1  ;;  %v1446_v20 = vpop.permute.xlu1 %1445 }
 0x1f4   : > { %v1332_v2 = vpop.permute.xlu0 %1331  ;;  %v5846_v31 = vpop.f32.mrf.mxu0  ;;  %v2455_v26 = vsel %vm2041_vm2, %v2437_v11, %v2454_v50 }
 0x1f5   : > { %v1840_v8 = vsel %vm1788_vm6, %v1783_v55, %v1332_v2  ;;  %2878 = vmatmul.mubr.bf16.gmra.mxu1 %v2455_v26  ;;  %v2980_v55 = vld [vmem:[%s6480_s4 + $0x28] sm:$0xff]  ;;  %v2979_v2 = vld [vmem:[%s6480_s4 + $0x20] sm:$0xff]  ;;  %v3817_v26 = vld [vmem:[%s4004_s25 + $0xd8] sm:$0xf] }
 0x1f6   : > { %v2766_v41 = vpop.f32.mrf.mxu0  ;;  %3538 = vmatprep.mubr.msk.bf16.mxu1 %vm1614_vm3, %v2481_v27  ;;  %v1897_v59 = vsel %vm1845_vm7, %v1840_v8, %v1446_v20  ;;  %3647 = vmatpush3.msra.mxu1 %v2980_v55  ;;  %v3463_v37 = vcombine.low %v3817_v26, %v3817_v26 }
 0x1f7   : > { %v1598_v38 = vpop.permute.xlu1 %1597  ;;  %3648 = vmatprep.subr.mxu1 %v3888_v47 }
 0x1f8   : > { %v1513_v53 = vpop.permute.xlu0 %1512  ;;  %3649 = vmatpush3.msra.mxu1 %v2979_v2 }
 0x1f9   : > { %v1954_v54 = vsel %vm1902_vm8, %v1897_v59, %v1513_v53  ;;  %3650 = vmatprep.subr.mxu1 %v3888_v47 }
 0x1fa   : > { %v2011_v24 = vsel %vm1959_vm9, %v1954_v54, %v1598_v38  ;;  %v2978_v38 = vld [vmem:[%s6480_s4 + $0x18] sm:$0xff] }
 0x1fb   : > { %v2465_v46 = vshrl.u32 %v2011_v24, 16  ;;  %v2468_v11 = vshll.u32 %v2011_v24, 16  ;;  %v967_v43 = vpop.permute.xlu1 %966  ;;  %3651 = vmatpush3.msra.mxu1 %v2978_v38 }
 0x1fc   : > { %v852_v40 = vpop.permute.xlu0 %851  ;;  %3652 = vmatprep.subr.mxu1 %v3888_v47 }
 0x1fd   : > { %v2467_v13 = vrot.slane %v2465_v46, 3  ;;  %v2470_v60 = vrot.slane %v2468_v11, 4  ;;  %v1670_v25 = vsel %vm1614_vm3, %v5427_v57, %v852_v40 }
 0x1fe   : > { %v1728_v6 = vsel %vm1674_vm4, %v1670_v25, %v967_v43  ;;  %v3812_v25 = vld [vmem:[%s4004_s25 + $0xf4] ss:$0 sps:$4 sm:$0x11]   ;;  %s3550_s25 = sshll.u32 %s3990_s17, 7  ;;  %s311_s17 = sand.u32 1, %s3870_s28  }
 0x1ff   : > { %v2471_v7 = vor.u32 %v2470_v60, %v2467_v13  ;;  %v1334_v17 = vpop.permute.xlu1 %1333  ;;  %s6136_s23 = scalar_lea.vmem %s6477_s1, %s3550_s25  ;;  %s3432_s10 = sshll.u32 %s311_s17, 8 }
 0x200   : > { %v1034_v36 = vpop.permute.xlu0 %1033  ;;  %s6343_s21 = scalar_lea.vmem [#allocation2], %s3432_s10  ;;  %s6436_s18 = scalar_lea.sflag [#allocation3], %s311_s17 }
 0x201   : > { %v1785_v1 = vsel %vm1731_vm5, %v1728_v6, %v1034_v36  ;;  %v2472_v56 = vsel %vm2041_vm2, %v2454_v50, %v2471_v7  ;;  %v1612_v36 = vrot.slane %v3812_v25, 5  ;;  %s3354_s24 = sshll.u32 %s6343_s21, 4  ;;  %s3890_s25 = smov [#allocation2]   ;;  %s6404_s24 = int_to_ptr.vmem [resolvable:$true] %s3354_s24 }
 0x202   : > { %2885 = vmatmul.mubr.bf16.gmra.mxu1 %v2472_v56  ;;  %v1842_v57 = vsel %vm1788_vm6, %v1785_v1, %v1334_v17  ;;  %v2977_v17 = vld [vmem:[%s6480_s4 + $0x10] sm:$0xff]  ;;  %s3818_s12 = scalar_lea.vmem %s6404_s24, 4096  ;;  %s3822_s19 = sshll.u32 %s3890_s25, 4  ;;  %s3823_s19 = int_to_ptr.vmem [resolvable:$false] %s3822_s19 }
 0x203   : > { %v1515_v32 = vpop.permute.xlu1 %1514  ;;  %3539 = vmatprep.mubr.msk.bf16.mxu1 %vm1614_vm3, %v2498_v28  ;;  %3653 = vmatpush3.msra.mxu1 %v2977_v17  ;;  %p3819_p11 = scmp.ne.s32.totalorder %s6404_s24, %s3818_s12  ;;  %s3824_s20 = scalar_lea.vmem %s3823_s19, 8192 }
 0x204   : > { %v1448_v0 = vpop.permute.xlu0 %1447  ;;  %3654 = vmatprep.subr.mxu1 %v3888_v47  ;;  %p3825_p0 = scmp.lt.s32.totalorder %s6404_s24, %s3823_s19  ;;  %p3826_p1 = scmp.lt.s32.totalorder %s3824_s20, %s3818_s12 }
 0x205   : > { %v1899_v29 = vsel %vm1845_vm7, %v1842_v57, %v1448_v0  ;;  %v1613_v57 = vsel %vm858_vm0, %v1610_v3, %v1612_v36  ;;  %v2976_v3 = vld [vmem:[%s6480_s4 + $0x8] sm:$0xff]  ;;  %p3820_p12 = pnand %p3819_p11, %p3976_p5 }
 0x206   : > { %v1956_v34 = vsel %vm1902_vm8, %v1899_v29, %v1515_v32  ;;  %v2508_v0 = vshrl.u32 %v1613_v57, 16  ;;  %v2511_v29 = vshll.u32 %v1613_v57, 16  ;;  %3655 = vmatpush3.msra.mxu1 %v2976_v3  ;;  %p3827_p2 = por %p3826_p1, %p3825_p0 }
 0x207   : > { %v854_v58 = vpop.permute.xlu1 %853  ;;  %3656 = vmatprep.subr.mxu1 %v3888_v47  ;;  %p3821_p13 = pneg %p3820_p12 }
 0x208   : > { %v1600_v45 = vpop.permute.xlu0 %1599  ;;  %v1673_v41 = vsel %vm1614_vm3, %v3463_v37, %v854_v58 }
 0x209   : > { %v2013_v39 = vsel %vm1959_vm9, %v1956_v34, %v1600_v45  ;;  %v5872_v30 = vpop.f32.mrf.mxu1  ;;  %p3828_p3 = pnand %p3827_p2, %p3821_p13 }
 0x20a   : > { %v2482_v42 = vshrl.u32 %v2013_v39, 16  ;;  %v2485_v14 = vshll.u32 %v2013_v39, 16  ;;  %v2510_v39 = vrot.slane %v2508_v0, 3 }
 0x20b   : > { %v2822_v19 = vpop.f32.mrf.mxu1 }
 0x20c   : > { %v2484_v9 = vrot.slane %v2482_v42, 3  ;;  %v2487_v16 = vrot.slane %v2485_v14, 4  ;;  %v5874_v21 = vpop.f32.mrf.mxu0  ;;  %v2513_v42 = vrot.slane %v2511_v29, 4 }
 0x20d   : > { %v5876_v35 = vpop.f32.mrf.mxu1 }
 0x20e   : > { %v2488_v49 = vor.u32 %v2487_v16, %v2484_v9  ;;  %v2771_v50 = vpop.f32.mrf.mxu0  ;;  %v2514_v9 = vor.u32 %v2513_v42, %v2510_v39 }
 0x20f   : > { %v2825_v15 = vpop.f32.mrf.mxu1 }
 0x210   : > { %v2772_v33 = vpop.f32.mrf.mxu0  ;;  %v2489_v20 = vsel %vm2041_vm2, %v2471_v7, %v2488_v49  ;;  %v1036_v59 = vpop.permute.xlu1 %1035  ;;  %v2515_v50 = vsel %vm2041_vm2, %v5854_v5, %v2514_v9 }
 0x211   : > { %2893 = vmatmul.mubr.bf16.gmra.mxu1 %v2489_v20 }
 0x212   : > { %v2773_v27 = vpop.f32.mrf.mxu0  ;;  %3540 = vmatprep.mubr.msk.bf16.mxu1 %vm1614_vm3, %v2515_v50 }
 0x215   : > { %v969_v44 = vpop.permute.xlu0 %968 }
 0x216   : > { %v1730_v54 = vsel %vm1674_vm4, %v1673_v41, %v969_v44 }
 0x217   : > { %v1787_v43 = vsel %vm1731_vm5, %v1730_v54, %v1036_v59  ;;  %v5936_v54 = vld [vmem:[%s6479_s3] ss:$0 sm:$0xff] }
 0x218   : > { %v5980_v57 = vadd.f32 %v5936_v54, %v5798_v52  ;;  %v5994_v52 = vadd.f32 %v5936_v54, %v5874_v21 }
 0x219   : > { %v1336_v40 = vpop.permute.xlu0 %1335 }
 0x21a   : > { %v1844_v7 = vsel %vm1788_vm6, %v1787_v43, %v1336_v40  ;;  %v5948_v43 = vadd.f32 %v5936_v54, %v5706_v18  ;;  %v2918_v42 = vsel %vm1788_vm6, %v5980_v57, 0.0 }
 0x21f   : > { %v1450_v60 = vpop.permute.xlu1 %1449 }
 0x220   : > { %v1901_v28 = vsel %vm1845_vm7, %v1844_v7, %v1450_v60  ;;  %v5954_v60 = vadd.f32 %v5936_v54, %v5715_v4  ;;  %v5968_v7 = vadd.f32 %v5936_v54, %v5760_v62 }
 0x221   : > { %v1517_v48 = vpop.permute.xlu0 %1516 }
 0x222   : > { %v1958_v1 = vsel %vm1902_vm8, %v1901_v28, %v1517_v48  ;;  %v2910_v18 = vsel %vm1788_vm6, %v5954_v60, 0.0  ;;  %v5974_v28 = vadd.f32 %v5936_v54, %v5788_v23  ;;  %v5988_v23 = vadd.f32 %v5936_v54, %v5846_v31 }
 0x223   : > { %v1602_v56 = vpop.permute.xlu1 %1601 }
 0x224   : > { %v2015_v32 = vsel %vm1959_vm9, %v1958_v1, %v1602_v56  ;;  %v2914_v56 = vsel %vm1788_vm6, %v5968_v7, 0.0  ;;  %v2916_v29 = vsel %vm1788_vm6, %v5974_v28, 0.0  ;;  %v2920_v9 = vsel %vm1788_vm6, %v5988_v23, 0.0 }
 0x225   : > { %v2828_v8 = vpop.f32.mrf.mxu1  ;;  %v2499_v34 = vshrl.u32 %v2015_v32, 16  ;;  %v2502_v45 = vshll.u32 %v2015_v32, 16 }
 0x227   : > { %v2829_v53 = vpop.f32.mrf.mxu1  ;;  %v2501_v14 = vrot.slane %v2499_v34, 3  ;;  %v2504_v19 = vrot.slane %v2502_v45, 4 }
 0x228   : > { %v5892_v10 = vpop.f32.mrf.mxu0 }
 0x229   : > { %v5896_v24 = vpop.f32.mrf.mxu1  ;;  %v2505_v16 = vor.u32 %v2504_v19, %v2501_v14 }
 0x22a   : > { %v2778_v46 = vpop.f32.mrf.mxu0 }
 0x22b   : > { %v2832_v11 = vpop.f32.mrf.mxu1  ;;  %v2506_v63 = vsel %vm2041_vm2, %v2488_v49, %v2505_v16  ;;  %v2975_v49 = vld [vmem:[%s6480_s4] sm:$0xff]  ;;  %v5940_v46 = vadd.f32 %v5936_v54, %v5655_v61  ;;  %v2908_v61 = vsel %vm1788_vm6, %v5948_v43, 0.0  ;;  %v6000_v16 = vadd.f32 %v5936_v54, %v5892_v10 }
 0x22c   : > { %v5899_v13 = vpop.f32.mrf.mxu0  ;;  %2899 = vmatmul.mubr.bf16.gmra.mxu1 %v2506_v63  ;;  %v5944_v11 = vadd.f32 %v5936_v54, %v5627_v22  ;;  %v5962_v22 = vadd.f32 %v5936_v54, %v5727_v51  ;;  %v2922_v63 = vsel %vm1788_vm6, %v5994_v52, 0.0 }
 0x22d   : > { %3657 = vmatpush3.msra.mxu1 %v2975_v49  ;;  %3658 = vmatprep.mubr.msk.f32.mxu1 %vm3889_vm10, %v3888_v47  ;;  %v2906_v40 = vsel %vm1788_vm6, %v5940_v46, 0.0  ;;  %v6006_v3 = vadd.f32 %v5936_v54, %v5899_v13 }
 0x22e   : > { %v2781_v6 = vpop.f32.mrf.mxu0  ;;  %3661 = vmatprep.subr.mxu1 %v3888_v47  ;;  %v2905_v25 = vsel %vm1788_vm6, %v5944_v11, 0.0  ;;  %v2912_v36 = vsel %vm1788_vm6, %v5962_v22, 0.0 }
 0x22f   : > { %v2907_v6 = vadd.f32 %v2906_v40, %v2905_v25 }
 0x231   : > { %v2909_v17 = vadd.f32 %v2908_v61, %v2907_v6 }
 0x233   : > { %v2911_v51 = vadd.f32 %v2910_v18, %v2909_v17 }
 0x235   : > { %v2913_v32 = vadd.f32 %v2912_v36, %v2911_v51 }
 0x237   : > { %v2915_v45 = vadd.f32 %v2914_v56, %v2913_v32 }
 0x239   : > { %v2917_v14 = vadd.f32 %v2916_v29, %v2915_v45 }
 0x23b   : > { %v2919_v31 = vadd.f32 %v2918_v42, %v2917_v14  ;;  %v6051_v42 = vadd.f32 %v5936_v54, %v5876_v35 }
 0x23d   : > { %v2921_v21 = vadd.f32 %v2920_v9, %v2919_v31  ;;  %v2942_v9 = vsel %vm1788_vm6, %v6051_v42, 0.0 }
 0x241   : > { %v5921_v15 = vpop.f32.mrf.mxu1 }
 0x243   : > { %v2837_v33 = vpop.f32.mrf.mxu1 }
 0x244   : > { %v2784_v20 = vpop.f32.mrf.mxu0 }
 0x245   : > { %v2838_v27 = vpop.f32.mrf.mxu1  ;;  %v2924_v20 = vsel %vm1788_vm6, %v6000_v16, 0.0 }
 0x246   : > { %v2785_v55 = vpop.f32.mrf.mxu0 }
 0x247   : > { %v2839_v2 = vpop.f32.mrf.mxu1  ;;  %v2923_v55 = vadd.f32 %v2922_v63, %v2921_v21  ;;  %v6063_v63 = vadd.f32 %v5936_v54, %v5921_v15 }
 0x248   : > { %v2786_v5 = vpop.f32.mrf.mxu0  ;;  %v2926_v2 = vsel %vm1788_vm6, %v6006_v3, 0.0 }
 0x249   : > { %v6011_v27 = vadd.f32 %v5936_v54, %v2786_v5  ;;  %v2925_v49 = vadd.f32 %v2924_v20, %v2923_v55  ;;  %v2946_v20 = vsel %vm1788_vm6, %v6063_v63, 0.0 }
 0x24a   : > { %v2788_v26 = vpop.f32.mrf.mxu0 }
 0x25d   : > { %v5929_v37 = vpop.f32.mrf.mxu1 }
 0x25e   : > { %v6069_v55 = vadd.f32 %v5936_v54, %v5929_v37 }
 0x25f   : > { %v2844_v58 = vpop.f32.mrf.mxu1 }
 0x260   : > { %v2791_v8 = vpop.f32.mrf.mxu0 }
 0x261   : > { %v5931_v41 = vpop.f32.mrf.mxu1  ;;  %v6016_v26 = vadd.f32 %v5936_v54, %v2791_v8 }
 0x262   : > { %v2793_v38 = vpop.f32.mrf.mxu0  ;;  %v6075_v15 = vadd.f32 %v5936_v54, %v5931_v41 }
 0x263   : > { %v2847_v59 = vpop.f32.mrf.mxu1  ;;  %v2928_v38 = vsel %vm1788_vm6, %v6011_v27, 0.0 }
 0x264   : > { %v2794_v53 = vpop.f32.mrf.mxu0 }
 0x265   : > { %v2927_v53 = vadd.f32 %v2926_v2, %v2925_v49  ;;  %v2948_v49 = vsel %vm1788_vm6, %v6069_v55, 0.0 }
 0x266   : > { %v2795_v44 = vpop.f32.mrf.mxu0 }
 0x267   : > { %v2930_v44 = vsel %vm1788_vm6, %v6016_v26, 0.0  ;;  %v2929_v25 = vadd.f32 %v2928_v38, %v2927_v53  ;;  %v2950_v38 = vsel %vm1788_vm6, %v6075_v15, 0.0 }
 0x269   : > { %v2931_v18 = vadd.f32 %v2930_v44, %v2929_v25 }
 0x279   : > { %v2850_v4 = vpop.f32.mrf.mxu1 }
 0x27b   : > { %v2851_v48 = vpop.f32.mrf.mxu1 }
 0x27c   : > { %v2798_v1 = vpop.f32.mrf.mxu0 }
 0x27d   : > { %v5982_v62 = vpop.f32.mrf.mxu1  ;;  %v6021_v59 = vadd.f32 %v5936_v54, %v2798_v1  ;;  %v6039_v1 = vadd.f32 %v5936_v54, %v5836_v12 }
 0x27e   : > { %v2800_v0 = vpop.f32.mrf.mxu0  ;;  %v6081_v53 = vadd.f32 %v5936_v54, %v5982_v62 }
 0x27f   : > { %v2854_v34 = vpop.f32.mrf.mxu1  ;;  %v2932_v61 = vsel %vm1788_vm6, %v6021_v59, 0.0  ;;  %v2938_v32 = vsel %vm1788_vm6, %v6039_v1, 0.0  ;;  %v6045_v0 = vadd.f32 %v5936_v54, %v5872_v30  ;;  %v6057_v30 = vadd.f32 %v5936_v54, %v5896_v24 }
 0x280   : > { %v2801_v39 = vpop.f32.mrf.mxu0  ;;  %v2933_v36 = vadd.f32 %v2932_v61, %v2931_v18 }
 0x281   : > { %v6026_v40 = vadd.f32 %v5936_v54, %v2801_v39  ;;  %v2940_v39 = vsel %vm1788_vm6, %v6045_v0, 0.0 }
 0x282   : > { %v2803_v19 = vpop.f32.mrf.mxu0 }
 0x283   : > { %v2934_v17 = vsel %vm1788_vm6, %v6026_v40, 0.0 }
 0x284   : > { %v2806_v50 = vpop.f32.mrf.mxu0  ;;  %v2935_v51 = vadd.f32 %v2934_v17, %v2933_v36 }
 0x285   : > { %v2944_v50 = vsel %vm1788_vm6, %v6057_v30, 0.0 }
 0x286   : > { %v2807_v33 = vpop.f32.mrf.mxu0 }
 0x288   : > { %v2808_v10 = vpop.f32.mrf.mxu0 }
 0x289   : > { %v6031_v6 = vadd.f32 %v5936_v54, %v2808_v10 }
 0x28a   : > { %v2857_v58 = vpop.f32.mrf.mxu1  ;;  %v2810_v13 = vpop.f32.mrf.mxu0 }
 0x28b   : > { %v2936_v48 = vsel %vm1788_vm6, %v6031_v6, 0.0  ;;  %v6086_v44 = vadd.f32 %v5936_v54, %v2857_v58 }
 0x28c   : > { %v2859_v5 = vpop.f32.mrf.mxu1  ;;  %v2937_v56 = vadd.f32 %v2936_v48, %v2935_v51 }
 0x28d   : > { %v2952_v5 = vsel %vm1788_vm6, %v6081_v53, 0.0  ;;  %v2954_v41 = vsel %vm1788_vm6, %v6086_v44, 0.0 }
 0x28e   : > { %v2860_v8 = vpop.f32.mrf.mxu1  ;;  %v2939_v34 = vadd.f32 %v2938_v32, %v2937_v56 }
 0x290   : > { %v2861_v4 = vpop.f32.mrf.mxu1  ;;  %v2941_v14 = vadd.f32 %v2940_v39, %v2939_v34 }
 0x292   : > { %v2943_v31 = vadd.f32 %v2942_v9, %v2941_v14 }
 0x294   : > { %v2945_v35 = vadd.f32 %v2944_v50, %v2943_v31 }
 0x296   : > { %v2947_v24 = vadd.f32 %v2946_v20, %v2945_v35 }
 0x298   : > { %v2949_v13 = vadd.f32 %v2948_v49, %v2947_v24 }
 0x299   : > { %v2864_v29 = vpop.f32.mrf.mxu1 }
 0x29a   : > { %v2951_v37 = vadd.f32 %v2950_v38, %v2949_v13  ;;  %v6091_v18 = vadd.f32 %v5936_v54, %v2864_v29 }
 0x29b   : > { %v2866_v45 = vpop.f32.mrf.mxu1 }
 0x29c   : > { %v2953_v8 = vadd.f32 %v2952_v5, %v2951_v37  ;;  %v2956_v36 = vsel %vm1788_vm6, %v6091_v18, 0.0 }
 0x29d   : > { %v2867_v12 = vpop.f32.mrf.mxu1 }
 0x29e   : > { %v2955_v17 = vadd.f32 %v2954_v41, %v2953_v8  ;;  %v6096_v48 = vadd.f32 %v5936_v54, %v2867_v12 }
 0x29f   : > { %v2869_v19 = vpop.f32.mrf.mxu1 }
 0x2a0   : > { %v2957_v51 = vadd.f32 %v2956_v36, %v2955_v17  ;;  %v2958_v32 = vsel %vm1788_vm6, %v6096_v48, 0.0  ;;  %v3058_v36 = vld [vmem:[%s6482_s6] sm:$0xf] }
 0x2a2   : > { %v2959_v34 = vadd.f32 %v2958_v32, %v2957_v51  ;;  %v2983_v51 = vld [vmem:[%s6481_s5] sm:$0x1] }
 0x2a6   : > { %v2872_v21 = vpop.f32.mrf.mxu1 }
 0x2a8   : > { %v2873_v33 = vpop.f32.mrf.mxu1 }
 0x2aa   : > { %v2874_v10 = vpop.f32.mrf.mxu1 }
 0x2ab   : > { %v6099_v58 = vadd.f32 %v5936_v54, %v2874_v10 }
 0x2ac   : > { %v2876_v2 = vpop.f32.mrf.mxu1 }
 0x2ad   : > { %v2960_v29 = vsel %vm1788_vm6, %v6099_v58, 0.0 }
 0x2ae   : > { %v2961_v14 = vadd.f32 %v2960_v29, %v2959_v34 }
 0x2b5   : > { %v2879_v25 = vpop.f32.mrf.mxu1 }
 0x2b6   : > { %v6102_v56 = vadd.f32 %v5936_v54, %v2879_v25 }
 0x2b7   : > { %v2881_v61 = vpop.f32.mrf.mxu1 }
 0x2b8   : > { %v2962_v39 = vsel %vm1788_vm6, %v6102_v56, 0.0 }
 0x2b9   : > { %v2882_v4 = vpop.f32.mrf.mxu1  ;;  %v2963_v31 = vadd.f32 %v2962_v39, %v2961_v14 }
 0x2bb   : > { %v2883_v62 = vpop.f32.mrf.mxu1 }
 0x2c2   : > { %v2886_v45 = vpop.f32.mrf.mxu1 }
 0x2c3   : > { %v6111_v12 = vadd.f32 %v5936_v54, %v2886_v45  ;;  %v3059_v45 = vld [vmem:[%s6483_s7] sm:$0x1] }
 0x2c4   : > { %v2888_v19 = vpop.f32.mrf.mxu1 }
 0x2c5   : > { %v2964_v9 = vsel %vm1788_vm6, %v6111_v12, 0.0 }
 0x2c6   : > { %v2889_v50 = vpop.f32.mrf.mxu1  ;;  %v2965_v21 = vadd.f32 %v2964_v9, %v2963_v31 }
 0x2c7   : > { %v6116_v35 = vadd.f32 %v5936_v54, %v2889_v50 }
 0x2c8   : > { %v2891_v33 = vpop.f32.mrf.mxu1 }
 0x2c9   : > { %v2966_v20 = vsel %vm1788_vm6, %v6116_v35, 0.0  ;;  %v6139_v33 = vld [vmem:[%s6136_s23] sm:$0xff]  }
 0x2ca   : > { %v2967_v24 = vadd.f32 %v2966_v20, %v2965_v21  ;;  %v3144_v21 = vlaneseq  ;;  %v6142_v20 = vld [vmem:[%s6136_s23 + $0x8] sm:$0xff]  }
 0x2cc   : > { %v2968_v10 = vrot.slane %v2967_v24, 4 }
 0x2ce   : > { %v2969_v2 = vadd.f32 %v2968_v10, %v2967_v24  ;;  %v6145_v24 = vld [vmem:[%s6136_s23 + $0x10] sm:$0xff]   ;;  %v6148_v10 = vld [vmem:[%s6136_s23 + $0x18] sm:$0xff]  }
 0x2d0   : > { %v2970_v49 = vrot.slane %v2969_v2, 2 }
 0x2d1   : > { %v2894_v13 = vpop.f32.mrf.mxu1 }
 0x2d2   : > { %v2971_v38 = vadd.f32 %v2970_v49, %v2969_v2  ;;  %v6151_v2 = vld [vmem:[%s6136_s23 + $0x40] sm:$0xff]   ;;  %v3145_v13 = vshrl.u32 %v3144_v21, 7 }
 0x2d3   : > { %v2895_v37 = vpop.f32.mrf.mxu1  ;;  %v6154_v49 = vld [vmem:[%s6136_s23 + $0x20] sm:$0xff]  }
 0x2d4   : > { %v2972_v5 = vrot.slane %v2971_v38, 1 }
 0x2d5   : > { %v2896_v25 = vpop.f32.mrf.mxu1 }
 0x2d6   : > { %v2973_v8 = vadd.f32 %v2972_v5, %v2971_v38  ;;  %v3554_v38 = vunpack.c.l.bf16 %v6139_v33  ;;  %v6159_v5 = vld [vmem:[%s6136_s23 + $0x48] sm:$0xff]  }
 0x2d7   : > { %v2897_v61 = vpop.f32.mrf.mxu1 }
 0x2d8   : > { %v2974_v41 = vmul.f32 0.00390625, %v2973_v8 }
 0x2da   : > { %3659 = vmatmul.mubr.msk.f32.vlgmr.msra.gmra.mxu1 %vm1788_vm6, %v2974_v41 }
 0x2db   : > { %3663 = vmatprep.mubr.msk.f32.mxu1 %vm3889_vm10, %v3888_v47  ;;  %3662 = vmatpush3.msk.msra.mxu1 %vm3064_vm11, %v3058_v36  ;;  %v6195_v36 = vld [vmem:[%s6136_s23 + $0x68] sm:$0xff]  }
 0x2ec   : > { %v2900_v54 = vpop.f32.mrf.mxu1 }
 0x2ed   : > { %v6166_v54 = vld [vmem:[%s6136_s23 + $0x28] sm:$0xff]  }
 0x2ee   : > { %v2901_v4 = vpop.f32.mrf.mxu1 }
 0x2ef   : > { %v6169_v4 = vld [vmem:[%s6136_s23 + $0x50] sm:$0xff]  }
 0x2f0   : > { %v2902_v17 = vpop.f32.mrf.mxu1 }
 0x2f1   : > { %v3586_v17 = vunpack.c.l.bf16 %v6151_v2 }
 0x2f2   : > { %v2903_v62 = vpop.f32.mrf.mxu1 }
 0x2f3   : > { %v6202_v62 = vld [vmem:[%s6136_s23 + $0x70] sm:$0xff]  }
 0x39a   : > { %v3053_v32 = vpop.f32.mrf.mxu1 }
 0x39b   : > { %v3054_v29 = vadd.f32 %v3053_v32, %v2983_v51  ;;  %v6176_v32 = vld [vmem:[%s6136_s23 + $0x30] sm:$0xff]  }
 0x39c   : > { %v3660_v34 = vpop.f32.mrf.mxu1 }
 0x39d   : > { %v3057_v47 = vmax.f32 %v3054_v29, 0.0  ;;  %v6179_v29 = vld [vmem:[%s6136_s23 + $0x58] sm:$0xff]  }
 0x39f   : > { %3664 = vmatmul.mubr.msk.f32.vlgmr.msra.gmra.mxu1 %vm3060_vm12, %v3057_v47 }
 0x45f   : > { %v3134_v39 = vpop.f32.mrf.mxu1 }
 0x460   : > { %v3135_v14 = vadd.f32 %v3134_v39, %v3059_v45  ;;  %v6185_v39 = vld [vmem:[%s6136_s23 + $0x38] sm:$0xff]   ;;  %v3607_v45 = vunpack.c.h.bf16 %v6195_v36 }
 0x461   : > { %v3665_v19 = vpop.f32.mrf.mxu1  ;;  %v3583_v21 = vunpack.c.h.bf16 %v6185_v39 }
 0x462   : > { %v3544_v9 = vmul.f32 -1.442695, %v3135_v14  ;;  %v6188_v14 = vld [vmem:[%s6136_s23 + $0x60] sm:$0xff]   ;;  %v3146_v19 = vsub.s32 0, %v3145_v13  ;;  %v6205_v13 = vld [vmem:[%s6136_s23 + $0x78] sm:$0xff]  }
 0x464   : > { %3813 = vpow2.f32 %v3544_v9 }
 0x471   : > { %v3814_v31 = vpop.eup %3813 }
 0x472   : > { %v3141_v50 = vadd.f32 1.0, %v3814_v31  ;;  %v3582_v31 = vunpack.c.l.bf16 %v6185_v39 }
 0x474   : > { %3815 = vrcp.f32 %v3141_v50 }
 0x481   : > { %v3816_v9 = vpop.eup %3815 }
 0x482   : > { %v3147_v51 = vrot.slane %v3816_v9, %v3146_v19 }
 0x484   : > { %v3148_v50 = vmul.f32 %v3147_v51, %v5944_v11  ;;  %v3149_v39 = vmul.f32 %v3147_v51, %v5940_v46  ;;  %v3150_v37 = vmul.f32 %v3147_v51, %v5948_v43  ;;  %v3151_v34 = vmul.f32 %v3147_v51, %v5954_v60 }
 0x485   : > { %v3152_v47 = vmul.f32 %v3147_v51, %v5962_v22  ;;  %v3153_v19 = vmul.f32 %v3147_v51, %v5968_v7  ;;  %v3154_v9 = vmul.f32 %v3147_v51, %v5974_v28  ;;  %v3155_v61 = vmul.f32 %v3147_v51, %v5980_v57 }
 0x486   : > { %v3156_v8 = vmul.f32 %v3147_v51, %v5988_v23  ;;  %v3157_v25 = vmul.f32 %v3147_v51, %v5994_v52  ;;  %v3158_v11 = vmul.f32 %v3147_v51, %v6000_v16  ;;  %v3159_v46 = vmul.f32 %v3147_v51, %v6006_v3 }
 0x487   : > { %v3160_v43 = vmul.f32 %v3147_v51, %v6011_v27  ;;  %v3161_v60 = vmul.f32 %v3147_v51, %v6016_v26  ;;  %v3162_v22 = vmul.f32 %v3147_v51, %v6021_v59  ;;  %v3163_v7 = vmul.f32 %v3147_v51, %v6026_v40 }
 0x488   : > { %v3164_v28 = vmul.f32 %v3147_v51, %v6031_v6  ;;  %v3165_v57 = vmul.f32 %v3147_v51, %v6039_v1  ;;  %v3166_v23 = vmul.f32 %v3147_v51, %v6045_v0  ;;  %v3167_v52 = vmul.f32 %v3147_v51, %v6051_v42 }
 0x489   : > { %v3168_v16 = vmul.f32 %v3147_v51, %v6057_v30  ;;  %v3169_v3 = vmul.f32 %v3147_v51, %v6063_v63  ;;  %v3170_v27 = vmul.f32 %v3147_v51, %v6069_v55  ;;  %v3171_v26 = vmul.f32 %v3147_v51, %v6075_v15 }
 0x48a   : > { %v3172_v59 = vmul.f32 %v3147_v51, %v6081_v53  ;;  %v3173_v40 = vmul.f32 %v3147_v51, %v6086_v44  ;;  %v3174_v6 = vmul.f32 %v3147_v51, %v6091_v18  ;;  %v3175_v1 = vmul.f32 %v3147_v51, %v6096_v48 }
 0x48b   : > { %v3176_v0 = vmul.f32 %v3147_v51, %v6099_v58  ;;  %v3177_v42 = vmul.f32 %v3147_v51, %v6102_v56  ;;  %v3178_v30 = vmul.f32 %v3147_v51, %v6111_v12  ;;  %v3179_v63 = vmul.f32 %v3147_v51, %v6116_v35 }
 0x48c   : > { %v3244_v55 = vadd.f32 %v3554_v38, %v3148_v50  ;;  %v6556_v15 = vunpack.c.h.bf16 %v6139_v33  ;;  %v6557_v44 = vunpack.c.l.bf16 %v6142_v20  ;;  %v6558_v48 = vunpack.c.h.bf16 %v6142_v20 }
 0x48d   : > { %v6559_v58 = vunpack.c.l.bf16 %v6145_v24  ;;  %v6560_v12 = vunpack.c.h.bf16 %v6145_v24  ;;  %v6561_v51 = vunpack.c.l.bf16 %v6148_v10  ;;  %v6562_v33 = vunpack.c.h.bf16 %v6148_v10 }
 0x48e   : > { %v3245_v53 = vadd.f32 %v6556_v15, %v3149_v39  ;;  %v3246_v18 = vadd.f32 %v6557_v44, %v3150_v37  ;;  %v3247_v41 = vadd.f32 %v6558_v48, %v3151_v34  ;;  %v6563_v39 = vunpack.c.l.bf16 %v6154_v49 }
 0x48f   : > { %v3248_v56 = vadd.f32 %v6559_v58, %v3152_v47  ;;  %v3249_v35 = vadd.f32 %v6560_v12, %v3153_v19  ;;  %v3250_v38 = vadd.f32 %v6561_v51, %v3154_v9  ;;  %v3251_v50 = vadd.f32 %v6562_v33, %v3155_v61 }
 0x490   : > { %v3252_v15 = vadd.f32 %v6563_v39, %v3156_v8  ;;  %v6564_v37 = vunpack.c.h.bf16 %v6154_v49  ;;  %v6565_v34 = vunpack.c.l.bf16 %v6166_v54  ;;  %v6566_v47 = vunpack.c.h.bf16 %v6166_v54 }
 0x491   : > { %v6567_v24 = vunpack.c.l.bf16 %v6176_v32  ;;  %v6568_v9 = vunpack.c.h.bf16 %v6176_v32  ;;  %v3258_v10 = vadd.f32 %v3582_v31, %v3162_v22  ;;  %v3259_v61 = vadd.f32 %v3583_v21, %v3163_v7 }
 0x492   : > { %v3253_v20 = vadd.f32 %v6564_v37, %v3157_v25  ;;  %v3254_v44 = vadd.f32 %v6565_v34, %v3158_v11  ;;  %v3255_v48 = vadd.f32 %v6566_v47, %v3159_v46  ;;  %v6281_v8 = vadd.f32 %v3586_v17, %v3164_v28 }
 0x493   : > { %v3256_v19 = vadd.f32 %v6567_v24, %v3160_v43  ;;  %v3257_v58 = vadd.f32 %v6568_v9, %v3161_v60  ;;  %v6569_v49 = vunpack.c.h.bf16 %v6151_v2  ;;  %v6570_v11 = vunpack.c.l.bf16 %v6159_v5 }
 0x494   : > { %v6571_v46 = vunpack.c.h.bf16 %v6159_v5  ;;  %v6572_v32 = vunpack.c.l.bf16 %v6169_v4  ;;  %v6573_v21 = vunpack.c.h.bf16 %v6169_v4  ;;  %v6574_v2 = vunpack.c.l.bf16 %v6179_v29 }
 0x495   : > { %v6285_v25 = vadd.f32 %v6569_v49, %v3165_v57  ;;  %v6289_v54 = vadd.f32 %v6570_v11, %v3166_v23  ;;  %v6575_v22 = vunpack.c.h.bf16 %v6179_v29  ;;  %v6576_v5 = vunpack.c.l.bf16 %v6188_v14 }
 0x496   : > { %v6293_v43 = vadd.f32 %v6571_v46, %v3167_v52  ;;  %v6297_v31 = vadd.f32 %v6572_v32, %v3168_v16  ;;  %v6301_v17 = vadd.f32 %v6573_v21, %v3169_v3  ;;  %v6305_v60 = vadd.f32 %v6574_v2, %v3170_v27 }
 0x497   : > { %v6309_v7 = vadd.f32 %v6575_v22, %v3171_v26  ;;  %v6313_v28 = vadd.f32 %v6576_v5, %v3172_v59  ;;  %v6577_v57 = vunpack.c.h.bf16 %v6188_v14  ;;  %v6578_v4 = vunpack.c.l.bf16 %v6195_v36 }
 0x498   : > { %v6325_v16 = vadd.f32 %v3607_v45, %v3175_v1  ;;  %v6579_v29 = vunpack.c.l.bf16 %v6202_v62  ;;  %v6580_v27 = vunpack.c.h.bf16 %v6202_v62  ;;  %v6581_v14 = vunpack.c.l.bf16 %v6205_v13 }
 0x499   : > { %v6317_v23 = vadd.f32 %v6577_v57, %v3173_v40  ;;  %v6321_v52 = vadd.f32 %v6578_v4, %v3174_v6  ;;  %v6582_v40 = vunpack.c.h.bf16 %v6205_v13  ;;  %v3276_v12 = vmax.f32 %v3244_v55, 0.0 }
 0x49a   : > { %v6329_v3 = vadd.f32 %v6579_v29, %v3176_v0  ;;  %v6333_v26 = vadd.f32 %v6580_v27, %v3177_v42  ;;  %v6337_v59 = vadd.f32 %v6581_v14, %v3178_v30  ;;  %v3277_v36 = vmax.f32 %v3245_v53, 0.0 }
 0x49b   : > { %v6341_v6 = vadd.f32 %v6582_v40, %v3179_v63  ;;  %v3278_v45 = vmax.f32 %v3246_v18, 0.0  ;;  %v3279_v1 = vmax.f32 %v3247_v41, 0.0  ;;  %v3280_v51 = vmax.f32 %v3248_v56, 0.0  ;;  %3308 = vst.msk [vmem:[%s6343_s21] sm:$0xff] %vm1788_vm6, %v3276_v12 }
 0x49c   : > { %v3281_v33 = vmax.f32 %v3249_v35, 0.0  ;;  %v3282_v0 = vmax.f32 %v3250_v38, 0.0  ;;  %v3283_v39 = vmax.f32 %v3251_v50, 0.0  ;;  %v3284_v37 = vmax.f32 %v3252_v15, 0.0  ;;  %3309 = vst.msk [vmem:[%s6343_s21 + $0x8] sm:$0xff] %vm1788_vm6, %v3277_v36 }
 0x49d   : > { %v3285_v62 = vmax.f32 %v3253_v20, 0.0  ;;  %v3286_v42 = vmax.f32 %v3254_v44, 0.0  ;;  %v3287_v34 = vmax.f32 %v3255_v48, 0.0  ;;  %3310 = vst.msk [vmem:[%s6343_s21 + $0x10] sm:$0xff] %vm1788_vm6, %v3278_v45  ;;  %3311 = vst.msk [vmem:[%s6343_s21 + $0x18] sm:$0xff] %vm1788_vm6, %v3279_v1  ;;  %v3288_v41 = vmax.f32 %v3256_v19, 0.0 }
 0x49e   : > { %v3289_v13 = vmax.f32 %v3257_v58, 0.0  ;;  %v3290_v30 = vmax.f32 %v3258_v10, 0.0  ;;  %v3291_v63 = vmax.f32 %v3259_v61, 0.0  ;;  %3312 = vst.msk [vmem:[%s6343_s21 + $0x20] sm:$0xff] %vm1788_vm6, %v3280_v51  ;;  %3313 = vst.msk [vmem:[%s6343_s21 + $0x28] sm:$0xff] %vm1788_vm6, %v3281_v33  ;;  %v3292_v55 = vmax.f32 %v6281_v8, 0.0 }
 0x49f   : > { %3314 = vst.msk [vmem:[%s6343_s21 + $0x30] sm:$0xff] %vm1788_vm6, %v3282_v0  ;;  %3315 = vst.msk [vmem:[%s6343_s21 + $0x38] sm:$0xff] %vm1788_vm6, %v3283_v39  ;;  %v3293_v53 = vmax.f32 %v6285_v25, 0.0  ;;  %v3294_v18 = vmax.f32 %v6289_v54, 0.0  ;;  %v3295_v56 = vmax.f32 %v6293_v43, 0.0  ;;  %v3296_v35 = vmax.f32 %v6297_v31, 0.0 }
 0x4a0   : > { %3316 = vst.msk [vmem:[%s6343_s21 + $0x40] sm:$0xff] %vm1788_vm6, %v3284_v37  ;;  %3317 = vst.msk [vmem:[%s6343_s21 + $0x48] sm:$0xff] %vm1788_vm6, %v3285_v62  ;;  %v3297_v38 = vmax.f32 %v6301_v17, 0.0  ;;  %v3298_v50 = vmax.f32 %v6305_v60, 0.0  ;;  %v3299_v15 = vmax.f32 %v6309_v7, 0.0  ;;  %v3300_v20 = vmax.f32 %v6313_v28, 0.0 }
 0x4a1   : > { %3318 = vst.msk [vmem:[%s6343_s21 + $0x50] sm:$0xff] %vm1788_vm6, %v3286_v42  ;;  %3319 = vst.msk [vmem:[%s6343_s21 + $0x58] sm:$0xff] %vm1788_vm6, %v3287_v34  ;;  %v3301_v44 = vmax.f32 %v6317_v23, 0.0  ;;  %v3302_v47 = vmax.f32 %v6321_v52, 0.0  ;;  %v3303_v48 = vmax.f32 %v6325_v16, 0.0  ;;  %v3304_v24 = vmax.f32 %v6329_v3, 0.0 }
 0x4a2   : > { %3320 = vst.msk [vmem:[%s6343_s21 + $0x60] sm:$0xff] %vm1788_vm6, %v3288_v41  ;;  %3321 = vst.msk [vmem:[%s6343_s21 + $0x68] sm:$0xff] %vm1788_vm6, %v3289_v13  ;;  %v3305_v19 = vmax.f32 %v6333_v26, 0.0  ;;  %v3306_v9 = vmax.f32 %v6337_v59, 0.0  ;;  %v3307_v58 = vmax.f32 %v6341_v6, 0.0 }
 0x4a3   : > { %3322 = vst.msk [vmem:[%s6343_s21 + $0x70] sm:$0xff] %vm1788_vm6, %v3290_v30  ;;  %3323 = vst.msk [vmem:[%s6343_s21 + $0x78] sm:$0xff] %vm1788_vm6, %v3291_v63 }
 0x4a4   : > { %3324 = vst.msk [vmem:[%s6343_s21 + $0x80] sm:$0xff] %vm1788_vm6, %v3292_v55  ;;  %3325 = vst.msk [vmem:[%s6343_s21 + $0x88] sm:$0xff] %vm1788_vm6, %v3293_v53 }
 0x4a5   : > { %3326 = vst.msk [vmem:[%s6343_s21 + $0x90] sm:$0xff] %vm1788_vm6, %v3294_v18  ;;  %3327 = vst.msk [vmem:[%s6343_s21 + $0x98] sm:$0xff] %vm1788_vm6, %v3295_v56 }
 0x4a6   : > { %3328 = vst.msk [vmem:[%s6343_s21 + $0xa0] sm:$0xff] %vm1788_vm6, %v3296_v35  ;;  %3329 = vst.msk [vmem:[%s6343_s21 + $0xa8] sm:$0xff] %vm1788_vm6, %v3297_v38 }
 0x4a7   : > { %3330 = vst.msk [vmem:[%s6343_s21 + $0xb0] sm:$0xff] %vm1788_vm6, %v3298_v50  ;;  %3331 = vst.msk [vmem:[%s6343_s21 + $0xb8] sm:$0xff] %vm1788_vm6, %v3299_v15 }
 0x4a8   : > { %3332 = vst.msk [vmem:[%s6343_s21 + $0xc0] sm:$0xff] %vm1788_vm6, %v3300_v20  ;;  %3333 = vst.msk [vmem:[%s6343_s21 + $0xc8] sm:$0xff] %vm1788_vm6, %v3301_v44 }
 0x4a9   : > { %3334 = vst.msk [vmem:[%s6343_s21 + $0xd0] sm:$0xff] %vm1788_vm6, %v3302_v47  ;;  %3335 = vst.msk [vmem:[%s6343_s21 + $0xd8] sm:$0xff] %vm1788_vm6, %v3303_v48 }
 0x4aa   : > { %3336 = vst.msk [vmem:[%s6343_s21 + $0xe0] sm:$0xff] %vm1788_vm6, %v3304_v24  ;;  %3337 = vst.msk [vmem:[%s6343_s21 + $0xe8] sm:$0xff] %vm1788_vm6, %v3305_v19 }
 0x4ab   : > { %3338 = vst.msk [vmem:[%s6343_s21 + $0xf0] sm:$0xff] %vm1788_vm6, %v3306_v9  ;;  %3339 = vst.msk [vmem:[%s6343_s21 + $0xf8] sm:$0xff] %vm1788_vm6, %v3307_v58 }
 0x4ac   : > { %3831 = shalt.err (!%p3828_p3)
}
 0x4ad   : > { %s3832_s23 = scalar_lea.hbm %s6402_s13, 4096  ;;  %s3836_s21 = scalar_lea.hbm %s6484_s8, 8192 }
 0x4ae   : > { %p3833_p4 = scmp.ne.s32.totalorder %s6402_s13, %s3832_s23  ;;  %p3837_p9 = scmp.lt.s32.totalorder %s6402_s13, %s6484_s8 }
 0x4af   : > { %p3838_p10 = scmp.lt.s32.totalorder %s3836_s21, %s3832_s23 }
 0x4b0   : > { %p3834_p7 = pnand %p3833_p4, %p3976_p5 }
 0x4b1   : > { %p3839_p11 = por %p3838_p10, %p3837_p9 }
 0x4b2   : > { %p3835_p8 = pneg %p3834_p7 }
 0x4b4   : > { %p3840_p12 = pnand %p3839_p11, %p3835_p8 }
 0x4b6   : > { %3843 = shalt.err (!%p3840_p12)
}
 0x4b7   : > { %s3891_s26 = smov 128   ;;  %s3892_s12 = smov 8  }
 0x4b8   : > { %3685 = dma.vmem_to_hbm [thread:$0]  (%p3976_p5), %s6404_s24, 4096, %s6402_s13, %s6436_s18, %s3891_s26, %s3891_s26, %s3892_s12  }
 0x4b9 PF: > { %p3691_p13 = scmp.ge.s32.totalorder %s3878_s30, 2  ;;  %s3369_s25 = sand.u32 1, %s3866_s27  }
 0x4ba   : > { %s3370_s19 = scalar_lea.sflag [#allocation3], %s3369_s25 }
 0x4bb   : > { %p3688_p0 = pnand %p3691_p13, %p3980_p6 }
 0x4bd   : > { %p3689_p1 = pneg %p3688_p0 }
 0x4bf   : > { %3861 = dma.done.wait (%p3689_p1), %s3370_s19, 4096  }
 0x4c0   : > { %3863 = vsyncadd (%p3689_p1), %s3370_s19, 4294963200  ;;  %p18_p2 = scmp.ge.s32.totalorder %s3963_s11, 4   ;;  %s6583_s27 = smov %s3870_s28 }
 0x4c1   : > { %s6584_s28 = smov %s3874_s29  ;;  %s6585_s29 = smov %s3974_s14 }
 0x4c2   : > { %s6586_s30 = smov %s3963_s11  ;;  %20 = sbr.rel (!%p18_p2) target bundleno = 3 (0x3), region = 90 }
 0x4c7   :  { %3375 = vsyncpa [#allocation3], 1 }
 0x4c8   :  { %3377 = vsyncpa [#allocation3 + $0x1], 1 }

// kernel: residual_block_forward.4
= control target key start
LH: loop header
LB: loop body
LE: loop exit
PB: predicated region body
PF: predicated region fallthrough
CT: control target
= control target key end

     0   :  { %s3488_s12 = smov 0   ;;  %s6031_s0 = inlined_call_operand.vmem [shape: bf16[2,256,16], index: 0, kind: input, shape index: {}]   ;;  %s6032_s1 = inlined_call_operand.vmem [shape: bf16[144,16], index: 1, kind: input, shape index: {}]   ;;  %s6033_s2 = inlined_call_operand.vmem [shape: f32[1,16], index: 2, kind: input, shape index: {}]   ;;  %s6034_s3 = inlined_call_operand.vmem [shape: bf16[2,496,16], index: 3, kind: output, shape index: {}]  }
   0x1 LB: > { %s3188_s13 = sadd.s32 4294967295, %s3458_s12   ;;  %p3192_p0 = scmp.ge.s32.totalorder %s3458_s12, 1  ;;  %s3458_s12 = sphi %s3488_s12, %s13_s12  }
   0x2   : > { %p137_p1 = scmp.lt.s32.totalorder %s3458_s12, 3 }
   0x4   : > { %p138_p2 = pnand %p3192_p0, %p137_p1 }
   0x6   : > { %141 = sbr.rel (%p138_p2) target bundleno = 784 (0x310), region = 32 }
   0xb   : > { %vm172_vm0 = vcmask 125952   ;;  %p3498_p3 = scmp.lt.s32.totalorder %s3188_s13, 1  ;;  %v3460_v0 = vmov 0   ;;  %vm832_vm1 = vcmask 1042432   ;;  %vm530_vm2 = vsmask.f32 3328 }
   0xc   : > { %178 = vst.msk [vmem:[#allocation2 + $0x14] sm:$0xf] %vm172_vm0, %v3460_v0  ;;  %179 = vst.msk [vmem:[#allocation2 + $0x18] sm:$0xf] %vm172_vm0, %v3460_v0  ;;  %2652 = vmatprep.subr.bf16.mxu0 %v3460_v0  ;;  %3368 = vmatprep.subr.bf16.mxu1 %v3460_v0  ;;  %s3461_s23 = smov 48   ;;  %v3420_v45 = vld [vmem:[%s6032_s1 + $0x38] sm:$0xff]  }
   0xd   : > { %180 = vst.msk [vmem:[#allocation2 + $0x1c] sm:$0xf] %vm172_vm0, %v3460_v0  ;;  %181 = vst.msk [vmem:[#allocation2 + $0x20] sm:$0xf] %vm172_vm0, %v3460_v0  ;;  %s6164_s13 = smov (!%p3498_p3, %s3188_s13), 1  ;;  %s3462_s26 = smov 32   ;;  %2653 = vmatpush1.bf16.msra.mxu0 %v3420_v45  ;;  %3377 = vmatpush1.bf16.msra.mxu1 %v3420_v45 }
   0xe   : > { %173 = vst.msk [vmem:[#allocation2] sm:$0xf] %vm172_vm0, %v3460_v0  ;;  %174 = vst.msk [vmem:[#allocation2 + $0x4] sm:$0xf] %vm172_vm0, %v3460_v0  ;;  %s3335_s15 = sshll.u32 %s6164_s13, 7  ;;  %s3386_s16 = smul.u32 248, %s6164_s13  ;;  %2654 = vmatprep.subr.bf16.mxu0 %v3460_v0  ;;  %3369 = vmatprep.subr.bf16.mxu1 %v3460_v0 }
   0xf   : > { %175 = vst.msk [vmem:[#allocation2 + $0x8] sm:$0xf] %vm172_vm0, %v3460_v0  ;;  %176 = vst.msk [vmem:[#allocation2 + $0xc] sm:$0xf] %vm172_vm0, %v3460_v0  ;;  %s3635_s19 = scalar_lea.vmem %s6031_s0, %s3335_s15  ;;  %v3421_v56 = vld [vmem:[%s6032_s1 + $0x30] sm:$0xff]   ;;  %s3463_s29 = smov 80  }
  0x10   : > { %177 = vst.msk [vmem:[#allocation2 + $0x10] sm:$0xf] %vm172_vm0, %v3460_v0  ;;  %182 = vst.msk [vmem:[#allocation2 + $0x24] sm:$0xf] %vm172_vm0, %v3460_v0  ;;  %v235_v1 = vld [vmem:[%s3635_s19] sm:$0xf]  ;;  %s3642_s22 = scalar_lea.vmem %s6034_s3, %s3386_s16 }
  0x11   : > { %183 = vst.msk [vmem:[#allocation2 + $0x28] sm:$0xf] %vm172_vm0, %v3460_v0  ;;  %184 = vst.msk [vmem:[#allocation2 + $0x2c] sm:$0xf] %vm172_vm0, %v3460_v0  ;;  %v236_v2 = vld [vmem:[%s3635_s19 + $0x4] sm:$0xf]  ;;  %2655 = vmatpush1.bf16.msra.mxu0 %v3421_v56  ;;  %3378 = vmatpush1.bf16.msra.mxu1 %v3421_v56 }
  0x12   : > { %185 = vst.msk [vmem:[#allocation2 + $0x30] sm:$0xf] %vm172_vm0, %v3460_v0  ;;  %186 = vst.msk [vmem:[#allocation2 + $0x34] sm:$0xf] %vm172_vm0, %v3460_v0  ;;  %v239_v3 = vld [vmem:[%s3635_s19 + $0x8] sm:$0xf]  ;;  %2656 = vmatprep.subr.bf16.mxu0 %v3460_v0  ;;  %3370 = vmatprep.subr.bf16.mxu1 %v3460_v0 }
  0x13   : > { %187 = vst.msk [vmem:[#allocation2 + $0x38] sm:$0xf] %vm172_vm0, %v3460_v0  ;;  %188 = vst.msk [vmem:[#allocation2 + $0x3c] sm:$0xf] %vm172_vm0, %v3460_v0  ;;  %v240_v4 = vld [vmem:[%s3635_s19 + $0xc] sm:$0xf] }
  0x14   : > { %189 = vst.msk [vmem:[#allocation2 + $0x40] sm:$0xf] %vm172_vm0, %v3460_v0  ;;  %190 = vst.msk [vmem:[#allocation2 + $0x44] sm:$0xf] %vm172_vm0, %v3460_v0  ;;  %v243_v5 = vld [vmem:[%s3635_s19 + $0x10] sm:$0xf] }
  0x15   : > { %191 = vst.msk [vmem:[#allocation2 + $0x48] sm:$0xf] %vm172_vm0, %v3460_v0  ;;  %192 = vst.msk [vmem:[#allocation2 + $0x4c] sm:$0xf] %vm172_vm0, %v3460_v0  ;;  %v244_v6 = vld [vmem:[%s3635_s19 + $0x14] sm:$0xf] }
  0x16   : > { %193 = vst.msk [vmem:[#allocation2 + $0x50] sm:$0xf] %vm172_vm0, %v3460_v0  ;;  %194 = vst.msk [vmem:[#allocation2 + $0x54] sm:$0xf] %vm172_vm0, %v3460_v0  ;;  %v304_v7 = vld [vmem:[#allocation2 + $0x14] sm:$0xf] }
  0x17   : > { %195 = vst.msk [vmem:[#allocation2 + $0x58] sm:$0xf] %vm172_vm0, %v3460_v0  ;;  %196 = vst.msk [vmem:[#allocation2 + $0x5c] sm:$0xf] %vm172_vm0, %v3460_v0  ;;  %v305_v8 = vld [vmem:[#allocation2 + $0x18] sm:$0xf] }
  0x18   : > { %197 = vst.msk [vmem:[#allocation2 + $0x60] sm:$0xf] %vm172_vm0, %v3460_v0  ;;  %198 = vst.msk [vmem:[#allocation2 + $0x64] sm:$0xf] %vm172_vm0, %v3460_v0  ;;  %v303_v9 = vld [vmem:[#allocation2 + $0x10] sm:$0xf]  ;;  %v3840_v10 = vcombine.low %v304_v7, %v305_v8 }
  0x19   : > { %199 = vst.msk [vmem:[#allocation2 + $0x68] sm:$0xf] %vm172_vm0, %v3460_v0  ;;  %200 = vst.msk [vmem:[#allocation2 + $0x6c] sm:$0xf] %vm172_vm0, %v3460_v0  ;;  %v355_v11 = vld [vmem:[#allocation2 + $0xc] sm:$0x8]  ;;  %v3842_v12 = vcombine.low %v303_v9, %v304_v7 }
  0x1a   : > { %201 = vst.msk [vmem:[#allocation2 + $0x70] sm:$0xf] %vm172_vm0, %v3460_v0  ;;  %202 = vst.msk [vmem:[#allocation2 + $0x74] sm:$0xf] %vm172_vm0, %v3460_v0  ;;  %v3844_v13 = vld [vmem:[#allocation2 + $0xc] sm:$0xf]  ;;  %v3252_v15 = vcombine.low %v355_v11, %v303_v9  ;;  %957 = vrot.lane.b32.xlu0 %v3840_v10, %s3461_s23 }
  0x1b   : > { %203 = vst.msk [vmem:[#allocation2 + $0x78] sm:$0xf] %vm172_vm0, %v3460_v0  ;;  %204 = vst.msk [vmem:[#allocation2 + $0x7c] sm:$0xf] %vm172_vm0, %v3460_v0  ;;  %v3846_v14 = vld [vmem:[#allocation2 + $0x4] sm:$0xf]  ;;  %v3849_v16 = vcombine.low %v3844_v13, %v303_v9 }
  0x1c   : > { %205 = vst.msk [vmem:[#allocation2 + $0x80] sm:$0xf] %vm172_vm0, %v3460_v0  ;;  %206 = vst.msk [vmem:[#allocation2 + $0x84] sm:$0xf] %vm172_vm0, %v3460_v0  ;;  %v3851_v17 = vld [vmem:[#allocation2 + $0x8] sm:$0xf]  ;;  %955 = vrot.lane.b32.xlu1 %v3252_v15, %s3461_s23 }
  0x1d   : > { %207 = vst.msk [vmem:[#allocation2 + $0x88] sm:$0xf] %vm172_vm0, %v3460_v0  ;;  %208 = vst.msk [vmem:[#allocation2 + $0x8c] sm:$0xf] %vm172_vm0, %v3460_v0  ;;  %v3224_v18 = vcombine.low %v3846_v14, %v3851_v17  ;;  %v1314_v19 = vrot.slane %v3842_v12, 5  ;;  %v1014_v20 = vshrl.u32 %v3842_v12, 16 }
  0x1e   : > { %209 = vst.msk [vmem:[#allocation2 + $0x90] sm:$0xf] %vm172_vm0, %v3460_v0  ;;  %210 = vst.msk [vmem:[#allocation2 + $0x94] sm:$0xf] %vm172_vm0, %v3460_v0  ;;  %v1017_v21 = vshll.u32 %v3842_v12, 16  ;;  %v834_v22 = vrot.slane %v3849_v16, 5 }
  0x1f   : > { %211 = vst.msk [vmem:[#allocation2 + $0x98] sm:$0xf] %vm172_vm0, %v3460_v0  ;;  %212 = vst.msk [vmem:[#allocation2 + $0x9c] sm:$0xf] %vm172_vm0, %v3460_v0  ;;  %v540_v23 = vshrl.u32 %v3849_v16, 16  ;;  %v543_v24 = vshll.u32 %v3849_v16, 16 }
  0x20   : > { %213 = vst.msk [vmem:[#allocation2 + $0xa0] sm:$0xf] %vm172_vm0, %v3460_v0  ;;  %214 = vst.msk [vmem:[#allocation2 + $0xa4] sm:$0xf] %vm172_vm0, %v3460_v0  ;;  %v549_v25 = vshrl.u32 %v3840_v10, 16  ;;  %v833_v28 = vrot.slane %v3224_v18, 5 }
  0x21   : > { %215 = vst.msk [vmem:[#allocation2 + $0xa8] sm:$0xf] %vm172_vm0, %v3460_v0  ;;  %216 = vst.msk [vmem:[#allocation2 + $0xac] sm:$0xf] %vm172_vm0, %v3460_v0  ;;  %v3865_v26 = vld [vmem:[#allocation2 + $0x24] sm:$0xf] }
  0x22   : > { %217 = vst.msk [vmem:[#allocation2 + $0xb0] sm:$0xf] %vm172_vm0, %v3460_v0  ;;  %218 = vst.msk [vmem:[#allocation2 + $0xb4] sm:$0xf] %vm172_vm0, %v3460_v0  ;;  %v263_v27 = vld [vmem:[%s3635_s19 + $0x38] sm:$0xf]  ;;  %v835_v41 = vsel %vm832_vm1, %v833_v28, %v834_v22  ;;  %888 = vrot.lane.b32.xlu1 %v833_v28, %s3462_s26 }
  0x23   : > { %219 = vst.msk [vmem:[#allocation2 + $0xb8] sm:$0xf] %vm172_vm0, %v3460_v0  ;;  %220 = vst.msk [vmem:[#allocation2 + $0xbc] sm:$0xf] %vm172_vm0, %v3460_v0  ;;  %v532_v29 = vshrl.u32 %v3224_v18, 16  ;;  %v535_v30 = vshll.u32 %v3224_v18, 16  ;;  %890 = vrot.lane.b32.xlu0 %v835_v41, %s3462_s26 }
  0x24   : > { %221 = vst.msk [vmem:[#allocation2 + $0xc0] sm:$0xf] %vm172_vm0, %v3460_v0  ;;  %222 = vst.msk [vmem:[#allocation2 + $0xc4] sm:$0xf] %vm172_vm0, %v3460_v0  ;;  %v1016_v31 = vrot.slane %v1014_v20, 4  ;;  %v1019_v36 = vrot.slane %v1017_v21, 5 }
  0x25   : > { %223 = vst.msk [vmem:[#allocation2 + $0xc8] sm:$0xf] %vm172_vm0, %v3460_v0  ;;  %224 = vst.msk [vmem:[#allocation2 + $0xcc] sm:$0xf] %vm172_vm0, %v3460_v0  ;;  %v3868_v32 = vld [vmem:[#allocation2 + $0x30] sm:$0xf] }
  0x26   : > { %225 = vst.msk [vmem:[#allocation2 + $0xd0] sm:$0xf] %vm172_vm0, %v3460_v0  ;;  %226 = vst.msk [vmem:[#allocation2 + $0xd4] sm:$0xf] %vm172_vm0, %v3460_v0  ;;  %v264_v33 = vld [vmem:[%s3635_s19 + $0x3c] sm:$0xf]  ;;  %v3898_v47 = vor.u32 %v1019_v36, %v1016_v31  ;;  %1369 = vrot.lane.b32.xlu1 %v1314_v19, %s3463_s29 }
  0x27   : > { %227 = vst.msk [vmem:[#allocation2 + $0xd8] sm:$0xf] %vm172_vm0, %v3460_v0  ;;  %228 = vst.msk [vmem:[#allocation2 + $0xdc] sm:$0xf] %vm172_vm0, %v3460_v0  ;;  %v542_v37 = vrot.slane %v540_v23, 4  ;;  %v534_v42 = vrot.slane %v532_v29, 4 }
  0x28   : > { %229 = vst.msk [vmem:[#allocation2 + $0xe0] sm:$0xf] %vm172_vm0, %v3460_v0  ;;  %230 = vst.msk [vmem:[#allocation2 + $0xe4] sm:$0xf] %vm172_vm0, %v3460_v0  ;;  %v537_v46 = vrot.slane %v535_v30, 5  ;;  %v545_v48 = vrot.slane %v543_v24, 5 }
  0x29   : > { %231 = vst.msk [vmem:[#allocation2 + $0xe8] sm:$0xf] %vm172_vm0, %v3460_v0  ;;  %232 = vst.msk [vmem:[#allocation2 + $0xec] sm:$0xf] %vm172_vm0, %v3460_v0  ;;  %v551_v49 = vrot.slane %v549_v25, 4  ;;  %v552_v51 = vshll.u32 %v3840_v10, 16 }
  0x2a   : > { %233 = vst.msk [vmem:[#allocation2 + $0xf0] sm:$0xf] %vm172_vm0, %v3460_v0  ;;  %234 = vst.msk [vmem:[#allocation2 + $0xf4] sm:$0xf] %vm172_vm0, %v3460_v0  ;;  %v538_v57 = vor.u32 %v537_v46, %v534_v42  ;;  %v546_v58 = vor.u32 %v545_v48, %v542_v37  ;;  %v267_v61 = vld [vmem:[%s3635_s19 + $0x40] sm:$0xf] }
  0x2b   : > { %237 = vst.msk [vmem:[#allocation2 + $0x1c] sm:$0xf] %vm172_vm0, %v235_v1  ;;  %238 = vst.msk [vmem:[#allocation2 + $0x20] sm:$0xf] %vm172_vm0, %v236_v2  ;;  %v554_v62 = vrot.slane %v552_v51, 5  ;;  %s3464_s30 = smov 16  }
  0x2c   : > { %241 = vst.msk [vmem:[#allocation2 + $0x28] sm:$0xf] %vm172_vm0, %v239_v3  ;;  %2911 = vst.msk [vmem:[%s3642_s22] sm:$0xf] %vm172_vm0, %v3460_v0  ;;  %v268_v3 = vld [vmem:[%s3635_s19 + $0x44] sm:$0xf]  ;;  %773 = vrot.lane.b32.xlu0 %v538_v57, %s3464_s30 }
  0x2d   : > { %2912 = vst.msk [vmem:[%s3642_s22 + $0x4] sm:$0xf] %vm172_vm0, %v3460_v0  ;;  %2913 = vst.msk [vmem:[%s3642_s22 + $0x8] sm:$0xf] %vm172_vm0, %v3460_v0  ;;  %v3423_v18 = vld [vmem:[%s6032_s1 + $0x28] sm:$0xff]   ;;  %s3465_s6 = smov 64  }
  0x2e   : > { %2914 = vst.msk [vmem:[%s3642_s22 + $0xc] sm:$0xf] %vm172_vm0, %v3460_v0  ;;  %2915 = vst.msk [vmem:[%s3642_s22 + $0x10] sm:$0xf] %vm172_vm0, %v3460_v0  ;;  %v271_v25 = vld [vmem:[%s3635_s19 + $0x48] sm:$0xf]  ;;  %1255 = vrot.lane.b32.xlu1 %v3898_v47, %s3465_s6  ;;  %2657 = vmatpush1.bf16.msra.mxu0 %v3423_v18 }
  0x2f   : > { %2916 = vst.msk [vmem:[%s3642_s22 + $0x14] sm:$0xf] %vm172_vm0, %v3460_v0  ;;  %2917 = vst.msk [vmem:[%s3642_s22 + $0x18] sm:$0xf] %vm172_vm0, %v3460_v0  ;;  %v272_v29 = vld [vmem:[%s3635_s19 + $0x4c] sm:$0xf]  ;;  %3379 = vmatpush1.bf16.msra.mxu1 %v3423_v18  ;;  %2658 = vmatprep.subr.bf16.mxu0 %v3460_v0 }
  0x30   : > { %2918 = vst.msk [vmem:[%s3642_s22 + $0x1c] sm:$0xf] %vm172_vm0, %v3460_v0  ;;  %2919 = vst.msk [vmem:[%s3642_s22 + $0x20] sm:$0xf] %vm172_vm0, %v3460_v0  ;;  %v275_v36 = vld [vmem:[%s3635_s19 + $0x50] sm:$0xf]  ;;  %3371 = vmatprep.subr.bf16.mxu1 %v3460_v0 }
  0x31   : > { %2920 = vst.msk [vmem:[%s3642_s22 + $0x24] sm:$0xf] %vm172_vm0, %v3460_v0  ;;  %2921 = vst.msk [vmem:[%s3642_s22 + $0x28] sm:$0xf] %vm172_vm0, %v3460_v0  ;;  %v276_v37 = vld [vmem:[%s3635_s19 + $0x54] sm:$0xf] }
  0x32   : > { %2922 = vst.msk [vmem:[%s3642_s22 + $0x2c] sm:$0xf] %vm172_vm0, %v3460_v0  ;;  %2923 = vst.msk [vmem:[%s3642_s22 + $0x30] sm:$0xf] %vm172_vm0, %v3460_v0  ;;  %v3872_v34 = vld [vmem:[#allocation2 + $0x1c] sm:$0xf] }
  0x33   : > { %2924 = vst.msk [vmem:[%s3642_s22 + $0x34] sm:$0xf] %vm172_vm0, %v3460_v0  ;;  %2925 = vst.msk [vmem:[%s3642_s22 + $0x38] sm:$0xf] %vm172_vm0, %v3460_v0  ;;  %v3874_v35 = vld [vmem:[#allocation2 + $0x20] sm:$0xf]  ;;  %v3880_v39 = vcombine.low %v305_v8, %v3872_v34  ;;  %v555_v8 = vor.u32 %v554_v62, %v551_v49 }
  0x34   : > { %2926 = vst.msk [vmem:[%s3642_s22 + $0x3c] sm:$0xf] %vm172_vm0, %v3460_v0  ;;  %2927 = vst.msk [vmem:[%s3642_s22 + $0x40] sm:$0xf] %vm172_vm0, %v3460_v0  ;;  %v3884_v40 = vcombine.low %v3872_v34, %v3874_v35  ;;  %v3889_v43 = vld [vmem:[#allocation2 + $0x28] sm:$0xf] }
  0x35   : > { %2928 = vst.msk [vmem:[%s3642_s22 + $0x44] sm:$0xf] %vm172_vm0, %v3460_v0  ;;  %2929 = vst.msk [vmem:[%s3642_s22 + $0x48] sm:$0xf] %vm172_vm0, %v3460_v0  ;;  %v3905_v52 = vcombine.low %v3865_v26, %v3889_v43  ;;  %v1022_v28 = vshrl.u32 %v3880_v39, 16  ;;  %v556_v41 = vsel %vm530_vm2, %v546_v58, %v555_v8  ;;  %v3424_v48 = vld [vmem:[%s6032_s1 + $0x20] sm:$0xff]  }
  0x36   : > { %2930 = vst.msk [vmem:[%s3642_s22 + $0x4c] sm:$0xf] %vm172_vm0, %v3460_v0  ;;  %2931 = vst.msk [vmem:[%s3642_s22 + $0x50] sm:$0xf] %vm172_vm0, %v3460_v0  ;;  %v558_v53 = vshrl.u32 %v3884_v40, 16  ;;  %v561_v54 = vshll.u32 %v3884_v40, 16  ;;  %777 = vrot.lane.b32.xlu1 %v556_v41, %s3464_s30  ;;  %2659 = vmatpush1.bf16.msra.mxu0 %v3424_v48 }
  0x37   : > { %2932 = vst.msk [vmem:[%s3642_s22 + $0x54] sm:$0xf] %vm172_vm0, %v3460_v0  ;;  %2933 = vst.msk [vmem:[%s3642_s22 + $0x58] sm:$0xf] %vm172_vm0, %v3460_v0  ;;  %v567_v2 = vshrl.u32 %v3905_v52, 16  ;;  %v1024_v45 = vrot.slane %v1022_v28, 4  ;;  %3380 = vmatpush1.bf16.msra.mxu1 %v3424_v48  ;;  %2660 = vmatprep.subr.bf16.mxu0 %v3460_v0 }
  0x38   : > { %2934 = vst.msk [vmem:[%s3642_s22 + $0x5c] sm:$0xf] %vm172_vm0, %v3460_v0  ;;  %2935 = vst.msk [vmem:[%s3642_s22 + $0x60] sm:$0xf] %vm172_vm0, %v3460_v0  ;;  %v560_v63 = vrot.slane %v558_v53, 4  ;;  %v563_v1 = vrot.slane %v561_v54, 5  ;;  %3372 = vmatprep.subr.bf16.mxu1 %v3460_v0 }
  0x39   : > { %2936 = vst.msk [vmem:[%s3642_s22 + $0x64] sm:$0xf] %vm172_vm0, %v3460_v0  ;;  %2937 = vst.msk [vmem:[%s3642_s22 + $0x68] sm:$0xf] %vm172_vm0, %v3460_v0  ;;  %v569_v11 = vrot.slane %v567_v2, 4  ;;  %v3425_v62 = vld [vmem:[%s6032_s1 + $0x18] sm:$0xff]  }
  0x3a   : > { %2938 = vst.msk [vmem:[%s3642_s22 + $0x6c] sm:$0xf] %vm172_vm0, %v3460_v0  ;;  %2939 = vst.msk [vmem:[%s3642_s22 + $0x70] sm:$0xf] %vm172_vm0, %v3460_v0  ;;  %v3937_v9 = vor.u32 %v563_v1, %v560_v63  ;;  %v279_v46 = vld [vmem:[%s3635_s19 + $0x58] sm:$0xf]  ;;  %v3995_v63 = vcombine.low %v3874_v35, %v3865_v26  ;;  %2661 = vmatpush1.bf16.msra.mxu0 %v3425_v62 }
  0x3b   : > { %2940 = vst.msk [vmem:[%s3642_s22 + $0x74] sm:$0xf] %vm172_vm0, %v3460_v0  ;;  %2941 = vst.msk [vmem:[%s3642_s22 + $0x78] sm:$0xf] %vm172_vm0, %v3460_v0  ;;  %v247_v54 = vld [vmem:[%s3635_s19 + $0x18] sm:$0xf]  ;;  %3381 = vmatpush1.bf16.msra.mxu1 %v3425_v62  ;;  %2662 = vmatprep.subr.bf16.mxu0 %v3460_v0 }
  0x3c   : > { %2942 = vst.msk [vmem:[%s3642_s22 + $0x7c] sm:$0xf] %vm172_vm0, %v3460_v0  ;;  %2943 = vst.msk [vmem:[%s3642_s22 + $0x80] sm:$0xf] %vm172_vm0, %v3460_v0  ;;  %v248_v1 = vld [vmem:[%s3635_s19 + $0x1c] sm:$0xf]  ;;  %3373 = vmatprep.subr.bf16.mxu1 %v3460_v0 }
  0x3d   : > { %2944 = vst.msk [vmem:[%s3642_s22 + $0x84] sm:$0xf] %vm172_vm0, %v3460_v0  ;;  %2945 = vst.msk [vmem:[%s3642_s22 + $0x88] sm:$0xf] %vm172_vm0, %v3460_v0  ;;  %v360_v2 = vld [vmem:[#allocation2 + $0x18] sm:$0x8] }
  0x3e   : > { %2946 = vst.msk [vmem:[%s3642_s22 + $0x8c] sm:$0xf] %vm172_vm0, %v3460_v0  ;;  %2947 = vst.msk [vmem:[%s3642_s22 + $0x90] sm:$0xf] %vm172_vm0, %v3460_v0  ;;  %v1315_v35 = vrot.slane %v3880_v39, 5  ;;  %v3258_v18 = vcombine.low %v360_v2, %v3872_v34  ;;  %s3466_s16 = smov 96  }
  0x3f   : > { %2948 = vst.msk [vmem:[%s3642_s22 + $0x94] sm:$0xf] %vm172_vm0, %v3460_v0  ;;  %2949 = vst.msk [vmem:[%s3642_s22 + $0x98] sm:$0xf] %vm172_vm0, %v3460_v0  ;;  %v284_v41 = vld [vmem:[%s3635_s19 + $0x64] sm:$0xf] }
  0x40   : > { %2950 = vst.msk [vmem:[%s3642_s22 + $0x9c] sm:$0xf] %vm172_vm0, %v3460_v0  ;;  %2951 = vst.msk [vmem:[%s3642_s22 + $0xa0] sm:$0xf] %vm172_vm0, %v3460_v0  ;;  %s3467_s20 = smov 112   ;;  %vm1588_vm4 = vcmask 130048  }
  0x41   : > { %2952 = vst.msk [vmem:[%s3642_s22 + $0xa4] sm:$0xf] %vm172_vm0, %v3460_v0  ;;  %2953 = vst.msk [vmem:[%s3642_s22 + $0xa8] sm:$0xf] %vm172_vm0, %v3460_v0  ;;  %vm2015_vm3 = vsmask.f32 4352 }
  0x42   : > { %2954 = vst.msk [vmem:[%s3642_s22 + $0xac] sm:$0xf] %vm172_vm0, %v3460_v0  ;;  %2955 = vst.msk [vmem:[%s3642_s22 + $0xb0] sm:$0xf] %vm172_vm0, %v3460_v0  ;;  %vm1648_vm5 = vcmask 261120   ;;  %vm1705_vm6 = vcmask 392192  }
  0x43   : > { %2956 = vst.msk [vmem:[%s3642_s22 + $0xb4] sm:$0xf] %vm172_vm0, %v3460_v0  ;;  %2957 = vst.msk [vmem:[%s3642_s22 + $0xb8] sm:$0xf] %vm172_vm0, %v3460_v0  ;;  %vm1762_vm7 = vcmask 523264   ;;  %vm1819_vm8 = vcmask 654336  }
  0x44   : > { %2958 = vst.msk [vmem:[%s3642_s22 + $0xbc] sm:$0xf] %vm172_vm0, %v3460_v0  ;;  %2959 = vst.msk [vmem:[%s3642_s22 + $0xc0] sm:$0xf] %vm172_vm0, %v3460_v0  ;;  %vm1876_vm9 = vcmask 785408   ;;  %vm1933_vm10 = vcmask 916480  }
  0x45   : > { %2960 = vst.msk [vmem:[%s3642_s22 + $0xc4] sm:$0xf] %vm172_vm0, %v3460_v0  ;;  %2961 = vst.msk [vmem:[%s3642_s22 + $0xc8] sm:$0xf] %vm172_vm0, %v3460_v0 }
  0x46   : > { %2962 = vst.msk [vmem:[%s3642_s22 + $0xcc] sm:$0xf] %vm172_vm0, %v3460_v0  ;;  %2963 = vst.msk [vmem:[%s3642_s22 + $0xd0] sm:$0xf] %vm172_vm0, %v3460_v0 }
  0x47   : > { %2964 = vst.msk [vmem:[%s3642_s22 + $0xd4] sm:$0xf] %vm172_vm0, %v3460_v0  ;;  %2965 = vst.msk [vmem:[%s3642_s22 + $0xd8] sm:$0xf] %vm172_vm0, %v3460_v0 }
  0x48   : > { %2966 = vst.msk [vmem:[%s3642_s22 + $0xdc] sm:$0xf] %vm172_vm0, %v3460_v0  ;;  %2967 = vst.msk [vmem:[%s3642_s22 + $0xe0] sm:$0xf] %vm172_vm0, %v3460_v0 }
  0x49   : > { %2968 = vst.msk [vmem:[%s3642_s22 + $0xe4] sm:$0xf] %vm172_vm0, %v3460_v0  ;;  %2969 = vst.msk [vmem:[%s3642_s22 + $0xe8] sm:$0xf] %vm172_vm0, %v3460_v0 }
  0x4a   : > { %2970 = vst.msk [vmem:[%s3642_s22 + $0xec] sm:$0xf] %vm172_vm0, %v3460_v0  ;;  %2971 = vst.msk [vmem:[%s3642_s22 + $0xf0] sm:$0xf] %vm172_vm0, %v3460_v0 }
  0x4b   : > { %2972 = vst.msk [vmem:[%s3642_s22 + $0xf4] sm:$0xf] %vm172_vm0, %v3460_v0  ;;  %242 = vst.msk [vmem:[#allocation2 + $0x2c] sm:$0xf] %vm172_vm0, %v240_v4  ;;  %v547_v4 = vsel %vm530_vm2, %v538_v57, %v546_v58  ;;  %v565_v57 = vsel %vm530_vm2, %v555_v8, %v3937_v9  ;;  %v3427_v8 = vld [vmem:[%s6032_s1 + $0x10] sm:$0xff]  }
  0x4c   : > { %245 = vst.msk [vmem:[#allocation2 + $0x34] sm:$0xf] %vm172_vm0, %v243_v5  ;;  %246 = vst.msk [vmem:[#allocation2 + $0x38] sm:$0xf] %vm172_vm0, %v244_v6  ;;  %v570_v5 = vshll.u32 %v3905_v52, 16  ;;  %775 = vrot.lane.b32.xlu0 %v547_v4, %s3464_s30  ;;  %779 = vrot.lane.b32.xlu1 %v565_v57, %s3464_s30 }
  0x4d   : > { %265 = vst.msk [vmem:[#allocation2 + $0x70] sm:$0xf] %vm172_vm0, %v263_v27  ;;  %266 = vst.msk [vmem:[#allocation2 + $0x74] sm:$0xf] %vm172_vm0, %v264_v33  ;;  %v1025_v33 = vshll.u32 %v3880_v39, 16  ;;  %2663 = vmatpush1.bf16.msra.mxu0 %v3427_v8  ;;  %3382 = vmatpush1.bf16.msra.mxu1 %v3427_v8 }
  0x4e   : > { %269 = vst.msk [vmem:[#allocation2 + $0x7c] sm:$0xf] %vm172_vm0, %v267_v61  ;;  %270 = vst.msk [vmem:[#allocation2 + $0x80] sm:$0xf] %vm172_vm0, %v268_v3  ;;  %v572_v20 = vrot.slane %v570_v5, 5  ;;  %2664 = vmatprep.subr.bf16.mxu0 %v3460_v0  ;;  %3374 = vmatprep.subr.bf16.mxu1 %v3460_v0 }
  0x4f   : > { %273 = vst.msk [vmem:[#allocation2 + $0x88] sm:$0xf] %vm172_vm0, %v271_v25  ;;  %274 = vst.msk [vmem:[#allocation2 + $0x8c] sm:$0xf] %vm172_vm0, %v272_v29  ;;  %v1027_v53 = vrot.slane %v1025_v33, 5  ;;  %v3428_v25 = vld [vmem:[%s6032_s1 + $0x8] sm:$0xff]  }
  0x50   : > { %v573_v30 = vor.u32 %v572_v20, %v569_v11  ;;  %277 = vst.msk [vmem:[#allocation2 + $0x94] sm:$0xf] %vm172_vm0, %v275_v36  ;;  %278 = vst.msk [vmem:[#allocation2 + $0x98] sm:$0xf] %vm172_vm0, %v276_v37  ;;  %v280_v61 = vld [vmem:[%s3635_s19 + $0x5c] sm:$0xf] }
  0x51   : > { %281 = vst.msk [vmem:[#allocation2 + $0xa0] sm:$0xf] %vm172_vm0, %v279_v46  ;;  %249 = vst.msk [vmem:[#allocation2 + $0x40] sm:$0xf] %vm172_vm0, %v247_v54  ;;  %v3984_v58 = vor.u32 %v1027_v53, %v1024_v45  ;;  %v326_v3 = vld [vmem:[#allocation2 + $0x6c] sm:$0xf]  ;;  %2665 = vmatpush1.bf16.msra.mxu0 %v3428_v25  ;;  %3383 = vmatpush1.bf16.msra.mxu1 %v3428_v25 }
  0x52   : > { %v3891_v44 = vld [vmem:[#allocation2 + $0x2c] sm:$0xf]  ;;  %v3966_v49 = vsel %vm530_vm2, %v3937_v9, %v573_v30  ;;  %282 = vst.msk [vmem:[#allocation2 + $0xa4] sm:$0xf] %vm172_vm0, %v280_v61  ;;  %6084 = vst [vmem:[#allocation3_spill] sm:$0xff] %v3995_v63  ;;  %v1031_v11 = vshrl.u32 %v3995_v63, 16  ;;  %2666 = vmatprep.subr.bf16.mxu0 %v3460_v0  ;;  %3375 = vmatprep.subr.bf16.mxu1 %v3460_v0 }
  0x53   : > { %v3900_v50 = vld [vmem:[#allocation2 + $0x34] sm:$0xf]  ;;  %v3909_v55 = vld [vmem:[#allocation2 + $0x38] sm:$0xf]  ;;  %v3916_v59 = vcombine.low %v3891_v44, %v3868_v32  ;;  %781 = vrot.lane.b32.xlu0 %v3966_v49, %s3464_s30  ;;  %250 = vst.msk [vmem:[#allocation2 + $0x44] sm:$0xf] %vm172_vm0, %v248_v1  ;;  %v1029_v26 = vsel %vm530_vm2, %v3898_v47, %v3984_v58 }
  0x54   : > { %v3920_v60 = vcombine.low %v3900_v50, %v3909_v55  ;;  %v4001_v4 = vld [vmem:[#allocation2 + $0x70] sm:$0xf]  ;;  %v1034_v47 = vshll.u32 %v3995_v63, 16  ;;  %v1033_v34 = vrot.slane %v1031_v11, 4  ;;  %v836_v33 = vrot.slane %v3840_v10, 5  ;;  %v3429_v36 = vld [vmem:[%s6032_s1] sm:$0xff]  }
  0x55   : > { %v576_v6 = vshrl.u32 %v3916_v59, 16  ;;  %v579_v7 = vshll.u32 %v3916_v59, 16  ;;  %v283_v37 = vld [vmem:[%s3635_s19 + $0x60] sm:$0xf]  ;;  %286 = vst.msk [vmem:[#allocation2 + $0xb0] sm:$0xf] %vm172_vm0, %v284_v41  ;;  %2667 = vmatpush1.bf16.msra.mxu0 %v3429_v36  ;;  %3384 = vmatpush1.bf16.msra.mxu1 %v3429_v36 }
  0x56   : > { %v585_v15 = vshrl.u32 %v3920_v60, 16  ;;  %v588_v24 = vshll.u32 %v3920_v60, 16  ;;  %285 = vst.msk [vmem:[#allocation2 + $0xac] sm:$0xf] %vm172_vm0, %v283_v37  ;;  %v251_v46 = vld [vmem:[%s3635_s19 + $0x20] sm:$0xf]  ;;  %v837_v62 = vsel %vm832_vm1, %v834_v22, %v836_v33  ;;  %2682 = vmatprep.subr.bf16.mxu0 %v3460_v0  ;;  %3376 = vmatprep.subr.bf16.mxu1 %v3460_v0 }
  0x57   : > { %v578_v21 = vrot.slane %v576_v6, 4  ;;  %v581_v23 = vrot.slane %v579_v7, 5  ;;  %v4011_v6 = vld [vmem:[#allocation2 + $0x74] sm:$0xf]  ;;  %v4013_v7 = vld [vmem:[#allocation2 + $0x78] sm:$0xf] }
  0x58   : > { %v587_v27 = vrot.slane %v585_v15, 4  ;;  %v590_v31 = vrot.slane %v588_v24, 5  ;;  %v4023_v15 = vcombine.low %v326_v3, %v4001_v4  ;;  %v4031_v20 = vcombine.low %v4011_v6, %v4013_v7  ;;  %v4040_v24 = vld [vmem:[#allocation2 + $0x80] sm:$0xf]  ;;  %v252_v61 = vld [vmem:[%s3635_s19 + $0x24] sm:$0xf] }
  0x59   : > { %v582_v42 = vor.u32 %v581_v23, %v578_v21  ;;  %v4033_v21 = vld [vmem:[#allocation2 + $0x7c] sm:$0xf]  ;;  %v1316_v23 = vsel %vm832_vm1, %v1314_v19, %v1315_v35  ;;  %253 = vst.msk [vmem:[#allocation2 + $0x4c] sm:$0xf] %vm172_vm0, %v251_v46  ;;  %254 = vst.msk [vmem:[#allocation2 + $0x50] sm:$0xf] %vm172_vm0, %v252_v61 }
  0x5a   : > { %v3968_v51 = vor.u32 %v590_v31, %v587_v27  ;;  %6085 = vst [vmem:[#allocation4_spill] sm:$0xff] %v4023_v15  ;;  %6086 = vst [vmem:[#allocation5_spill] sm:$0xff] %v4031_v20  ;;  %v1036_v27 = vrot.slane %v1034_v47, 5  ;;  %v648_v28 = vshrl.u32 %v4023_v15, 16  ;;  %v651_v19 = vshll.u32 %v4023_v15, 16 }
  0x5b   : > { %v4005_v5 = vsel %vm530_vm2, %v573_v30, %v582_v42  ;;  %v657_v29 = vshrl.u32 %v4031_v20, 16  ;;  %v660_v30 = vshll.u32 %v4031_v20, 16  ;;  %v4055_v31 = vcombine.low %v4033_v21, %v4040_v24  ;;  %v332_v0 = vld [vmem:[#allocation2 + $0x84] sm:$0xf]  ;;  %v333_v25 = vld [vmem:[#allocation2 + $0x88] sm:$0xf] }
  0x5c   : > { %v3980_v56 = vsel %vm530_vm2, %v582_v42, %v3968_v51  ;;  %783 = vrot.lane.b32.xlu1 %v4005_v5, %s3464_s30  ;;  %v4064_v42 = vor.u32 %v1036_v27, %v1033_v34  ;;  %v650_v45 = vrot.slane %v648_v28, 4  ;;  %v653_v48 = vrot.slane %v651_v19, 5  ;;  %v334_v34 = vld [vmem:[#allocation2 + $0x8c] sm:$0xf] }
  0x5d   : > { %785 = vrot.lane.b32.xlu0 %v3980_v56, %s3464_s30  ;;  %v659_v53 = vrot.slane %v657_v29, 4  ;;  %v662_v54 = vrot.slane %v660_v30, 5  ;;  %v666_v57 = vshrl.u32 %v4055_v31, 16  ;;  %v669_v1 = vshll.u32 %v4055_v31, 16 }
  0x5e   : > { %v1038_v16 = vsel %vm530_vm2, %v3984_v58, %v4064_v42  ;;  %v1317_v22 = vrot.slane %v3995_v63, 5  ;;  %v4096_v2 = vor.u32 %v653_v48, %v650_v45  ;;  %v4108_v58 = vcombine.low %v4013_v7, %v4033_v21 }
  0x5f   : > { %v663_v3 = vor.u32 %v662_v54, %v659_v53  ;;  %v671_v8 = vrot.slane %v669_v1, 5  ;;  %v4115_v47 = vcombine.low %v4040_v24, %v332_v0  ;;  %v4126_v7 = vcombine.low %v3889_v43, %v3891_v44  ;;  %v255_v53 = vld [vmem:[%s3635_s19 + $0x28] sm:$0xf] }
  0x60   : > { %1436 = vrot.lane.b32.xlu1 %v3258_v18, %s3466_s16  ;;  %6087 = vst [vmem:[#allocation6_spill] sm:$0xff] %v4096_v2  ;;  %v860_v21 = vrot.slane %v4031_v20, 5  ;;  %v6039_v24 = vrot.slane %v4055_v31, 5  ;;  %v1133_v27 = vshll.u32 %v4108_v58, 16  ;;  %v4143_v19 = vcombine.low %v333_v25, %v334_v34  ;;  %257 = vst.msk [vmem:[#allocation2 + $0x58] sm:$0xf] %vm172_vm0, %v255_v53 }
  0x61   : > { %1257 = vrot.lane.b32.xlu0 %v1029_v26, %s3465_s6  ;;  %v668_v26 = vrot.slane %v666_v57, 4  ;;  %v4112_v11 = vsel %vm530_vm2, %v4096_v2, %v663_v3  ;;  %6089 = vst [vmem:[#allocation8_spill] sm:$0xff] %v4115_v47  ;;  %6091 = vst [vmem:[#allocation10_spill] sm:$0xff] %v4126_v7  ;;  %v1139_v44 = vshrl.u32 %v4115_v47, 16  ;;  %v1142_v28 = vshll.u32 %v4115_v47, 16 }
  0x62   : > { %6088 = vst [vmem:[#allocation7_spill] sm:$0xff] %v4112_v11  ;;  %6093 = vst [vmem:[#allocation12_spill] sm:$0xff] %v4143_v19  ;;  %v4152_v29 = vsel %vm832_vm1, %v860_v21, %v6039_v24  ;;  %v1135_v37 = vrot.slane %v1133_v27, 5  ;;  %v1148_v46 = vshrl.u32 %v4143_v19, 16  ;;  %v1151_v48 = vshll.u32 %v4143_v19, 16 }
  0x63   : > { %v4117_v18 = vor.u32 %v671_v8, %v668_v26  ;;  %6094 = vst [vmem:[#allocation13_spill] sm:$0xff] %v4152_v29  ;;  %v1141_v41 = vrot.slane %v1139_v44, 4  ;;  %v1144_v45 = vrot.slane %v1142_v28, 5  ;;  %v4173_v1 = vcombine.low %v332_v0, %v333_v25  ;;  %v336_v8 = vld [vmem:[#allocation2 + $0x94] sm:$0xf] }
  0x64   : > { %1521 = vrot.lane.b32.xlu1 %v3937_v9, %s3467_s20  ;;  %v3430_v9 = vld [vmem:[%s6032_s1 + $0x40] sm:$0xff]   ;;  %v1150_v61 = vrot.slane %v1148_v46, 4  ;;  %v1043_v27 = vshll.u32 %v4126_v7, 16 }
  0x65   : > { %1371 = vrot.lane.b32.xlu0 %v1316_v23, %s3463_s29  ;;  %2683 = vmatpush2.bf16.msra.mxu0 %v3430_v9  ;;  %v4121_v23 = vcombine.low %v3868_v32, %v3900_v50  ;;  %v6036_v32 = vrot.slane %v4023_v15, 5  ;;  %v1130_v50 = vshrl.u32 %v4108_v58, 16  ;;  %v4139_v43 = vsel %vm530_vm2, %v663_v3, %v4117_v18  ;;  %v4229_v24 = vld [vmem:[#allocation2 + $0xa0] sm:$0xf] }
  0x66   : > { %3385 = vmatpush2.bf16.msra.mxu1 %v3430_v9  ;;  %6092 = vst [vmem:[#allocation11_spill] sm:$0xff] %v4139_v43  ;;  %v1145_v57 = vor.u32 %v1144_v45, %v1141_v41  ;;  %v838_v3 = vrot.slane %v3884_v40, 5  ;;  %v678_v41 = vshll.u32 %v4173_v1, 16  ;;  %v1045_v46 = vrot.slane %v1043_v27, 5 }
  0x67   : > { %6090 = vst [vmem:[#allocation9_spill] sm:$0xff] %v4121_v23  ;;  %v4157_v30 = vsel %vm832_vm1, %v6036_v32, %v860_v21  ;;  %v1132_v36 = vrot.slane %v1130_v50, 4  ;;  %v6038_v21 = vrot.slane %v4143_v19, 5  ;;  %v6035_v50 = vrot.slane %v4108_v58, 5  ;;  %v288_v32 = vld [vmem:[%s3635_s19 + $0x6c] sm:$0xf] }
  0x68   : > { %892 = vrot.lane.b32.xlu1 %v837_v62, %s3462_s26  ;;  %6095 = vst [vmem:[#allocation14_spill] sm:$0xff] %v4157_v30  ;;  %v1153_v62 = vrot.slane %v1151_v48, 5  ;;  %v839_v0 = vsel %vm832_vm1, %v836_v33, %v838_v3  ;;  %290 = vst.msk [vmem:[#allocation2 + $0xbc] sm:$0xf] %vm172_vm0, %v288_v32  ;;  %v6107_v15 = vrot.slane %v3916_v59, 5 }
  0x69   : > { %1438 = vrot.lane.b32.xlu0 %v3995_v63, %s3466_s16  ;;  %v4167_v54 = vor.u32 %v1135_v37, %v1132_v36  ;;  %v675_v37 = vshrl.u32 %v4173_v1, 16 }
  0x6a   : > { %v4178_v26 = vor.u32 %v1153_v62, %v1150_v61 }
  0x6b   : > { %6096 = vst [vmem:[#allocation15_spill] sm:$0xff] %v4167_v54  ;;  %v1146_v9 = vsel %vm530_vm2, %v4167_v54, %v1145_v57 }
  0x6c   : > { %1259 = vrot.lane.b32.xlu1 %v1038_v16, %s3465_s6  ;;  %v335_v16 = vld [vmem:[#allocation2 + $0x90] sm:$0xf]  ;;  %v1155_v25 = vsel %vm530_vm2, %v1145_v57, %v4178_v26 }
  0x6d   : > { %1523 = vrot.lane.b32.xlu0 %v3966_v49, %s3467_s20  ;;  %v1318_v49 = vsel %vm832_vm1, %v1315_v35, %v1317_v22  ;;  %v287_v35 = vld [vmem:[%s3635_s19 + $0x68] sm:$0xf] }
  0x6e   : > { %289 = vst.msk [vmem:[#allocation2 + $0xb8] sm:$0xf] %vm172_vm0, %v287_v35  ;;  %v1341_v35 = vrot.slane %v4115_v47, 5 }
  0x70   : > { %801 = vrot.lane.b32.xlu1 %v4112_v11, %s3464_s30  ;;  %v1344_v28 = vsel %vm832_vm1, %v1341_v35, %v6038_v21  ;;  %v1342_v10 = vsel %vm832_vm1, %v6035_v50, %v1341_v35  ;;  %v4227_v21 = vld [vmem:[#allocation2 + $0x9c] sm:$0xf] }
  0x71   : > { %959 = vrot.lane.b32.xlu0 %v3884_v40, %s3461_s23  ;;  %v1040_v40 = vshrl.u32 %v4126_v7, 16  ;;  %v4245_v32 = vcombine.low %v4227_v21, %v4229_v24 }
  0x73   : > { %v1042_v45 = vrot.slane %v1040_v40, 4  ;;  %v677_v40 = vrot.slane %v675_v37, 4 }
  0x74   : > { %1440 = vrot.lane.b32.xlu1 %v4126_v7, %s3466_s16 }
  0x75   : > { %1373 = vrot.lane.b32.xlu0 %v1318_v49, %s3463_s29  ;;  %v4180_v49 = vld [vmem:[#allocation2 + $0x98] sm:$0xf] }
  0x76   : > { %v4198_v44 = vcombine.low %v336_v8, %v4180_v49 }
  0x78   : > { %918 = vrot.lane.b32.xlu1 %v4152_v29, %s3462_s26  ;;  %v693_v48 = vshrl.u32 %v4198_v44, 16  ;;  %v696_v53 = vshll.u32 %v4198_v44, 16 }
  0x79   : > { %803 = vrot.lane.b32.xlu0 %v4139_v43, %s3464_s30 }
  0x7a   : > { %v695_v27 = vrot.slane %v693_v48, 4  ;;  %v698_v50 = vrot.slane %v696_v53, 5 }
  0x7c   : > { %983 = vrot.lane.b32.xlu1 %v4055_v31, %s3461_s23  ;;  %v4241_v37 = vor.u32 %v698_v50, %v695_v27 }
  0x7d   : > { %916 = vrot.lane.b32.xlu0 %v4157_v30, %s3462_s26  ;;  %v6108_v30 = vrot.slane %v3905_v52, 5 }
  0x7f   : > { %v4482_v29 = vsel %vm832_vm1, %v6108_v30, %v6107_v15  ;;  %v6064_v15 = vrot.slane %v3920_v60, 5 }
  0x80   : > { %1283 = vrot.lane.b32.xlu1 %v1146_v9, %s3465_s6 }
  0x81   : > { %1525 = vrot.lane.b32.xlu0 %v4005_v5, %s3467_s20  ;;  %v4186_v5 = vcombine.low %v334_v34, %v335_v16  ;;  %v6037_v34 = vrot.slane %v3905_v52, 5 }
  0x83   : > { %v684_v33 = vshrl.u32 %v4186_v5, 16  ;;  %v687_v36 = vshll.u32 %v4186_v5, 16  ;;  %v4218_v57 = vsel %vm832_vm1, %v838_v3, %v6037_v34 }
  0x84   : > { %894 = vrot.lane.b32.xlu1 %v839_v0, %s3462_s26  ;;  %v2040_v61 = vshrl.u32 %v4218_v57, 16  ;;  %v2043_v62 = vshll.u32 %v4218_v57, 16  ;;  %v680_v0 = vrot.slane %v678_v41, 5  ;;  %v2032_v41 = vshrl.u32 %v838_v3, 16 }
  0x85   : > { %985 = vrot.lane.b32.xlu0 %v4173_v1, %s3461_s23  ;;  %v686_v9 = vrot.slane %v684_v33, 4  ;;  %v689_v35 = vrot.slane %v687_v36, 5 }
  0x86   : > { %v2042_v38 = vrot.slane %v2040_v61, 3  ;;  %v2045_v34 = vrot.slane %v2043_v62, 4  ;;  %v681_v33 = vor.u32 %v680_v0, %v677_v40 }
  0x88   : > { %1399 = vrot.lane.b32.xlu1 %v1344_v28, %s3463_s29  ;;  %v4236_v28 = vcombine.low %v335_v16, %v336_v8  ;;  %v866_v16 = vrot.slane %v4186_v5, 5  ;;  %v2034_v8 = vrot.slane %v2032_v41, 3  ;;  %v4252_v53 = vor.u32 %v2045_v34, %v2042_v38 }
  0x89   : > { %1285 = vrot.lane.b32.xlu0 %v1155_v25, %s3465_s6  ;;  %v4224_v25 = vor.u32 %v1045_v46, %v1042_v45  ;;  %v2035_v45 = vshll.u32 %v838_v3, 16  ;;  %v4249_v46 = vcombine.low %v4001_v4, %v4011_v6  ;;  %v6041_v3 = vrot.slane %v4126_v7, 5 }
  0x8a   : > { %6097 = vst [vmem:[#allocation16_spill] sm:$0xff] %v4236_v28  ;;  %v864_v4 = vrot.slane %v4173_v1, 5  ;;  %v868_v38 = vrot.slane %v4198_v44, 5  ;;  %v6040_v34 = vrot.slane %v4245_v32, 5  ;;  %v1157_v61 = vshrl.u32 %v4236_v28, 16 }
  0x8b   : > { %v1047_v36 = vsel %vm530_vm2, %v4064_v42, %v4224_v25  ;;  %v2037_v48 = vrot.slane %v2035_v45, 4  ;;  %v1160_v40 = vshll.u32 %v4236_v28, 16 }
  0x8c   : > { %1464 = vrot.lane.b32.xlu1 %v4143_v19, %s3466_s16  ;;  %v4270_v62 = vsel %vm832_vm1, %v864_v4, %v866_v16  ;;  %v4277_v1 = vsel %vm832_vm1, %v868_v38, %v6040_v34  ;;  %v4298_v41 = vsel %vm832_vm1, %v866_v16, %v868_v38  ;;  %v4311_v38 = vld [vmem:[#allocation2 + $0x3c] sm:$0xf]  ;;  %v4313_v34 = vld [vmem:[#allocation2 + $0x48] sm:$0xf] }
  0x8d   : > { %1397 = vrot.lane.b32.xlu0 %v1342_v10, %s3463_s29  ;;  %v690_v10 = vor.u32 %v689_v35, %v686_v9  ;;  %v2038_v50 = vor.u32 %v2037_v48, %v2034_v8  ;;  %v256_v35 = vld [vmem:[%s3635_s19 + $0x2c] sm:$0xf]  ;;  %v2261_v0 = vshrl.u32 %v4270_v62, 16  ;;  %v2264_v27 = vshll.u32 %v4270_v62, 16 }
  0x8e   : > { %258 = vst.msk [vmem:[#allocation2 + $0x5c] sm:$0xf] %vm172_vm0, %v256_v35  ;;  %v2278_v45 = vshrl.u32 %v4298_v41, 16  ;;  %v2281_v8 = vshll.u32 %v4298_v41, 16 }
  0x8f   : > { %v4258_v42 = vsel %vm530_vm2, %v681_v33, %v690_v10  ;;  %v4264_v6 = vsel %vm530_vm2, %v690_v10, %v4241_v37  ;;  %v2047_v9 = vsel %vm2015_vm3, %v2038_v50, %v4252_v53  ;;  %v4290_v10 = vsel %vm530_vm2, %v4117_v18, %v681_v33 }
  0x90   : > { %1261 = vrot.lane.b32.xlu1 %v1047_v36, %s3465_s6  ;;  %6098 = vst [vmem:[#allocation17_spill] sm:$0xff] %v4290_v10  ;;  %v1320_v36 = vsel %vm832_vm1, %v1317_v22, %v6041_v3  ;;  %3274 = vmatprep.mubr.msk.bf16.mxu0 %vm1588_vm4, %v2047_v9  ;;  %v1159_v18 = vrot.slane %v1157_v61, 4  ;;  %v1162_v33 = vrot.slane %v1160_v40, 5  ;;  %v2263_v48 = vrot.slane %v2261_v0, 3  ;;  %v4319_v61 = vld [vmem:[#allocation2 + $0x44] sm:$0xf] }
  0x91   : > { %961 = vrot.lane.b32.xlu0 %v3905_v52, %s3461_s23  ;;  %v2266_v50 = vrot.slane %v2264_v27, 4  ;;  %v6099_v22 = vrot.slane %v4055_v31, 5  ;;  %v2280_v9 = vrot.slane %v2278_v45, 3  ;;  %v2283_v35 = vrot.slane %v2281_v8, 4 }
  0x92   : > { %v1049_v3 = vshrl.u32 %v4121_v23, 16  ;;  %v4325_v31 = vor.u32 %v1162_v33, %v1159_v18  ;;  %v2295_v40 = vshrl.u32 %v4277_v1, 16  ;;  %v2298_v0 = vshll.u32 %v4277_v1, 16 }
  0x93   : > { %v4309_v16 = vsel %vm832_vm1, %v6099_v22, %v864_v4  ;;  %v4327_v4 = vor.u32 %v2266_v50, %v2263_v48  ;;  %v4337_v45 = vcombine.low %v4319_v61, %v4313_v34  ;;  %v2284_v8 = vor.u32 %v2283_v35, %v2280_v9 }
  0x94   : > { %1551 = vrot.lane.b32.xlu1 %v4264_v6, %s3467_s20  ;;  %6100 = vst [vmem:[#allocation18_spill] sm:$0xff] %v4309_v16  ;;  %v6052_v22 = vrot.slane %v4236_v28, 5  ;;  %v1051_v54 = vrot.slane %v1049_v3, 4  ;;  %v1164_v33 = vsel %vm530_vm2, %v4178_v26, %v4325_v31  ;;  %v2297_v9 = vrot.slane %v2295_v40, 3 }
  0x95   : > { %1466 = vrot.lane.b32.xlu0 %v4236_v28, %s3466_s16  ;;  %6101 = vst [vmem:[#allocation19_spill] sm:$0xff] %v4327_v4  ;;  %v2285_v50 = vsel %vm2015_vm3, %v4327_v4, %v2284_v8  ;;  %v6048_v3 = vrot.slane %v4337_v45, 5  ;;  %v2300_v35 = vrot.slane %v2298_v0, 4  ;;  %v6102_v26 = vrot.slane %v4143_v19, 5 }
  0x96   : > { %3288 = vmatprep.mubr.msk.bf16.mxu1 %vm1588_vm4, %v2285_v50 }
  0x97   : > { %v1346_v40 = vsel %vm832_vm1, %v6102_v26, %v6052_v22  ;;  %v4371_v20 = vor.u32 %v2300_v35, %v2297_v9  ;;  %v340_v26 = vld [vmem:[#allocation2 + $0xa4] sm:$0xf] }
  0x98   : > { %805 = vrot.lane.b32.xlu1 %v4290_v10, %s3464_s30  ;;  %v1052_v10 = vshll.u32 %v4121_v23, 16  ;;  %v4492_v52 = vcombine.low %v4229_v24, %v340_v26 }
  0x99   : > { %1549 = vrot.lane.b32.xlu0 %v4258_v42, %s3467_s20 }
  0x9a   : > { %v1054_v18 = vrot.slane %v1052_v10, 5  ;;  %v702_v10 = vshrl.u32 %v4245_v32, 16 }
  0x9c   : > { %920 = vrot.lane.b32.xlu1 %v4309_v16, %s3462_s26  ;;  %v4369_v0 = vor.u32 %v1054_v18, %v1051_v54  ;;  %v704_v50 = vrot.slane %v702_v10, 4  ;;  %v291_v16 = vld [vmem:[%s3635_s19 + $0x70] sm:$0xf]  ;;  %v6050_v54 = vrot.slane %v4121_v23, 5  ;;  %v4394_v10 = vsel %vm2015_vm3, %v2284_v8, %v4371_v20 }
  0x9d   : > { %1375 = vrot.lane.b32.xlu0 %v1320_v36, %s3463_s29  ;;  %v4317_v36 = vld [vmem:[#allocation2 + $0x40] sm:$0xf]  ;;  %293 = vst.msk [vmem:[#allocation2 + $0xc4] sm:$0xf] %vm172_vm0, %v291_v16 }
  0x9e   : > { %v4333_v27 = vcombine.low %v4311_v38, %v4317_v36  ;;  %v1056_v16 = vsel %vm530_vm2, %v4224_v25, %v4369_v0 }
  0xa0   : > { %987 = vrot.lane.b32.xlu1 %v4186_v5, %s3461_s23  ;;  %v6051_v48 = vrot.slane %v4333_v27, 5  ;;  %v705_v5 = vshll.u32 %v4245_v32, 16  ;;  %v594_v18 = vshrl.u32 %v4333_v27, 16 }
  0xa1   : > { %1442 = vrot.lane.b32.xlu0 %v4121_v23, %s3466_s16 }
  0xa2   : > { %v707_v4 = vrot.slane %v705_v5, 5  ;;  %v596_v5 = vrot.slane %v594_v18, 4 }
  0xa4   : > { %896 = vrot.lane.b32.xlu1 %v4218_v57, %s3462_s26  ;;  %v4382_v57 = vcombine.low %v4180_v49, %v4227_v21  ;;  %v6104_v49 = vrot.slane %v4126_v7, 5 }
  0xa5   : > { %1527 = vrot.lane.b32.xlu0 %v3980_v56, %s3467_s20  ;;  %v4359_v56 = vsel %vm832_vm1, %v6051_v48, %v6048_v3  ;;  %v292_v3 = vld [vmem:[%s3635_s19 + $0x74] sm:$0xf] }
  0xa6   : > { %294 = vst.msk [vmem:[#allocation2 + $0xc8] sm:$0xf] %vm172_vm0, %v292_v3  ;;  %6103 = vst [vmem:[#allocation20_spill] sm:$0xff] %v4382_v57  ;;  %v597_v3 = vshll.u32 %v4333_v27, 16  ;;  %v1322_v21 = vsel %vm832_vm1, %v6104_v49, %v6050_v54  ;;  %v1166_v25 = vshrl.u32 %v4382_v57, 16  ;;  %v1169_v35 = vshll.u32 %v4382_v57, 16 }
  0xa8   : > { %963 = vrot.lane.b32.xlu1 %v3916_v59, %s3461_s23  ;;  %v599_v9 = vrot.slane %v597_v3, 5  ;;  %v1168_v3 = vrot.slane %v1166_v25, 4  ;;  %v1171_v49 = vrot.slane %v1169_v35, 5  ;;  %v4443_v25 = vpop.permute.xlu1 %955 }
  0xa9   : > { %1287 = vrot.lane.b32.xlu0 %v1164_v33, %s3465_s6  ;;  %v4389_v33 = vor.u32 %v707_v4, %v704_v50  ;;  %v4405_v4 = vld [vmem:[#allocation2 + $0xa8] sm:$0xf]  ;;  %v4419_v50 = vcombine.low %v3909_v55, %v4311_v38  ;;  %v4434_v55 = vpop.permute.xlu0 %957 }
  0xaa   : > { %v4426_v18 = vor.u32 %v599_v9, %v596_v5  ;;  %v4441_v5 = vor.u32 %v1171_v49, %v1168_v3  ;;  %v6105_v9 = vrot.slane %v4245_v32, 5 }
  0xab   : > { %v4410_v8 = vsel %vm530_vm2, %v4241_v37, %v4389_v33  ;;  %v260_v37 = vld [vmem:[%s3635_s19 + $0x34] sm:$0xf]  ;;  %v1058_v3 = vshrl.u32 %v4419_v50, 16  ;;  %v1061_v54 = vshll.u32 %v4419_v50, 16 }
  0xac   : > { %1263 = vrot.lane.b32.xlu1 %v1056_v16, %s3465_s6  ;;  %v4422_v16 = vcombine.low %v340_v26, %v4405_v4  ;;  %262 = vst.msk [vmem:[#allocation2 + $0x68] sm:$0xf] %vm172_vm0, %v260_v37  ;;  %v4439_v38 = vsel %vm530_vm2, %v3968_v51, %v4426_v18  ;;  %v6063_v51 = vrot.slane %v4382_v57, 5  ;;  %v1173_v49 = vsel %vm530_vm2, %v4325_v31, %v4441_v5  ;;  %v889_v48 = vpop.permute.xlu1 %888  ;;  %v295_v26 = vld [vmem:[%s3635_s19 + $0x78] sm:$0xf] }
  0xad   : > { %1401 = vrot.lane.b32.xlu0 %v1346_v40, %s3463_s29  ;;  %v259_v40 = vld [vmem:[%s3635_s19 + $0x30] sm:$0xf]  ;;  %v4467_v22 = vpop.permute.xlu0 %890  ;;  %v6106_v31 = vrot.slane %v4236_v28, 5  ;;  %v1060_v11 = vrot.slane %v1058_v3, 4  ;;  %297 = vst.msk [vmem:[#allocation2 + $0xd0] sm:$0xf] %vm172_vm0, %v295_v26 }
  0xae   : > { %261 = vst.msk [vmem:[#allocation2 + $0x64] sm:$0xf] %vm172_vm0, %v259_v40 }
  0xaf   : > { %v1348_v37 = vsel %vm832_vm1, %v6106_v31, %v6063_v51  ;;  %v2108_v31 = vshrl.u32 %v4359_v56, 16  ;;  %v606_v51 = vshll.u32 %v4337_v45, 16 }
  0xb0   : > { %1377 = vrot.lane.b32.xlu1 %v1322_v21, %s3463_s29  ;;  %v6049_v21 = vrot.slane %v4422_v16, 5  ;;  %v4484_v2 = vpop.permute.xlu1 %1369 }
  0xb1   : > { %1468 = vrot.lane.b32.xlu0 %v4382_v57, %s3466_s16  ;;  %v2110_v19 = vrot.slane %v2108_v31, 3 }
  0xb2   : > { %v4450_v35 = vsel %vm832_vm1, %v6105_v9, %v6049_v21  ;;  %v711_v9 = vshrl.u32 %v4422_v16, 16  ;;  %v714_v21 = vshll.u32 %v4422_v16, 16 }
  0xb3   : > { %v2315_v40 = vshll.u32 %v4450_v35, 16 }
  0xb4   : > { %1444 = vrot.lane.b32.xlu1 %v4419_v50, %s3466_s16  ;;  %v4504_v3 = vpop.permute.xlu1 %1255 }
  0xb5   : > { %1553 = vrot.lane.b32.xlu0 %v4410_v8, %s3467_s20  ;;  %v2317_v43 = vrot.slane %v2315_v40, 4  ;;  %v716_v40 = vrot.slane %v714_v21, 5 }
  0xb8   : > { %1529 = vrot.lane.b32.xlu1 %v4439_v38, %s3467_s20 }
  0xb9   : > { %807 = vrot.lane.b32.xlu0 %v4258_v42, %s3464_s30  ;;  %v2312_v42 = vshrl.u32 %v4450_v35, 16 }
  0xbc   : > { %1289 = vrot.lane.b32.xlu1 %v1173_v49, %s3465_s6  ;;  %v1063_v49 = vrot.slane %v1061_v54, 5 }
  0xbd   : > { %922 = vrot.lane.b32.xlu0 %v4270_v62, %s3462_s26  ;;  %v2314_v62 = vrot.slane %v2312_v42, 3  ;;  %v713_v42 = vrot.slane %v711_v9, 4  ;;  %v6111_v9 = vrot.slane %v4333_v27, 5 }
  0xbe   : > { %v4497_v21 = vor.u32 %v1063_v49, %v1060_v11 }
  0xbf   : > { %v4486_v7 = vor.u32 %v2317_v43, %v2314_v62  ;;  %v4495_v30 = vor.u32 %v716_v40, %v713_v42  ;;  %v299_v43 = vld [vmem:[#allocation2] sm:$0x8]  ;;  %v4511_v24 = vsel %vm832_vm1, %v6064_v15, %v6111_v9  ;;  %v603_v40 = vshrl.u32 %v4337_v45, 16  ;;  %v4535_v15 = vpop.permute.xlu1 %777 }
  0xc0   : > { %1403 = vrot.lane.b32.xlu1 %v1348_v37, %s3463_s29  ;;  %v2091_v11 = vshrl.u32 %v4511_v24, 16  ;;  %v2094_v62 = vshll.u32 %v4511_v24, 16  ;;  %v3196_v49 = vcombine.low %v299_v43, %v3846_v14  ;;  %v1065_v26 = vsel %vm530_vm2, %v4369_v0, %v4497_v21 }
  0xc1   : > { %989 = vrot.lane.b32.xlu0 %v4198_v44, %s3461_s23  ;;  %v774_v44 = vpop.permute.xlu0 %773  ;;  %6109 = vst [vmem:[#allocation21_spill] sm:$0xff] %v4486_v7  ;;  %v4502_v54 = vsel %vm2015_vm3, %v4371_v20, %v4486_v7  ;;  %v2111_v20 = vshll.u32 %v4359_v56, 16  ;;  %v4529_v9 = vsel %vm530_vm2, %v4389_v33, %v4495_v30  ;;  %v6113_v14 = vrot.slane %v4419_v50, 5 }
  0xc2   : > { %6110 = vst [vmem:[#allocation22_spill] sm:$0xff] %v4502_v54  ;;  %v2093_v42 = vrot.slane %v2091_v11, 3  ;;  %v2096_v7 = vrot.slane %v2094_v62, 4  ;;  %v6114_v0 = vrot.slane %v4121_v23, 5  ;;  %v605_v43 = vrot.slane %v603_v40, 4 }
  0xc3   : > { %v2113_v54 = vrot.slane %v2111_v20, 4  ;;  %v1591_v63 = vsel %vm1588_vm4, %v3196_v49, %v774_v44  ;;  %v1175_v11 = vshrl.u32 %v4492_v52, 16  ;;  %v1178_v62 = vshll.u32 %v4492_v52, 16  ;;  %v4552_v20 = vpop.permute.xlu1 %779 }
  0xc4   : > { %1470 = vrot.lane.b32.xlu1 %v4492_v52, %s3466_s16  ;;  %v1324_v33 = vsel %vm832_vm1, %v6114_v0, %v6113_v14  ;;  %v4554_v47 = vor.u32 %v2096_v7, %v2093_v42  ;;  %v1650_v23 = vsel %vm1648_vm5, %v1591_v63, %v889_v48  ;;  %v342_v48 = vld [vmem:[#allocation2 + $0xac] sm:$0xf]  ;;  %v4601_v0 = vld [vmem:[#allocation2 + $0x50] sm:$0xf] }
  0xc5   : > { %898 = vrot.lane.b32.xlu0 %v4482_v29, %s3462_s26  ;;  %v776_v37 = vpop.permute.xlu0 %775  ;;  %v1177_v40 = vrot.slane %v1175_v11, 4  ;;  %v1180_v49 = vrot.slane %v1178_v62, 5 }
  0xc8   : > { %1555 = vrot.lane.b32.xlu1 %v4529_v9, %s3467_s20 }
  0xc9   : > { %965 = vrot.lane.b32.xlu0 %v3920_v60, %s3461_s23  ;;  %v4537_v28 = vpop.permute.xlu0 %781 }
  0xca   : > { %6112 = vst [vmem:[#allocation23_spill] sm:$0xff] %v4537_v28  ;;  %v608_v28 = vrot.slane %v606_v51, 5  ;;  %v4564_v51 = vcombine.low %v4317_v36, %v4319_v61  ;;  %v1707_v36 = vsel %vm1705_vm6, %v1650_v23, %v4443_v25  ;;  %v4594_v23 = vor.u32 %v1180_v49, %v1177_v40  ;;  %v4599_v25 = vld [vmem:[#allocation2 + $0x4c] sm:$0xf] }
  0xcc   : > { %809 = vrot.lane.b32.xlu1 %v4264_v6, %s3464_s30  ;;  %v4566_v44 = vor.u32 %v608_v28, %v605_v43  ;;  %v4575_v6 = vld [vmem:[#allocation2 + $0xb0] sm:$0xf]  ;;  %v1067_v28 = vshrl.u32 %v4564_v51, 16  ;;  %v1070_v61 = vshll.u32 %v4564_v51, 16  ;;  %v6118_v43 = vrot.slane %v3916_v59, 5 }
  0xcd   : > { %1265 = vrot.lane.b32.xlu0 %v1065_v26, %s3465_s6  ;;  %v4556_v26 = vor.u32 %v2113_v54, %v2110_v19  ;;  %v6116_v54 = vcombine.low %v3851_v17, %v3844_v13  ;;  %v1764_v13 = vsel %vm1762_vm7, %v1707_v36, %v4504_v3  ;;  %v1182_v36 = vsel %vm530_vm2, %v4441_v5, %v4594_v23 }
  0xce   : > { %v4573_v63 = vpop.permute.xlu1 %783  ;;  %v4592_v14 = vsel %vm530_vm2, %v4426_v18, %v4566_v44  ;;  %v6117_v18 = vrot.slane %v3920_v60, 5  ;;  %v1069_v3 = vrot.slane %v1067_v28, 4  ;;  %v1072_v49 = vrot.slane %v1070_v61, 5 }
  0xcf   : > { %v4550_v31 = vpop.permute.xlu0 %785  ;;  %v4571_v7 = vsel %vm2015_vm3, %v4554_v47, %v4556_v26  ;;  %v1594_v42 = vsel %vm1588_vm4, %v6116_v54, %v776_v37  ;;  %v4622_v60 = vcombine.low %v4599_v25, %v4601_v0  ;;  %v1821_v59 = vsel %vm1819_vm8, %v1764_v13, %v4484_v2 }
  0xd0   : > { %6115 = vst [vmem:[#allocation24_spill] sm:$0xff] %v4550_v31  ;;  %924 = vrot.lane.b32.xlu1 %v4298_v41, %s3462_s26  ;;  %v4597_v41 = vcombine.low %v342_v48, %v4575_v6  ;;  %v4611_v11 = vsel %vm832_vm1, %v6118_v43, %v6117_v18  ;;  %v1652_v40 = vsel %vm1648_vm5, %v1594_v42, %v4467_v22  ;;  %v2060_v54 = vshll.u32 %v4482_v29, 16 }
  0xd1   : > { %1379 = vrot.lane.b32.xlu0 %v1324_v33, %s3463_s29  ;;  %v2057_v33 = vshrl.u32 %v4482_v29, 16  ;;  %v1709_v2 = vsel %vm1705_vm6, %v1652_v40, %v4434_v55  ;;  %v6119_v29 = vrot.slane %v4492_v52, 5  ;;  %v4647_v55 = vor.u32 %v1072_v49, %v1069_v3 }
  0xd2   : > { %v1437_v17 = vpop.permute.xlu1 %1436  ;;  %v720_v22 = vshrl.u32 %v4597_v41, 16  ;;  %v4651_v18 = vcombine.low %v4405_v4, %v342_v48 }
  0xd3   : > { %v1258_v19 = vpop.permute.xlu0 %1257  ;;  %v1878_v28 = vsel %vm1876_vm9, %v1821_v59, %v1437_v17  ;;  %v2059_v43 = vrot.slane %v2057_v33, 3  ;;  %v6120_v17 = vrot.slane %v4382_v57, 5  ;;  %v6122_v57 = vrot.slane %v4337_v45, 5 }
  0xd4   : > { %991 = vrot.lane.b32.xlu1 %v4245_v32, %s3461_s23  ;;  %v723_v32 = vshll.u32 %v4597_v41, 16  ;;  %v1766_v5 = vsel %vm1762_vm7, %v1709_v2, %v1258_v19  ;;  %v722_v40 = vrot.slane %v720_v22, 4  ;;  %v2062_v19 = vrot.slane %v2060_v54, 4 }
  0xd5   : > { %1446 = vrot.lane.b32.xlu0 %v4564_v51, %s3466_s16  ;;  %v1350_v33 = vsel %vm832_vm1, %v6120_v17, %v6119_v29  ;;  %v615_v17 = vshll.u32 %v4622_v60, 16 }
  0xd6   : > { %v1522_v61 = vpop.permute.xlu1 %1521 }
  0xd7   : > { %v1372_v37 = vpop.permute.xlu0 %1371  ;;  %v1935_v13 = vsel %vm1933_vm10, %v1878_v28, %v1522_v61  ;;  %v725_v28 = vrot.slane %v723_v32, 5 }
  0xd8   : > { %v2016_v62 = vshrl.u32 %v1935_v13, 16  ;;  %v2019_v31 = vshll.u32 %v1935_v13, 16  ;;  %900 = vrot.lane.b32.xlu1 %v4611_v11, %s3462_s26  ;;  %v1823_v59 = vsel %vm1819_vm8, %v1766_v5, %v1372_v37  ;;  %v612_v5 = vshrl.u32 %v4622_v60, 16 }
  0xd9   : > { %1531 = vrot.lane.b32.xlu0 %v4592_v14, %s3467_s20 }
  0xda   : > { %v893_v2 = vpop.permute.xlu1 %892  ;;  %v2018_v32 = vrot.slane %v2016_v62, 3  ;;  %v2021_v54 = vrot.slane %v2019_v31, 4 }
  0xdb   : > { %v1439_v42 = vpop.permute.xlu0 %1438 }
  0xdc   : > { %v1880_v61 = vsel %vm1876_vm9, %v1823_v59, %v1439_v42  ;;  %967 = vrot.lane.b32.xlu1 %v4333_v27, %s3461_s23  ;;  %v4670_v42 = vor.u32 %v725_v28, %v722_v40  ;;  %v4674_v59 = vor.u32 %v2062_v19, %v2059_v43  ;;  %v6124_v43 = vrot.slane %v4419_v50, 5 }
  0xdd   : > { %1291 = vrot.lane.b32.xlu0 %v1182_v36, %s3465_s6  ;;  %v6121_v36 = vrot.slane %v4622_v60, 5  ;;  %v614_v19 = vrot.slane %v612_v5, 4  ;;  %v1187_v5 = vshll.u32 %v4651_v18, 16 }
  0xde   : > { %v4691_v28 = vsel %vm530_vm2, %v4495_v30, %v4670_v42  ;;  %v4707_v30 = vcombine.low %v4313_v34, %v4599_v25  ;;  %v1596_v34 = vsel %vm1588_vm4, %v3842_v12, %v4535_v15  ;;  %v2077_v12 = vshll.u32 %v4611_v11, 16 }
  0xdf   : > { %v1524_v13 = vpop.permute.xlu0 %1523  ;;  %v4658_v29 = vsel %vm832_vm1, %v6122_v57, %v6121_v36  ;;  %v1074_v57 = vsel %vm530_vm2, %v4497_v21, %v4647_v55  ;;  %v296_v36 = vld [vmem:[%s3635_s19 + $0x7c] sm:$0xf]  ;;  %v6123_v21 = vrot.slane %v4564_v51, 5  ;;  %v1654_v25 = vsel %vm1648_vm5, %v1596_v34, %v893_v2 }
  0xe0   : > { %v1937_v37 = vsel %vm1933_vm10, %v1880_v61, %v1524_v13  ;;  %v2125_v49 = vshrl.u32 %v4658_v29, 16  ;;  %v2128_v22 = vshll.u32 %v4658_v29, 16  ;;  %v1260_v61 = vpop.permute.xlu1 %1259  ;;  %298 = vst.msk [vmem:[#allocation2 + $0xd4] sm:$0xf] %vm172_vm0, %v296_v36  ;;  %1267 = vrot.lane.b32.xlu1 %v1074_v57, %s3465_s6  ;;  %v1184_v57 = vshrl.u32 %v4651_v18, 16 }
  0xe1   : > { %v2023_v4 = vshrl.u32 %v1937_v37, 16  ;;  %v2026_v48 = vshll.u32 %v1937_v37, 16  ;;  %1405 = vrot.lane.b32.xlu0 %v1350_v33, %s3463_s29  ;;  %v2022_v33 = vor.u32 %v2021_v54, %v2018_v32  ;;  %v1326_v40 = vsel %vm832_vm1, %v6124_v43, %v6123_v21  ;;  %v344_v21 = vld [vmem:[#allocation2 + $0xb4] sm:$0xf]  ;;  %v4741_v43 = vld [vmem:[#allocation2 + $0xb8] sm:$0xf] }
  0xe2   : > { %v2127_v27 = vrot.slane %v2125_v49, 3  ;;  %v2130_v37 = vrot.slane %v2128_v22, 4  ;;  %v617_v49 = vrot.slane %v615_v17, 5  ;;  %v1186_v36 = vrot.slane %v1184_v57, 4 }
  0xe3   : > { %v2025_v31 = vrot.slane %v2023_v4, 3  ;;  %v2028_v62 = vrot.slane %v2026_v48, 4  ;;  %v960_v13 = vpop.permute.xlu0 %959  ;;  %v2064_v4 = vsel %vm2015_vm3, %v4252_v53, %v4674_v59 }
  0xe4   : > { %v4693_v22 = vpop.permute.xlu1 %801  ;;  %v4700_v48 = vor.u32 %v2130_v37, %v2127_v27  ;;  %1381 = vrot.lane.b32.xlu1 %v1326_v40, %s3463_s29  ;;  %v4711_v17 = vor.u32 %v617_v49, %v614_v19  ;;  %v1189_v27 = vrot.slane %v1187_v5, 5  ;;  %v1079_v40 = vshll.u32 %v4707_v30, 16 }
  0xe5   : > { %v4678_v3 = vor.u32 %v2028_v62, %v2025_v31  ;;  %1472 = vrot.lane.b32.xlu0 %v4651_v18, %s3466_s16  ;;  %v4754_v19 = vcombine.low %v344_v21, %v4741_v43 }
  0xe6   : > { %v4717_v53 = vsel %vm2015_vm3, %v4556_v26, %v4700_v48  ;;  %v1711_v26 = vsel %vm1705_vm6, %v1654_v25, %v960_v13  ;;  %v4733_v37 = vsel %vm530_vm2, %v4566_v44, %v4711_v17  ;;  %v4748_v44 = vor.u32 %v1189_v27, %v1186_v36 }
  0xe7   : > { %v1374_v32 = vpop.permute.xlu0 %1373  ;;  %v2030_v54 = vsel %vm2015_vm3, %v2022_v33, %v4678_v3  ;;  %v2074_v33 = vshrl.u32 %v4611_v11, 16  ;;  %v1076_v11 = vshrl.u32 %v4707_v30, 16  ;;  %v1351_v25 = vrot.slane %v4651_v18, 5 }
  0xe8   : > { %2685 = vmatmul.mubr.bf16.vlgmr.msra.gmra.mxu0 %v2030_v54  ;;  %v1441_v31 = vpop.permute.xlu1 %1440  ;;  %1448 = vrot.lane.b32.xlu1 %v4707_v30, %s3466_s16  ;;  %v2079_v54 = vrot.slane %v2077_v12, 4  ;;  %v1081_v27 = vrot.slane %v1079_v40, 5  ;;  %v4770_v12 = vld [vmem:[#allocation2 + $0x58] sm:$0xf] }
  0xe9   : > { %1557 = vrot.lane.b32.xlu0 %v4691_v28, %s3467_s20  ;;  %3275 = vmatprep.mubr.msk.bf16.mxu0 %vm1588_vm4, %v2064_v4  ;;  %v2076_v49 = vrot.slane %v2074_v33, 3  ;;  %v1078_v36 = vrot.slane %v1076_v11, 4  ;;  %v732_v33 = vshll.u32 %v4754_v19, 16  ;;  %v6125_v11 = vrot.slane %v4492_v52, 5 }
  0xeb   : > { %v4719_v62 = vpop.permute.xlu0 %803  ;;  %v1352_v40 = vsel %vm832_vm1, %v6125_v11, %v1351_v25  ;;  %v6126_v11 = vrot.slane %v4564_v51, 5 }
  0xec   : > { %v4737_v15 = vpop.permute.xlu1 %918  ;;  %1533 = vrot.lane.b32.xlu1 %v4733_v37, %s3467_s20 }
  0xed   : > { %811 = vrot.lane.b32.xlu0 %v4410_v8, %s3464_s30  ;;  %v1768_v8 = vsel %vm1762_vm7, %v1711_v26, %v1260_v61  ;;  %v729_v26 = vshrl.u32 %v4754_v19, 16 }
  0xee   : > { %v1825_v13 = vsel %vm1819_vm8, %v1768_v8, %v1374_v32  ;;  %v1191_v32 = vsel %vm530_vm2, %v4594_v23, %v4748_v44  ;;  %v4772_v8 = vor.u32 %v2079_v54, %v2076_v49  ;;  %v4787_v49 = vor.u32 %v1081_v27, %v1078_v36 }
  0xef   : > { %v4739_v2 = vpop.permute.xlu0 %916  ;;  %v1882_v61 = vsel %vm1876_vm9, %v1825_v13, %v1441_v31  ;;  %v320_v31 = vld [vmem:[#allocation2 + $0x54] sm:$0xf]  ;;  %v731_v54 = vrot.slane %v729_v26, 4  ;;  %v4801_v36 = vcombine.low %v4575_v6, %v344_v21 }
  0xf0   : > { %v4757_v4 = vpop.permute.xlu1 %983  ;;  %787 = vrot.lane.b32.xlu1 %v4439_v38, %s3464_s30  ;;  %v4780_v23 = vcombine.low %v320_v31, %v4770_v12 }
  0xf1   : > { %926 = vrot.lane.b32.xlu0 %v4277_v1, %s3462_s26 }
  0xf2   : > { %v621_v27 = vshrl.u32 %v4780_v23, 16  ;;  %v624_v26 = vshll.u32 %v4780_v23, 16 }
  0xf3   : > { %v1526_v57 = vpop.permute.xlu0 %1525 }
  0xf4   : > { %v1939_v1 = vsel %vm1933_vm10, %v1882_v61, %v1526_v57  ;;  %v1284_v61 = vpop.permute.xlu1 %1283  ;;  %902 = vrot.lane.b32.xlu1 %v4511_v24, %s3462_s26  ;;  %v623_v6 = vrot.slane %v621_v27, 4  ;;  %v626_v21 = vrot.slane %v624_v26, 5  ;;  %v1620_v27 = vsel %vm1588_vm4, %v4249_v46, %v4693_v22 }
  0xf5   : > { %v2048_v5 = vshrl.u32 %v1939_v1, 16  ;;  %v2051_v34 = vshll.u32 %v1939_v1, 16  ;;  %993 = vrot.lane.b32.xlu0 %v4422_v16, %s3461_s23  ;;  %v1193_v26 = vshrl.u32 %v4801_v36, 16 }
  0xf7   : > { %v2050_v38 = vrot.slane %v2048_v5, 3  ;;  %v2053_v13 = vrot.slane %v2051_v34, 4  ;;  %v986_v57 = vpop.permute.xlu0 %985  ;;  %v734_v5 = vrot.slane %v732_v33, 5  ;;  %v1327_v33 = vrot.slane %v4707_v30, 5 }
  0xf8   : > { %v4789_v34 = vpop.permute.xlu1 %894  ;;  %969 = vrot.lane.b32.xlu1 %v4337_v45, %s3461_s23 }
  0xf9   : > { %v4774_v1 = vor.u32 %v2053_v13, %v2050_v38  ;;  %1293 = vrot.lane.b32.xlu0 %v1191_v32, %s3465_s6  ;;  %v2081_v32 = vsel %vm2015_vm3, %v4674_v59, %v4772_v8  ;;  %v4809_v59 = vor.u32 %v734_v5, %v731_v54 }
  0xfb   : > { %v1286_v38 = vpop.permute.xlu0 %1285  ;;  %v2055_v24 = vsel %vm2015_vm3, %v4678_v3, %v4774_v1  ;;  %v1083_v3 = vsel %vm530_vm2, %v4647_v55, %v4787_v49  ;;  %v1328_v55 = vsel %vm832_vm1, %v6126_v11, %v1327_v33 }
  0xfc   : > { %2691 = vmatmul.mubr.bf16.gmra.mxu0 %v2055_v24  ;;  %v1400_v45 = vpop.permute.xlu1 %1399  ;;  %1269 = vrot.lane.b32.xlu1 %v1083_v3, %s3465_s6  ;;  %v4831_v24 = vcombine.low %v4601_v0, %v320_v31  ;;  %v1196_v3 = vshll.u32 %v4801_v36, 16  ;;  %v1678_v0 = vsel %vm1648_vm5, %v1620_v27, %v4739_v2 }
  0xfd   : > { %1407 = vrot.lane.b32.xlu0 %v1352_v40, %s3463_s29  ;;  %3276 = vmatprep.mubr.msk.bf16.mxu0 %vm1588_vm4, %v2081_v32  ;;  %v4823_v40 = vsel %vm530_vm2, %v4670_v42, %v4809_v59  ;;  %v4833_v32 = vor.u32 %v626_v21, %v623_v6  ;;  %v1622_v42 = vsel %vm1588_vm4, %v4108_v58, %v4719_v62 }
  0xfe   : > { %v1680_v11 = vsel %vm1648_vm5, %v1622_v42, %v4737_v15  ;;  %v1735_v21 = vsel %vm1705_vm6, %v1678_v0, %v4757_v4  ;;  %v1198_v27 = vrot.slane %v1196_v3, 5  ;;  %v346_v0 = vld [vmem:[#allocation2 + $0xbc] sm:$0xf] }
  0xff   : > { %v1398_v13 = vpop.permute.xlu0 %1397  ;;  %v1737_v22 = vsel %vm1705_vm6, %v1680_v11, %v986_v57  ;;  %v4859_v15 = vsel %vm530_vm2, %v4711_v17, %v4833_v32  ;;  %v1195_v57 = vrot.slane %v1193_v26, 4 }
 0x100   : > { %v1465_v54 = vpop.permute.xlu1 %1464  ;;  %1383 = vrot.lane.b32.xlu1 %v1328_v55, %s3463_s29  ;;  %v1792_v55 = vsel %vm1762_vm7, %v1735_v21, %v1284_v61  ;;  %v1794_v62 = vsel %vm1762_vm7, %v1737_v22, %v1286_v38  ;;  %v4865_v21 = vld [vmem:[#allocation2 + $0xc0] sm:$0xf]  ;;  %v1085_v22 = vshrl.u32 %v4831_v24, 16 }
 0x101   : > { %1474 = vrot.lane.b32.xlu0 %v4801_v36, %s3466_s16  ;;  %v1851_v2 = vsel %vm1819_vm8, %v1794_v62, %v1400_v45  ;;  %v1849_v4 = vsel %vm1819_vm8, %v1792_v55, %v1398_v13  ;;  %v1088_v45 = vshll.u32 %v4831_v24, 16 }
 0x102   : > { %v1906_v61 = vsel %vm1876_vm9, %v1849_v4, %v1465_v54  ;;  %v4875_v54 = vor.u32 %v1198_v27, %v1195_v57  ;;  %v1598_v27 = vsel %vm1588_vm4, %v3880_v39, %v4552_v20 }
 0x103   : > { %v4825_v5 = vpop.permute.xlu0 %961  ;;  %v1090_v57 = vrot.slane %v1088_v45, 5  ;;  %v322_v45 = vld [vmem:[#allocation2 + $0x5c] sm:$0xf] }
 0x104   : > { %v1262_v31 = vpop.permute.xlu1 %1261  ;;  %1450 = vrot.lane.b32.xlu1 %v4831_v24, %s3466_s16 }
 0x105   : > { %1559 = vrot.lane.b32.xlu0 %v4823_v40, %s3467_s20 }
 0x107   : > { %v1467_v6 = vpop.permute.xlu0 %1466 }
 0x108   : > { %v1908_v38 = vsel %vm1876_vm9, %v1851_v2, %v1467_v6  ;;  %v1552_v42 = vpop.permute.xlu1 %1551  ;;  %1535 = vrot.lane.b32.xlu1 %v4859_v15, %s3467_s20  ;;  %v4878_v6 = vcombine.low %v346_v0, %v4865_v21 }
 0x109   : > { %813 = vrot.lane.b32.xlu0 %v4529_v9, %s3464_s30  ;;  %v1965_v9 = vsel %vm1933_vm10, %v1908_v38, %v1552_v42 }
 0x10a   : > { %v2269_v13 = vshrl.u32 %v1965_v9, 16  ;;  %v2272_v26 = vshll.u32 %v1965_v9, 16 }
 0x10b   : > { %v1550_v11 = vpop.permute.xlu0 %1549 }
 0x10c   : > { %v1963_v17 = vsel %vm1933_vm10, %v1906_v61, %v1550_v11  ;;  %v2271_v62 = vrot.slane %v2269_v13, 3  ;;  %v2274_v2 = vrot.slane %v2272_v26, 4  ;;  %v4880_v38 = vpop.permute.xlu1 %805  ;;  %v6075_v11 = vrot.slane %v4801_v36, 5  ;;  %789 = vrot.lane.b32.xlu1 %v4592_v14, %s3464_s30 }
 0x10d   : > { %v2252_v3 = vshrl.u32 %v1963_v17, 16  ;;  %v2255_v55 = vshll.u32 %v1963_v17, 16  ;;  %928 = vrot.lane.b32.xlu0 %v4450_v35, %s3462_s26  ;;  %v1087_v35 = vrot.slane %v1085_v22, 4  ;;  %v1200_v13 = vsel %vm530_vm2, %v4748_v44, %v4875_v54 }
 0x10e   : > { %v4883_v9 = vor.u32 %v2274_v2, %v2271_v62  ;;  %v738_v26 = vshrl.u32 %v4878_v6, 16  ;;  %v1656_v14 = vsel %vm1648_vm5, %v1598_v27, %v4789_v34  ;;  %v4904_v2 = vld [vmem:[#allocation2 + $0x60] sm:$0xf]  ;;  %v1354_v44 = vsel %vm832_vm1, %v1351_v25, %v6075_v11 }
 0x10f   : > { %v2254_v4 = vrot.slane %v2252_v3, 3  ;;  %v2257_v61 = vrot.slane %v2255_v55, 4  ;;  %v1376_v42 = vpop.permute.xlu0 %1375  ;;  %v741_v3 = vshll.u32 %v4878_v6, 16  ;;  %v1713_v39 = vsel %vm1705_vm6, %v1656_v14, %v4825_v5 }
 0x110   : > { %v921_v55 = vpop.permute.xlu1 %920  ;;  %v1770_v20 = vsel %vm1762_vm7, %v1713_v39, %v1262_v31  ;;  %904 = vrot.lane.b32.xlu1 %v4359_v56, %s3462_s26  ;;  %v4917_v34 = vor.u32 %v1090_v57, %v1087_v35  ;;  %v4921_v27 = vcombine.low %v322_v45, %v4904_v2  ;;  %v6074_v35 = vrot.slane %v4831_v24, 5 }
 0x111   : > { %v4885_v17 = vor.u32 %v2257_v61, %v2254_v4  ;;  %995 = vrot.lane.b32.xlu0 %v4597_v41, %s3461_s23  ;;  %v1827_v4 = vsel %vm1819_vm8, %v1770_v20, %v1376_v42  ;;  %v740_v61 = vrot.slane %v738_v26, 4  ;;  %v743_v5 = vrot.slane %v741_v3, 5 }
 0x112   : > { %v4931_v42 = vcombine.low %v4741_v43, %v346_v0  ;;  %v630_v26 = vshrl.u32 %v4921_v27, 16  ;;  %v633_v3 = vshll.u32 %v4921_v27, 16  ;;  %v1330_v43 = vsel %vm832_vm1, %v1327_v33, %v6074_v35 }
 0x113   : > { %v1443_v62 = vpop.permute.xlu0 %1442  ;;  %v2276_v22 = vsel %vm2015_vm3, %v4885_v17, %v4883_v9  ;;  %v4937_v57 = vor.u32 %v743_v5, %v740_v61  ;;  %v4966_v33 = vcombine.low %v4770_v12, %v322_v45 }
 0x114   : > { %2786 = vmatmul.mubr.bf16.vlgmr.msra.gmra.mxu1 %v2276_v22  ;;  %v1884_v56 = vsel %vm1876_vm9, %v1827_v4, %v1443_v62  ;;  %v988_v31 = vpop.permute.xlu1 %987  ;;  %971 = vrot.lane.b32.xlu1 %v4622_v60, %s3461_s23  ;;  %v632_v0 = vrot.slane %v630_v26, 4  ;;  %v635_v61 = vrot.slane %v633_v3, 5 }
 0x115   : > { %1295 = vrot.lane.b32.xlu0 %v1200_v13, %s3465_s6  ;;  %3289 = vmatprep.mubr.msk.bf16.mxu1 %vm1588_vm4, %v4394_v10  ;;  %v1092_v10 = vsel %vm530_vm2, %v4787_v49, %v4917_v34  ;;  %v4954_v49 = vsel %vm530_vm2, %v4809_v59, %v4937_v57  ;;  %v6073_v59 = vrot.slane %v4597_v41, 5 }
 0x117   : > { %v1528_v13 = vpop.permute.xlu0 %1527 }
 0x118   : > { %v1941_v14 = vsel %vm1933_vm10, %v1884_v56, %v1528_v13  ;;  %v897_v20 = vpop.permute.xlu1 %896  ;;  %1271 = vrot.lane.b32.xlu1 %v1092_v10, %s3465_s6  ;;  %v1202_v10 = vshrl.u32 %v4931_v42, 16 }
 0x119   : > { %v2065_v22 = vshrl.u32 %v1941_v14, 16  ;;  %v2068_v25 = vshll.u32 %v1941_v14, 16  ;;  %1409 = vrot.lane.b32.xlu0 %v1354_v44, %s3463_s29  ;;  %v2098_v14 = vsel %vm2015_vm3, %v4772_v8, %v4554_v47  ;;  %v1205_v47 = vshll.u32 %v4931_v42, 16 }
 0x11b   : > { %v2067_v62 = vrot.slane %v2065_v22, 3  ;;  %v2070_v39 = vrot.slane %v2068_v25, 4  ;;  %v1288_v4 = vpop.permute.xlu0 %1287  ;;  %v6127_v22 = vld [vmem:[#allocation8_spill] sm:$0xff] }
 0x11c   : > { %v964_v5 = vpop.permute.xlu1 %963  ;;  %1385 = vrot.lane.b32.xlu1 %v1330_v43, %s3463_s29  ;;  %v1624_v25 = vsel %vm1588_vm4, %v6127_v22, %v4880_v38  ;;  %v6128_v38 = vrot.slane %v4422_v16, 5 }
 0x11d   : > { %v4941_v44 = vor.u32 %v2070_v39, %v2067_v62  ;;  %1476 = vrot.lane.b32.xlu0 %v4931_v42, %s3466_s16  ;;  %v1682_v8 = vsel %vm1648_vm5, %v1624_v25, %v921_v55  ;;  %v1204_v39 = vrot.slane %v1202_v10, 4  ;;  %v6129_v10 = vld [vmem:[#allocation23_spill] sm:$0xff] }
 0x11e   : > { %v1739_v12 = vsel %vm1705_vm6, %v1682_v8, %v988_v31  ;;  %v4989_v62 = vsel %vm832_vm1, %v6128_v38, %v6073_v59  ;;  %v1355_v59 = vrot.slane %v4931_v42, 5 }
 0x11f   : > { %v1402_v56 = vpop.permute.xlu0 %1401  ;;  %v2072_v13 = vsel %vm2015_vm3, %v4774_v1, %v4941_v44  ;;  %v4972_v1 = vor.u32 %v635_v61, %v632_v0  ;;  %v1796_v45 = vsel %vm1762_vm7, %v1739_v12, %v1288_v4  ;;  %v1207_v4 = vrot.slane %v1205_v47, 5  ;;  %v348_v61 = vld [vmem:[#allocation2 + $0xc4] sm:$0xf]  ;;  %v6130_v47 = vld [vmem:[#allocation3_spill] sm:$0xff] }
 0x120   : > { %2698 = vmatmul.mubr.bf16.gmra.mxu0 %v2072_v13  ;;  %v1264_v26 = vpop.permute.xlu1 %1263  ;;  %1452 = vrot.lane.b32.xlu1 %v4966_v33, %s3466_s16  ;;  %v1853_v55 = vsel %vm1819_vm8, %v1796_v45, %v1402_v56  ;;  %v4998_v13 = vld [vmem:[#allocation2 + $0xc8] sm:$0xf]  ;;  %v1097_v56 = vshll.u32 %v4966_v33, 16  ;;  %v1600_v8 = vsel %vm1588_vm4, %v6130_v47, %v6129_v10 }
 0x121   : > { %1561 = vrot.lane.b32.xlu0 %v4954_v49, %s3467_s20  ;;  %3277 = vmatprep.mubr.msk.bf16.mxu0 %vm1588_vm4, %v2098_v14  ;;  %v4995_v31 = vsel %vm530_vm2, %v4833_v32, %v4972_v1  ;;  %v1094_v32 = vshrl.u32 %v4966_v33, 16  ;;  %v5013_v12 = vcombine.low %v348_v61, %v4998_v13  ;;  %v1658_v45 = vsel %vm1648_vm5, %v1600_v8, %v897_v20 }
 0x122   : > { %v1099_v20 = vrot.slane %v1097_v56, 5  ;;  %v5035_v56 = vld [vmem:[#allocation2 + $0x68] sm:$0xf]  ;;  %v6131_v8 = vrot.slane %v4801_v36, 5 }
 0x123   : > { %v1469_v3 = vpop.permute.xlu0 %1468 }
 0x124   : > { %v1910_v43 = vsel %vm1876_vm9, %v1853_v55, %v1469_v3  ;;  %v1378_v0 = vpop.permute.xlu1 %1377  ;;  %1537 = vrot.lane.b32.xlu1 %v4995_v31, %s3467_s20  ;;  %v5010_v3 = vor.u32 %v1207_v4, %v1204_v39  ;;  %v1096_v39 = vrot.slane %v1094_v32, 4  ;;  %v324_v32 = vld [vmem:[#allocation2 + $0x64] sm:$0xf] }
 0x125   : > { %815 = vrot.lane.b32.xlu0 %v4691_v28, %s3464_s30 }
 0x127   : > { %v1554_v28 = vpop.permute.xlu0 %1553 }
 0x128   : > { %v1967_v16 = vsel %vm1933_vm10, %v1910_v43, %v1554_v28  ;;  %v1445_v43 = vpop.permute.xlu1 %1444  ;;  %791 = vrot.lane.b32.xlu1 %v4733_v37, %s3464_s30 }
 0x129   : > { %v2286_v14 = vshrl.u32 %v1967_v16, 16  ;;  %v2289_v25 = vshll.u32 %v1967_v16, 16  ;;  %930 = vrot.lane.b32.xlu0 %v4989_v62, %s3462_s26  ;;  %v1715_v16 = vsel %vm1705_vm6, %v1658_v45, %v964_v5  ;;  %v1209_v5 = vsel %vm530_vm2, %v4875_v54, %v5010_v3 }
 0x12a   : > { %v1772_v35 = vsel %vm1762_vm7, %v1715_v16, %v1264_v26  ;;  %v750_v26 = vshll.u32 %v5013_v12, 16  ;;  %v1356_v45 = vsel %vm832_vm1, %v6131_v8, %v1355_v59  ;;  %v6132_v16 = vld [vmem:[#allocation22_spill] sm:$0xff] }
 0x12b   : > { %v2288_v38 = vrot.slane %v2286_v14, 3  ;;  %v2291_v55 = vrot.slane %v2289_v25, 4  ;;  %v808_v28 = vpop.permute.xlu0 %807  ;;  %v1829_v4 = vsel %vm1819_vm8, %v1772_v35, %v1378_v0  ;;  %v747_v14 = vshrl.u32 %v5013_v12, 16 }
 0x12c   : > { %v1886_v25 = vsel %vm1876_vm9, %v1829_v4, %v1445_v43  ;;  %v1530_v10 = vpop.permute.xlu1 %1529  ;;  %906 = vrot.lane.b32.xlu1 %v4658_v29, %s3462_s26  ;;  %v5049_v43 = vcombine.low %v324_v32, %v5035_v56 }
 0x12d   : > { %v5019_v11 = vor.u32 %v2291_v55, %v2288_v38  ;;  %997 = vrot.lane.b32.xlu0 %v4754_v19, %s3461_s23  ;;  %v1943_v35 = vsel %vm1933_vm10, %v1886_v25, %v1530_v10  ;;  %v749_v38 = vrot.slane %v747_v14, 4  ;;  %v752_v55 = vrot.slane %v750_v26, 5 }
 0x12e   : > { %v2082_v0 = vshrl.u32 %v1943_v35, 16  ;;  %v2085_v54 = vshll.u32 %v1943_v35, 16  ;;  %v642_v35 = vshll.u32 %v5049_v43, 16 }
 0x12f   : > { %v923_v47 = vpop.permute.xlu0 %922  ;;  %v2293_v37 = vsel %vm2015_vm3, %v4883_v9, %v5019_v11  ;;  %v5046_v9 = vor.u32 %v1099_v20, %v1096_v39  ;;  %v5059_v39 = vcombine.low %v4865_v21, %v348_v61  ;;  %v1331_v20 = vrot.slane %v4966_v33, 5  ;;  %v6133_v21 = vld [vmem:[#allocation12_spill] sm:$0xff] }
 0x130   : > { %2793 = vmatmul.mubr.bf16.gmra.mxu1 %v2293_v37  ;;  %v2084_v4 = vrot.slane %v2082_v0, 3  ;;  %v2087_v29 = vrot.slane %v2085_v54, 4  ;;  %v1290_v25 = vpop.permute.xlu1 %1289  ;;  %973 = vrot.lane.b32.xlu1 %v4780_v23, %s3461_s23  ;;  %v5065_v26 = vor.u32 %v752_v55, %v749_v38  ;;  %v639_v37 = vshrl.u32 %v5049_v43, 16 }
 0x131   : > { %1297 = vrot.lane.b32.xlu0 %v1209_v5, %s3465_s6  ;;  %3290 = vmatprep.mubr.msk.bf16.mxu1 %vm1588_vm4, %v6132_v16  ;;  %v1101_v14 = vsel %vm530_vm2, %v4917_v34, %v5046_v9  ;;  %v1626_v61 = vsel %vm1588_vm4, %v6133_v21, %v808_v28  ;;  %v6134_v34 = vrot.slane %v4831_v24, 5  ;;  %v2329_v16 = vshrl.u32 %v4989_v62, 16 }
 0x132   : > { %v5053_v10 = vor.u32 %v2087_v29, %v2084_v4  ;;  %v641_v28 = vrot.slane %v639_v37, 4  ;;  %v2332_v4 = vshll.u32 %v4989_v62, 16  ;;  %v6076_v62 = vrot.slane %v4754_v19, 5 }
 0x133   : > { %v990_v5 = vpop.permute.xlu0 %989  ;;  %v1332_v38 = vsel %vm832_vm1, %v6134_v34, %v1331_v20  ;;  %v2331_v21 = vrot.slane %v2329_v16, 3 }
 0x134   : > { %v1404_v0 = vpop.permute.xlu1 %1403  ;;  %v2089_v8 = vsel %vm2015_vm3, %v4941_v44, %v5053_v10  ;;  %1273 = vrot.lane.b32.xlu1 %v1101_v14, %s3465_s6  ;;  %v5087_v44 = vsel %vm530_vm2, %v4937_v57, %v5065_v26  ;;  %v5098_v57 = vcombine.low %v4904_v2, %v324_v32 }
 0x135   : > { %1411 = vrot.lane.b32.xlu0 %v1356_v45, %s3463_s29  ;;  %2705 = vmatmul.mubr.bf16.gmra.mxu0 %v2089_v8  ;;  %v1684_v45 = vsel %vm1648_vm5, %v1626_v61, %v923_v47  ;;  %v644_v47 = vrot.slane %v642_v35, 5 }
 0x136   : > { %v1741_v55 = vsel %vm1705_vm6, %v1684_v45, %v990_v5  ;;  %3278 = vmatprep.mubr.msk.bf16.mxu0 %vm1588_vm4, %v4571_v7  ;;  %v1211_v5 = vshrl.u32 %v5059_v39, 16  ;;  %v1214_v7 = vshll.u32 %v5059_v39, 16 }
 0x137   : > { %v899_v54 = vpop.permute.xlu0 %898  ;;  %v1798_v8 = vsel %vm1762_vm7, %v1741_v55, %v1290_v25  ;;  %v5103_v35 = vor.u32 %v644_v47, %v641_v28  ;;  %v2334_v25 = vrot.slane %v2332_v4, 4  ;;  %v6135_v47 = vrot.slane %v4597_v41, 5 }
 0x138   : > { %v1471_v29 = vpop.permute.xlu1 %1470  ;;  %1387 = vrot.lane.b32.xlu1 %v1332_v38, %s3463_s29  ;;  %v1855_v37 = vsel %vm1819_vm8, %v1798_v8, %v1404_v0  ;;  %v1213_v0 = vrot.slane %v1211_v5, 4  ;;  %v1216_v55 = vrot.slane %v1214_v7, 5  ;;  %v5126_v5 = vld [vmem:[#allocation2 + $0xd0] sm:$0xf] }
 0x139   : > { %1478 = vrot.lane.b32.xlu0 %v5059_v39, %s3466_s16  ;;  %v1912_v61 = vsel %vm1876_vm9, %v1855_v37, %v1471_v29  ;;  %v5115_v28 = vsel %vm530_vm2, %v4972_v1, %v5103_v35  ;;  %v5122_v16 = vsel %vm832_vm1, %v6135_v47, %v6076_v62  ;;  %v5128_v7 = vor.u32 %v2334_v25, %v2331_v21 }
 0x13a   : > { %v6077_v1 = vrot.slane %v4780_v23, 5  ;;  %v5137_v41 = vor.u32 %v1216_v55, %v1213_v0  ;;  %v1106_v21 = vshll.u32 %v5098_v57, 16  ;;  %v6137_v55 = vld [vmem:[#allocation21_spill] sm:$0xff] }
 0x13b   : > { %v966_v14 = vpop.permute.xlu0 %965 }
 0x13c   : > { %v1556_v45 = vpop.permute.xlu1 %1555  ;;  %1454 = vrot.lane.b32.xlu1 %v5098_v57, %s3466_s16 }
 0x13d   : > { %1563 = vrot.lane.b32.xlu0 %v5087_v44, %s3467_s20  ;;  %v1969_v38 = vsel %vm1933_vm10, %v1912_v61, %v1556_v45  ;;  %v1103_v45 = vshrl.u32 %v5098_v57, 16 }
 0x13e   : > { %v2303_v2 = vshrl.u32 %v1969_v38, 16  ;;  %v2306_v32 = vshll.u32 %v1969_v38, 16  ;;  %v6136_v38 = vld [vmem:[#allocation10_spill] sm:$0xff] }
 0x13f   : > { %v1266_v34 = vpop.permute.xlu0 %1265 }
 0x140   : > { %v2305_v4 = vrot.slane %v2303_v2, 3  ;;  %v2308_v29 = vrot.slane %v2306_v32, 4  ;;  %v5124_v8 = vpop.permute.xlu1 %809  ;;  %1539 = vrot.lane.b32.xlu1 %v5115_v28, %s3467_s20  ;;  %v1602_v2 = vsel %vm1588_vm4, %v6136_v38, %v4573_v63  ;;  %v6138_v63 = vrot.slane %v4622_v60, 5 }
 0x141   : > { %817 = vrot.lane.b32.xlu0 %v4823_v40, %s3464_s30  ;;  %v350_v40 = vld [vmem:[#allocation2 + $0xcc] sm:$0xf]  ;;  %v1660_v32 = vsel %vm1648_vm5, %v1602_v2, %v899_v54  ;;  %v1105_v2 = vrot.slane %v1103_v45, 4 }
 0x142   : > { %v5131_v61 = vor.u32 %v2308_v29, %v2305_v4  ;;  %v5145_v25 = vcombine.low %v350_v40, %v5126_v5  ;;  %v2336_v29 = vsel %vm2015_vm3, %v6137_v55, %v5128_v7  ;;  %v1717_v62 = vsel %vm1705_vm6, %v1660_v32, %v966_v14 }
 0x143   : > { %v1380_v37 = vpop.permute.xlu0 %1379  ;;  %v5160_v38 = vsel %vm832_vm1, %v6138_v63, %v6077_v1  ;;  %v1774_v54 = vsel %vm1762_vm7, %v1717_v62, %v1266_v34  ;;  %v1357_v14 = vrot.slane %v5059_v39, 5  ;;  %v1108_v32 = vrot.slane %v1106_v21, 5 }
 0x144   : > { %v925_v47 = vpop.permute.xlu1 %924  ;;  %v2310_v0 = vsel %vm2015_vm3, %v5019_v11, %v5131_v61  ;;  %793 = vrot.lane.b32.xlu1 %v4859_v15, %s3464_s30  ;;  %v1218_v11 = vsel %vm530_vm2, %v5010_v3, %v5137_v41  ;;  %v1831_v60 = vsel %vm1819_vm8, %v1774_v54, %v1380_v37  ;;  %v759_v62 = vshll.u32 %v5145_v25, 16 }
 0x145   : > { %932 = vrot.lane.b32.xlu0 %v5122_v16, %s3462_s26  ;;  %2801 = vmatmul.mubr.bf16.gmra.mxu1 %v2310_v0  ;;  %v756_v0 = vshrl.u32 %v5145_v25, 16  ;;  %v1358_v37 = vsel %vm832_vm1, %v1355_v59, %v1357_v14  ;;  %v5185_v45 = vor.u32 %v1108_v32, %v1105_v2  ;;  %v6078_v2 = vrot.slane %v5098_v57, 5 }
 0x146   : > { %3291 = vmatprep.mubr.msk.bf16.mxu1 %vm1588_vm4, %v2336_v29 }
 0x147   : > { %v1447_v4 = vpop.permute.xlu0 %1446  ;;  %v758_v21 = vrot.slane %v756_v0, 4  ;;  %v1110_v59 = vsel %vm530_vm2, %v5046_v9, %v5185_v45 }
 0x148   : > { %v1888_v15 = vsel %vm1876_vm9, %v1831_v60, %v1447_v4  ;;  %v992_v34 = vpop.permute.xlu1 %991  ;;  %908 = vrot.lane.b32.xlu1 %v5160_v38, %s3462_s26  ;;  %v761_v4 = vrot.slane %v759_v62, 5 }
 0x149   : > { %999 = vrot.lane.b32.xlu0 %v4878_v6, %s3461_s23 }
 0x14b   : > { %v1532_v55 = vpop.permute.xlu0 %1531 }
 0x14c   : > { %v1945_v63 = vsel %vm1933_vm10, %v1888_v15, %v1532_v55  ;;  %v901_v60 = vpop.permute.xlu1 %900  ;;  %975 = vrot.lane.b32.xlu1 %v4921_v27, %s3461_s23 }
 0x14d   : > { %v2099_v1 = vshrl.u32 %v1945_v63, 16  ;;  %v2102_v3 = vshll.u32 %v1945_v63, 16  ;;  %1299 = vrot.lane.b32.xlu0 %v1218_v11, %s3465_s6  ;;  %v5193_v11 = vcombine.low %v4998_v13, %v350_v40  ;;  %v6139_v13 = vld [vmem:[#allocation16_spill] sm:$0xff]  ;;  %v1334_v40 = vsel %vm832_vm1, %v1331_v20, %v6078_v2 }
 0x14e   : > { %v1628_v9 = vsel %vm1588_vm4, %v6139_v13, %v5124_v8  ;;  %v2346_v63 = vshrl.u32 %v5122_v16, 16 }
 0x14f   : > { %v2101_v29 = vrot.slane %v2099_v1, 3  ;;  %v2104_v54 = vrot.slane %v2102_v3, 4  ;;  %v1292_v15 = vpop.permute.xlu0 %1291  ;;  %v5199_v1 = vor.u32 %v761_v4, %v758_v21  ;;  %v2349_v3 = vshll.u32 %v5122_v16, 16 }
 0x150   : > { %v968_v32 = vpop.permute.xlu1 %967  ;;  %1275 = vrot.lane.b32.xlu1 %v1110_v59, %s3465_s6  ;;  %v1686_v8 = vsel %vm1648_vm5, %v1628_v9, %v925_v47  ;;  %v1223_v16 = vshll.u32 %v5193_v11, 16  ;;  %v2142_v9 = vshrl.u32 %v5160_v38, 16 }
 0x151   : > { %v5187_v55 = vor.u32 %v2104_v54, %v2101_v29  ;;  %1413 = vrot.lane.b32.xlu0 %v1358_v37, %s3463_s29  ;;  %v1743_v4 = vsel %vm1705_vm6, %v1686_v8, %v992_v34  ;;  %v1220_v29 = vshrl.u32 %v5193_v11, 16  ;;  %v6079_v54 = vrot.slane %v4878_v6, 5 }
 0x152   : > { %v1800_v20 = vsel %vm1762_vm7, %v1743_v4, %v1292_v15  ;;  %v2348_v34 = vrot.slane %v2346_v63, 3  ;;  %v2351_v59 = vrot.slane %v2349_v3, 4  ;;  %v1225_v4 = vrot.slane %v1223_v16, 5  ;;  %v6140_v63 = vld [vmem:[#allocation24_spill] sm:$0xff]  ;;  %v6141_v3 = vld [vmem:[#allocation9_spill] sm:$0xff] }
 0x153   : > { %v1406_v0 = vpop.permute.xlu0 %1405  ;;  %v2106_v62 = vsel %vm2015_vm3, %v5053_v10, %v5187_v55  ;;  %v5218_v10 = vsel %vm530_vm2, %v5065_v26, %v5199_v1  ;;  %v3450_v26 = vld [vmem:[#allocation2 + $0x6c] sm:$0xf] }
 0x154   : > { %2713 = vmatmul.mubr.bf16.gmra.mxu0 %v2106_v62  ;;  %v1268_v37 = vpop.permute.xlu1 %1267  ;;  %1389 = vrot.lane.b32.xlu1 %v1334_v40, %s3463_s29  ;;  %v1857_v47 = vsel %vm1819_vm8, %v1800_v20, %v1406_v0  ;;  %v1222_v0 = vrot.slane %v1220_v29, 4  ;;  %v2145_v20 = vshll.u32 %v5160_v38, 16  ;;  %v352_v38 = vld [vmem:[#allocation2 + $0xd4] sm:$0xf]  ;;  %v5265_v2 = vor.u32 %v2351_v59, %v2348_v34 }
 0x155   : > { %1480 = vrot.lane.b32.xlu0 %v5193_v11, %s3466_s16  ;;  %3279 = vmatprep.mubr.msk.bf16.mxu0 %vm1588_vm4, %v4717_v53  ;;  %v5231_v53 = vcombine.low %v5035_v56, %v3450_v26  ;;  %v6142_v26 = vld [vmem:[#allocation6_spill] sm:$0xff] }
 0x157   : > { %v1473_v21 = vpop.permute.xlu0 %1472  ;;  %v1112_v59 = vshrl.u32 %v5231_v53, 16 }
 0x158   : > { %v1914_v15 = vsel %vm1876_vm9, %v1857_v47, %v1473_v21  ;;  %v1382_v62 = vpop.permute.xlu1 %1381  ;;  %1456 = vrot.lane.b32.xlu1 %v5231_v53, %s3466_s16  ;;  %v1604_v21 = vsel %vm1588_vm4, %v6141_v3, %v6140_v63  ;;  %v5251_v47 = vsel %vm530_vm2, %v5103_v35, %v6142_v26  ;;  %v5263_v3 = vld [vmem:[#allocation2 + $0xd8] sm:$0xf]  ;;  %v854_v26 = vrot.slane %v4921_v27, 5 }
 0x159   : > { %1565 = vrot.lane.b32.xlu0 %v5218_v10, %s3467_s20 }
 0x15b   : > { %v1558_v13 = vpop.permute.xlu0 %1557 }
 0x15c   : > { %v1971_v40 = vsel %vm1933_vm10, %v1914_v15, %v1558_v13  ;;  %v6143_v15 = vrot.slane %v4754_v19, 5  ;;  %v2144_v19 = vrot.slane %v2142_v9, 3  ;;  %1541 = vrot.lane.b32.xlu1 %v5251_v47, %s3467_s20  ;;  %v5282_v9 = vcombine.low %v352_v38, %v5263_v3 }
 0x15d   : > { %v2320_v56 = vshrl.u32 %v1971_v40, 16  ;;  %v2323_v8 = vshll.u32 %v1971_v40, 16  ;;  %819 = vrot.lane.b32.xlu0 %v4954_v49, %s3464_s30  ;;  %v1662_v49 = vsel %vm1648_vm5, %v1604_v21, %v901_v60  ;;  %v1449_v40 = vpop.permute.xlu1 %1448  ;;  %v5276_v60 = vor.u32 %v1225_v4, %v1222_v0 }
 0x15e   : > { %v5258_v13 = vsel %vm832_vm1, %v6143_v15, %v6079_v54  ;;  %v1719_v35 = vsel %vm1705_vm6, %v1662_v49, %v968_v32  ;;  %v1115_v32 = vshll.u32 %v5231_v53, 16  ;;  %v6144_v4 = vrot.slane %v4780_v23, 5 }
 0x15f   : > { %v2322_v29 = vrot.slane %v2320_v56, 3  ;;  %v2325_v16 = vrot.slane %v2323_v8, 4  ;;  %v5261_v63 = vpop.permute.xlu0 %811  ;;  %v1776_v15 = vsel %vm1762_vm7, %v1719_v35, %v1268_v37  ;;  %v2147_v37 = vrot.slane %v2145_v20, 4 }
 0x160   : > { %v1833_v34 = vsel %vm1819_vm8, %v1776_v15, %v1382_v62  ;;  %v2353_v62 = vsel %vm2015_vm3, %v5128_v7, %v5265_v2  ;;  %v5297_v20 = vsel %vm832_vm1, %v6144_v4, %v854_v26  ;;  %795 = vrot.lane.b32.xlu1 %v4995_v31, %s3464_s30  ;;  %v1227_v7 = vsel %vm530_vm2, %v5137_v41, %v5276_v60 }
 0x161   : > { %v5270_v54 = vor.u32 %v2325_v16, %v2322_v29  ;;  %934 = vrot.lane.b32.xlu0 %v5258_v13, %s3462_s26  ;;  %v1890_v56 = vsel %vm1876_vm9, %v1833_v34, %v1449_v40  ;;  %v1534_v8 = vpop.permute.xlu1 %1533  ;;  %v1114_v40 = vrot.slane %v1112_v59, 4  ;;  %v1117_v35 = vrot.slane %v1115_v32, 5 }
 0x162   : > { %v1947_v0 = vsel %vm1933_vm10, %v1890_v56, %v1534_v8  ;;  %v765_v23 = vshrl.u32 %v5282_v9, 16  ;;  %v768_v15 = vshll.u32 %v5282_v9, 16 }
 0x163   : > { %v927_v21 = vpop.permute.xlu0 %926  ;;  %v2327_v49 = vsel %vm2015_vm3, %v5131_v61, %v5270_v54  ;;  %v2116_v29 = vshrl.u32 %v1947_v0, 16  ;;  %v2119_v16 = vshll.u32 %v1947_v0, 16  ;;  %v1359_v61 = vrot.slane %v5193_v11, 5 }
 0x164   : > { %2808 = vmatmul.mubr.bf16.gmra.mxu1 %v2327_v49  ;;  %v5310_v49 = vor.u32 %v2147_v37, %v2144_v19  ;;  %910 = vrot.lane.b32.xlu1 %v5297_v20, %s3462_s26  ;;  %v5322_v59 = vor.u32 %v1117_v35, %v1114_v40  ;;  %v767_v32 = vrot.slane %v765_v23, 4 }
 0x165   : > { %1001 = vrot.lane.b32.xlu0 %v5013_v12, %s3461_s23  ;;  %3292 = vmatprep.mubr.msk.bf16.mxu1 %vm1588_vm4, %v2353_v62  ;;  %v2118_v34 = vrot.slane %v2116_v29, 3  ;;  %v2121_v56 = vrot.slane %v2119_v16, 4  ;;  %v788_v31 = vpop.permute.xlu1 %787  ;;  %v1360_v41 = vsel %vm832_vm1, %v1357_v14, %v1359_v61  ;;  %v770_v62 = vrot.slane %v768_v15, 5 }
 0x166   : > { %v2149_v29 = vsel %vm2015_vm3, %v4700_v48, %v5310_v49  ;;  %v5334_v14 = vcombine.low %v5126_v5, %v352_v38  ;;  %v1119_v16 = vsel %vm530_vm2, %v5185_v45, %v5322_v59  ;;  %v6145_v5 = vld [vmem:[#allocation20_spill] sm:$0xff]  ;;  %v6146_v45 = vrot.slane %v5098_v57, 5 }
 0x167   : > { %v994_v8 = vpop.permute.xlu0 %993  ;;  %v5312_v0 = vor.u32 %v2121_v56, %v2118_v34  ;;  %v1630_v38 = vsel %vm1588_vm4, %v6145_v5, %v5261_v63  ;;  %v2363_v15 = vshrl.u32 %v5258_v13, 16  ;;  %v2366_v34 = vshll.u32 %v5258_v13, 16 }
 0x168   : > { %977 = vrot.lane.b32.xlu1 %v5049_v43, %s3461_s23  ;;  %v1688_v56 = vsel %vm1648_vm5, %v1630_v38, %v927_v21  ;;  %v6080_v13 = vrot.slane %v5013_v12, 5 }
 0x169   : > { %1301 = vrot.lane.b32.xlu0 %v1227_v7, %s3465_s6  ;;  %v903_v4 = vpop.permute.xlu1 %902  ;;  %v2123_v37 = vsel %vm2015_vm3, %v5187_v55, %v5312_v0  ;;  %v1335_v7 = vrot.slane %v5231_v53, 5  ;;  %v5340_v55 = vor.u32 %v770_v62, %v767_v32  ;;  %v1745_v63 = vsel %vm1705_vm6, %v1688_v56, %v994_v8 }
 0x16a   : > { %2720 = vmatmul.mubr.bf16.gmra.mxu0 %v2123_v37  ;;  %v1232_v37 = vshll.u32 %v5334_v14, 16  ;;  %v2365_v21 = vrot.slane %v2363_v15, 3  ;;  %v1606_v15 = vsel %vm1588_vm4, %v4419_v50, %v788_v31  ;;  %v856_v31 = vrot.slane %v5049_v43, 5 }
 0x16b   : > { %v1294_v19 = vpop.permute.xlu0 %1293  ;;  %3280 = vmatprep.mubr.msk.bf16.mxu0 %vm1588_vm4, %v2149_v29  ;;  %v1336_v35 = vsel %vm832_vm1, %v6146_v45, %v1335_v7  ;;  %v5357_v23 = vsel %vm530_vm2, %v5199_v1, %v5340_v55  ;;  %v1229_v1 = vshrl.u32 %v5334_v14, 16 }
 0x16c   : > { %1277 = vrot.lane.b32.xlu1 %v1119_v16, %s3465_s6  ;;  %v1802_v62 = vsel %vm1762_vm7, %v1745_v63, %v1294_v19  ;;  %v2368_v16 = vrot.slane %v2366_v34, 4  ;;  %v2159_v19 = vshrl.u32 %v5297_v20, 16  ;;  %v1234_v63 = vrot.slane %v1232_v37, 5  ;;  %v5391_v37 = vld [vmem:[#allocation2 + $0xe0] sm:$0xf] }
 0x16d   : > { %1415 = vrot.lane.b32.xlu0 %v1360_v41, %s3463_s29  ;;  %v970_v48 = vpop.permute.xlu1 %969  ;;  %v2162_v34 = vshll.u32 %v5297_v20, 16 }
 0x16e   : > { %v5393_v50 = vor.u32 %v2368_v16, %v2365_v21  ;;  %v1121_v16 = vshrl.u32 %v4249_v46, 16 }
 0x16f   : > { %v1408_v40 = vpop.permute.xlu0 %1407 }
 0x170   : > { %1391 = vrot.lane.b32.xlu1 %v1336_v35, %s3463_s29  ;;  %v1859_v29 = vsel %vm1819_vm8, %v1802_v62, %v1408_v40  ;;  %v1231_v40 = vrot.slane %v1229_v1, 4  ;;  %v356_v1 = vld [vmem:[#allocation2 + $0xdc] sm:$0xf] }
 0x171   : > { %1482 = vrot.lane.b32.xlu0 %v5334_v14, %s3466_s16  ;;  %v1270_v41 = vpop.permute.xlu1 %1269 }
 0x173   : > { %v1475_v32 = vpop.permute.xlu0 %1474 }
 0x174   : > { %v1916_v5 = vsel %vm1876_vm9, %v1859_v29, %v1475_v32  ;;  %1458 = vrot.lane.b32.xlu1 %v4249_v46, %s3466_s16  ;;  %v6147_v32 = vrot.slane %v4878_v6, 5  ;;  %v1664_v29 = vsel %vm1648_vm5, %v1606_v15, %v903_v4  ;;  %v2161_v6 = vrot.slane %v2159_v19, 3  ;;  %v6148_v4 = vld [vmem:[#allocation7_spill] sm:$0xff] }
 0x175   : > { %1567 = vrot.lane.b32.xlu0 %v5357_v23, %s3467_s20  ;;  %v1384_v8 = vpop.permute.xlu1 %1383  ;;  %v1721_v20 = vsel %vm1705_vm6, %v1664_v29, %v970_v48  ;;  %v1124_v48 = vshll.u32 %v4249_v46, 16  ;;  %v5410_v19 = vcombine.low %v356_v1, %v5391_v37 }
 0x176   : > { %v5386_v62 = vsel %vm832_vm1, %v6147_v32, %v6080_v13  ;;  %v1778_v32 = vsel %vm1762_vm7, %v1721_v20, %v1270_v41  ;;  %v2164_v41 = vrot.slane %v2162_v34, 4 }
 0x177   : > { %v1560_v38 = vpop.permute.xlu0 %1559  ;;  %v1835_v21 = vsel %vm1819_vm8, %v1778_v32, %v1384_v8  ;;  %v2370_v8 = vsel %vm2015_vm3, %v5265_v2, %v5393_v50  ;;  %v1126_v20 = vrot.slane %v1124_v48, 5  ;;  %v1495_v27 = vshrl.u32 %v5410_v19, 16 }
 0x178   : > { %v1973_v45 = vsel %vm1933_vm10, %v1916_v5, %v1560_v38  ;;  %1543 = vrot.lane.b32.xlu1 %v6148_v4, %s3467_s20 }
 0x179   : > { %v2337_v35 = vshrl.u32 %v1973_v45, 16  ;;  %v2340_v56 = vshll.u32 %v1973_v45, 16  ;;  %821 = vrot.lane.b32.xlu0 %v5087_v44, %s3464_s30  ;;  %v1451_v45 = vpop.permute.xlu1 %1450 }
 0x17b   : > { %v2339_v5 = vrot.slane %v2337_v35, 3  ;;  %v2342_v38 = vrot.slane %v2340_v56, 4  ;;  %v5389_v44 = vpop.permute.xlu0 %813  ;;  %v5404_v35 = vor.u32 %v1234_v63, %v1231_v40  ;;  %v1892_v56 = vsel %vm1876_vm9, %v1835_v21, %v1451_v45 }
 0x17c   : > { %v5425_v63 = vsel %vm832_vm1, %v854_v26, %v856_v31  ;;  %797 = vrot.lane.b32.xlu1 %v5115_v28, %s3464_s30  ;;  %v1123_v45 = vrot.slane %v1121_v16, 4  ;;  %v1498_v26 = vshll.u32 %v5410_v19, 16 }
 0x17d   : > { %v5398_v13 = vor.u32 %v2342_v38, %v2339_v5  ;;  %936 = vrot.lane.b32.xlu0 %v5386_v62, %s3462_s26  ;;  %v1536_v15 = vpop.permute.xlu1 %1535  ;;  %v1236_v2 = vsel %vm530_vm2, %v5276_v60, %v5404_v35 }
 0x17e   : > { %v1949_v40 = vsel %vm1933_vm10, %v1892_v56, %v1536_v15  ;;  %v5440_v56 = vor.u32 %v2164_v41, %v2161_v6  ;;  %v6149_v15 = vld [vmem:[#allocation13_spill] sm:$0xff]  ;;  %v5454_v48 = vor.u32 %v1126_v20, %v1123_v45  ;;  %v1497_v6 = vrot.slane %v1495_v27, 4  ;;  %v6151_v45 = vld [vmem:[#allocation4_spill] sm:$0xff] }
 0x17f   : > { %v929_v29 = vpop.permute.xlu0 %928  ;;  %v2344_v5 = vsel %vm2015_vm3, %v5270_v54, %v5398_v13  ;;  %v2133_v34 = vshrl.u32 %v1949_v40, 16  ;;  %v2136_v38 = vshll.u32 %v1949_v40, 16  ;;  %v6081_v54 = vrot.slane %v5334_v14, 5 }
 0x180   : > { %2815 = vmatmul.mubr.bf16.gmra.mxu1 %v2344_v5  ;;  %v2227_v5 = vshrl.u32 %v6149_v15, 16  ;;  %v2230_v60 = vshll.u32 %v6149_v15, 16  ;;  %912 = vrot.lane.b32.xlu1 %v5425_v63, %s3462_s26  ;;  %v1500_v41 = vrot.slane %v1498_v26, 5  ;;  %v5468_v20 = vcombine.low %v5263_v3, %v356_v1 }
 0x181   : > { %1003 = vrot.lane.b32.xlu0 %v5145_v25, %s3461_s23  ;;  %3293 = vmatprep.mubr.msk.bf16.mxu1 %vm1588_vm4, %v2370_v8  ;;  %v2135_v32 = vrot.slane %v2133_v34, 3  ;;  %v2138_v4 = vrot.slane %v2136_v38, 4  ;;  %v5438_v28 = vpop.permute.xlu1 %789  ;;  %v1362_v16 = vsel %vm832_vm1, %v1359_v61, %v6081_v54 }
 0x182   : > { %v2229_v61 = vrot.slane %v2227_v5, 3  ;;  %v2232_v27 = vrot.slane %v2230_v60, 4  ;;  %v5474_v26 = vor.u32 %v1500_v41, %v1497_v6  ;;  %v2383_v6 = vshll.u32 %v5386_v62, 16 }
 0x183   : > { %v996_v21 = vpop.permute.xlu0 %995  ;;  %v5444_v40 = vor.u32 %v2138_v4, %v2135_v32  ;;  %v6150_v32 = vld [vmem:[#allocation14_spill] sm:$0xff] }
 0x184   : > { %v2210_v4 = vshrl.u32 %v6150_v32, 16  ;;  %v2213_v15 = vshll.u32 %v6150_v32, 16  ;;  %979 = vrot.lane.b32.xlu1 %v6151_v45, %s3461_s23  ;;  %v5480_v3 = vor.u32 %v2232_v27, %v2229_v61  ;;  %v1502_v60 = vsel %vm530_vm2, %v5340_v55, %v5474_v26 }
 0x185   : > { %1303 = vrot.lane.b32.xlu0 %v1236_v2, %s3465_s6  ;;  %v905_v8 = vpop.permute.xlu1 %904  ;;  %v2140_v38 = vsel %vm2015_vm3, %v5312_v0, %v5444_v40  ;;  %v2166_v2 = vsel %vm2015_vm3, %v5310_v49, %v5440_v56  ;;  %v1128_v0 = vsel %vm530_vm2, %v5322_v59, %v5454_v48  ;;  %v6082_v49 = vrot.slane %v4249_v46, 5 }
 0x186   : > { %2727 = vmatmul.mubr.bf16.gmra.mxu0 %v2140_v38  ;;  %v2212_v32 = vrot.slane %v2210_v4, 3  ;;  %v2215_v54 = vrot.slane %v2213_v15, 4  ;;  %v1632_v59 = vsel %vm1588_vm4, %v4492_v52, %v5389_v44  ;;  %v2385_v27 = vrot.slane %v2383_v6, 4 }
 0x187   : > { %v1296_v34 = vpop.permute.xlu0 %1295  ;;  %3281 = vmatprep.mubr.msk.bf16.mxu0 %vm1588_vm4, %v2166_v2  ;;  %v1338_v1 = vsel %vm832_vm1, %v1335_v7, %v6082_v49  ;;  %v1690_v41 = vsel %vm1648_vm5, %v1632_v59, %v929_v29  ;;  %v882_v7 = vrot.slane %v5145_v25, 5  ;;  %v1241_v29 = vshll.u32 %v5468_v20, 16  ;;  %v5534_v49 = vld [vmem:[#allocation2 + $0xe8] sm:$0xf] }
 0x188   : > { %1279 = vrot.lane.b32.xlu1 %v1128_v0, %s3465_s6  ;;  %v5496_v15 = vor.u32 %v2215_v54, %v2212_v32  ;;  %v1747_v52 = vsel %vm1705_vm6, %v1690_v41, %v996_v21  ;;  %v6152_v6 = vrot.slane %v5013_v12, 5 }
 0x189   : > { %1417 = vrot.lane.b32.xlu0 %v1362_v16, %s3463_s29  ;;  %v972_v5 = vpop.permute.xlu1 %971  ;;  %v2380_v16 = vshrl.u32 %v5386_v62, 16  ;;  %v1804_v44 = vsel %vm1762_vm7, %v1747_v52, %v1296_v34  ;;  %v1238_v62 = vshrl.u32 %v5468_v20, 16  ;;  %v1243_v52 = vrot.slane %v1241_v29, 5 }
 0x18a   : > { %v5509_v54 = vsel %vm2015_vm3, %v5496_v15, %v5480_v3 }
 0x18b   : > { %v1410_v38 = vpop.permute.xlu0 %1409  ;;  %v2382_v21 = vrot.slane %v2380_v16, 3  ;;  %v1608_v16 = vsel %vm1588_vm4, %v4564_v51, %v5438_v28 }
 0x18c   : > { %1393 = vrot.lane.b32.xlu1 %v1338_v1, %s3463_s29  ;;  %v1861_v61 = vsel %vm1819_vm8, %v1804_v44, %v1410_v38  ;;  %v2176_v1 = vshrl.u32 %v5425_v63, 16  ;;  %v2179_v38 = vshll.u32 %v5425_v63, 16  ;;  %v1240_v63 = vrot.slane %v1238_v62, 4  ;;  %v6153_v62 = vld [vmem:[#allocation11_spill] sm:$0xff] }
 0x18d   : > { %1484 = vrot.lane.b32.xlu0 %v5468_v20, %s3466_s16  ;;  %v1272_v2 = vpop.permute.xlu1 %1271  ;;  %v1666_v44 = vsel %vm1648_vm5, %v1608_v16, %v905_v8  ;;  %v5536_v51 = vor.u32 %v2385_v27, %v2382_v21 }
 0x18e   : > { %v1723_v12 = vsel %vm1705_vm6, %v1666_v44, %v972_v5  ;;  %v2178_v8 = vrot.slane %v2176_v1, 3  ;;  %v2181_v5 = vrot.slane %v2179_v38, 4  ;;  %v6154_v38 = vrot.slane %v6151_v45, 5 }
 0x18f   : > { %v1477_v4 = vpop.permute.xlu0 %1476  ;;  %v1780_v28 = vsel %vm1762_vm7, %v1723_v12, %v1272_v2  ;;  %v2387_v1 = vsel %vm2015_vm3, %v5393_v50, %v5536_v51  ;;  %v1363_v44 = vrot.slane %v5468_v20, 5 }
 0x190   : > { %v1918_v34 = vsel %vm1876_vm9, %v1861_v61, %v1477_v4  ;;  %1460 = vrot.lane.b32.xlu1 %v4108_v58, %s3466_s16  ;;  %v5527_v4 = vsel %vm832_vm1, %v6152_v6, %v882_v7  ;;  %v5581_v12 = vor.u32 %v2181_v5, %v2178_v8 }
 0x191   : > { %1569 = vrot.lane.b32.xlu0 %v1502_v60, %s3467_s20  ;;  %v1386_v0 = vpop.permute.xlu1 %1385 }
 0x192   : > { %v1837_v29 = vsel %vm1819_vm8, %v1780_v28, %v1386_v0 }
 0x193   : > { %v1562_v32 = vpop.permute.xlu0 %1561 }
 0x194   : > { %v1975_v59 = vsel %vm1933_vm10, %v1918_v34, %v1562_v32  ;;  %1545 = vrot.lane.b32.xlu1 %v6153_v62, %s3467_s20 }
 0x195   : > { %v2354_v60 = vshrl.u32 %v1975_v59, 16  ;;  %v2357_v41 = vshll.u32 %v1975_v59, 16  ;;  %823 = vrot.lane.b32.xlu0 %v5218_v10, %s3464_s30  ;;  %v1453_v32 = vpop.permute.xlu1 %1452  ;;  %v5532_v10 = vld [vmem:[#allocation2 + $0xe4] sm:$0xf] }
 0x196   : > { %v5551_v21 = vcombine.low %v5532_v10, %v5534_v49  ;;  %v1894_v2 = vsel %vm1876_vm9, %v1837_v29, %v1453_v32  ;;  %v6156_v29 = vrot.slane %v5334_v14, 5 }
 0x197   : > { %v2356_v61 = vrot.slane %v2354_v60, 3  ;;  %v2359_v34 = vrot.slane %v2357_v41, 4  ;;  %v5530_v59 = vpop.permute.xlu0 %815  ;;  %v5547_v60 = vor.u32 %v1243_v52, %v1240_v63 }
 0x198   : > { %799 = vrot.lane.b32.xlu1 %v5251_v47, %s3464_s30  ;;  %v1507_v47 = vshll.u32 %v5551_v21, 16 }
 0x199   : > { %v5540_v6 = vor.u32 %v2359_v34, %v2356_v61  ;;  %938 = vrot.lane.b32.xlu0 %v5527_v4, %s3462_s26  ;;  %v1538_v27 = vpop.permute.xlu1 %1537  ;;  %v1245_v50 = vsel %vm530_vm2, %v5404_v35, %v5547_v60  ;;  %v1504_v61 = vshrl.u32 %v5551_v21, 16 }
 0x19a   : > { %v1951_v0 = vsel %vm1933_vm10, %v1894_v2, %v1538_v27  ;;  %v1364_v2 = vsel %vm832_vm1, %v6156_v29, %v1363_v44  ;;  %v1509_v8 = vrot.slane %v1507_v47, 5  ;;  %v6159_v29 = vrot.slane %v4108_v58, 5 }
 0x19b   : > { %v931_v41 = vpop.permute.xlu0 %930  ;;  %v2361_v16 = vsel %vm2015_vm3, %v5398_v13, %v5540_v6  ;;  %v2150_v63 = vshrl.u32 %v1951_v0, 16  ;;  %v2153_v52 = vshll.u32 %v1951_v0, 16  ;;  %v5570_v13 = vsel %vm832_vm1, %v856_v31, %v6154_v38  ;;  %v6155_v31 = vld [vmem:[#allocation18_spill] sm:$0xff] }
 0x19c   : > { %2823 = vmatmul.mubr.bf16.gmra.mxu1 %v2361_v16  ;;  %v2244_v28 = vshrl.u32 %v6155_v31, 16  ;;  %914 = vrot.lane.b32.xlu1 %v5570_v13, %s3462_s26  ;;  %v2247_v35 = vshll.u32 %v6155_v31, 16  ;;  %v1506_v27 = vrot.slane %v1504_v61, 4  ;;  %v2183_v0 = vsel %vm2015_vm3, %v5440_v56, %v5581_v12  ;;  %v6158_v61 = vld [vmem:[#allocation15_spill] sm:$0xff] }
 0x19d   : > { %1005 = vrot.lane.b32.xlu0 %v5282_v9, %s3461_s23  ;;  %3294 = vmatprep.mubr.msk.bf16.mxu1 %vm1588_vm4, %v2387_v1  ;;  %v2152_v34 = vrot.slane %v2150_v63, 3  ;;  %v2155_v32 = vrot.slane %v2153_v52, 4  ;;  %v5579_v45 = vpop.permute.xlu1 %791  ;;  %v6157_v63 = vld [vmem:[#allocation5_spill] sm:$0xff]  ;;  %v5606_v52 = vcombine.low %v5391_v37, %v5532_v10 }
 0x19e   : > { %v2246_v38 = vrot.slane %v2244_v28, 3  ;;  %v5611_v47 = vor.u32 %v1509_v8, %v1506_v27 }
 0x19f   : > { %v998_v43 = vpop.permute.xlu0 %997  ;;  %v5584_v62 = vor.u32 %v2155_v32, %v2152_v34  ;;  %v1247_v37 = vshrl.u32 %v5606_v52, 16  ;;  %v1250_v31 = vshll.u32 %v5606_v52, 16 }
 0x1a0   : > { %981 = vrot.lane.b32.xlu1 %v6157_v63, %s3461_s23  ;;  %v1511_v8 = vsel %vm530_vm2, %v5474_v26, %v5611_v47 }
 0x1a1   : > { %1305 = vrot.lane.b32.xlu0 %v1245_v50, %s3465_s6  ;;  %v907_v5 = vpop.permute.xlu1 %906  ;;  %v2157_v1 = vsel %vm2015_vm3, %v5444_v40, %v5584_v62  ;;  %v2249_v50 = vrot.slane %v2247_v35, 4  ;;  %v1137_v40 = vsel %vm530_vm2, %v5454_v48, %v6158_v61  ;;  %v1634_v48 = vsel %vm1588_vm4, %v4651_v18, %v5530_v59  ;;  %v5635_v18 = vld [vmem:[#allocation2 + $0xec] sm:$0xf]  ;;  %v5637_v59 = vld [vmem:[#allocation2 + $0xf0] sm:$0xf] }
 0x1a2   : > { %2735 = vmatmul.mubr.bf16.gmra.mxu0 %v2157_v1  ;;  %v2397_v1 = vshrl.u32 %v5527_v4, 16  ;;  %v1692_v63 = vsel %vm1648_vm5, %v1634_v48, %v931_v41  ;;  %v1249_v26 = vrot.slane %v1247_v37, 4  ;;  %v5649_v48 = vcombine.low %v5635_v18, %v5637_v59 }
 0x1a3   : > { %v1298_v16 = vpop.permute.xlu0 %1297  ;;  %3282 = vmatprep.mubr.msk.bf16.mxu0 %vm1588_vm4, %v2183_v0  ;;  %v5619_v28 = vor.u32 %v2249_v50, %v2246_v38  ;;  %v2400_v0 = vshll.u32 %v5527_v4, 16  ;;  %v1749_v58 = vsel %vm1705_vm6, %v1692_v63, %v998_v43 }
 0x1a4   : > { %1281 = vrot.lane.b32.xlu1 %v1137_v40, %s3465_s6  ;;  %v1806_v61 = vsel %vm1762_vm7, %v1749_v58, %v1298_v16  ;;  %v1252_v40 = vrot.slane %v1250_v31, 5  ;;  %v2399_v16 = vrot.slane %v2397_v1, 3  ;;  %v1610_v1 = vsel %vm1588_vm4, %v4707_v30, %v5579_v45 }
 0x1a5   : > { %1419 = vrot.lane.b32.xlu0 %v1364_v2, %s3463_s29  ;;  %v974_v56 = vpop.permute.xlu1 %973  ;;  %v6160_v2 = vrot.slane %v4249_v46, 5  ;;  %v5654_v43 = vsel %vm2015_vm3, %v5480_v3, %v5619_v28  ;;  %v1516_v63 = vshll.u32 %v5649_v48, 16 }
 0x1a6   : > { %v5664_v3 = vor.u32 %v1252_v40, %v1249_v26  ;;  %v6161_v26 = vld [vmem:[#allocation17_spill] sm:$0xff] }
 0x1a7   : > { %v1412_v34 = vpop.permute.xlu0 %1411  ;;  %v1340_v27 = vsel %vm832_vm1, %v6160_v2, %v6159_v29  ;;  %v2196_v2 = vshll.u32 %v5570_v13, 16 }
 0x1a8   : > { %v2686_v32 = vpop.f32.mrf.mxu0  ;;  %1395 = vrot.lane.b32.xlu1 %v1340_v27, %s3463_s29  ;;  %v1863_v4 = vsel %vm1819_vm8, %v1806_v61, %v1412_v34  ;;  %v2193_v34 = vshrl.u32 %v5570_v13, 16  ;;  %v1513_v13 = vshrl.u32 %v5649_v48, 16 }
 0x1a9   : > { %1486 = vrot.lane.b32.xlu0 %v5606_v52, %s3466_s16  ;;  %v1274_v38 = vpop.permute.xlu1 %1273  ;;  %v5645_v32 = vrot.slane %v5282_v9, 5 }
 0x1aa   : > { %v2687_v35 = vpop.f32.mrf.mxu0  ;;  %v2195_v45 = vrot.slane %v2193_v34, 3 }
 0x1ab   : > { %v1479_v50 = vpop.permute.xlu0 %1478  ;;  %v2402_v35 = vrot.slane %v2400_v0, 4  ;;  %v5673_v0 = vsel %vm832_vm1, %v882_v7, %v5645_v32 }
 0x1ac   : > { %v2688_v46 = vpop.f32.mrf.mxu0  ;;  %v1920_v37 = vsel %vm1876_vm9, %v1863_v4, %v1479_v50  ;;  %1462 = vrot.lane.b32.xlu1 %v6127_v22, %s3466_s16  ;;  %v1668_v22 = vsel %vm1648_vm5, %v1610_v1, %v907_v5  ;;  %v1254_v5 = vsel %vm530_vm2, %v5547_v60, %v5664_v3  ;;  %v1365_v4 = vrot.slane %v5606_v52, 5 }
 0x1ad   : > { %1571 = vrot.lane.b32.xlu0 %v1511_v8, %s3467_s20  ;;  %v1388_v31 = vpop.permute.xlu1 %1387  ;;  %v5680_v61 = vor.u32 %v2402_v35, %v2399_v16  ;;  %v1725_v30 = vsel %vm1705_vm6, %v1668_v22, %v974_v56  ;;  %v1515_v56 = vrot.slane %v1513_v13, 4  ;;  %v2198_v16 = vrot.slane %v2196_v2, 4 }
 0x1ae   : > { %v2689_v41 = vpop.f32.mrf.mxu0  ;;  %v1782_v25 = vsel %vm1762_vm7, %v1725_v30, %v1274_v38 }
 0x1af   : > { %v1564_v29 = vpop.permute.xlu0 %1563  ;;  %v1839_v40 = vsel %vm1819_vm8, %v1782_v25, %v1388_v31  ;;  %v1518_v41 = vrot.slane %v1516_v63, 5  ;;  %v2404_v34 = vsel %vm2015_vm3, %v5536_v51, %v5680_v61  ;;  %v5712_v63 = vor.u32 %v2198_v16, %v2195_v45 }
 0x1b0   : > { %v1977_v9 = vsel %vm1933_vm10, %v1920_v37, %v1564_v29  ;;  %1547 = vrot.lane.b32.xlu1 %v6161_v26, %s3467_s20 }
 0x1b1   : > { %v2371_v27 = vshrl.u32 %v1977_v9, 16  ;;  %v2374_v8 = vshll.u32 %v1977_v9, 16  ;;  %825 = vrot.lane.b32.xlu0 %v5357_v23, %s3464_s30  ;;  %v1455_v58 = vpop.permute.xlu1 %1454  ;;  %v3259_v9 = vcombine.low %v5534_v49, %v5635_v18  ;;  %v1519_v2 = vor.u32 %v1518_v41, %v1515_v56  ;;  %v5721_v49 = vld [vmem:[%s6033_s2] ss:$0 sm:$0xff] }
 0x1b2   : > { %v1896_v38 = vsel %vm1876_vm9, %v1839_v40, %v1455_v58  ;;  %v2200_v25 = vsel %vm2015_vm3, %v5581_v12, %v5712_v63 }
 0x1b3   : > { %v2373_v50 = vrot.slane %v2371_v27, 3  ;;  %v2376_v23 = vrot.slane %v2374_v8, 4  ;;  %v5678_v46 = vpop.permute.xlu0 %817  ;;  %v3447_v27 = vld [vmem:[#allocation2 + $0xdc] ss:$0 sps:$4 sm:$0x11]  }
 0x1b4   : > { %1307 = vrot.lane.b32.xlu1 %v1254_v5, %s3465_s6  ;;  %v886_v18 = vrot.slane %v3447_v27, 5 }
 0x1b5   : > { %v5684_v7 = vor.u32 %v2376_v23, %v2373_v50  ;;  %940 = vrot.lane.b32.xlu0 %v5673_v0, %s3462_s26  ;;  %v1540_v35 = vpop.permute.xlu1 %1539  ;;  %v3448_v23 = vld [vmem:[#allocation2 + $0xe8] ss:$0 sps:$4 sm:$0x11]  }
 0x1b6   : > { %v1953_v60 = vsel %vm1933_vm10, %v1896_v38, %v1540_v35  ;;  %v1367_v56 = vrot.slane %v3448_v23, 5  ;;  %v2417_v35 = vshll.u32 %v5673_v0, 16 }
 0x1b7   : > { %v933_v37 = vpop.permute.xlu0 %932  ;;  %v2378_v29 = vsel %vm2015_vm3, %v5540_v6, %v5684_v7  ;;  %v2167_v31 = vshrl.u32 %v1953_v60, 16  ;;  %v2170_v52 = vshll.u32 %v1953_v60, 16  ;;  %v1366_v6 = vsel %vm832_vm1, %v1363_v44, %v1365_v4 }
 0x1b8   : > { %2830 = vmatmul.mubr.bf16.gmra.mxu1 %v2378_v29  ;;  %1488 = vrot.lane.b32.xlu1 %v3259_v9, %s3466_s16  ;;  %v1520_v44 = vsel %vm530_vm2, %v5611_v47, %v1519_v2  ;;  %v3254_v47 = vcombine.low %v5532_v10, %v5532_v10  ;;  %v2414_v10 = vshrl.u32 %v5673_v0, 16  ;;  %v1368_v29 = vsel %vm832_vm1, %v1365_v4, %v1367_v56 }
 0x1b9   : > { %1007 = vrot.lane.b32.xlu0 %v5410_v19, %s3461_s23  ;;  %3295 = vmatprep.mubr.msk.bf16.mxu1 %vm1588_vm4, %v2404_v34  ;;  %v2169_v51 = vrot.slane %v2167_v31, 3  ;;  %v2172_v8 = vrot.slane %v2170_v52, 4  ;;  %v794_v1 = vpop.permute.xlu1 %793 }
 0x1ba   : > { %v2416_v0 = vrot.slane %v2414_v10, 3 }
 0x1bb   : > { %v1000_v13 = vpop.permute.xlu0 %999  ;;  %v5714_v50 = vor.u32 %v2172_v8, %v2169_v51 }
 0x1bc   : > { %v2692_v22 = vpop.f32.mrf.mxu0  ;;  %827 = vrot.lane.b32.xlu1 %v5340_v55, %s3464_s30  ;;  %v1636_v55 = vsel %vm1588_vm4, %v4801_v36, %v5678_v46  ;;  %v3260_v36 = vcombine.low %v5637_v59, %v5637_v59  ;;  %v2419_v46 = vrot.slane %v2417_v35, 4 }
 0x1bd   : > { %1421 = vrot.lane.b32.xlu0 %v1366_v6, %s3463_s29  ;;  %v909_v58 = vpop.permute.xlu1 %908  ;;  %v2174_v45 = vsel %vm2015_vm3, %v5584_v62, %v5714_v50  ;;  %v887_v62 = vsel %vm832_vm1, %v5645_v32, %v886_v18  ;;  %v1694_v34 = vsel %vm1648_vm5, %v1636_v55, %v933_v37 }
 0x1be   : > { %v2693_v20 = vpop.f32.mrf.mxu0  ;;  %2742 = vmatmul.mubr.bf16.gmra.mxu0 %v2174_v45  ;;  %v1751_v52 = vsel %vm1705_vm6, %v1694_v34, %v1000_v13  ;;  %v5765_v59 = vor.u32 %v2419_v46, %v2416_v0 }
 0x1bf   : > { %v1300_v30 = vpop.permute.xlu0 %1299  ;;  %3283 = vmatprep.mubr.msk.bf16.mxu0 %vm1588_vm4, %v2200_v25 }
 0x1c0   : > { %v2694_v26 = vpop.f32.mrf.mxu0  ;;  %1009 = vrot.lane.b32.xlu1 %v3254_v47, %s3461_s23  ;;  %v1808_v9 = vsel %vm1762_vm7, %v1751_v52, %v1300_v30 }
 0x1c1   : > { %v2695_v5 = vadd.f32 %v5721_v49, %v2694_v26  ;;  %1573 = vrot.lane.b32.xlu0 %v1520_v44, %s3467_s20  ;;  %v976_v41 = vpop.permute.xlu1 %975 }
 0x1c2   : > { %v2696_v40 = vpop.f32.mrf.mxu0 }
 0x1c3   : > { %v2879_v12 = vmax.f32 %v2695_v5, 0.0  ;;  %v1414_v16 = vpop.permute.xlu0 %1413 }
 0x1c4   : > { %1423 = vrot.lane.b32.xlu1 %v1368_v29, %s3463_s29  ;;  %v1865_v4 = vsel %vm1819_vm8, %v1808_v9, %v1414_v16 }
 0x1c5   : > { %v3336_v38 = vpack.c.bf16 %v2879_v12, %v2879_v12  ;;  %942 = vrot.lane.b32.xlu0 %v887_v62, %s3462_s26  ;;  %v1276_v60 = vpop.permute.xlu1 %1275 }
 0x1c7   : > { %2981 = vst.msk [vmem:[%s3642_s22 + $0x1c] sm:$0xf] %vm172_vm0, %v3336_v38  ;;  %v1481_v31 = vpop.permute.xlu0 %1480 }
 0x1c8   : > { %v1922_v37 = vsel %vm1876_vm9, %v1865_v4, %v1481_v31  ;;  %1575 = vrot.lane.b32.xlu1 %v1519_v2, %s3467_s20 }
 0x1c9   : > { %1309 = vrot.lane.b32.xlu0 %v5664_v3, %s3465_s6  ;;  %v1390_v6 = vpop.permute.xlu1 %1389  ;;  %v1612_v3 = vsel %vm1588_vm4, %v4831_v24, %v794_v1  ;;  %v2421_v24 = vsel %vm2015_vm3, %v5680_v61, %v5765_v59 }
 0x1ca   : > { %v1670_v22 = vsel %vm1648_vm5, %v1612_v3, %v909_v58 }
 0x1cb   : > { %v1566_v27 = vpop.permute.xlu0 %1565  ;;  %v1727_v30 = vsel %vm1705_vm6, %v1670_v22, %v976_v41 }
 0x1cc   : > { %v1979_v51 = vsel %vm1933_vm10, %v1922_v37, %v1566_v27  ;;  %v1784_v45 = vsel %vm1762_vm7, %v1727_v30, %v1276_v60  ;;  %v2217_v60 = vsel %vm2015_vm3, %v5712_v63, %v5496_v15 }
 0x1cd   : > { %v2388_v8 = vshrl.u32 %v1979_v51, 16  ;;  %v2391_v13 = vshll.u32 %v1979_v51, 16  ;;  %1490 = vrot.lane.b32.xlu0 %v3260_v36, %s3466_s16  ;;  %v1457_v18 = vpop.permute.xlu1 %1456  ;;  %v1841_v26 = vsel %vm1819_vm8, %v1784_v45, %v1390_v6  ;;  %v1580_v36 = vrot.slane %v5410_v19, 5 }
 0x1ce   : > { %v1898_v2 = vsel %vm1876_vm9, %v1841_v26, %v1457_v18 }
 0x1cf   : > { %v2390_v20 = vrot.slane %v2388_v8, 3  ;;  %v2393_v44 = vrot.slane %v2391_v13, 4  ;;  %v820_v23 = vpop.permute.xlu0 %819  ;;  %v1581_v15 = vsel %vm832_vm1, %v5645_v32, %v1580_v36 }
 0x1d0   : > { %v1638_v37 = vsel %vm1588_vm4, %v4931_v42, %v820_v23  ;;  %v2431_v6 = vshrl.u32 %v1581_v15, 16  ;;  %v2434_v27 = vshll.u32 %v1581_v15, 16 }
 0x1d1   : > { %v5770_v25 = vor.u32 %v2393_v44, %v2390_v20  ;;  %v1542_v1 = vpop.permute.xlu1 %1541 }
 0x1d2   : > { %v1955_v47 = vsel %vm1933_vm10, %v1898_v2, %v1542_v1  ;;  %v2433_v45 = vrot.slane %v2431_v6, 3  ;;  %v2436_v42 = vrot.slane %v2434_v27, 4 }
 0x1d3   : > { %v935_v58 = vpop.permute.xlu0 %934  ;;  %v2395_v5 = vsel %vm2015_vm3, %v5684_v7, %v5770_v25  ;;  %v2184_v62 = vshrl.u32 %v1955_v47, 16  ;;  %v2187_v56 = vshll.u32 %v1955_v47, 16 }
 0x1d4   : > { %v2787_v40 = vpop.f32.mrf.mxu1  ;;  %2837 = vmatmul.mubr.bf16.gmra.mxu1 %v2395_v5  ;;  %v1696_v51 = vsel %vm1648_vm5, %v1638_v37, %v935_v58  ;;  %v5812_v47 = vor.u32 %v2436_v42, %v2433_v45 }
 0x1d5   : > { %v2788_v12 = vadd.f32 %v5721_v49, %v2787_v40  ;;  %3296 = vmatprep.mubr.msk.bf16.mxu1 %vm1588_vm4, %v2421_v24  ;;  %v2186_v41 = vrot.slane %v2184_v62, 3  ;;  %v2189_v16 = vrot.slane %v2187_v56, 4  ;;  %v796_v55 = vpop.permute.xlu1 %795 }
 0x1d6   : > { %v2789_v61 = vpop.f32.mrf.mxu1  ;;  %v1614_v5 = vsel %vm1588_vm4, %v4966_v33, %v796_v55  ;;  %v2438_v33 = vsel %vm2015_vm3, %v5765_v59, %v5812_v47 }
 0x1d7   : > { %v2896_v38 = vmax.f32 %v2788_v12, 0.0  ;;  %v1002_v10 = vpop.permute.xlu0 %1001  ;;  %v5783_v29 = vor.u32 %v2189_v16, %v2186_v41 }
 0x1d8   : > { %v2790_v35 = vpop.f32.mrf.mxu1  ;;  %v1753_v22 = vsel %vm1705_vm6, %v1696_v51, %v1002_v10 }
 0x1d9   : > { %v3353_v7 = vpack.c.bf16 %v2896_v38, %v2896_v38  ;;  %v911_v31 = vpop.permute.xlu1 %910  ;;  %v2191_v9 = vsel %vm2015_vm3, %v5714_v50, %v5783_v29 }
 0x1da   : > { %v2791_v34 = vpop.f32.mrf.mxu1  ;;  %2749 = vmatmul.mubr.bf16.gmra.mxu0 %v2191_v9  ;;  %v1672_v40 = vsel %vm1648_vm5, %v1614_v5, %v911_v31 }
 0x1db   : > { %3062 = vst.msk [vmem:[%s3642_s22 + $0x80] sm:$0xf] %vm172_vm0, %v3353_v7  ;;  %v1302_v52 = vpop.permute.xlu0 %1301  ;;  %3284 = vmatprep.mubr.msk.bf16.mxu0 %vm1588_vm4, %v2217_v60 }
 0x1dc   : > { %v1810_v32 = vsel %vm1762_vm7, %v1753_v22, %v1302_v52 }
 0x1dd   : > { %v978_v0 = vpop.permute.xlu1 %977 }
 0x1de   : > { %v1729_v41 = vsel %vm1705_vm6, %v1672_v40, %v978_v0 }
 0x1df   : > { %v1416_v46 = vpop.permute.xlu0 %1415 }
 0x1e0   : > { %v2699_v63 = vpop.f32.mrf.mxu0  ;;  %v1867_v18 = vsel %vm1819_vm8, %v1810_v32, %v1416_v46 }
 0x1e1   : > { %v2700_v4 = vadd.f32 %v5721_v49, %v2699_v63  ;;  %v1278_v13 = vpop.permute.xlu1 %1277 }
 0x1e2   : > { %v2701_v50 = vpop.f32.mrf.mxu0  ;;  %v1786_v16 = vsel %vm1762_vm7, %v1729_v41, %v1278_v13 }
 0x1e3   : > { %v2880_v8 = vmax.f32 %v2700_v4, 0.0  ;;  %v1483_v3 = vpop.permute.xlu0 %1482 }
 0x1e4   : > { %v2702_v20 = vpop.f32.mrf.mxu0  ;;  %v1924_v23 = vsel %vm1876_vm9, %v1867_v18, %v1483_v3 }
 0x1e5   : > { %v3337_v44 = vpack.c.bf16 %v2880_v8, %v2880_v8  ;;  %v1392_v26 = vpop.permute.xlu1 %1391  ;;  %v1582_v20 = vrot.slane %v5551_v21, 5 }
 0x1e6   : > { %v2703_v30 = vpop.f32.mrf.mxu0  ;;  %v1843_v10 = vsel %vm1819_vm8, %v1786_v16, %v1392_v26 }
 0x1e7   : > { %2982 = vst.msk [vmem:[%s3642_s22 + $0x20] sm:$0xf] %vm172_vm0, %v3337_v44  ;;  %v1568_v24 = vpop.permute.xlu0 %1567 }
 0x1e8   : > { %v1981_v2 = vsel %vm1933_vm10, %v1924_v23, %v1568_v24 }
 0x1e9   : > { %v2405_v1 = vshrl.u32 %v1981_v2, 16  ;;  %v2408_v58 = vshll.u32 %v1981_v2, 16  ;;  %v1459_v12 = vpop.permute.xlu1 %1458 }
 0x1ea   : > { %v1900_v55 = vsel %vm1876_vm9, %v1843_v10, %v1459_v12 }
 0x1eb   : > { %v2407_v62 = vrot.slane %v2405_v1, 3  ;;  %v2410_v56 = vrot.slane %v2408_v58, 4  ;;  %v822_v61 = vpop.permute.xlu0 %821 }
 0x1ed   : > { %v5817_v38 = vor.u32 %v2410_v56, %v2407_v62  ;;  %v1544_v35 = vpop.permute.xlu1 %1543 }
 0x1ee   : > { %v1957_v60 = vsel %vm1933_vm10, %v1900_v55, %v1544_v35 }
 0x1ef   : > { %v937_v7 = vpop.permute.xlu0 %936  ;;  %v2412_v34 = vsel %vm2015_vm3, %v5770_v25, %v5817_v38  ;;  %v2201_v52 = vshrl.u32 %v1957_v60, 16  ;;  %v2204_v9 = vshll.u32 %v1957_v60, 16 }
 0x1f0   : > { %v2794_v31 = vpop.f32.mrf.mxu1  ;;  %2845 = vmatmul.mubr.bf16.gmra.mxu1 %v2412_v34 }
 0x1f1   : > { %v2795_v0 = vadd.f32 %v5721_v49, %v2794_v31  ;;  %3297 = vmatprep.mubr.msk.bf16.mxu1 %vm1588_vm4, %v2438_v33  ;;  %v2203_v46 = vrot.slane %v2201_v52, 3  ;;  %v2206_v15 = vrot.slane %v2204_v9, 4  ;;  %v798_v4 = vpop.permute.xlu1 %797 }
 0x1f2   : > { %v2796_v59 = vpop.f32.mrf.mxu1  ;;  %v1616_v60 = vsel %vm1588_vm4, %v5098_v57, %v798_v4 }
 0x1f3   : > { %v2897_v63 = vmax.f32 %v2795_v0, 0.0  ;;  %v1004_v37 = vpop.permute.xlu0 %1003  ;;  %v5830_v6 = vor.u32 %v2206_v15, %v2203_v46 }
 0x1f4   : > { %v2797_v50 = vpop.f32.mrf.mxu1 }
 0x1f5   : > { %v3354_v25 = vpack.c.bf16 %v2897_v63, %v2897_v63  ;;  %v2798_v27 = vadd.f32 %v5721_v49, %v2797_v50  ;;  %v913_v13 = vpop.permute.xlu1 %912  ;;  %v2208_v22 = vsel %vm2015_vm3, %v5783_v29, %v5830_v6  ;;  %v2706_v32 = vpop.f32.mrf.mxu0  ;;  %v1583_v29 = vsel %vm832_vm1, %v1580_v36, %v1582_v20 }
 0x1f6   : > { %v2799_v51 = vpop.f32.mrf.mxu1  ;;  %2757 = vmatmul.mubr.bf16.gmra.mxu0 %v2208_v22  ;;  %v2707_v18 = vadd.f32 %v5721_v49, %v2706_v32  ;;  %v2448_v58 = vshrl.u32 %v1583_v29, 16  ;;  %v2451_v5 = vshll.u32 %v1583_v29, 16  ;;  %v1674_v52 = vsel %vm1648_vm5, %v1616_v60, %v913_v13 }
 0x1f7   : > { %3071 = vst.msk [vmem:[%s3642_s22 + $0x88] sm:$0xf] %vm172_vm0, %v3354_v25  ;;  %v2898_v8 = vmax.f32 %v2798_v27, 0.0  ;;  %v1304_v3 = vpop.permute.xlu0 %1303  ;;  %3285 = vmatprep.mubr.msk.bf16.mxu0 %vm1588_vm4, %v5509_v54  ;;  %v2708_v30 = vpop.f32.mrf.mxu0  ;;  %v1640_v54 = vsel %vm1588_vm4, %v5059_v39, %v822_v61 }
 0x1f8   : > { %v2881_v45 = vmax.f32 %v2707_v18, 0.0  ;;  %v1698_v40 = vsel %vm1648_vm5, %v1640_v54, %v937_v7  ;;  %v2450_v10 = vrot.slane %v2448_v58, 3  ;;  %v2453_v33 = vrot.slane %v2451_v5, 4 }
 0x1f9   : > { %v3355_v44 = vpack.c.bf16 %v2898_v8, %v2898_v8  ;;  %v980_v42 = vpop.permute.xlu1 %979  ;;  %v2709_v26 = vpop.f32.mrf.mxu0  ;;  %v1755_v36 = vsel %vm1705_vm6, %v1698_v40, %v1004_v37 }
 0x1fa   : > { %v3338_v24 = vpack.c.bf16 %v2881_v45, %v2881_v45  ;;  %v2710_v2 = vadd.f32 %v5721_v49, %v2709_v26  ;;  %v1812_v12 = vsel %vm1762_vm7, %v1755_v36, %v1304_v3  ;;  %v5864_v31 = vor.u32 %v2453_v33, %v2450_v10 }
 0x1fb   : > { %3072 = vst.msk [vmem:[%s3642_s22 + $0x8c] sm:$0xf] %vm172_vm0, %v3355_v44  ;;  %v1418_v23 = vpop.permute.xlu0 %1417  ;;  %v2711_v1 = vpop.f32.mrf.mxu0  ;;  %v1731_v15 = vsel %vm1705_vm6, %v1674_v52, %v980_v42 }
 0x1fc   : > { %2991 = vst.msk [vmem:[%s3642_s22 + $0x28] sm:$0xf] %vm172_vm0, %v3338_v24  ;;  %v2882_v62 = vmax.f32 %v2710_v2, 0.0  ;;  %v1869_v16 = vsel %vm1819_vm8, %v1812_v12, %v1418_v23  ;;  %v2455_v57 = vsel %vm2015_vm3, %v5812_v47, %v5864_v31  ;;  %v1584_v24 = vrot.slane %v5649_v48, 5 }
 0x1fd   : > { %v1280_v56 = vpop.permute.xlu1 %1279 }
 0x1fe   : > { %v3339_v41 = vpack.c.bf16 %v2882_v62, %v2882_v62  ;;  %v1788_v37 = vsel %vm1762_vm7, %v1731_v15, %v1280_v56  ;;  %v1585_v56 = vsel %vm832_vm1, %v1582_v20, %v1584_v24 }
 0x1ff   : > { %v1485_v19 = vpop.permute.xlu0 %1484 }
 0x200   : > { %2992 = vst.msk [vmem:[%s3642_s22 + $0x2c] sm:$0xf] %vm172_vm0, %v3339_v41  ;;  %v1926_v39 = vsel %vm1876_vm9, %v1869_v16, %v1485_v19  ;;  %v2465_v41 = vshrl.u32 %v1585_v56, 16  ;;  %v2468_v16 = vshll.u32 %v1585_v56, 16 }
 0x201   : > { %v1394_v61 = vpop.permute.xlu1 %1393 }
 0x202   : > { %v1845_v25 = vsel %vm1819_vm8, %v1788_v37, %v1394_v61 }
 0x203   : > { %v1570_v55 = vpop.permute.xlu0 %1569 }
 0x204   : > { %v1983_v35 = vsel %vm1933_vm10, %v1926_v39, %v1570_v55 }
 0x205   : > { %v2422_v7 = vshrl.u32 %v1983_v35, 16  ;;  %v2425_v34 = vshll.u32 %v1983_v35, 16  ;;  %v1461_v59 = vpop.permute.xlu1 %1460  ;;  %v2802_v63 = vpop.f32.mrf.mxu1  ;;  %v2467_v35 = vrot.slane %v2465_v41, 3  ;;  %v6162_v41 = vld [vmem:[#allocation19_spill] sm:$0xff] }
 0x206   : > { %v1902_v4 = vsel %vm1876_vm9, %v1845_v25, %v1461_v59 }
 0x207   : > { %v2424_v9 = vrot.slane %v2422_v7, 3  ;;  %v2427_v0 = vrot.slane %v2425_v34, 4  ;;  %v824_v46 = vpop.permute.xlu0 %823  ;;  %v2803_v27 = vpop.f32.mrf.mxu1  ;;  %v2470_v7 = vrot.slane %v2468_v16, 4  ;;  %v2268_v16 = vsel %vm2015_vm3, %v5619_v28, %v6162_v41 }
 0x209   : > { %v5869_v50 = vor.u32 %v2427_v0, %v2424_v9  ;;  %v1546_v51 = vpop.permute.xlu1 %1545  ;;  %v2804_v22 = vpop.f32.mrf.mxu1 }
 0x20a   : > { %v1959_v3 = vsel %vm1933_vm10, %v1902_v4, %v1546_v51  ;;  %v2805_v18 = vadd.f32 %v5721_v49, %v2804_v22 }
 0x20b   : > { %v939_v8 = vpop.permute.xlu0 %938  ;;  %v2429_v13 = vsel %vm2015_vm3, %v5817_v38, %v5869_v50  ;;  %v2218_v32 = vshrl.u32 %v1959_v3, 16  ;;  %v2221_v44 = vshll.u32 %v1959_v3, 16  ;;  %v2806_v47 = vpop.f32.mrf.mxu1 }
 0x20c   : > { %2852 = vmatmul.mubr.bf16.gmra.mxu1 %v2429_v13  ;;  %v2899_v42 = vmax.f32 %v2805_v18, 0.0 }
 0x20d   : > { %3298 = vmatprep.mubr.msk.bf16.mxu1 %vm1588_vm4, %v2455_v57  ;;  %v2220_v30 = vrot.slane %v2218_v32, 3  ;;  %v2223_v45 = vrot.slane %v2221_v44, 4  ;;  %v800_v23 = vpop.permute.xlu1 %799  ;;  %v3449_v57 = vld [vmem:[#allocation2 + $0xf4] ss:$0 sps:$4 sm:$0x11]  }
 0x20e   : > { %v3356_v38 = vpack.c.bf16 %v2899_v42, %v2899_v42  ;;  %v1618_v59 = vsel %vm1588_vm4, %v5231_v53, %v800_v23  ;;  %v1586_v42 = vrot.slane %v3449_v57, 5 }
 0x20f   : > { %v1006_v29 = vpop.permute.xlu0 %1005  ;;  %v5882_v26 = vor.u32 %v2223_v45, %v2220_v30 }
 0x210   : > { %3081 = vst.msk [vmem:[%s3642_s22 + $0x94] sm:$0xf] %vm172_vm0, %v3356_v38  ;;  %v1587_v56 = vsel %vm832_vm1, %v1584_v24, %v1586_v42 }
 0x211   : > { %v915_v2 = vpop.permute.xlu1 %914  ;;  %v2225_v1 = vsel %vm2015_vm3, %v5830_v6, %v5882_v26  ;;  %v1642_v6 = vsel %vm1588_vm4, %v5193_v11, %v824_v46  ;;  %v5910_v46 = vor.u32 %v2470_v7, %v2467_v35 }
 0x212   : > { %2764 = vmatmul.mubr.bf16.gmra.mxu0 %v2225_v1  ;;  %v1676_v15 = vsel %vm1648_vm5, %v1618_v59, %v915_v2 }
 0x213   : > { %v1306_v54 = vpop.permute.xlu0 %1305  ;;  %3286 = vmatprep.mubr.msk.bf16.mxu0 %vm1588_vm4, %v5654_v43  ;;  %v1700_v43 = vsel %vm1648_vm5, %v1642_v6, %v939_v8  ;;  %v2472_v32 = vsel %vm2015_vm3, %v5864_v31, %v5910_v46 }
 0x214   : > { %v2714_v58 = vpop.f32.mrf.mxu0  ;;  %v1757_v61 = vsel %vm1705_vm6, %v1700_v43, %v1006_v29  ;;  %v2482_v43 = vshrl.u32 %v1587_v56, 16 }
 0x215   : > { %v982_v40 = vpop.permute.xlu1 %981  ;;  %v1814_v21 = vsel %vm1762_vm7, %v1757_v61, %v1306_v54 }
 0x216   : > { %v2715_v5 = vpop.f32.mrf.mxu0  ;;  %v1733_v4 = vsel %vm1705_vm6, %v1676_v15, %v982_v40  ;;  %v2484_v28 = vrot.slane %v2482_v43, 3 }
 0x217   : > { %v1420_v62 = vpop.permute.xlu0 %1419 }
 0x218   : > { %v2716_v19 = vpop.f32.mrf.mxu0  ;;  %v1871_v55 = vsel %vm1819_vm8, %v1814_v21, %v1420_v62 }
 0x219   : > { %v2717_v36 = vadd.f32 %v5721_v49, %v2716_v19  ;;  %v1282_v33 = vpop.permute.xlu1 %1281 }
 0x21a   : > { %v2718_v12 = vpop.f32.mrf.mxu0  ;;  %v1790_v8 = vsel %vm1762_vm7, %v1733_v4, %v1282_v33 }
 0x21b   : > { %v2883_v10 = vmax.f32 %v2717_v36, 0.0  ;;  %v1487_v39 = vpop.permute.xlu0 %1486 }
 0x21c   : > { %v1928_v11 = vsel %vm1876_vm9, %v1871_v55, %v1487_v39 }
 0x21d   : > { %v3340_v20 = vpack.c.bf16 %v2883_v10, %v2883_v10  ;;  %v1396_v34 = vpop.permute.xlu1 %1395  ;;  %v2485_v10 = vshll.u32 %v1587_v56, 16 }
 0x21e   : > { %v1847_v53 = vsel %vm1819_vm8, %v1790_v8, %v1396_v34 }
 0x21f   : > { %3001 = vst.msk [vmem:[%s3642_s22 + $0x34] sm:$0xf] %vm172_vm0, %v3340_v20  ;;  %v1572_v60 = vpop.permute.xlu0 %1571  ;;  %v2487_v7 = vrot.slane %v2485_v10, 4 }
 0x220   : > { %v1985_v52 = vsel %vm1933_vm10, %v1928_v11, %v1572_v60  ;;  %v3451_v60 = vld [vmem:[#allocation2 + $0xd8] sm:$0xf] }
 0x221   : > { %v2439_v9 = vshrl.u32 %v1985_v52, 16  ;;  %v2442_v0 = vshll.u32 %v1985_v52, 16  ;;  %v1463_v25 = vpop.permute.xlu1 %1462  ;;  %v3223_v52 = vcombine.low %v3451_v60, %v3451_v60  ;;  %v2488_v15 = vor.u32 %v2487_v7, %v2484_v28 }
 0x222   : > { %v1904_v44 = vsel %vm1876_vm9, %v1847_v53, %v1463_v25 }
 0x223   : > { %v2441_v63 = vrot.slane %v2439_v9, 3  ;;  %v2444_v37 = vrot.slane %v2442_v0, 4  ;;  %v826_v27 = vpop.permute.xlu0 %825 }
 0x224   : > { %v2809_v51 = vpop.f32.mrf.mxu1  ;;  %v1644_v31 = vsel %vm1588_vm4, %v5334_v14, %v826_v27 }
 0x225   : > { %v5915_v13 = vor.u32 %v2444_v37, %v2441_v63  ;;  %v2810_v3 = vadd.f32 %v5721_v49, %v2809_v51  ;;  %v1548_v47 = vpop.permute.xlu1 %1547 }
 0x226   : > { %v2811_v22 = vpop.f32.mrf.mxu1  ;;  %v1961_v23 = vsel %vm1933_vm10, %v1904_v44, %v1548_v47 }
 0x227   : > { %v2900_v18 = vmax.f32 %v2810_v3, 0.0  ;;  %v941_v30 = vpop.permute.xlu0 %940  ;;  %v2446_v45 = vsel %vm2015_vm3, %v5869_v50, %v5915_v13  ;;  %v2235_v2 = vshrl.u32 %v1961_v23, 16  ;;  %v2238_v54 = vshll.u32 %v1961_v23, 16 }
 0x228   : > { %v2812_v29 = vpop.f32.mrf.mxu1  ;;  %2859 = vmatmul.mubr.bf16.gmra.mxu1 %v2446_v45  ;;  %v1702_v50 = vsel %vm1648_vm5, %v1644_v31, %v941_v30  ;;  %v2489_v3 = vsel %vm2015_vm3, %v5910_v46, %v2488_v15 }
 0x229   : > { %v3357_v38 = vpack.c.bf16 %v2900_v18, %v2900_v18  ;;  %3299 = vmatprep.mubr.msk.bf16.mxu1 %vm1588_vm4, %v2472_v32  ;;  %v2237_v58 = vrot.slane %v2235_v2, 3  ;;  %v2240_v5 = vrot.slane %v2238_v54, 4  ;;  %v1308_v62 = vpop.permute.xlu1 %1307 }
 0x22a   : > { %v2813_v1 = vpop.f32.mrf.mxu1  ;;  %v2721_v36 = vpop.f32.mrf.mxu0 }
 0x22b   : > { %3082 = vst.msk [vmem:[%s3642_s22 + $0x98] sm:$0xf] %vm172_vm0, %v3357_v38  ;;  %v1008_v40 = vpop.permute.xlu0 %1007  ;;  %v2241_v6 = vor.u32 %v2240_v5, %v2237_v58  ;;  %v2722_v12 = vadd.f32 %v5721_v49, %v2721_v36 }
 0x22c   : > { %v1759_v19 = vsel %vm1705_vm6, %v1702_v50, %v1008_v40  ;;  %v2723_v14 = vpop.f32.mrf.mxu0 }
 0x22d   : > { %v1816_v33 = vsel %vm1762_vm7, %v1759_v19, %v1308_v62  ;;  %v2884_v39 = vmax.f32 %v2722_v12, 0.0  ;;  %v1489_v61 = vpop.permute.xlu1 %1488  ;;  %v2242_v24 = vsel %vm2015_vm3, %v5882_v26, %v2241_v6  ;;  %v2259_v4 = vsel %vm2015_vm3, %v2241_v6, %v4885_v17 }
 0x22e   : > { %v2724_v20 = vpop.f32.mrf.mxu0  ;;  %2771 = vmatmul.mubr.bf16.gmra.mxu0 %v2242_v24 }
 0x22f   : > { %v1422_v48 = vpop.permute.xlu0 %1421  ;;  %v3341_v55 = vpack.c.bf16 %v2884_v39, %v2884_v39  ;;  %3287 = vmatprep.mubr.msk.bf16.mxu0 %vm1588_vm4, %v2268_v16 }
 0x230   : > { %v1873_v21 = vsel %vm1819_vm8, %v1816_v33, %v1422_v48  ;;  %v2725_v35 = vpop.f32.mrf.mxu0 }
 0x231   : > { %3002 = vst.msk [vmem:[%s3642_s22 + $0x38] sm:$0xf] %vm172_vm0, %v3341_v55  ;;  %v1930_v11 = vsel %vm1876_vm9, %v1873_v21, %v1489_v61  ;;  %v828_v9 = vpop.permute.xlu1 %827 }
 0x232   : > { %v1647_v25 = vsel %vm1588_vm4, %v3223_v52, %v828_v9 }
 0x233   : > { %v1574_v34 = vpop.permute.xlu0 %1573 }
 0x234   : > { %v1987_v26 = vsel %vm1933_vm10, %v1930_v11, %v1574_v34 }
 0x235   : > { %v2456_v0 = vshrl.u32 %v1987_v26, 16  ;;  %v2459_v59 = vshll.u32 %v1987_v26, 16  ;;  %v1010_v57 = vpop.permute.xlu1 %1009 }
 0x236   : > { %2779 = vmatmul.mubr.bf16.gmra.mxu0 %v2259_v4 }
 0x237   : > { %v2458_v63 = vrot.slane %v2456_v0, 3  ;;  %v2461_v37 = vrot.slane %v2459_v59, 4  ;;  %v943_v27 = vpop.permute.xlu0 %942 }
 0x238   : > { %v1704_v51 = vsel %vm1648_vm5, %v1647_v25, %v943_v27 }
 0x239   : > { %v2462_v8 = vor.u32 %v2461_v37, %v2458_v63  ;;  %v1761_v53 = vsel %vm1705_vm6, %v1704_v51, %v1010_v57  ;;  %v1424_v32 = vpop.permute.xlu1 %1423 }
 0x23b   : > { %v1310_v22 = vpop.permute.xlu0 %1309  ;;  %v2463_v44 = vsel %vm2015_vm3, %v5915_v13, %v2462_v8 }
 0x23c   : > { %v1818_v18 = vsel %vm1762_vm7, %v1761_v53, %v1310_v22  ;;  %2867 = vmatmul.mubr.bf16.gmra.mxu1 %v2463_v44 }
 0x23d   : > { %3300 = vmatprep.mubr.msk.bf16.mxu1 %vm1588_vm4, %v2489_v3  ;;  %v1875_v17 = vsel %vm1819_vm8, %v1818_v18, %v1424_v32  ;;  %v1576_v30 = vpop.permute.xlu1 %1575 }
 0x23f   : > { %v1491_v47 = vpop.permute.xlu0 %1490 }
 0x240   : > { %v1932_v45 = vsel %vm1876_vm9, %v1875_v17, %v1491_v47  ;;  %v2816_v46 = vpop.f32.mrf.mxu1 }
 0x241   : > { %v1989_v42 = vsel %vm1933_vm10, %v1932_v45, %v1576_v30  ;;  %v2817_v23 = vadd.f32 %v5721_v49, %v2816_v46 }
 0x242   : > { %v2473_v29 = vshrl.u32 %v1989_v42, 16  ;;  %v2476_v38 = vshll.u32 %v1989_v42, 16  ;;  %v2818_v13 = vpop.f32.mrf.mxu1 }
 0x243   : > { %v2901_v2 = vmax.f32 %v2817_v23, 0.0 }
 0x244   : > { %v2475_v54 = vrot.slane %v2473_v29, 3  ;;  %v2478_v31 = vrot.slane %v2476_v38, 4  ;;  %v2819_v1 = vpop.f32.mrf.mxu1 }
 0x245   : > { %v3358_v58 = vpack.c.bf16 %v2901_v2, %v2901_v2  ;;  %v2820_v5 = vadd.f32 %v5721_v49, %v2819_v1 }
 0x246   : > { %v2479_v50 = vor.u32 %v2478_v31, %v2475_v54  ;;  %v2821_v40 = vpop.f32.mrf.mxu1  ;;  %v2728_v56 = vpop.f32.mrf.mxu0 }
 0x247   : > { %3091 = vst.msk [vmem:[%s3642_s22 + $0xa0] sm:$0xf] %vm172_vm0, %v3358_v58  ;;  %v2902_v62 = vmax.f32 %v2820_v5, 0.0  ;;  %v2729_v6 = vadd.f32 %v5721_v49, %v2728_v56 }
 0x248   : > { %v2480_v19 = vsel %vm2015_vm3, %v2462_v8, %v2479_v50  ;;  %v2730_v12 = vpop.f32.mrf.mxu0 }
 0x249   : > { %v3359_v36 = vpack.c.bf16 %v2902_v62, %v2902_v62  ;;  %2873 = vmatmul.mubr.bf16.gmra.mxu1 %v2480_v19  ;;  %v2885_v14 = vmax.f32 %v2729_v6, 0.0 }
 0x24a   : > { %v2731_v41 = vpop.f32.mrf.mxu0 }
 0x24b   : > { %3092 = vst.msk [vmem:[%s3642_s22 + $0xa4] sm:$0xf] %vm172_vm0, %v3359_v36  ;;  %v3342_v16 = vpack.c.bf16 %v2885_v14, %v2885_v14  ;;  %v2732_v43 = vadd.f32 %v5721_v49, %v2731_v41 }
 0x24c   : > { %v2733_v10 = vpop.f32.mrf.mxu0 }
 0x24d   : > { %3011 = vst.msk [vmem:[%s3642_s22 + $0x40] sm:$0xf] %vm172_vm0, %v3342_v16  ;;  %v2886_v33 = vmax.f32 %v2732_v43, 0.0 }
 0x24f   : > { %v3343_v39 = vpack.c.bf16 %v2886_v33, %v2886_v33 }
 0x251   : > { %3012 = vst.msk [vmem:[%s3642_s22 + $0x44] sm:$0xf] %vm172_vm0, %v3343_v39 }
 0x25c   : > { %v2824_v48 = vpop.f32.mrf.mxu1 }
 0x25e   : > { %v2825_v61 = vpop.f32.mrf.mxu1 }
 0x260   : > { %v2826_v24 = vpop.f32.mrf.mxu1 }
 0x261   : > { %v2827_v21 = vadd.f32 %v5721_v49, %v2826_v24 }
 0x262   : > { %v2828_v20 = vpop.f32.mrf.mxu1  ;;  %v2736_v35 = vpop.f32.mrf.mxu0 }
 0x263   : > { %v2903_v55 = vmax.f32 %v2827_v21, 0.0 }
 0x264   : > { %v2737_v7 = vpop.f32.mrf.mxu0 }
 0x265   : > { %v3360_v28 = vpack.c.bf16 %v2903_v55, %v2903_v55 }
 0x266   : > { %v2738_v11 = vpop.f32.mrf.mxu0 }
 0x267   : > { %3101 = vst.msk [vmem:[%s3642_s22 + $0xac] sm:$0xf] %vm172_vm0, %v3360_v28  ;;  %v2739_v34 = vadd.f32 %v5721_v49, %v2738_v11 }
 0x268   : > { %v2740_v60 = vpop.f32.mrf.mxu0 }
 0x269   : > { %v2887_v52 = vmax.f32 %v2739_v34, 0.0 }
 0x26b   : > { %v3344_v9 = vpack.c.bf16 %v2887_v52, %v2887_v52 }
 0x26d   : > { %3021 = vst.msk [vmem:[%s3642_s22 + $0x4c] sm:$0xf] %vm172_vm0, %v3344_v9 }
 0x278   : > { %v2831_v26 = vpop.f32.mrf.mxu1 }
 0x279   : > { %v2832_v0 = vadd.f32 %v5721_v49, %v2831_v26 }
 0x27a   : > { %v2833_v59 = vpop.f32.mrf.mxu1 }
 0x27b   : > { %v2904_v15 = vmax.f32 %v2832_v0, 0.0 }
 0x27c   : > { %v2834_v63 = vpop.f32.mrf.mxu1 }
 0x27d   : > { %v3361_v37 = vpack.c.bf16 %v2904_v15, %v2904_v15 }
 0x27e   : > { %v2835_v25 = vpop.f32.mrf.mxu1  ;;  %v2743_v27 = vpop.f32.mrf.mxu0 }
 0x27f   : > { %3102 = vst.msk [vmem:[%s3642_s22 + $0xb0] sm:$0xf] %vm172_vm0, %v3361_v37  ;;  %v2744_v57 = vadd.f32 %v5721_v49, %v2743_v27 }
 0x280   : > { %v2745_v4 = vpop.f32.mrf.mxu0 }
 0x281   : > { %v2888_v51 = vmax.f32 %v2744_v57, 0.0 }
 0x282   : > { %v2746_v8 = vpop.f32.mrf.mxu0 }
 0x283   : > { %v3345_v3 = vpack.c.bf16 %v2888_v51, %v2888_v51 }
 0x284   : > { %v2747_v53 = vpop.f32.mrf.mxu0 }
 0x285   : > { %3022 = vst.msk [vmem:[%s3642_s22 + $0x50] sm:$0xf] %vm172_vm0, %v3345_v3 }
 0x294   : > { %v2838_v22 = vpop.f32.mrf.mxu1 }
 0x295   : > { %v2839_v32 = vadd.f32 %v5721_v49, %v2838_v22 }
 0x296   : > { %v2840_v44 = vpop.f32.mrf.mxu1 }
 0x297   : > { %v2905_v18 = vmax.f32 %v2839_v32, 0.0 }
 0x298   : > { %v2841_v17 = vpop.f32.mrf.mxu1 }
 0x299   : > { %v3362_v47 = vpack.c.bf16 %v2905_v18, %v2905_v18  ;;  %v2842_v30 = vadd.f32 %v5721_v49, %v2841_v17 }
 0x29a   : > { %v2843_v45 = vpop.f32.mrf.mxu1  ;;  %v2750_v42 = vpop.f32.mrf.mxu0 }
 0x29b   : > { %3111 = vst.msk [vmem:[%s3642_s22 + $0xb8] sm:$0xf] %vm172_vm0, %v3362_v47  ;;  %v2906_v46 = vmax.f32 %v2842_v30, 0.0  ;;  %v2751_v29 = vadd.f32 %v5721_v49, %v2750_v42 }
 0x29c   : > { %v2752_v38 = vpop.f32.mrf.mxu0 }
 0x29d   : > { %v3363_v23 = vpack.c.bf16 %v2906_v46, %v2906_v46  ;;  %v2889_v13 = vmax.f32 %v2751_v29, 0.0 }
 0x29e   : > { %v2753_v2 = vpop.f32.mrf.mxu0 }
 0x29f   : > { %3112 = vst.msk [vmem:[%s3642_s22 + $0xbc] sm:$0xf] %vm172_vm0, %v3363_v23  ;;  %v3346_v54 = vpack.c.bf16 %v2889_v13, %v2889_v13  ;;  %v2754_v31 = vadd.f32 %v5721_v49, %v2753_v2 }
 0x2a0   : > { %v2755_v1 = vpop.f32.mrf.mxu0 }
 0x2a1   : > { %3031 = vst.msk [vmem:[%s3642_s22 + $0x58] sm:$0xf] %vm172_vm0, %v3346_v54  ;;  %v2890_v58 = vmax.f32 %v2754_v31, 0.0 }
 0x2a3   : > { %v3347_v5 = vpack.c.bf16 %v2890_v58, %v2890_v58 }
 0x2a5   : > { %3032 = vst.msk [vmem:[%s3642_s22 + $0x5c] sm:$0xf] %vm172_vm0, %v3347_v5 }
 0x2b0   : > { %v2846_v50 = vpop.f32.mrf.mxu1 }
 0x2b2   : > { %v2847_v40 = vpop.f32.mrf.mxu1 }
 0x2b4   : > { %v2848_v62 = vpop.f32.mrf.mxu1 }
 0x2b5   : > { %v2849_v56 = vadd.f32 %v5721_v49, %v2848_v62 }
 0x2b6   : > { %v2850_v19 = vpop.f32.mrf.mxu1  ;;  %v2758_v6 = vpop.f32.mrf.mxu0 }
 0x2b7   : > { %v2907_v36 = vmax.f32 %v2849_v56, 0.0 }
 0x2b8   : > { %v2759_v14 = vpop.f32.mrf.mxu0 }
 0x2b9   : > { %v3364_v12 = vpack.c.bf16 %v2907_v36, %v2907_v36 }
 0x2ba   : > { %v2760_v41 = vpop.f32.mrf.mxu0 }
 0x2bb   : > { %3121 = vst.msk [vmem:[%s3642_s22 + $0xc4] sm:$0xf] %vm172_vm0, %v3364_v12  ;;  %v2761_v16 = vadd.f32 %v5721_v49, %v2760_v41 }
 0x2bc   : > { %v2762_v43 = vpop.f32.mrf.mxu0 }
 0x2bd   : > { %v2891_v10 = vmax.f32 %v2761_v16, 0.0 }
 0x2bf   : > { %v3348_v33 = vpack.c.bf16 %v2891_v10, %v2891_v10 }
 0x2c1   : > { %3041 = vst.msk [vmem:[%s3642_s22 + $0x64] sm:$0xf] %vm172_vm0, %v3348_v33 }
 0x2cc   : > { %v2853_v39 = vpop.f32.mrf.mxu1 }
 0x2cd   : > { %v2854_v48 = vadd.f32 %v5721_v49, %v2853_v39 }
 0x2ce   : > { %v2855_v61 = vpop.f32.mrf.mxu1 }
 0x2cf   : > { %v2908_v24 = vmax.f32 %v2854_v48, 0.0 }
 0x2d0   : > { %v2856_v21 = vpop.f32.mrf.mxu1 }
 0x2d1   : > { %v3365_v20 = vpack.c.bf16 %v2908_v24, %v2908_v24 }
 0x2d2   : > { %v2857_v55 = vpop.f32.mrf.mxu1  ;;  %v2765_v35 = vpop.f32.mrf.mxu0 }
 0x2d3   : > { %3122 = vst.msk [vmem:[%s3642_s22 + $0xc8] sm:$0xf] %vm172_vm0, %v3365_v20  ;;  %v2766_v28 = vadd.f32 %v5721_v49, %v2765_v35 }
 0x2d4   : > { %v2767_v7 = vpop.f32.mrf.mxu0 }
 0x2d5   : > { %v2892_v11 = vmax.f32 %v2766_v28, 0.0 }
 0x2d6   : > { %v2768_v34 = vpop.f32.mrf.mxu0 }
 0x2d7   : > { %v3349_v60 = vpack.c.bf16 %v2892_v11, %v2892_v11 }
 0x2d8   : > { %v2769_v52 = vpop.f32.mrf.mxu0 }
 0x2d9   : > { %3042 = vst.msk [vmem:[%s3642_s22 + $0x68] sm:$0xf] %vm172_vm0, %v3349_v60 }
 0x2e8   : > { %v2860_v9 = vpop.f32.mrf.mxu1 }
 0x2e9   : > { %v2861_v26 = vadd.f32 %v5721_v49, %v2860_v9 }
 0x2ea   : > { %v2862_v0 = vpop.f32.mrf.mxu1 }
 0x2eb   : > { %v2909_v59 = vmax.f32 %v2861_v26, 0.0 }
 0x2ec   : > { %v2863_v15 = vpop.f32.mrf.mxu1 }
 0x2ed   : > { %v3366_v63 = vpack.c.bf16 %v2909_v59, %v2909_v59  ;;  %v2864_v37 = vadd.f32 %v5721_v49, %v2863_v15 }
 0x2ee   : > { %v2865_v25 = vpop.f32.mrf.mxu1  ;;  %v2772_v57 = vpop.f32.mrf.mxu0 }
 0x2ef   : > { %3131 = vst.msk [vmem:[%s3642_s22 + $0xd0] sm:$0xf] %vm172_vm0, %v3366_v63  ;;  %v2910_v27 = vmax.f32 %v2864_v37, 0.0  ;;  %v2773_v51 = vadd.f32 %v5721_v49, %v2772_v57 }
 0x2f0   : > { %v2774_v8 = vpop.f32.mrf.mxu0 }
 0x2f1   : > { %v3367_v4 = vpack.c.bf16 %v2910_v27, %v2910_v27  ;;  %v2893_v3 = vmax.f32 %v2773_v51, 0.0 }
 0x2f2   : > { %v2775_v53 = vpop.f32.mrf.mxu0 }
 0x2f3   : > { %3132 = vst.msk [vmem:[%s3642_s22 + $0xd4] sm:$0xf] %vm172_vm0, %v3367_v4  ;;  %v3350_v22 = vpack.c.bf16 %v2893_v3, %v2893_v3  ;;  %v2776_v32 = vadd.f32 %v5721_v49, %v2775_v53 }
 0x2f4   : > { %v2777_v44 = vpop.f32.mrf.mxu0 }
 0x2f5   : > { %3051 = vst.msk [vmem:[%s3642_s22 + $0x70] sm:$0xf] %vm172_vm0, %v3350_v22  ;;  %v2894_v18 = vmax.f32 %v2776_v32, 0.0 }
 0x2f6   : > { %v2780_v17 = vpop.f32.mrf.mxu0 }
 0x2f7   : > { %v3351_v47 = vpack.c.bf16 %v2894_v18, %v2894_v18 }
 0x2f8   : > { %v2781_v30 = vpop.f32.mrf.mxu0 }
 0x2f9   : > { %3052 = vst.msk [vmem:[%s3642_s22 + $0x74] sm:$0xf] %vm172_vm0, %v3351_v47 }
 0x2fa   : > { %v2782_v45 = vpop.f32.mrf.mxu0 }
 0x2fb   : > { %v2783_v42 = vadd.f32 %v5721_v49, %v2782_v45 }
 0x2fc   : > { %v2868_v46 = vpop.f32.mrf.mxu1  ;;  %v2784_v23 = vpop.f32.mrf.mxu0 }
 0x2fd   : > { %v2895_v38 = vmax.f32 %v2783_v42, 0.0 }
 0x2fe   : > { %v2869_v29 = vpop.f32.mrf.mxu1 }
 0x2ff   : > { %v3352_v2 = vpack.c.bf16 %v2895_v38, %v2895_v38 }
 0x300   : > { %v2870_v13 = vpop.f32.mrf.mxu1 }
 0x301   : > { %3061 = vst.msk [vmem:[%s3642_s22 + $0x7c] sm:$0xf] %vm172_vm0, %v3352_v2 }
 0x302   : > { %v2871_v54 = vpop.f32.mrf.mxu1 }
 0x309   : > { %v2874_v31 = vpop.f32.mrf.mxu1 }
 0x30b   : > { %v2875_v1 = vpop.f32.mrf.mxu1 }
 0x30d   : > { %v2876_v58 = vpop.f32.mrf.mxu1 }
 0x30f   : > { %v2877_v5 = vpop.f32.mrf.mxu1 }
 0x310 PF: > { %s13_s12 = sadd.s32 1, %s3458_s12  }
 0x311   : > { %p10_p4 = scmp.ge.s32.totalorder %s13_s12, 4  }
 0x313   :  { %12 = sbr.rel (!%p10_p4) target bundleno = 1 (0x1), region = 62 }

</bundles_post_ra>
